<compile_context>
chip_gen: v7x
topology: tpu7x:2x2x1
jax: 0.10.0
libtpu: 0.0.40
codegen_flags: <defaults>
</compile_context>

<pallas_src>
import functools

import jax
import jax.numpy as jnp
from jax import lax
from jax.experimental import pallas as pl
from jax.experimental.pallas import tpu as pltpu

STATE_DIM = 16
NUM_CLASSES = 9
NUM_STEPS = 8
HIDDEN = 128        # perceive channels
READOUT_HIDDEN = 64
LANE = 128


def _round_up(x, m):
    return (x + m - 1) // m * m


def nca_kernel(x_ref, wpt_ref, bp_ref, wut_ref, bu_ref, mask_ref,
               wr1t_ref, br1_ref, sel_ref, wr2_ref, br2_ref,
               out_ref, buf, sb16, col, *, n, halo, woff, offsets):
    # x_ref   : (S, n + 2*halo) f32  channels-major, zero-padded NCA state init
    # wpt_ref : (128, 144) bf16      perceive weights, (dy,dx,cin)-major K
    # bp_ref  : (128, 1) f32         perceive bias
    # wut_ref : (16, 128) bf16       update 1x1 conv weights
    # bu_ref  : (16, 1) f32          update bias
    # mask_ref: (1, n) f32           1.0 at interior pixels, 0.0 at padding
    # wr1t_ref: (64, 16), br1_ref: (64, 1)   readout conv1
    # sel_ref : (B, n) f32           lane-dense per-batch interior-mean weights
    # wr2_ref : (64, 9),  br2_ref: (1, 9)    readout conv2
    # out_ref : (B, 9)
    # buf     : VMEM (S, n + 2*halo) f32     mutable NCA state
    # sb16    : VMEM (S, n + 2*woff) bf16    once-per-step bf16 state window
    # col     : VMEM (144, n) bf16           persistent im2col tile
    buf[...] = x_ref[...]

    # Loop invariants: weights / biases / mask are read exactly once.
    wp_t = wpt_ref[...]                                   # (128, 144) bf16
    wu_t = wut_ref[...]                                   # (16, 128)  bf16
    bp = bp_ref[...]                                      # (128, 1)   f32
    bu = bu_ref[...]                                      # (16, 1)    f32
    # Hoisted broadcast (JAX does not CSE broadcast_in_dim across iterations).
    mask_b = jnp.broadcast_to(mask_ref[...], (STATE_DIM, n))

    win_lo = halo - woff          # 128-aligned window start
    win = n + 2 * woff            # 128-aligned window length

    def step(_, carry):
        # f32 -> bf16 cast of the state window, ONCE per step, fully aligned.
        sb16[...] = buf[:, win_lo: win_lo + win].astype(jnp.bfloat16)
        # im2col: 9 static lane-offset slices of the packed bf16 window into a
        # persistent (144, n) bf16 scratch; each 16-row block is exactly one
        # packed sublane tile, so stores are aligned and no temp is built.
        for t, off in enumerate(offsets):
            col[16 * t: 16 * (t + 1), :] = sb16[:, woff + off: woff + off + n]
        p = jnp.dot(wp_t, col[...], preferred_element_type=jnp.float32) + bp
        h = jnp.maximum(p, 0.0).astype(jnp.bfloat16)      # (128, n)
        dxv = jnp.dot(wu_t, h, preferred_element_type=jnp.float32) + bu
        # Residual update; the mask keeps the zero-padding ring (and the lane
        # pad beyond the real spatial extent) exactly zero every step.
        buf[:, halo: halo + n] = buf[:, halo: halo + n] + dxv * mask_b
        return carry

    lax.fori_loop(0, NUM_STEPS, step, 0, unroll=True)

    # Readout (one-time, f32): conv1x1 -> ReLU, per-batch masked spatial mean,
    # then the (linear) 64->9 conv applied to the mean.
    st = buf[:, halo: halo + n]                                       # (16, n)
    h1 = jnp.maximum(
        jnp.dot(wr1t_ref[...], st, preferred_element_type=jnp.float32)
        + br1_ref[...], 0.0)                                          # (64, n)
    # sel is lane-dense (B, n); contract the lane axis of both operands.
    mh = lax.dot_general(sel_ref[...], h1, (((1,), (1,)), ((), ())),
                         preferred_element_type=jnp.float32)          # (B, 64)
    out_ref[...] = (jnp.dot(mh, wr2_ref[...],
                            preferred_element_type=jnp.float32)
                    + br2_ref[...])                                   # (B, 9)


def nca_forward(x_nchw, params):
    wp, bp, wu, bu, wr1, br1, wr2, br2 = params
    B, C, H, W = x_nchw.shape
    S = wu.shape[1]
    K = wr2.shape[1]
    Hp, Wp = H + 2, W + 2
    n_real = B * Hp * Wp
    n = _round_up(n_real, LANE)                 # lane-dense spatial extent

    maxoff = Wp + 1                             # largest |3x3 tap offset|
    woff = _round_up(maxoff, LANE)              # aligned bf16-window margin
    halo = LANE * (maxoff // LANE + 2)          # aligned lane halo
    # Halo must cover every tap and the aligned bf16 window (VMEM refs have
    # no bounds check, so enforce here).
    assert halo >= Wp + 1, "halo too small for tap offsets"
    assert woff >= maxoff and halo >= woff

    # ---- state init: NCHW -> channels-major flat zero-padded grid -----------
    x = x_nchw.astype(jnp.float32)
    x = jnp.pad(x, ((0, 0), (0, S - C), (1, 1), (1, 1)))       # (B, S, Hp, Wp)
    x = jnp.transpose(x, (1, 0, 2, 3)).reshape(S, n_real)      # (S, n_real)
    x = jnp.pad(x, ((0, 0), (halo, halo + n - n_real)))        # (S, n+2*halo)

    # ---- weight prep (host-side, one-time) -----------------------------------
    wp_t = wp.reshape(9 * S, HIDDEN).T.astype(jnp.bfloat16)    # (128, 144)
    wu_t = wu.T.astype(jnp.bfloat16)                           # (16, 128)
    bp_c = bp.reshape(HIDDEN, 1).astype(jnp.float32)
    bu_c = bu.reshape(S, 1).astype(jnp.float32)
    wr1_t = wr1.T.astype(jnp.float32)                          # (64, 16)
    br1_c = br1.reshape(-1, 1).astype(jnp.float32)             # (64, 1)
    wr2_c = wr2.astype(jnp.float32)                            # (64, 9)
    br2_c = br2.reshape(1, -1).astype(jnp.float32)             # (1, 9)

    # ---- interior mask (1,n) & lane-dense per-batch mean selector (B,n) -----
    idx = jnp.arange(n)
    valid = idx < n_real
    hp = (idx // Wp) % Hp
    wq = idx % Wp
    interior = (valid & (hp >= 1) & (hp <= H) & (wq >= 1) & (wq <= W)
                ).astype(jnp.float32)
    mask = interior.reshape(1, n)
    bidx = idx // (Hp * Wp)
    sel = (interior[None, :]
           * (jnp.arange(B)[:, None] == bidx[None, :]).astype(jnp.float32)
           ) / float(H * W)                                    # (B, n)

    # 3x3 tap offsets in the flat padded-spatial index, (dy, dx)-row-major to
    # match wp_t's contraction ordering.
    offsets = tuple((dy - 1) * Wp + (dx - 1)
                    for dy in range(3) for dx in range(3))

    def full(a):
        nd = a.ndim
        return pl.BlockSpec(a.shape, lambda i, _nd=nd: (0,) * _nd)

    out = pl.pallas_call(
        functools.partial(nca_kernel, n=n, halo=halo, woff=woff,
                          offsets=offsets),
        out_shape=jax.ShapeDtypeStruct((B, K), jnp.float32),
        grid_spec=pltpu.PrefetchScalarGridSpec(
            num_scalar_prefetch=0,
            grid=(1,),
            in_specs=[
                full(x), full(wp_t), full(bp_c), full(wu_t), full(bu_c),
                full(mask), full(wr1_t), full(br1_c), full(sel),
                full(wr2_c), full(br2_c),
            ],
            out_specs=pl.BlockSpec((B, K), lambda i: (0, 0)),
            scratch_shapes=[
                pltpu.VMEM((S, n + 2 * halo), jnp.float32),     # NCA state
                pltpu.VMEM((S, n + 2 * woff), jnp.bfloat16),    # bf16 window
                pltpu.VMEM((9 * S, n), jnp.bfloat16),           # im2col tile
            ],
        ),
        compiler_params=pltpu.CompilerParams(
            dimension_semantics=("arbitrary",)),
    )(x, wp_t, bp_c, wu_t, bu_c, mask, wr1_t, br1_c, sel, wr2_c, br2_c)
    return out                                                 # (B, K)


def ref_forward(x_nchw, params):
    """Pure-JAX reference (lax.conv) mirroring the PyTorch module."""
    wp, bp, wu, bu, wr1, br1, wr2, br2 = params
    B, C, H, W = x_nchw.shape
    S = wu.shape[1]
    x = jnp.transpose(x_nchw, (0, 2, 3, 1)).astype(jnp.float32)
    state = jnp.zeros((B, H, W, S), jnp.float32).at[..., :C].set(x)
    dn = ("NHWC", "HWIO", "NHWC")
    for _ in range(NUM_STEPS):
        p = lax.conv_general_dilated(state, wp, (1, 1), "SAME",
                                     dimension_numbers=dn) + bp
        dxv = jnp.maximum(p, 0.0) @ wu + bu
        state = state + dxv
    h = jnp.maximum(state @ wr1 + br1, 0.0)
    logits = h @ wr2 + br2
    return logits.mean(axis=(1, 2))


def init_params(key):
    ks = jax.random.split(key, 8)

    def unif(k, shape, fan_in):
        bound = 1.0 / jnp.sqrt(fan_in)
        return jax.random.uniform(k, shape, jnp.float32, -bound, bound)

    wp = unif(ks[0], (3, 3, STATE_DIM, HIDDEN), STATE_DIM * 9)          # HWIO
    bp = unif(ks[1], (1, HIDDEN), STATE_DIM * 9)
    wu = unif(ks[2], (HIDDEN, STATE_DIM), HIDDEN)
    bu = unif(ks[3], (1, STATE_DIM), HIDDEN)
    wr1 = unif(ks[4], (STATE_DIM, READOUT_HIDDEN), STATE_DIM)
    br1 = unif(ks[5], (1, READOUT_HIDDEN), STATE_DIM)
    wr2 = unif(ks[6], (READOUT_HIDDEN, NUM_CLASSES), READOUT_HIDDEN)
    br2 = unif(ks[7], (1, NUM_CLASSES), READOUT_HIDDEN)
    return (wp, bp, wu, bu, wr1, br1, wr2, br2)


if __name__ == "__main__":
    key = jax.random.PRNGKey(0)
    k_param, k_x = jax.random.split(key)
    params = init_params(k_param)

    B, C, H, W = 2, 4, 16, 16
    x = jax.random.normal(k_x, (B, C, H, W), jnp.float32)

    out = nca_forward(x, params)
    out = jax.block_until_ready(out)

    ref = ref_forward(x, params)
    assert out.shape == (B, NUM_CLASSES), out.shape
    max_err = float(jnp.max(jnp.abs(out - ref)))
    assert max_err < 5e-2, f"mismatch vs reference: {max_err}"
    print("KERNEL_OK")
</pallas_src>

<mosaic_0001>
module attributes {stable_mosaic.version = 11 : i64} {
  func.func @nca_kernel(%arg0: i32, %arg1: memref<16x1280xf32, #tpu.memory_space<vmem>>, %arg2: memref<128x144xbf16, #tpu.memory_space<vmem>>, %arg3: memref<128x1xf32, #tpu.memory_space<vmem>>, %arg4: memref<16x128xbf16, #tpu.memory_space<vmem>>, %arg5: memref<16x1xf32, #tpu.memory_space<vmem>>, %arg6: memref<1x768xf32, #tpu.memory_space<vmem>>, %arg7: memref<64x16xf32, #tpu.memory_space<vmem>>, %arg8: memref<64x1xf32, #tpu.memory_space<vmem>>, %arg9: memref<2x768xf32, #tpu.memory_space<vmem>>, %arg10: memref<64x9xf32, #tpu.memory_space<vmem>>, %arg11: memref<1x9xf32, #tpu.memory_space<vmem>>, %arg12: memref<2x9xf32, #tpu.memory_space<vmem>>, %arg13: memref<16x1280xf32, #tpu.memory_space<vmem>>, %arg14: memref<16x1024xbf16, #tpu.memory_space<vmem>>, %arg15: memref<144x768xbf16, #tpu.memory_space<vmem>>) attributes {dimension_semantics = [#tpu.dimension_semantics<arbitrary>], iteration_bounds = array<i64: 1>, scalar_prefetch = 0 : i64, scratch_operands = 3 : i64, tpu.core_type = #tpu.core_type<tc>, window_params = [{pipeline_mode = #tpu.pipeline_mode<synchronous>, transform_indices = @transform_0, window_bounds = array<i64: 16, 1280>}, {pipeline_mode = #tpu.pipeline_mode<synchronous>, transform_indices = @transform_1, window_bounds = array<i64: 128, 144>}, {pipeline_mode = #tpu.pipeline_mode<synchronous>, transform_indices = @transform_2, window_bounds = array<i64: 128, 1>}, {pipeline_mode = #tpu.pipeline_mode<synchronous>, transform_indices = @transform_3, window_bounds = array<i64: 16, 128>}, {pipeline_mode = #tpu.pipeline_mode<synchronous>, transform_indices = @transform_4, window_bounds = array<i64: 16, 1>}, {pipeline_mode = #tpu.pipeline_mode<synchronous>, transform_indices = @transform_5, window_bounds = array<i64: 1, 768>}, {pipeline_mode = #tpu.pipeline_mode<synchronous>, transform_indices = @transform_6, window_bounds = array<i64: 64, 16>}, {pipeline_mode = #tpu.pipeline_mode<synchronous>, transform_indices = @transform_7, window_bounds = array<i64: 64, 1>}, {pipeline_mode = #tpu.pipeline_mode<synchronous>, transform_indices = @transform_8, window_bounds = array<i64: 2, 768>}, {pipeline_mode = #tpu.pipeline_mode<synchronous>, transform_indices = @transform_9, window_bounds = array<i64: 64, 9>}, {pipeline_mode = #tpu.pipeline_mode<synchronous>, transform_indices = @transform_10, window_bounds = array<i64: 1, 9>}, {pipeline_mode = #tpu.pipeline_mode<synchronous>, transform_indices = @transform_11, window_bounds = array<i64: 2, 9>}]} {
    %c0 = arith.constant 0 : index
    %c0_0 = arith.constant 0 : index
    %0 = vector.load %arg1[%c0, %c0_0] : memref<16x1280xf32, #tpu.memory_space<vmem>>, vector<16x1280xf32>
    %c0_1 = arith.constant 0 : index
    %c0_2 = arith.constant 0 : index
    %1 = vector.load %arg13[%c0_1, %c0_2] : memref<16x1280xf32, #tpu.memory_space<vmem>>, vector<16x1280xf32>
    tpu.vector_store %arg13[%c0_1, %c0_2], %0 {strides = array<i32>} : memref<16x1280xf32, #tpu.memory_space<vmem>>, vector<16x1280xf32>,
    %c0_3 = arith.constant 0 : index
    %c0_4 = arith.constant 0 : index
    %2 = vector.load %arg2[%c0_3, %c0_4] : memref<128x144xbf16, #tpu.memory_space<vmem>>, vector<128x144xbf16>
    %c0_5 = arith.constant 0 : index
    %c0_6 = arith.constant 0 : index
    %3 = vector.load %arg4[%c0_5, %c0_6] : memref<16x128xbf16, #tpu.memory_space<vmem>>, vector<16x128xbf16>
    %c0_7 = arith.constant 0 : index
    %c0_8 = arith.constant 0 : index
    %4 = vector.load %arg3[%c0_7, %c0_8] : memref<128x1xf32, #tpu.memory_space<vmem>>, vector<128x1xf32>
    %c0_9 = arith.constant 0 : index
    %c0_10 = arith.constant 0 : index
    %5 = vector.load %arg5[%c0_9, %c0_10] : memref<16x1xf32, #tpu.memory_space<vmem>>, vector<16x1xf32>
    %c0_11 = arith.constant 0 : index
    %c0_12 = arith.constant 0 : index
    %6 = vector.load %arg6[%c0_11, %c0_12] : memref<1x768xf32, #tpu.memory_space<vmem>>, vector<1x768xf32>
    %7 = vector.shape_cast %6 : vector<1x768xf32> to vector<1x768xf32>
    %8 = vector.broadcast %7 : vector<1x768xf32> to vector<16x768xf32>
    %c0_i32 = arith.constant 0 : i32
    %c0_13 = arith.constant 0 : index
    %c128 = arith.constant 128 : index
    %9 = vector.load %arg13[%c0_13, %c128] : memref<16x1280xf32, #tpu.memory_space<vmem>>, vector<16x1024xf32>
    %10 = arith.truncf %9 : vector<16x1024xf32> to vector<16x1024xbf16>
    %c0_14 = arith.constant 0 : index
    %c0_15 = arith.constant 0 : index
    %11 = vector.load %arg14[%c0_14, %c0_15] : memref<16x1024xbf16, #tpu.memory_space<vmem>>, vector<16x1024xbf16>
    tpu.vector_store %arg14[%c0_14, %c0_15], %10 {strides = array<i32>} : memref<16x1024xbf16, #tpu.memory_space<vmem>>, vector<16x1024xbf16>,
    %c0_16 = arith.constant 0 : index
    %c109 = arith.constant 109 : index
    %12 = vector.load %arg14[%c0_16, %c109] : memref<16x1024xbf16, #tpu.memory_space<vmem>>, vector<16x768xbf16>
    %c0_17 = arith.constant 0 : index
    %c0_18 = arith.constant 0 : index
    %13 = vector.load %arg15[%c0_17, %c0_18] : memref<144x768xbf16, #tpu.memory_space<vmem>>, vector<16x768xbf16>
    tpu.vector_store %arg15[%c0_17, %c0_18], %12 {strides = array<i32>} : memref<144x768xbf16, #tpu.memory_space<vmem>>, vector<16x768xbf16>,
    %c0_19 = arith.constant 0 : index
    %c110 = arith.constant 110 : index
    %14 = vector.load %arg14[%c0_19, %c110] : memref<16x1024xbf16, #tpu.memory_space<vmem>>, vector<16x768xbf16>
    %c16 = arith.constant 16 : index
    %c0_20 = arith.constant 0 : index
    %15 = vector.load %arg15[%c16, %c0_20] : memref<144x768xbf16, #tpu.memory_space<vmem>>, vector<16x768xbf16>
    tpu.vector_store %arg15[%c16, %c0_20], %14 {strides = array<i32>} : memref<144x768xbf16, #tpu.memory_space<vmem>>, vector<16x768xbf16>,
    %c0_21 = arith.constant 0 : index
    %c111 = arith.constant 111 : index
    %16 = vector.load %arg14[%c0_21, %c111] : memref<16x1024xbf16, #tpu.memory_space<vmem>>, vector<16x768xbf16>
    %c32 = arith.constant 32 : index
    %c0_22 = arith.constant 0 : index
    %17 = vector.load %arg15[%c32, %c0_22] : memref<144x768xbf16, #tpu.memory_space<vmem>>, vector<16x768xbf16>
    tpu.vector_store %arg15[%c32, %c0_22], %16 {strides = array<i32>} : memref<144x768xbf16, #tpu.memory_space<vmem>>, vector<16x768xbf16>,
    %c0_23 = arith.constant 0 : index
    %c127 = arith.constant 127 : index
    %18 = vector.load %arg14[%c0_23, %c127] : memref<16x1024xbf16, #tpu.memory_space<vmem>>, vector<16x768xbf16>
    %c48 = arith.constant 48 : index
    %c0_24 = arith.constant 0 : index
    %19 = vector.load %arg15[%c48, %c0_24] : memref<144x768xbf16, #tpu.memory_space<vmem>>, vector<16x768xbf16>
    tpu.vector_store %arg15[%c48, %c0_24], %18 {strides = array<i32>} : memref<144x768xbf16, #tpu.memory_space<vmem>>, vector<16x768xbf16>,
    %c0_25 = arith.constant 0 : index
    %c128_26 = arith.constant 128 : index
    %20 = vector.load %arg14[%c0_25, %c128_26] : memref<16x1024xbf16, #tpu.memory_space<vmem>>, vector<16x768xbf16>
    %c64 = arith.constant 64 : index
    %c0_27 = arith.constant 0 : index
    %21 = vector.load %arg15[%c64, %c0_27] : memref<144x768xbf16, #tpu.memory_space<vmem>>, vector<16x768xbf16>
    tpu.vector_store %arg15[%c64, %c0_27], %20 {strides = array<i32>} : memref<144x768xbf16, #tpu.memory_space<vmem>>, vector<16x768xbf16>,
    %c0_28 = arith.constant 0 : index
    %c129 = arith.constant 129 : index
    %22 = vector.load %arg14[%c0_28, %c129] : memref<16x1024xbf16, #tpu.memory_space<vmem>>, vector<16x768xbf16>
    %c80 = arith.constant 80 : index
    %c0_29 = arith.constant 0 : index
    %23 = vector.load %arg15[%c80, %c0_29] : memref<144x768xbf16, #tpu.memory_space<vmem>>, vector<16x768xbf16>
    tpu.vector_store %arg15[%c80, %c0_29], %22 {strides = array<i32>} : memref<144x768xbf16, #tpu.memory_space<vmem>>, vector<16x768xbf16>,
    %c0_30 = arith.constant 0 : index
    %c145 = arith.constant 145 : index
    %24 = vector.load %arg14[%c0_30, %c145] : memref<16x1024xbf16, #tpu.memory_space<vmem>>, vector<16x768xbf16>
    %c96 = arith.constant 96 : index
    %c0_31 = arith.constant 0 : index
    %25 = vector.load %arg15[%c96, %c0_31] : memref<144x768xbf16, #tpu.memory_space<vmem>>, vector<16x768xbf16>
    tpu.vector_store %arg15[%c96, %c0_31], %24 {strides = array<i32>} : memref<144x768xbf16, #tpu.memory_space<vmem>>, vector<16x768xbf16>,
    %c0_32 = arith.constant 0 : index
    %c146 = arith.constant 146 : index
    %26 = vector.load %arg14[%c0_32, %c146] : memref<16x1024xbf16, #tpu.memory_space<vmem>>, vector<16x768xbf16>
    %c112 = arith.constant 112 : index
    %c0_33 = arith.constant 0 : index
    %27 = vector.load %arg15[%c112, %c0_33] : memref<144x768xbf16, #tpu.memory_space<vmem>>, vector<16x768xbf16>
    tpu.vector_store %arg15[%c112, %c0_33], %26 {strides = array<i32>} : memref<144x768xbf16, #tpu.memory_space<vmem>>, vector<16x768xbf16>,
    %c0_34 = arith.constant 0 : index
    %c147 = arith.constant 147 : index
    %28 = vector.load %arg14[%c0_34, %c147] : memref<16x1024xbf16, #tpu.memory_space<vmem>>, vector<16x768xbf16>
    %c128_35 = arith.constant 128 : index
    %c0_36 = arith.constant 0 : index
    %29 = vector.load %arg15[%c128_35, %c0_36] : memref<144x768xbf16, #tpu.memory_space<vmem>>, vector<16x768xbf16>
    tpu.vector_store %arg15[%c128_35, %c0_36], %28 {strides = array<i32>} : memref<144x768xbf16, #tpu.memory_space<vmem>>, vector<16x768xbf16>,
    %c0_37 = arith.constant 0 : index
    %c0_38 = arith.constant 0 : index
    %30 = vector.load %arg15[%c0_37, %c0_38] : memref<144x768xbf16, #tpu.memory_space<vmem>>, vector<144x768xbf16>
    %cst = arith.constant dense<0.000000e+00> : vector<128x768xf32>
    %31 = tpu.matmul %2, %30, %cst {dimension_numbers = #tpu.dot_dimension_numbers<[1], [0], [0], [1], [0, 0, 1, 1], [], []>} : vector<128x144xbf16>, vector<144x768xbf16>, vector<128x768xf32> -> vector<128x768xf32>
    %32 = vector.broadcast %4 : vector<128x1xf32> to vector<128x768xf32>
    %33 = arith.addf %31, %32 : vector<128x768xf32>
    %cst_39 = arith.constant 0.000000e+00 : f32
    %34 = vector.broadcast %cst_39 : f32 to vector<128x768xf32>
    %35 = arith.maximumf %33, %34 : vector<128x768xf32>
    %36 = arith.truncf %35 : vector<128x768xf32> to vector<128x768xbf16>
    %cst_40 = arith.constant dense<0.000000e+00> : vector<16x768xf32>
    %37 = tpu.matmul %3, %36, %cst_40 {dimension_numbers = #tpu.dot_dimension_numbers<[1], [0], [0], [1], [0, 0, 1, 1], [], []>} : vector<16x128xbf16>, vector<128x768xbf16>, vector<16x768xf32> -> vector<16x768xf32>
    %38 = vector.broadcast %5 : vector<16x1xf32> to vector<16x768xf32>
    %39 = arith.addf %37, %38 : vector<16x768xf32>
    %c0_41 = arith.constant 0 : index
    %c256 = arith.constant 256 : index
    %40 = vector.load %arg13[%c0_41, %c256] : memref<16x1280xf32, #tpu.memory_space<vmem>>, vector<16x768xf32>
    %41 = arith.mulf %39, %8 : vector<16x768xf32>
    %42 = arith.addf %40, %41 : vector<16x768xf32>
    %c0_42 = arith.constant 0 : index
    %c256_43 = arith.constant 256 : index
    %43 = vector.load %arg13[%c0_42, %c256_43] : memref<16x1280xf32, #tpu.memory_space<vmem>>, vector<16x768xf32>
    tpu.vector_store %arg13[%c0_42, %c256_43], %42 {strides = array<i32>} : memref<16x1280xf32, #tpu.memory_space<vmem>>, vector<16x768xf32>,
    %c1_i32 = arith.constant 1 : i32
    %c0_44 = arith.constant 0 : index
    %c128_45 = arith.constant 128 : index
    %44 = vector.load %arg13[%c0_44, %c128_45] : memref<16x1280xf32, #tpu.memory_space<vmem>>, vector<16x1024xf32>
    %45 = arith.truncf %44 : vector<16x1024xf32> to vector<16x1024xbf16>
    %c0_46 = arith.constant 0 : index
    %c0_47 = arith.constant 0 : index
    %46 = vector.load %arg14[%c0_46, %c0_47] : memref<16x1024xbf16, #tpu.memory_space<vmem>>, vector<16x1024xbf16>
    tpu.vector_store %arg14[%c0_46, %c0_47], %45 {strides = array<i32>} : memref<16x1024xbf16, #tpu.memory_space<vmem>>, vector<16x1024xbf16>,
    %c0_48 = arith.constant 0 : index
    %c109_49 = arith.constant 109 : index
    %47 = vector.load %arg14[%c0_48, %c109_49] : memref<16x1024xbf16, #tpu.memory_space<vmem>>, vector<16x768xbf16>
    %c0_50 = arith.constant 0 : index
    %c0_51 = arith.constant 0 : index
    %48 = vector.load %arg15[%c0_50, %c0_51] : memref<144x768xbf16, #tpu.memory_space<vmem>>, vector<16x768xbf16>
    tpu.vector_store %arg15[%c0_50, %c0_51], %47 {strides = array<i32>} : memref<144x768xbf16, #tpu.memory_space<vmem>>, vector<16x768xbf16>,
    %c0_52 = arith.constant 0 : index
    %c110_53 = arith.constant 110 : index
    %49 = vector.load %arg14[%c0_52, %c110_53] : memref<16x1024xbf16, #tpu.memory_space<vmem>>, vector<16x768xbf16>
    %c16_54 = arith.constant 16 : index
    %c0_55 = arith.constant 0 : index
    %50 = vector.load %arg15[%c16_54, %c0_55] : memref<144x768xbf16, #tpu.memory_space<vmem>>, vector<16x768xbf16>
    tpu.vector_store %arg15[%c16_54, %c0_55], %49 {strides = array<i32>} : memref<144x768xbf16, #tpu.memory_space<vmem>>, vector<16x768xbf16>,
    %c0_56 = arith.constant 0 : index
    %c111_57 = arith.constant 111 : index
    %51 = vector.load %arg14[%c0_56, %c111_57] : memref<16x1024xbf16, #tpu.memory_space<vmem>>, vector<16x768xbf16>
    %c32_58 = arith.constant 32 : index
    %c0_59 = arith.constant 0 : index
    %52 = vector.load %arg15[%c32_58, %c0_59] : memref<144x768xbf16, #tpu.memory_space<vmem>>, vector<16x768xbf16>
    tpu.vector_store %arg15[%c32_58, %c0_59], %51 {strides = array<i32>} : memref<144x768xbf16, #tpu.memory_space<vmem>>, vector<16x768xbf16>,
    %c0_60 = arith.constant 0 : index
    %c127_61 = arith.constant 127 : index
    %53 = vector.load %arg14[%c0_60, %c127_61] : memref<16x1024xbf16, #tpu.memory_space<vmem>>, vector<16x768xbf16>
    %c48_62 = arith.constant 48 : index
    %c0_63 = arith.constant 0 : index
    %54 = vector.load %arg15[%c48_62, %c0_63] : memref<144x768xbf16, #tpu.memory_space<vmem>>, vector<16x768xbf16>
    tpu.vector_store %arg15[%c48_62, %c0_63], %53 {strides = array<i32>} : memref<144x768xbf16, #tpu.memory_space<vmem>>, vector<16x768xbf16>,
    %c0_64 = arith.constant 0 : index
    %c128_65 = arith.constant 128 : index
    %55 = vector.load %arg14[%c0_64, %c128_65] : memref<16x1024xbf16, #tpu.memory_space<vmem>>, vector<16x768xbf16>
    %c64_66 = arith.constant 64 : index
    %c0_67 = arith.constant 0 : index
    %56 = vector.load %arg15[%c64_66, %c0_67] : memref<144x768xbf16, #tpu.memory_space<vmem>>, vector<16x768xbf16>
    tpu.vector_store %arg15[%c64_66, %c0_67], %55 {strides = array<i32>} : memref<144x768xbf16, #tpu.memory_space<vmem>>, vector<16x768xbf16>,
    %c0_68 = arith.constant 0 : index
    %c129_69 = arith.constant 129 : index
    %57 = vector.load %arg14[%c0_68, %c129_69] : memref<16x1024xbf16, #tpu.memory_space<vmem>>, vector<16x768xbf16>
    %c80_70 = arith.constant 80 : index
    %c0_71 = arith.constant 0 : index
    %58 = vector.load %arg15[%c80_70, %c0_71] : memref<144x768xbf16, #tpu.memory_space<vmem>>, vector<16x768xbf16>
    tpu.vector_store %arg15[%c80_70, %c0_71], %57 {strides = array<i32>} : memref<144x768xbf16, #tpu.memory_space<vmem>>, vector<16x768xbf16>,
    %c0_72 = arith.constant 0 : index
    %c145_73 = arith.constant 145 : index
    %59 = vector.load %arg14[%c0_72, %c145_73] : memref<16x1024xbf16, #tpu.memory_space<vmem>>, vector<16x768xbf16>
    %c96_74 = arith.constant 96 : index
    %c0_75 = arith.constant 0 : index
    %60 = vector.load %arg15[%c96_74, %c0_75] : memref<144x768xbf16, #tpu.memory_space<vmem>>, vector<16x768xbf16>
    tpu.vector_store %arg15[%c96_74, %c0_75], %59 {strides = array<i32>} : memref<144x768xbf16, #tpu.memory_space<vmem>>, vector<16x768xbf16>,
    %c0_76 = arith.constant 0 : index
    %c146_77 = arith.constant 146 : index
    %61 = vector.load %arg14[%c0_76, %c146_77] : memref<16x1024xbf16, #tpu.memory_space<vmem>>, vector<16x768xbf16>
    %c112_78 = arith.constant 112 : index
    %c0_79 = arith.constant 0 : index
    %62 = vector.load %arg15[%c112_78, %c0_79] : memref<144x768xbf16, #tpu.memory_space<vmem>>, vector<16x768xbf16>
    tpu.vector_store %arg15[%c112_78, %c0_79], %61 {strides = array<i32>} : memref<144x768xbf16, #tpu.memory_space<vmem>>, vector<16x768xbf16>,
    %c0_80 = arith.constant 0 : index
    %c147_81 = arith.constant 147 : index
    %63 = vector.load %arg14[%c0_80, %c147_81] : memref<16x1024xbf16, #tpu.memory_space<vmem>>, vector<16x768xbf16>
    %c128_82 = arith.constant 128 : index
    %c0_83 = arith.constant 0 : index
    %64 = vector.load %arg15[%c128_82, %c0_83] : memref<144x768xbf16, #tpu.memory_space<vmem>>, vector<16x768xbf16>
    tpu.vector_store %arg15[%c128_82, %c0_83], %63 {strides = array<i32>} : memref<144x768xbf16, #tpu.memory_space<vmem>>, vector<16x768xbf16>,
    %c0_84 = arith.constant 0 : index
    %c0_85 = arith.constant 0 : index
    %65 = vector.load %arg15[%c0_84, %c0_85] : memref<144x768xbf16, #tpu.memory_space<vmem>>, vector<144x768xbf16>
    %cst_86 = arith.constant dense<0.000000e+00> : vector<128x768xf32>
    %66 = tpu.matmul %2, %65, %cst_86 {dimension_numbers = #tpu.dot_dimension_numbers<[1], [0], [0], [1], [0, 0, 1, 1], [], []>} : vector<128x144xbf16>, vector<144x768xbf16>, vector<128x768xf32> -> vector<128x768xf32>
    %67 = vector.broadcast %4 : vector<128x1xf32> to vector<128x768xf32>
    %68 = arith.addf %66, %67 : vector<128x768xf32>
    %cst_87 = arith.constant 0.000000e+00 : f32
    %69 = vector.broadcast %cst_87 : f32 to vector<128x768xf32>
    %70 = arith.maximumf %68, %69 : vector<128x768xf32>
    %71 = arith.truncf %70 : vector<128x768xf32> to vector<128x768xbf16>
    %cst_88 = arith.constant dense<0.000000e+00> : vector<16x768xf32>
    %72 = tpu.matmul %3, %71, %cst_88 {dimension_numbers = #tpu.dot_dimension_numbers<[1], [0], [0], [1], [0, 0, 1, 1], [], []>} : vector<16x128xbf16>, vector<128x768xbf16>, vector<16x768xf32> -> vector<16x768xf32>
    %73 = vector.broadcast %5 : vector<16x1xf32> to vector<16x768xf32>
    %74 = arith.addf %72, %73 : vector<16x768xf32>
    %c0_89 = arith.constant 0 : index
    %c256_90 = arith.constant 256 : index
    %75 = vector.load %arg13[%c0_89, %c256_90] : memref<16x1280xf32, #tpu.memory_space<vmem>>, vector<16x768xf32>
    %76 = arith.mulf %74, %8 : vector<16x768xf32>
    %77 = arith.addf %75, %76 : vector<16x768xf32>
    %c0_91 = arith.constant 0 : index
    %c256_92 = arith.constant 256 : index
    %78 = vector.load %arg13[%c0_91, %c256_92] : memref<16x1280xf32, #tpu.memory_space<vmem>>, vector<16x768xf32>
    tpu.vector_store %arg13[%c0_91, %c256_92], %77 {strides = array<i32>} : memref<16x1280xf32, #tpu.memory_space<vmem>>, vector<16x768xf32>,
    %c2_i32 = arith.constant 2 : i32
    %c0_93 = arith.constant 0 : index
    %c128_94 = arith.constant 128 : index
    %79 = vector.load %arg13[%c0_93, %c128_94] : memref<16x1280xf32, #tpu.memory_space<vmem>>, vector<16x1024xf32>
    %80 = arith.truncf %79 : vector<16x1024xf32> to vector<16x1024xbf16>
    %c0_95 = arith.constant 0 : index
    %c0_96 = arith.constant 0 : index
    %81 = vector.load %arg14[%c0_95, %c0_96] : memref<16x1024xbf16, #tpu.memory_space<vmem>>, vector<16x1024xbf16>
    tpu.vector_store %arg14[%c0_95, %c0_96], %80 {strides = array<i32>} : memref<16x1024xbf16, #tpu.memory_space<vmem>>, vector<16x1024xbf16>,
    %c0_97 = arith.constant 0 : index
    %c109_98 = arith.constant 109 : index
    %82 = vector.load %arg14[%c0_97, %c109_98] : memref<16x1024xbf16, #tpu.memory_space<vmem>>, vector<16x768xbf16>
    %c0_99 = arith.constant 0 : index
    %c0_100 = arith.constant 0 : index
    %83 = vector.load %arg15[%c0_99, %c0_100] : memref<144x768xbf16, #tpu.memory_space<vmem>>, vector<16x768xbf16>
    tpu.vector_store %arg15[%c0_99, %c0_100], %82 {strides = array<i32>} : memref<144x768xbf16, #tpu.memory_space<vmem>>, vector<16x768xbf16>,
    %c0_101 = arith.constant 0 : index
    %c110_102 = arith.constant 110 : index
    %84 = vector.load %arg14[%c0_101, %c110_102] : memref<16x1024xbf16, #tpu.memory_space<vmem>>, vector<16x768xbf16>
    %c16_103 = arith.constant 16 : index
    %c0_104 = arith.constant 0 : index
    %85 = vector.load %arg15[%c16_103, %c0_104] : memref<144x768xbf16, #tpu.memory_space<vmem>>, vector<16x768xbf16>
    tpu.vector_store %arg15[%c16_103, %c0_104], %84 {strides = array<i32>} : memref<144x768xbf16, #tpu.memory_space<vmem>>, vector<16x768xbf16>,
    %c0_105 = arith.constant 0 : index
    %c111_106 = arith.constant 111 : index
    %86 = vector.load %arg14[%c0_105, %c111_106] : memref<16x1024xbf16, #tpu.memory_space<vmem>>, vector<16x768xbf16>
    %c32_107 = arith.constant 32 : index
    %c0_108 = arith.constant 0 : index
    %87 = vector.load %arg15[%c32_107, %c0_108] : memref<144x768xbf16, #tpu.memory_space<vmem>>, vector<16x768xbf16>
    tpu.vector_store %arg15[%c32_107, %c0_108], %86 {strides = array<i32>} : memref<144x768xbf16, #tpu.memory_space<vmem>>, vector<16x768xbf16>,
    %c0_109 = arith.constant 0 : index
    %c127_110 = arith.constant 127 : index
    %88 = vector.load %arg14[%c0_109, %c127_110] : memref<16x1024xbf16, #tpu.memory_space<vmem>>, vector<16x768xbf16>
    %c48_111 = arith.constant 48 : index
    %c0_112 = arith.constant 0 : index
    %89 = vector.load %arg15[%c48_111, %c0_112] : memref<144x768xbf16, #tpu.memory_space<vmem>>, vector<16x768xbf16>
    tpu.vector_store %arg15[%c48_111, %c0_112], %88 {strides = array<i32>} : memref<144x768xbf16, #tpu.memory_space<vmem>>, vector<16x768xbf16>,
    %c0_113 = arith.constant 0 : index
    %c128_114 = arith.constant 128 : index
    %90 = vector.load %arg14[%c0_113, %c128_114] : memref<16x1024xbf16, #tpu.memory_space<vmem>>, vector<16x768xbf16>
    %c64_115 = arith.constant 64 : index
    %c0_116 = arith.constant 0 : index
    %91 = vector.load %arg15[%c64_115, %c0_116] : memref<144x768xbf16, #tpu.memory_space<vmem>>, vector<16x768xbf16>
    tpu.vector_store %arg15[%c64_115, %c0_116], %90 {strides = array<i32>} : memref<144x768xbf16, #tpu.memory_space<vmem>>, vector<16x768xbf16>,
    %c0_117 = arith.constant 0 : index
    %c129_118 = arith.constant 129 : index
    %92 = vector.load %arg14[%c0_117, %c129_118] : memref<16x1024xbf16, #tpu.memory_space<vmem>>, vector<16x768xbf16>
    %c80_119 = arith.constant 80 : index
    %c0_120 = arith.constant 0 : index
    %93 = vector.load %arg15[%c80_119, %c0_120] : memref<144x768xbf16, #tpu.memory_space<vmem>>, vector<16x768xbf16>
    tpu.vector_store %arg15[%c80_119, %c0_120], %92 {strides = array<i32>} : memref<144x768xbf16, #tpu.memory_space<vmem>>, vector<16x768xbf16>,
    %c0_121 = arith.constant 0 : index
    %c145_122 = arith.constant 145 : index
    %94 = vector.load %arg14[%c0_121, %c145_122] : memref<16x1024xbf16, #tpu.memory_space<vmem>>, vector<16x768xbf16>
    %c96_123 = arith.constant 96 : index
    %c0_124 = arith.constant 0 : index
    %95 = vector.load %arg15[%c96_123, %c0_124] : memref<144x768xbf16, #tpu.memory_space<vmem>>, vector<16x768xbf16>
    tpu.vector_store %arg15[%c96_123, %c0_124], %94 {strides = array<i32>} : memref<144x768xbf16, #tpu.memory_space<vmem>>, vector<16x768xbf16>,
    %c0_125 = arith.constant 0 : index
    %c146_126 = arith.constant 146 : index
    %96 = vector.load %arg14[%c0_125, %c146_126] : memref<16x1024xbf16, #tpu.memory_space<vmem>>, vector<16x768xbf16>
    %c112_127 = arith.constant 112 : index
    %c0_128 = arith.constant 0 : index
    %97 = vector.load %arg15[%c112_127, %c0_128] : memref<144x768xbf16, #tpu.memory_space<vmem>>, vector<16x768xbf16>
    tpu.vector_store %arg15[%c112_127, %c0_128], %96 {strides = array<i32>} : memref<144x768xbf16, #tpu.memory_space<vmem>>, vector<16x768xbf16>,
    %c0_129 = arith.constant 0 : index
    %c147_130 = arith.constant 147 : index
    %98 = vector.load %arg14[%c0_129, %c147_130] : memref<16x1024xbf16, #tpu.memory_space<vmem>>, vector<16x768xbf16>
    %c128_131 = arith.constant 128 : index
    %c0_132 = arith.constant 0 : index
    %99 = vector.load %arg15[%c128_131, %c0_132] : memref<144x768xbf16, #tpu.memory_space<vmem>>, vector<16x768xbf16>
    tpu.vector_store %arg15[%c128_131, %c0_132], %98 {strides = array<i32>} : memref<144x768xbf16, #tpu.memory_space<vmem>>, vector<16x768xbf16>,
    %c0_133 = arith.constant 0 : index
    %c0_134 = arith.constant 0 : index
    %100 = vector.load %arg15[%c0_133, %c0_134] : memref<144x768xbf16, #tpu.memory_space<vmem>>, vector<144x768xbf16>
    %cst_135 = arith.constant dense<0.000000e+00> : vector<128x768xf32>
    %101 = tpu.matmul %2, %100, %cst_135 {dimension_numbers = #tpu.dot_dimension_numbers<[1], [0], [0], [1], [0, 0, 1, 1], [], []>} : vector<128x144xbf16>, vector<144x768xbf16>, vector<128x768xf32> -> vector<128x768xf32>
    %102 = vector.broadcast %4 : vector<128x1xf32> to vector<128x768xf32>
    %103 = arith.addf %101, %102 : vector<128x768xf32>
    %cst_136 = arith.constant 0.000000e+00 : f32
    %104 = vector.broadcast %cst_136 : f32 to vector<128x768xf32>
    %105 = arith.maximumf %103, %104 : vector<128x768xf32>
    %106 = arith.truncf %105 : vector<128x768xf32> to vector<128x768xbf16>
    %cst_137 = arith.constant dense<0.000000e+00> : vector<16x768xf32>
    %107 = tpu.matmul %3, %106, %cst_137 {dimension_numbers = #tpu.dot_dimension_numbers<[1], [0], [0], [1], [0, 0, 1, 1], [], []>} : vector<16x128xbf16>, vector<128x768xbf16>, vector<16x768xf32> -> vector<16x768xf32>
    %108 = vector.broadcast %5 : vector<16x1xf32> to vector<16x768xf32>
    %109 = arith.addf %107, %108 : vector<16x768xf32>
    %c0_138 = arith.constant 0 : index
    %c256_139 = arith.constant 256 : index
    %110 = vector.load %arg13[%c0_138, %c256_139] : memref<16x1280xf32, #tpu.memory_space<vmem>>, vector<16x768xf32>
    %111 = arith.mulf %109, %8 : vector<16x768xf32>
    %112 = arith.addf %110, %111 : vector<16x768xf32>
    %c0_140 = arith.constant 0 : index
    %c256_141 = arith.constant 256 : index
    %113 = vector.load %arg13[%c0_140, %c256_141] : memref<16x1280xf32, #tpu.memory_space<vmem>>, vector<16x768xf32>
    tpu.vector_store %arg13[%c0_140, %c256_141], %112 {strides = array<i32>} : memref<16x1280xf32, #tpu.memory_space<vmem>>, vector<16x768xf32>,
    %c3_i32 = arith.constant 3 : i32
    %c0_142 = arith.constant 0 : index
    %c128_143 = arith.constant 128 : index
    %114 = vector.load %arg13[%c0_142, %c128_143] : memref<16x1280xf32, #tpu.memory_space<vmem>>, vector<16x1024xf32>
    %115 = arith.truncf %114 : vector<16x1024xf32> to vector<16x1024xbf16>
    %c0_144 = arith.constant 0 : index
    %c0_145 = arith.constant 0 : index
    %116 = vector.load %arg14[%c0_144, %c0_145] : memref<16x1024xbf16, #tpu.memory_space<vmem>>, vector<16x1024xbf16>
    tpu.vector_store %arg14[%c0_144, %c0_145], %115 {strides = array<i32>} : memref<16x1024xbf16, #tpu.memory_space<vmem>>, vector<16x1024xbf16>,
    %c0_146 = arith.constant 0 : index
    %c109_147 = arith.constant 109 : index
    %117 = vector.load %arg14[%c0_146, %c109_147] : memref<16x1024xbf16, #tpu.memory_space<vmem>>, vector<16x768xbf16>
    %c0_148 = arith.constant 0 : index
    %c0_149 = arith.constant 0 : index
    %118 = vector.load %arg15[%c0_148, %c0_149] : memref<144x768xbf16, #tpu.memory_space<vmem>>, vector<16x768xbf16>
    tpu.vector_store %arg15[%c0_148, %c0_149], %117 {strides = array<i32>} : memref<144x768xbf16, #tpu.memory_space<vmem>>, vector<16x768xbf16>,
    %c0_150 = arith.constant 0 : index
    %c110_151 = arith.constant 110 : index
    %119 = vector.load %arg14[%c0_150, %c110_151] : memref<16x1024xbf16, #tpu.memory_space<vmem>>, vector<16x768xbf16>
    %c16_152 = arith.constant 16 : index
    %c0_153 = arith.constant 0 : index
    %120 = vector.load %arg15[%c16_152, %c0_153] : memref<144x768xbf16, #tpu.memory_space<vmem>>, vector<16x768xbf16>
    tpu.vector_store %arg15[%c16_152, %c0_153], %119 {strides = array<i32>} : memref<144x768xbf16, #tpu.memory_space<vmem>>, vector<16x768xbf16>,
    %c0_154 = arith.constant 0 : index
    %c111_155 = arith.constant 111 : index
    %121 = vector.load %arg14[%c0_154, %c111_155] : memref<16x1024xbf16, #tpu.memory_space<vmem>>, vector<16x768xbf16>
    %c32_156 = arith.constant 32 : index
    %c0_157 = arith.constant 0 : index
    %122 = vector.load %arg15[%c32_156, %c0_157] : memref<144x768xbf16, #tpu.memory_space<vmem>>, vector<16x768xbf16>
    tpu.vector_store %arg15[%c32_156, %c0_157], %121 {strides = array<i32>} : memref<144x768xbf16, #tpu.memory_space<vmem>>, vector<16x768xbf16>,
    %c0_158 = arith.constant 0 : index
    %c127_159 = arith.constant 127 : index
    %123 = vector.load %arg14[%c0_158, %c127_159] : memref<16x1024xbf16, #tpu.memory_space<vmem>>, vector<16x768xbf16>
    %c48_160 = arith.constant 48 : index
    %c0_161 = arith.constant 0 : index
    %124 = vector.load %arg15[%c48_160, %c0_161] : memref<144x768xbf16, #tpu.memory_space<vmem>>, vector<16x768xbf16>
    tpu.vector_store %arg15[%c48_160, %c0_161], %123 {strides = array<i32>} : memref<144x768xbf16, #tpu.memory_space<vmem>>, vector<16x768xbf16>,
    %c0_162 = arith.constant 0 : index
    %c128_163 = arith.constant 128 : index
    %125 = vector.load %arg14[%c0_162, %c128_163] : memref<16x1024xbf16, #tpu.memory_space<vmem>>, vector<16x768xbf16>
    %c64_164 = arith.constant 64 : index
    %c0_165 = arith.constant 0 : index
    %126 = vector.load %arg15[%c64_164, %c0_165] : memref<144x768xbf16, #tpu.memory_space<vmem>>, vector<16x768xbf16>
    tpu.vector_store %arg15[%c64_164, %c0_165], %125 {strides = array<i32>} : memref<144x768xbf16, #tpu.memory_space<vmem>>, vector<16x768xbf16>,
    %c0_166 = arith.constant 0 : index
    %c129_167 = arith.constant 129 : index
    %127 = vector.load %arg14[%c0_166, %c129_167] : memref<16x1024xbf16, #tpu.memory_space<vmem>>, vector<16x768xbf16>
    %c80_168 = arith.constant 80 : index
    %c0_169 = arith.constant 0 : index
    %128 = vector.load %arg15[%c80_168, %c0_169] : memref<144x768xbf16, #tpu.memory_space<vmem>>, vector<16x768xbf16>
    tpu.vector_store %arg15[%c80_168, %c0_169], %127 {strides = array<i32>} : memref<144x768xbf16, #tpu.memory_space<vmem>>, vector<16x768xbf16>,
    %c0_170 = arith.constant 0 : index
    %c145_171 = arith.constant 145 : index
    %129 = vector.load %arg14[%c0_170, %c145_171] : memref<16x1024xbf16, #tpu.memory_space<vmem>>, vector<16x768xbf16>
    %c96_172 = arith.constant 96 : index
    %c0_173 = arith.constant 0 : index
    %130 = vector.load %arg15[%c96_172, %c0_173] : memref<144x768xbf16, #tpu.memory_space<vmem>>, vector<16x768xbf16>
    tpu.vector_store %arg15[%c96_172, %c0_173], %129 {strides = array<i32>} : memref<144x768xbf16, #tpu.memory_space<vmem>>, vector<16x768xbf16>,
    %c0_174 = arith.constant 0 : index
    %c146_175 = arith.constant 146 : index
    %131 = vector.load %arg14[%c0_174, %c146_175] : memref<16x1024xbf16, #tpu.memory_space<vmem>>, vector<16x768xbf16>
    %c112_176 = arith.constant 112 : index
    %c0_177 = arith.constant 0 : index
    %132 = vector.load %arg15[%c112_176, %c0_177] : memref<144x768xbf16, #tpu.memory_space<vmem>>, vector<16x768xbf16>
    tpu.vector_store %arg15[%c112_176, %c0_177], %131 {strides = array<i32>} : memref<144x768xbf16, #tpu.memory_space<vmem>>, vector<16x768xbf16>,
    %c0_178 = arith.constant 0 : index
    %c147_179 = arith.constant 147 : index
    %133 = vector.load %arg14[%c0_178, %c147_179] : memref<16x1024xbf16, #tpu.memory_space<vmem>>, vector<16x768xbf16>
    %c128_180 = arith.constant 128 : index
    %c0_181 = arith.constant 0 : index
    %134 = vector.load %arg15[%c128_180, %c0_181] : memref<144x768xbf16, #tpu.memory_space<vmem>>, vector<16x768xbf16>
    tpu.vector_store %arg15[%c128_180, %c0_181], %133 {strides = array<i32>} : memref<144x768xbf16, #tpu.memory_space<vmem>>, vector<16x768xbf16>,
    %c0_182 = arith.constant 0 : index
    %c0_183 = arith.constant 0 : index
    %135 = vector.load %arg15[%c0_182, %c0_183] : memref<144x768xbf16, #tpu.memory_space<vmem>>, vector<144x768xbf16>
    %cst_184 = arith.constant dense<0.000000e+00> : vector<128x768xf32>
    %136 = tpu.matmul %2, %135, %cst_184 {dimension_numbers = #tpu.dot_dimension_numbers<[1], [0], [0], [1], [0, 0, 1, 1], [], []>} : vector<128x144xbf16>, vector<144x768xbf16>, vector<128x768xf32> -> vector<128x768xf32>
    %137 = vector.broadcast %4 : vector<128x1xf32> to vector<128x768xf32>
    %138 = arith.addf %136, %137 : vector<128x768xf32>
    %cst_185 = arith.constant 0.000000e+00 : f32
    %139 = vector.broadcast %cst_185 : f32 to vector<128x768xf32>
    %140 = arith.maximumf %138, %139 : vector<128x768xf32>
    %141 = arith.truncf %140 : vector<128x768xf32> to vector<128x768xbf16>
    %cst_186 = arith.constant dense<0.000000e+00> : vector<16x768xf32>
    %142 = tpu.matmul %3, %141, %cst_186 {dimension_numbers = #tpu.dot_dimension_numbers<[1], [0], [0], [1], [0, 0, 1, 1], [], []>} : vector<16x128xbf16>, vector<128x768xbf16>, vector<16x768xf32> -> vector<16x768xf32>
    %143 = vector.broadcast %5 : vector<16x1xf32> to vector<16x768xf32>
    %144 = arith.addf %142, %143 : vector<16x768xf32>
    %c0_187 = arith.constant 0 : index
    %c256_188 = arith.constant 256 : index
    %145 = vector.load %arg13[%c0_187, %c256_188] : memref<16x1280xf32, #tpu.memory_space<vmem>>, vector<16x768xf32>
    %146 = arith.mulf %144, %8 : vector<16x768xf32>
    %147 = arith.addf %145, %146 : vector<16x768xf32>
    %c0_189 = arith.constant 0 : index
    %c256_190 = arith.constant 256 : index
    %148 = vector.load %arg13[%c0_189, %c256_190] : memref<16x1280xf32, #tpu.memory_space<vmem>>, vector<16x768xf32>
    tpu.vector_store %arg13[%c0_189, %c256_190], %147 {strides = array<i32>} : memref<16x1280xf32, #tpu.memory_space<vmem>>, vector<16x768xf32>,
    %c4_i32 = arith.constant 4 : i32
    %c0_191 = arith.constant 0 : index
    %c128_192 = arith.constant 128 : index
    %149 = vector.load %arg13[%c0_191, %c128_192] : memref<16x1280xf32, #tpu.memory_space<vmem>>, vector<16x1024xf32>
    %150 = arith.truncf %149 : vector<16x1024xf32> to vector<16x1024xbf16>
    %c0_193 = arith.constant 0 : index
    %c0_194 = arith.constant 0 : index
    %151 = vector.load %arg14[%c0_193, %c0_194] : memref<16x1024xbf16, #tpu.memory_space<vmem>>, vector<16x1024xbf16>
    tpu.vector_store %arg14[%c0_193, %c0_194], %150 {strides = array<i32>} : memref<16x1024xbf16, #tpu.memory_space<vmem>>, vector<16x1024xbf16>,
    %c0_195 = arith.constant 0 : index
    %c109_196 = arith.constant 109 : index
    %152 = vector.load %arg14[%c0_195, %c109_196] : memref<16x1024xbf16, #tpu.memory_space<vmem>>, vector<16x768xbf16>
    %c0_197 = arith.constant 0 : index
    %c0_198 = arith.constant 0 : index
    %153 = vector.load %arg15[%c0_197, %c0_198] : memref<144x768xbf16, #tpu.memory_space<vmem>>, vector<16x768xbf16>
    tpu.vector_store %arg15[%c0_197, %c0_198], %152 {strides = array<i32>} : memref<144x768xbf16, #tpu.memory_space<vmem>>, vector<16x768xbf16>,
    %c0_199 = arith.constant 0 : index
    %c110_200 = arith.constant 110 : index
    %154 = vector.load %arg14[%c0_199, %c110_200] : memref<16x1024xbf16, #tpu.memory_space<vmem>>, vector<16x768xbf16>
    %c16_201 = arith.constant 16 : index
    %c0_202 = arith.constant 0 : index
    %155 = vector.load %arg15[%c16_201, %c0_202] : memref<144x768xbf16, #tpu.memory_space<vmem>>, vector<16x768xbf16>
    tpu.vector_store %arg15[%c16_201, %c0_202], %154 {strides = array<i32>} : memref<144x768xbf16, #tpu.memory_space<vmem>>, vector<16x768xbf16>,
    %c0_203 = arith.constant 0 : index
    %c111_204 = arith.constant 111 : index
    %156 = vector.load %arg14[%c0_203, %c111_204] : memref<16x1024xbf16, #tpu.memory_space<vmem>>, vector<16x768xbf16>
    %c32_205 = arith.constant 32 : index
    %c0_206 = arith.constant 0 : index
    %157 = vector.load %arg15[%c32_205, %c0_206] : memref<144x768xbf16, #tpu.memory_space<vmem>>, vector<16x768xbf16>
    tpu.vector_store %arg15[%c32_205, %c0_206], %156 {strides = array<i32>} : memref<144x768xbf16, #tpu.memory_space<vmem>>, vector<16x768xbf16>,
    %c0_207 = arith.constant 0 : index
    %c127_208 = arith.constant 127 : index
    %158 = vector.load %arg14[%c0_207, %c127_208] : memref<16x1024xbf16, #tpu.memory_space<vmem>>, vector<16x768xbf16>
    %c48_209 = arith.constant 48 : index
    %c0_210 = arith.constant 0 : index
    %159 = vector.load %arg15[%c48_209, %c0_210] : memref<144x768xbf16, #tpu.memory_space<vmem>>, vector<16x768xbf16>
    tpu.vector_store %arg15[%c48_209, %c0_210], %158 {strides = array<i32>} : memref<144x768xbf16, #tpu.memory_space<vmem>>, vector<16x768xbf16>,
    %c0_211 = arith.constant 0 : index
    %c128_212 = arith.constant 128 : index
    %160 = vector.load %arg14[%c0_211, %c128_212] : memref<16x1024xbf16, #tpu.memory_space<vmem>>, vector<16x768xbf16>
    %c64_213 = arith.constant 64 : index
    %c0_214 = arith.constant 0 : index
    %161 = vector.load %arg15[%c64_213, %c0_214] : memref<144x768xbf16, #tpu.memory_space<vmem>>, vector<16x768xbf16>
    tpu.vector_store %arg15[%c64_213, %c0_214], %160 {strides = array<i32>} : memref<144x768xbf16, #tpu.memory_space<vmem>>, vector<16x768xbf16>,
    %c0_215 = arith.constant 0 : index
    %c129_216 = arith.constant 129 : index
    %162 = vector.load %arg14[%c0_215, %c129_216] : memref<16x1024xbf16, #tpu.memory_space<vmem>>, vector<16x768xbf16>
    %c80_217 = arith.constant 80 : index
    %c0_218 = arith.constant 0 : index
    %163 = vector.load %arg15[%c80_217, %c0_218] : memref<144x768xbf16, #tpu.memory_space<vmem>>, vector<16x768xbf16>
    tpu.vector_store %arg15[%c80_217, %c0_218], %162 {strides = array<i32>} : memref<144x768xbf16, #tpu.memory_space<vmem>>, vector<16x768xbf16>,
    %c0_219 = arith.constant 0 : index
    %c145_220 = arith.constant 145 : index
    %164 = vector.load %arg14[%c0_219, %c145_220] : memref<16x1024xbf16, #tpu.memory_space<vmem>>, vector<16x768xbf16>
    %c96_221 = arith.constant 96 : index
    %c0_222 = arith.constant 0 : index
    %165 = vector.load %arg15[%c96_221, %c0_222] : memref<144x768xbf16, #tpu.memory_space<vmem>>, vector<16x768xbf16>
    tpu.vector_store %arg15[%c96_221, %c0_222], %164 {strides = array<i32>} : memref<144x768xbf16, #tpu.memory_space<vmem>>, vector<16x768xbf16>,
    %c0_223 = arith.constant 0 : index
    %c146_224 = arith.constant 146 : index
    %166 = vector.load %arg14[%c0_223, %c146_224] : memref<16x1024xbf16, #tpu.memory_space<vmem>>, vector<16x768xbf16>
    %c112_225 = arith.constant 112 : index
    %c0_226 = arith.constant 0 : index
    %167 = vector.load %arg15[%c112_225, %c0_226] : memref<144x768xbf16, #tpu.memory_space<vmem>>, vector<16x768xbf16>
    tpu.vector_store %arg15[%c112_225, %c0_226], %166 {strides = array<i32>} : memref<144x768xbf16, #tpu.memory_space<vmem>>, vector<16x768xbf16>,
    %c0_227 = arith.constant 0 : index
    %c147_228 = arith.constant 147 : index
    %168 = vector.load %arg14[%c0_227, %c147_228] : memref<16x1024xbf16, #tpu.memory_space<vmem>>, vector<16x768xbf16>
    %c128_229 = arith.constant 128 : index
    %c0_230 = arith.constant 0 : index
    %169 = vector.load %arg15[%c128_229, %c0_230] : memref<144x768xbf16, #tpu.memory_space<vmem>>, vector<16x768xbf16>
    tpu.vector_store %arg15[%c128_229, %c0_230], %168 {strides = array<i32>} : memref<144x768xbf16, #tpu.memory_space<vmem>>, vector<16x768xbf16>,
    %c0_231 = arith.constant 0 : index
    %c0_232 = arith.constant 0 : index
    %170 = vector.load %arg15[%c0_231, %c0_232] : memref<144x768xbf16, #tpu.memory_space<vmem>>, vector<144x768xbf16>
    %cst_233 = arith.constant dense<0.000000e+00> : vector<128x768xf32>
    %171 = tpu.matmul %2, %170, %cst_233 {dimension_numbers = #tpu.dot_dimension_numbers<[1], [0], [0], [1], [0, 0, 1, 1], [], []>} : vector<128x144xbf16>, vector<144x768xbf16>, vector<128x768xf32> -> vector<128x768xf32>
    %172 = vector.broadcast %4 : vector<128x1xf32> to vector<128x768xf32>
    %173 = arith.addf %171, %172 : vector<128x768xf32>
    %cst_234 = arith.constant 0.000000e+00 : f32
    %174 = vector.broadcast %cst_234 : f32 to vector<128x768xf32>
    %175 = arith.maximumf %173, %174 : vector<128x768xf32>
    %176 = arith.truncf %175 : vector<128x768xf32> to vector<128x768xbf16>
    %cst_235 = arith.constant dense<0.000000e+00> : vector<16x768xf32>
    %177 = tpu.matmul %3, %176, %cst_235 {dimension_numbers = #tpu.dot_dimension_numbers<[1], [0], [0], [1], [0, 0, 1, 1], [], []>} : vector<16x128xbf16>, vector<128x768xbf16>, vector<16x768xf32> -> vector<16x768xf32>
    %178 = vector.broadcast %5 : vector<16x1xf32> to vector<16x768xf32>
    %179 = arith.addf %177, %178 : vector<16x768xf32>
    %c0_236 = arith.constant 0 : index
    %c256_237 = arith.constant 256 : index
    %180 = vector.load %arg13[%c0_236, %c256_237] : memref<16x1280xf32, #tpu.memory_space<vmem>>, vector<16x768xf32>
    %181 = arith.mulf %179, %8 : vector<16x768xf32>
    %182 = arith.addf %180, %181 : vector<16x768xf32>
    %c0_238 = arith.constant 0 : index
    %c256_239 = arith.constant 256 : index
    %183 = vector.load %arg13[%c0_238, %c256_239] : memref<16x1280xf32, #tpu.memory_space<vmem>>, vector<16x768xf32>
    tpu.vector_store %arg13[%c0_238, %c256_239], %182 {strides = array<i32>} : memref<16x1280xf32, #tpu.memory_space<vmem>>, vector<16x768xf32>,
    %c5_i32 = arith.constant 5 : i32
    %c0_240 = arith.constant 0 : index
    %c128_241 = arith.constant 128 : index
    %184 = vector.load %arg13[%c0_240, %c128_241] : memref<16x1280xf32, #tpu.memory_space<vmem>>, vector<16x1024xf32>
    %185 = arith.truncf %184 : vector<16x1024xf32> to vector<16x1024xbf16>
    %c0_242 = arith.constant 0 : index
    %c0_243 = arith.constant 0 : index
    %186 = vector.load %arg14[%c0_242, %c0_243] : memref<16x1024xbf16, #tpu.memory_space<vmem>>, vector<16x1024xbf16>
    tpu.vector_store %arg14[%c0_242, %c0_243], %185 {strides = array<i32>} : memref<16x1024xbf16, #tpu.memory_space<vmem>>, vector<16x1024xbf16>,
    %c0_244 = arith.constant 0 : index
    %c109_245 = arith.constant 109 : index
    %187 = vector.load %arg14[%c0_244, %c109_245] : memref<16x1024xbf16, #tpu.memory_space<vmem>>, vector<16x768xbf16>
    %c0_246 = arith.constant 0 : index
    %c0_247 = arith.constant 0 : index
    %188 = vector.load %arg15[%c0_246, %c0_247] : memref<144x768xbf16, #tpu.memory_space<vmem>>, vector<16x768xbf16>
    tpu.vector_store %arg15[%c0_246, %c0_247], %187 {strides = array<i32>} : memref<144x768xbf16, #tpu.memory_space<vmem>>, vector<16x768xbf16>,
    %c0_248 = arith.constant 0 : index
    %c110_249 = arith.constant 110 : index
    %189 = vector.load %arg14[%c0_248, %c110_249] : memref<16x1024xbf16, #tpu.memory_space<vmem>>, vector<16x768xbf16>
    %c16_250 = arith.constant 16 : index
    %c0_251 = arith.constant 0 : index
    %190 = vector.load %arg15[%c16_250, %c0_251] : memref<144x768xbf16, #tpu.memory_space<vmem>>, vector<16x768xbf16>
    tpu.vector_store %arg15[%c16_250, %c0_251], %189 {strides = array<i32>} : memref<144x768xbf16, #tpu.memory_space<vmem>>, vector<16x768xbf16>,
    %c0_252 = arith.constant 0 : index
    %c111_253 = arith.constant 111 : index
    %191 = vector.load %arg14[%c0_252, %c111_253] : memref<16x1024xbf16, #tpu.memory_space<vmem>>, vector<16x768xbf16>
    %c32_254 = arith.constant 32 : index
    %c0_255 = arith.constant 0 : index
    %192 = vector.load %arg15[%c32_254, %c0_255] : memref<144x768xbf16, #tpu.memory_space<vmem>>, vector<16x768xbf16>
    tpu.vector_store %arg15[%c32_254, %c0_255], %191 {strides = array<i32>} : memref<144x768xbf16, #tpu.memory_space<vmem>>, vector<16x768xbf16>,
    %c0_256 = arith.constant 0 : index
    %c127_257 = arith.constant 127 : index
    %193 = vector.load %arg14[%c0_256, %c127_257] : memref<16x1024xbf16, #tpu.memory_space<vmem>>, vector<16x768xbf16>
    %c48_258 = arith.constant 48 : index
    %c0_259 = arith.constant 0 : index
    %194 = vector.load %arg15[%c48_258, %c0_259] : memref<144x768xbf16, #tpu.memory_space<vmem>>, vector<16x768xbf16>
    tpu.vector_store %arg15[%c48_258, %c0_259], %193 {strides = array<i32>} : memref<144x768xbf16, #tpu.memory_space<vmem>>, vector<16x768xbf16>,
    %c0_260 = arith.constant 0 : index
    %c128_261 = arith.constant 128 : index
    %195 = vector.load %arg14[%c0_260, %c128_261] : memref<16x1024xbf16, #tpu.memory_space<vmem>>, vector<16x768xbf16>
    %c64_262 = arith.constant 64 : index
    %c0_263 = arith.constant 0 : index
    %196 = vector.load %arg15[%c64_262, %c0_263] : memref<144x768xbf16, #tpu.memory_space<vmem>>, vector<16x768xbf16>
    tpu.vector_store %arg15[%c64_262, %c0_263], %195 {strides = array<i32>} : memref<144x768xbf16, #tpu.memory_space<vmem>>, vector<16x768xbf16>,
    %c0_264 = arith.constant 0 : index
    %c129_265 = arith.constant 129 : index
    %197 = vector.load %arg14[%c0_264, %c129_265] : memref<16x1024xbf16, #tpu.memory_space<vmem>>, vector<16x768xbf16>
    %c80_266 = arith.constant 80 : index
    %c0_267 = arith.constant 0 : index
    %198 = vector.load %arg15[%c80_266, %c0_267] : memref<144x768xbf16, #tpu.memory_space<vmem>>, vector<16x768xbf16>
    tpu.vector_store %arg15[%c80_266, %c0_267], %197 {strides = array<i32>} : memref<144x768xbf16, #tpu.memory_space<vmem>>, vector<16x768xbf16>,
    %c0_268 = arith.constant 0 : index
    %c145_269 = arith.constant 145 : index
    %199 = vector.load %arg14[%c0_268, %c145_269] : memref<16x1024xbf16, #tpu.memory_space<vmem>>, vector<16x768xbf16>
    %c96_270 = arith.constant 96 : index
    %c0_271 = arith.constant 0 : index
    %200 = vector.load %arg15[%c96_270, %c0_271] : memref<144x768xbf16, #tpu.memory_space<vmem>>, vector<16x768xbf16>
    tpu.vector_store %arg15[%c96_270, %c0_271], %199 {strides = array<i32>} : memref<144x768xbf16, #tpu.memory_space<vmem>>, vector<16x768xbf16>,
    %c0_272 = arith.constant 0 : index
    %c146_273 = arith.constant 146 : index
    %201 = vector.load %arg14[%c0_272, %c146_273] : memref<16x1024xbf16, #tpu.memory_space<vmem>>, vector<16x768xbf16>
    %c112_274 = arith.constant 112 : index
    %c0_275 = arith.constant 0 : index
    %202 = vector.load %arg15[%c112_274, %c0_275] : memref<144x768xbf16, #tpu.memory_space<vmem>>, vector<16x768xbf16>
    tpu.vector_store %arg15[%c112_274, %c0_275], %201 {strides = array<i32>} : memref<144x768xbf16, #tpu.memory_space<vmem>>, vector<16x768xbf16>,
    %c0_276 = arith.constant 0 : index
    %c147_277 = arith.constant 147 : index
    %203 = vector.load %arg14[%c0_276, %c147_277] : memref<16x1024xbf16, #tpu.memory_space<vmem>>, vector<16x768xbf16>
    %c128_278 = arith.constant 128 : index
    %c0_279 = arith.constant 0 : index
    %204 = vector.load %arg15[%c128_278, %c0_279] : memref<144x768xbf16, #tpu.memory_space<vmem>>, vector<16x768xbf16>
    tpu.vector_store %arg15[%c128_278, %c0_279], %203 {strides = array<i32>} : memref<144x768xbf16, #tpu.memory_space<vmem>>, vector<16x768xbf16>,
    %c0_280 = arith.constant 0 : index
    %c0_281 = arith.constant 0 : index
    %205 = vector.load %arg15[%c0_280, %c0_281] : memref<144x768xbf16, #tpu.memory_space<vmem>>, vector<144x768xbf16>
    %cst_282 = arith.constant dense<0.000000e+00> : vector<128x768xf32>
    %206 = tpu.matmul %2, %205, %cst_282 {dimension_numbers = #tpu.dot_dimension_numbers<[1], [0], [0], [1], [0, 0, 1, 1], [], []>} : vector<128x144xbf16>, vector<144x768xbf16>, vector<128x768xf32> -> vector<128x768xf32>
    %207 = vector.broadcast %4 : vector<128x1xf32> to vector<128x768xf32>
    %208 = arith.addf %206, %207 : vector<128x768xf32>
    %cst_283 = arith.constant 0.000000e+00 : f32
    %209 = vector.broadcast %cst_283 : f32 to vector<128x768xf32>
    %210 = arith.maximumf %208, %209 : vector<128x768xf32>
    %211 = arith.truncf %210 : vector<128x768xf32> to vector<128x768xbf16>
    %cst_284 = arith.constant dense<0.000000e+00> : vector<16x768xf32>
    %212 = tpu.matmul %3, %211, %cst_284 {dimension_numbers = #tpu.dot_dimension_numbers<[1], [0], [0], [1], [0, 0, 1, 1], [], []>} : vector<16x128xbf16>, vector<128x768xbf16>, vector<16x768xf32> -> vector<16x768xf32>
    %213 = vector.broadcast %5 : vector<16x1xf32> to vector<16x768xf32>
    %214 = arith.addf %212, %213 : vector<16x768xf32>
    %c0_285 = arith.constant 0 : index
    %c256_286 = arith.constant 256 : index
    %215 = vector.load %arg13[%c0_285, %c256_286] : memref<16x1280xf32, #tpu.memory_space<vmem>>, vector<16x768xf32>
    %216 = arith.mulf %214, %8 : vector<16x768xf32>
    %217 = arith.addf %215, %216 : vector<16x768xf32>
    %c0_287 = arith.constant 0 : index
    %c256_288 = arith.constant 256 : index
    %218 = vector.load %arg13[%c0_287, %c256_288] : memref<16x1280xf32, #tpu.memory_space<vmem>>, vector<16x768xf32>
    tpu.vector_store %arg13[%c0_287, %c256_288], %217 {strides = array<i32>} : memref<16x1280xf32, #tpu.memory_space<vmem>>, vector<16x768xf32>,
    %c6_i32 = arith.constant 6 : i32
    %c0_289 = arith.constant 0 : index
    %c128_290 = arith.constant 128 : index
    %219 = vector.load %arg13[%c0_289, %c128_290] : memref<16x1280xf32, #tpu.memory_space<vmem>>, vector<16x1024xf32>
    %220 = arith.truncf %219 : vector<16x1024xf32> to vector<16x1024xbf16>
    %c0_291 = arith.constant 0 : index
    %c0_292 = arith.constant 0 : index
    %221 = vector.load %arg14[%c0_291, %c0_292] : memref<16x1024xbf16, #tpu.memory_space<vmem>>, vector<16x1024xbf16>
    tpu.vector_store %arg14[%c0_291, %c0_292], %220 {strides = array<i32>} : memref<16x1024xbf16, #tpu.memory_space<vmem>>, vector<16x1024xbf16>,
    %c0_293 = arith.constant 0 : index
    %c109_294 = arith.constant 109 : index
    %222 = vector.load %arg14[%c0_293, %c109_294] : memref<16x1024xbf16, #tpu.memory_space<vmem>>, vector<16x768xbf16>
    %c0_295 = arith.constant 0 : index
    %c0_296 = arith.constant 0 : index
    %223 = vector.load %arg15[%c0_295, %c0_296] : memref<144x768xbf16, #tpu.memory_space<vmem>>, vector<16x768xbf16>
    tpu.vector_store %arg15[%c0_295, %c0_296], %222 {strides = array<i32>} : memref<144x768xbf16, #tpu.memory_space<vmem>>, vector<16x768xbf16>,
    %c0_297 = arith.constant 0 : index
    %c110_298 = arith.constant 110 : index
    %224 = vector.load %arg14[%c0_297, %c110_298] : memref<16x1024xbf16, #tpu.memory_space<vmem>>, vector<16x768xbf16>
    %c16_299 = arith.constant 16 : index
    %c0_300 = arith.constant 0 : index
    %225 = vector.load %arg15[%c16_299, %c0_300] : memref<144x768xbf16, #tpu.memory_space<vmem>>, vector<16x768xbf16>
    tpu.vector_store %arg15[%c16_299, %c0_300], %224 {strides = array<i32>} : memref<144x768xbf16, #tpu.memory_space<vmem>>, vector<16x768xbf16>,
    %c0_301 = arith.constant 0 : index
    %c111_302 = arith.constant 111 : index
    %226 = vector.load %arg14[%c0_301, %c111_302] : memref<16x1024xbf16, #tpu.memory_space<vmem>>, vector<16x768xbf16>
    %c32_303 = arith.constant 32 : index
    %c0_304 = arith.constant 0 : index
    %227 = vector.load %arg15[%c32_303, %c0_304] : memref<144x768xbf16, #tpu.memory_space<vmem>>, vector<16x768xbf16>
    tpu.vector_store %arg15[%c32_303, %c0_304], %226 {strides = array<i32>} : memref<144x768xbf16, #tpu.memory_space<vmem>>, vector<16x768xbf16>,
    %c0_305 = arith.constant 0 : index
    %c127_306 = arith.constant 127 : index
    %228 = vector.load %arg14[%c0_305, %c127_306] : memref<16x1024xbf16, #tpu.memory_space<vmem>>, vector<16x768xbf16>
    %c48_307 = arith.constant 48 : index
    %c0_308 = arith.constant 0 : index
    %229 = vector.load %arg15[%c48_307, %c0_308] : memref<144x768xbf16, #tpu.memory_space<vmem>>, vector<16x768xbf16>
    tpu.vector_store %arg15[%c48_307, %c0_308], %228 {strides = array<i32>} : memref<144x768xbf16, #tpu.memory_space<vmem>>, vector<16x768xbf16>,
    %c0_309 = arith.constant 0 : index
    %c128_310 = arith.constant 128 : index
    %230 = vector.load %arg14[%c0_309, %c128_310] : memref<16x1024xbf16, #tpu.memory_space<vmem>>, vector<16x768xbf16>
    %c64_311 = arith.constant 64 : index
    %c0_312 = arith.constant 0 : index
    %231 = vector.load %arg15[%c64_311, %c0_312] : memref<144x768xbf16, #tpu.memory_space<vmem>>, vector<16x768xbf16>
    tpu.vector_store %arg15[%c64_311, %c0_312], %230 {strides = array<i32>} : memref<144x768xbf16, #tpu.memory_space<vmem>>, vector<16x768xbf16>,
    %c0_313 = arith.constant 0 : index
    %c129_314 = arith.constant 129 : index
    %232 = vector.load %arg14[%c0_313, %c129_314] : memref<16x1024xbf16, #tpu.memory_space<vmem>>, vector<16x768xbf16>
    %c80_315 = arith.constant 80 : index
    %c0_316 = arith.constant 0 : index
    %233 = vector.load %arg15[%c80_315, %c0_316] : memref<144x768xbf16, #tpu.memory_space<vmem>>, vector<16x768xbf16>
    tpu.vector_store %arg15[%c80_315, %c0_316], %232 {strides = array<i32>} : memref<144x768xbf16, #tpu.memory_space<vmem>>, vector<16x768xbf16>,
    %c0_317 = arith.constant 0 : index
    %c145_318 = arith.constant 145 : index
    %234 = vector.load %arg14[%c0_317, %c145_318] : memref<16x1024xbf16, #tpu.memory_space<vmem>>, vector<16x768xbf16>
    %c96_319 = arith.constant 96 : index
    %c0_320 = arith.constant 0 : index
    %235 = vector.load %arg15[%c96_319, %c0_320] : memref<144x768xbf16, #tpu.memory_space<vmem>>, vector<16x768xbf16>
    tpu.vector_store %arg15[%c96_319, %c0_320], %234 {strides = array<i32>} : memref<144x768xbf16, #tpu.memory_space<vmem>>, vector<16x768xbf16>,
    %c0_321 = arith.constant 0 : index
    %c146_322 = arith.constant 146 : index
    %236 = vector.load %arg14[%c0_321, %c146_322] : memref<16x1024xbf16, #tpu.memory_space<vmem>>, vector<16x768xbf16>
    %c112_323 = arith.constant 112 : index
    %c0_324 = arith.constant 0 : index
    %237 = vector.load %arg15[%c112_323, %c0_324] : memref<144x768xbf16, #tpu.memory_space<vmem>>, vector<16x768xbf16>
    tpu.vector_store %arg15[%c112_323, %c0_324], %236 {strides = array<i32>} : memref<144x768xbf16, #tpu.memory_space<vmem>>, vector<16x768xbf16>,
    %c0_325 = arith.constant 0 : index
    %c147_326 = arith.constant 147 : index
    %238 = vector.load %arg14[%c0_325, %c147_326] : memref<16x1024xbf16, #tpu.memory_space<vmem>>, vector<16x768xbf16>
    %c128_327 = arith.constant 128 : index
    %c0_328 = arith.constant 0 : index
    %239 = vector.load %arg15[%c128_327, %c0_328] : memref<144x768xbf16, #tpu.memory_space<vmem>>, vector<16x768xbf16>
    tpu.vector_store %arg15[%c128_327, %c0_328], %238 {strides = array<i32>} : memref<144x768xbf16, #tpu.memory_space<vmem>>, vector<16x768xbf16>,
    %c0_329 = arith.constant 0 : index
    %c0_330 = arith.constant 0 : index
    %240 = vector.load %arg15[%c0_329, %c0_330] : memref<144x768xbf16, #tpu.memory_space<vmem>>, vector<144x768xbf16>
    %cst_331 = arith.constant dense<0.000000e+00> : vector<128x768xf32>
    %241 = tpu.matmul %2, %240, %cst_331 {dimension_numbers = #tpu.dot_dimension_numbers<[1], [0], [0], [1], [0, 0, 1, 1], [], []>} : vector<128x144xbf16>, vector<144x768xbf16>, vector<128x768xf32> -> vector<128x768xf32>
    %242 = vector.broadcast %4 : vector<128x1xf32> to vector<128x768xf32>
    %243 = arith.addf %241, %242 : vector<128x768xf32>
    %cst_332 = arith.constant 0.000000e+00 : f32
    %244 = vector.broadcast %cst_332 : f32 to vector<128x768xf32>
    %245 = arith.maximumf %243, %244 : vector<128x768xf32>
    %246 = arith.truncf %245 : vector<128x768xf32> to vector<128x768xbf16>
    %cst_333 = arith.constant dense<0.000000e+00> : vector<16x768xf32>
    %247 = tpu.matmul %3, %246, %cst_333 {dimension_numbers = #tpu.dot_dimension_numbers<[1], [0], [0], [1], [0, 0, 1, 1], [], []>} : vector<16x128xbf16>, vector<128x768xbf16>, vector<16x768xf32> -> vector<16x768xf32>
    %248 = vector.broadcast %5 : vector<16x1xf32> to vector<16x768xf32>
    %249 = arith.addf %247, %248 : vector<16x768xf32>
    %c0_334 = arith.constant 0 : index
    %c256_335 = arith.constant 256 : index
    %250 = vector.load %arg13[%c0_334, %c256_335] : memref<16x1280xf32, #tpu.memory_space<vmem>>, vector<16x768xf32>
    %251 = arith.mulf %249, %8 : vector<16x768xf32>
    %252 = arith.addf %250, %251 : vector<16x768xf32>
    %c0_336 = arith.constant 0 : index
    %c256_337 = arith.constant 256 : index
    %253 = vector.load %arg13[%c0_336, %c256_337] : memref<16x1280xf32, #tpu.memory_space<vmem>>, vector<16x768xf32>
    tpu.vector_store %arg13[%c0_336, %c256_337], %252 {strides = array<i32>} : memref<16x1280xf32, #tpu.memory_space<vmem>>, vector<16x768xf32>,
    %c7_i32 = arith.constant 7 : i32
    %c0_338 = arith.constant 0 : index
    %c128_339 = arith.constant 128 : index
    %254 = vector.load %arg13[%c0_338, %c128_339] : memref<16x1280xf32, #tpu.memory_space<vmem>>, vector<16x1024xf32>
    %255 = arith.truncf %254 : vector<16x1024xf32> to vector<16x1024xbf16>
    %c0_340 = arith.constant 0 : index
    %c0_341 = arith.constant 0 : index
    %256 = vector.load %arg14[%c0_340, %c0_341] : memref<16x1024xbf16, #tpu.memory_space<vmem>>, vector<16x1024xbf16>
    tpu.vector_store %arg14[%c0_340, %c0_341], %255 {strides = array<i32>} : memref<16x1024xbf16, #tpu.memory_space<vmem>>, vector<16x1024xbf16>,
    %c0_342 = arith.constant 0 : index
    %c109_343 = arith.constant 109 : index
    %257 = vector.load %arg14[%c0_342, %c109_343] : memref<16x1024xbf16, #tpu.memory_space<vmem>>, vector<16x768xbf16>
    %c0_344 = arith.constant 0 : index
    %c0_345 = arith.constant 0 : index
    %258 = vector.load %arg15[%c0_344, %c0_345] : memref<144x768xbf16, #tpu.memory_space<vmem>>, vector<16x768xbf16>
    tpu.vector_store %arg15[%c0_344, %c0_345], %257 {strides = array<i32>} : memref<144x768xbf16, #tpu.memory_space<vmem>>, vector<16x768xbf16>,
    %c0_346 = arith.constant 0 : index
    %c110_347 = arith.constant 110 : index
    %259 = vector.load %arg14[%c0_346, %c110_347] : memref<16x1024xbf16, #tpu.memory_space<vmem>>, vector<16x768xbf16>
    %c16_348 = arith.constant 16 : index
    %c0_349 = arith.constant 0 : index
    %260 = vector.load %arg15[%c16_348, %c0_349] : memref<144x768xbf16, #tpu.memory_space<vmem>>, vector<16x768xbf16>
    tpu.vector_store %arg15[%c16_348, %c0_349], %259 {strides = array<i32>} : memref<144x768xbf16, #tpu.memory_space<vmem>>, vector<16x768xbf16>,
    %c0_350 = arith.constant 0 : index
    %c111_351 = arith.constant 111 : index
    %261 = vector.load %arg14[%c0_350, %c111_351] : memref<16x1024xbf16, #tpu.memory_space<vmem>>, vector<16x768xbf16>
    %c32_352 = arith.constant 32 : index
    %c0_353 = arith.constant 0 : index
    %262 = vector.load %arg15[%c32_352, %c0_353] : memref<144x768xbf16, #tpu.memory_space<vmem>>, vector<16x768xbf16>
    tpu.vector_store %arg15[%c32_352, %c0_353], %261 {strides = array<i32>} : memref<144x768xbf16, #tpu.memory_space<vmem>>, vector<16x768xbf16>,
    %c0_354 = arith.constant 0 : index
    %c127_355 = arith.constant 127 : index
    %263 = vector.load %arg14[%c0_354, %c127_355] : memref<16x1024xbf16, #tpu.memory_space<vmem>>, vector<16x768xbf16>
    %c48_356 = arith.constant 48 : index
    %c0_357 = arith.constant 0 : index
    %264 = vector.load %arg15[%c48_356, %c0_357] : memref<144x768xbf16, #tpu.memory_space<vmem>>, vector<16x768xbf16>
    tpu.vector_store %arg15[%c48_356, %c0_357], %263 {strides = array<i32>} : memref<144x768xbf16, #tpu.memory_space<vmem>>, vector<16x768xbf16>,
    %c0_358 = arith.constant 0 : index
    %c128_359 = arith.constant 128 : index
    %265 = vector.load %arg14[%c0_358, %c128_359] : memref<16x1024xbf16, #tpu.memory_space<vmem>>, vector<16x768xbf16>
    %c64_360 = arith.constant 64 : index
    %c0_361 = arith.constant 0 : index
    %266 = vector.load %arg15[%c64_360, %c0_361] : memref<144x768xbf16, #tpu.memory_space<vmem>>, vector<16x768xbf16>
    tpu.vector_store %arg15[%c64_360, %c0_361], %265 {strides = array<i32>} : memref<144x768xbf16, #tpu.memory_space<vmem>>, vector<16x768xbf16>,
    %c0_362 = arith.constant 0 : index
    %c129_363 = arith.constant 129 : index
    %267 = vector.load %arg14[%c0_362, %c129_363] : memref<16x1024xbf16, #tpu.memory_space<vmem>>, vector<16x768xbf16>
    %c80_364 = arith.constant 80 : index
    %c0_365 = arith.constant 0 : index
    %268 = vector.load %arg15[%c80_364, %c0_365] : memref<144x768xbf16, #tpu.memory_space<vmem>>, vector<16x768xbf16>
    tpu.vector_store %arg15[%c80_364, %c0_365], %267 {strides = array<i32>} : memref<144x768xbf16, #tpu.memory_space<vmem>>, vector<16x768xbf16>,
    %c0_366 = arith.constant 0 : index
    %c145_367 = arith.constant 145 : index
    %269 = vector.load %arg14[%c0_366, %c145_367] : memref<16x1024xbf16, #tpu.memory_space<vmem>>, vector<16x768xbf16>
    %c96_368 = arith.constant 96 : index
    %c0_369 = arith.constant 0 : index
    %270 = vector.load %arg15[%c96_368, %c0_369] : memref<144x768xbf16, #tpu.memory_space<vmem>>, vector<16x768xbf16>
    tpu.vector_store %arg15[%c96_368, %c0_369], %269 {strides = array<i32>} : memref<144x768xbf16, #tpu.memory_space<vmem>>, vector<16x768xbf16>,
    %c0_370 = arith.constant 0 : index
    %c146_371 = arith.constant 146 : index
    %271 = vector.load %arg14[%c0_370, %c146_371] : memref<16x1024xbf16, #tpu.memory_space<vmem>>, vector<16x768xbf16>
    %c112_372 = arith.constant 112 : index
    %c0_373 = arith.constant 0 : index
    %272 = vector.load %arg15[%c112_372, %c0_373] : memref<144x768xbf16, #tpu.memory_space<vmem>>, vector<16x768xbf16>
    tpu.vector_store %arg15[%c112_372, %c0_373], %271 {strides = array<i32>} : memref<144x768xbf16, #tpu.memory_space<vmem>>, vector<16x768xbf16>,
    %c0_374 = arith.constant 0 : index
    %c147_375 = arith.constant 147 : index
    %273 = vector.load %arg14[%c0_374, %c147_375] : memref<16x1024xbf16, #tpu.memory_space<vmem>>, vector<16x768xbf16>
    %c128_376 = arith.constant 128 : index
    %c0_377 = arith.constant 0 : index
    %274 = vector.load %arg15[%c128_376, %c0_377] : memref<144x768xbf16, #tpu.memory_space<vmem>>, vector<16x768xbf16>
    tpu.vector_store %arg15[%c128_376, %c0_377], %273 {strides = array<i32>} : memref<144x768xbf16, #tpu.memory_space<vmem>>, vector<16x768xbf16>,
    %c0_378 = arith.constant 0 : index
    %c0_379 = arith.constant 0 : index
    %275 = vector.load %arg15[%c0_378, %c0_379] : memref<144x768xbf16, #tpu.memory_space<vmem>>, vector<144x768xbf16>
    %cst_380 = arith.constant dense<0.000000e+00> : vector<128x768xf32>
    %276 = tpu.matmul %2, %275, %cst_380 {dimension_numbers = #tpu.dot_dimension_numbers<[1], [0], [0], [1], [0, 0, 1, 1], [], []>} : vector<128x144xbf16>, vector<144x768xbf16>, vector<128x768xf32> -> vector<128x768xf32>
    %277 = vector.broadcast %4 : vector<128x1xf32> to vector<128x768xf32>
    %278 = arith.addf %276, %277 : vector<128x768xf32>
    %cst_381 = arith.constant 0.000000e+00 : f32
    %279 = vector.broadcast %cst_381 : f32 to vector<128x768xf32>
    %280 = arith.maximumf %278, %279 : vector<128x768xf32>
    %281 = arith.truncf %280 : vector<128x768xf32> to vector<128x768xbf16>
    %cst_382 = arith.constant dense<0.000000e+00> : vector<16x768xf32>
    %282 = tpu.matmul %3, %281, %cst_382 {dimension_numbers = #tpu.dot_dimension_numbers<[1], [0], [0], [1], [0, 0, 1, 1], [], []>} : vector<16x128xbf16>, vector<128x768xbf16>, vector<16x768xf32> -> vector<16x768xf32>
    %283 = vector.broadcast %5 : vector<16x1xf32> to vector<16x768xf32>
    %284 = arith.addf %282, %283 : vector<16x768xf32>
    %c0_383 = arith.constant 0 : index
    %c256_384 = arith.constant 256 : index
    %285 = vector.load %arg13[%c0_383, %c256_384] : memref<16x1280xf32, #tpu.memory_space<vmem>>, vector<16x768xf32>
    %286 = arith.mulf %284, %8 : vector<16x768xf32>
    %287 = arith.addf %285, %286 : vector<16x768xf32>
    %c0_385 = arith.constant 0 : index
    %c256_386 = arith.constant 256 : index
    %288 = vector.load %arg13[%c0_385, %c256_386] : memref<16x1280xf32, #tpu.memory_space<vmem>>, vector<16x768xf32>
    tpu.vector_store %arg13[%c0_385, %c256_386], %287 {strides = array<i32>} : memref<16x1280xf32, #tpu.memory_space<vmem>>, vector<16x768xf32>,
    %c0_387 = arith.constant 0 : index
    %c256_388 = arith.constant 256 : index
    %289 = vector.load %arg13[%c0_387, %c256_388] : memref<16x1280xf32, #tpu.memory_space<vmem>>, vector<16x768xf32>
    %c0_389 = arith.constant 0 : index
    %c0_390 = arith.constant 0 : index
    %290 = vector.load %arg7[%c0_389, %c0_390] : memref<64x16xf32, #tpu.memory_space<vmem>>, vector<64x16xf32>
    %cst_391 = arith.constant dense<0.000000e+00> : vector<64x768xf32>
    %291 = tpu.matmul %290, %289, %cst_391 {dimension_numbers = #tpu.dot_dimension_numbers<[1], [0], [0], [1], [0, 0, 1, 1], [], []>} : vector<64x16xf32>, vector<16x768xf32>, vector<64x768xf32> -> vector<64x768xf32>
    %c0_392 = arith.constant 0 : index
    %c0_393 = arith.constant 0 : index
    %292 = vector.load %arg8[%c0_392, %c0_393] : memref<64x1xf32, #tpu.memory_space<vmem>>, vector<64x1xf32>
    %293 = vector.broadcast %292 : vector<64x1xf32> to vector<64x768xf32>
    %294 = arith.addf %291, %293 : vector<64x768xf32>
    %cst_394 = arith.constant 0.000000e+00 : f32
    %295 = vector.broadcast %cst_394 : f32 to vector<64x768xf32>
    %296 = arith.maximumf %294, %295 : vector<64x768xf32>
    %c0_395 = arith.constant 0 : index
    %c0_396 = arith.constant 0 : index
    %297 = vector.load %arg9[%c0_395, %c0_396] : memref<2x768xf32, #tpu.memory_space<vmem>>, vector<2x768xf32>
    %cst_397 = arith.constant dense<0.000000e+00> : vector<2x64xf32>
    %298 = tpu.matmul %297, %296, %cst_397 {dimension_numbers = #tpu.dot_dimension_numbers<[1], [1], [0], [0], [0, 0, 1, 0], [], []>} : vector<2x768xf32>, vector<64x768xf32>, vector<2x64xf32> -> vector<2x64xf32>
    %c0_398 = arith.constant 0 : index
    %c0_399 = arith.constant 0 : index
    %299 = vector.load %arg10[%c0_398, %c0_399] : memref<64x9xf32, #tpu.memory_space<vmem>>, vector<64x9xf32>
    %cst_400 = arith.constant dense<0.000000e+00> : vector<2x9xf32>
    %300 = tpu.matmul %298, %299, %cst_400 {dimension_numbers = #tpu.dot_dimension_numbers<[1], [0], [0], [1], [0, 0, 1, 1], [], []>} : vector<2x64xf32>, vector<64x9xf32>, vector<2x9xf32> -> vector<2x9xf32>
    %c0_401 = arith.constant 0 : index
    %c0_402 = arith.constant 0 : index
    %301 = vector.load %arg11[%c0_401, %c0_402] : memref<1x9xf32, #tpu.memory_space<vmem>>, vector<1x9xf32>
    %302 = vector.broadcast %301 : vector<1x9xf32> to vector<2x9xf32>
    %303 = arith.addf %300, %302 : vector<2x9xf32>
    %c0_403 = arith.constant 0 : index
    %c0_404 = arith.constant 0 : index
    %304 = vector.load %arg12[%c0_403, %c0_404] : memref<2x9xf32, #tpu.memory_space<vmem>>, vector<2x9xf32>
    tpu.vector_store %arg12[%c0_403, %c0_404], %303 {strides = array<i32>} : memref<2x9xf32, #tpu.memory_space<vmem>>, vector<2x9xf32>,
    return
  }
  func.func @transform_0(%arg0: i32) -> (i32, i32) {
    %c0_i32 = arith.constant 0 : i32
    %c0_i32_0 = arith.constant 0 : i32
    %c0_i32_1 = arith.constant 0 : i32
    return %c0_i32, %c0_i32_0 : i32, i32
  }
  func.func @transform_1(%arg0: i32) -> (i32, i32) {
    %c0_i32 = arith.constant 0 : i32
    %c0_i32_0 = arith.constant 0 : i32
    %c0_i32_1 = arith.constant 0 : i32
    return %c0_i32, %c0_i32_0 : i32, i32
  }
  func.func @transform_2(%arg0: i32) -> (i32, i32) {
    %c0_i32 = arith.constant 0 : i32
    %c0_i32_0 = arith.constant 0 : i32
    %c0_i32_1 = arith.constant 0 : i32
    return %c0_i32, %c0_i32_0 : i32, i32
  }
  func.func @transform_3(%arg0: i32) -> (i32, i32) {
    %c0_i32 = arith.constant 0 : i32
    %c0_i32_0 = arith.constant 0 : i32
    %c0_i32_1 = arith.constant 0 : i32
    return %c0_i32, %c0_i32_0 : i32, i32
  }
  func.func @transform_4(%arg0: i32) -> (i32, i32) {
    %c0_i32 = arith.constant 0 : i32
    %c0_i32_0 = arith.constant 0 : i32
    %c0_i32_1 = arith.constant 0 : i32
    return %c0_i32, %c0_i32_0 : i32, i32
  }
  func.func @transform_5(%arg0: i32) -> (i32, i32) {
    %c0_i32 = arith.constant 0 : i32
    %c0_i32_0 = arith.constant 0 : i32
    %c0_i32_1 = arith.constant 0 : i32
    return %c0_i32, %c0_i32_0 : i32, i32
  }
  func.func @transform_6(%arg0: i32) -> (i32, i32) {
    %c0_i32 = arith.constant 0 : i32
    %c0_i32_0 = arith.constant 0 : i32
    %c0_i32_1 = arith.constant 0 : i32
    return %c0_i32, %c0_i32_0 : i32, i32
  }
  func.func @transform_7(%arg0: i32) -> (i32, i32) {
    %c0_i32 = arith.constant 0 : i32
    %c0_i32_0 = arith.constant 0 : i32
    %c0_i32_1 = arith.constant 0 : i32
    return %c0_i32, %c0_i32_0 : i32, i32
  }
  func.func @transform_8(%arg0: i32) -> (i32, i32) {
    %c0_i32 = arith.constant 0 : i32
    %c0_i32_0 = arith.constant 0 : i32
    %c0_i32_1 = arith.constant 0 : i32
    return %c0_i32, %c0_i32_0 : i32, i32
  }
  func.func @transform_9(%arg0: i32) -> (i32, i32) {
    %c0_i32 = arith.constant 0 : i32
    %c0_i32_0 = arith.constant 0 : i32
    %c0_i32_1 = arith.constant 0 : i32
    return %c0_i32, %c0_i32_0 : i32, i32
  }
  func.func @transform_10(%arg0: i32) -> (i32, i32) {
    %c0_i32 = arith.constant 0 : i32
    %c0_i32_0 = arith.constant 0 : i32
    %c0_i32_1 = arith.constant 0 : i32
    return %c0_i32, %c0_i32_0 : i32, i32
  }
  func.func @transform_11(%arg0: i32) -> (i32, i32) {
    %c0_i32 = arith.constant 0 : i32
    %c0_i32_0 = arith.constant 0 : i32
    %c0_i32_1 = arith.constant 0 : i32
    return %c0_i32, %c0_i32_0 : i32, i32
  }
}

</mosaic_0001>

<bundles_post_ra>
// kernel: tpu_custom_call.1
= control target key start
LH: loop header
LB: loop body
LE: loop exit
PB: predicated region body
PF: predicated region fallthrough
CT: control target
= control target key end

     0   :  { %s10724_s29 = smov 19   ;;  %s10725_s30 = smov 18   ;;  %s15713_s0 = inlined_call_operand.vmem [shape: f32[16,1280], index: 0, kind: input, shape index: {}]   ;;  %s15714_s1 = inlined_call_operand.vmem [shape: bf16[128,144], index: 1, kind: input, shape index: {}]   ;;  %s15715_s2 = inlined_call_operand.vmem [shape: f32[128,1], index: 2, kind: input, shape index: {}]   ;;  %s15716_s3 = inlined_call_operand.vmem [shape: bf16[16,128], index: 3, kind: input, shape index: {}]   ;;  %s15717_s4 = inlined_call_operand.vmem [shape: f32[16,1], index: 4, kind: input, shape index: {}]   ;;  %s15718_s5 = inlined_call_operand.vmem [shape: f32[1,768], index: 5, kind: input, shape index: {}]   ;;  %s15719_s6 = inlined_call_operand.vmem [shape: f32[64,16], index: 6, kind: input, shape index: {}]   ;;  %s15720_s7 = inlined_call_operand.vmem [shape: f32[64,1], index: 7, kind: input, shape index: {}]   ;;  %s15721_s8 = inlined_call_operand.vmem [shape: f32[2,768], index: 8, kind: input, shape index: {}]   ;;  %s15722_s9 = inlined_call_operand.vmem [shape: f32[64,9], index: 9, kind: input, shape index: {}]   ;;  %s15723_s10 = inlined_call_operand.vmem [shape: f32[1,9], index: 10, kind: input, shape index: {}]   ;;  %s15724_s11 = inlined_call_operand.hbm [shape: f32[2,9], index: 11, kind: output, shape index: {}]  }
   0x1   :  { %v42_v0 = vld [vmem:[%s15713_s0 + $0x10] sm:$0xff]  ;;  %v52_v1 = vld [vmem:[%s15713_s0 + $0x60] sm:$0xff]  ;;  %v41_v2 = vld [vmem:[%s15713_s0 + $0x8] sm:$0xff] }
   0x2   :  { %v10807_v3 = vpack.c.bf16 %v52_v1, %v42_v0  ;;  %v51_v4 = vld [vmem:[%s15713_s0 + $0x58] sm:$0xff]  ;;  %v53_v6 = vld [vmem:[%s15713_s0 + $0x68] sm:$0xff] }
   0x3   :  { %v43_v5 = vld [vmem:[%s15713_s0 + $0x18] sm:$0xff]  ;;  %v10818_v7 = vpack.c.bf16 %v51_v4, %v41_v2 }
   0x4   :  { %196 = vrot.lane.b32.xlu0 %v10807_v3, %s10724_s29  ;;  %v10822_v8 = vpack.c.bf16 %v53_v6, %v43_v5 }
   0x5   :  { %15769 = vst [vmem:[#allocation8_spill] sm:$0xff] %v10818_v7  ;;  %194 = vrot.lane.b32.xlu1 %v10818_v7, %s10724_s29 }
   0x8   :  { %198 = vrot.lane.b32.xlu0 %v10822_v8, %s10724_s29 }
   0x9   :  { %243 = vrot.lane.b32.xlu1 %v10807_v3, %s10725_s30 }
   0xc   :  { %245 = vrot.lane.b32.xlu0 %v10822_v8, %s10725_s30 }
   0xd   :  { %16 = vsyncpa [#allocation6], 0  ;;  %241 = vrot.lane.b32.xlu1 %v10818_v7, %s10725_s30  ;;  %s10726_s12 = smov 17   ;;  %s10727_s13 = smov 1   ;;  %v44_v9 = vld [vmem:[%s15713_s0 + $0x20] sm:$0xff]  ;;  %v54_v10 = vld [vmem:[%s15713_s0 + $0x70] sm:$0xff] }
   0xe   :  { %v10852_v11 = vpack.c.bf16 %v54_v10, %v44_v9  ;;  %s10728_s18 = smov 127   ;;  %s10729_s19 = smov 111   ;;  %v45_v12 = vld [vmem:[%s15713_s0 + $0x28] sm:$0xff]  ;;  %v55_v13 = vld [vmem:[%s15713_s0 + $0x78] sm:$0xff]  ;;  %vm774_vm0 = vcmask 130048   ;;  %v46_v16 = vld [vmem:[%s15713_s0 + $0x30] sm:$0xff] }
   0xf   :  { %s10730_s20 = smov 110   ;;  %v10879_v14 = vld [vmem:[%s15714_s1 + $0x4] ss:$8 sps:$4 sm:$0xff]   ;;  %v10883_v15 = vpack.c.bf16 %v55_v13, %v45_v12  ;;  %s10731_s27 = smov 109   ;;  %v47_v19 = vld [vmem:[%s15713_s0 + $0x38] sm:$0xff]  ;;  %v58_v23 = vld [vmem:[%s15713_s0 + $0x90] sm:$0xff] }
  0x10   :  { %290 = vrot.lane.b32.xlu0 %v10807_v3, %s10726_s12  ;;  %10202 = vmatprep.mubr.msk.bf16.mxu0 %vm774_vm0, %v10879_v14  ;;  %v56_v17 = vld [vmem:[%s15713_s0 + $0x80] sm:$0xff]  ;;  %v57_v20 = vld [vmem:[%s15713_s0 + $0x88] sm:$0xff]  ;;  %vm208_vm1 = vcmask 154624   ;;  %vm255_vm2 = vcmask 146432   ;;  %v15725_v34 = vmov 0   ;;  %v101_v38 = vld [vmem:[%s15715_s2 + $0x18] sm:$0xff] }
  0x11   :  { %292 = vrot.lane.b32.xlu1 %v10822_v8, %s10726_s12  ;;  %10210 = vmatprep.mubr.msk.bf16.mxu1 %vm774_vm0, %v10879_v14  ;;  %v10917_v18 = vpack.c.bf16 %v56_v17, %v46_v16  ;;  %v10937_v21 = vpack.c.bf16 %v57_v20, %v47_v19  ;;  %v48_v22 = vld [vmem:[%s15713_s0 + $0x40] sm:$0xff]  ;;  %v99_v32 = vld [vmem:[%s15715_s2 + $0x8] sm:$0xff]  ;;  %v100_v39 = vld [vmem:[%s15715_s2 + $0x10] sm:$0xff]  ;;  %vm302_vm3 = vcmask 138240   ;;  %vm349_vm4 = vcmask 7168   ;;  %s10737_s17 = smov [#allocation5]  }
  0x12   :  { %v10965_v24 = vpack.c.bf16 %v58_v23, %v48_v22  ;;  %v98_v31 = vld [vmem:[%s15715_s2] sm:$0xff]  ;;  %10542 = vset.pattern.permute.xlu1 %v15725_v34  ;;  %10541 = vset.pattern.permute.xlu0 %v15725_v34  ;;  %v103_v43 = vld [vmem:[%s15715_s2 + $0x28] sm:$0xff]  ;;  %v105_v48 = vld [vmem:[%s15715_s2 + $0x38] sm:$0xff]  ;;  %vm408_vm5 = vcmask 1039360   ;;  %vm455_vm6 = vcmask 908288   ;;  %vm502_vm7 = vcmask 900096  }
  0x13   :  { %v102_v44 = vld [vmem:[%s15715_s2 + $0x20] sm:$0xff]  ;;  %v104_v49 = vld [vmem:[%s15715_s2 + $0x30] sm:$0xff]  ;;  %v107_v54 = vld [vmem:[%s15715_s2 + $0x48] sm:$0xff]  ;;  %vm549_vm8 = vcmask 891904   ;;  %vm10736_vm9 = vmmov 0   ;;  %vm10096_vm10 = vcmask 523264  }
  0x14   :  { %288 = vrot.lane.b32.xlu0 %v10818_v7, %s10726_s12  ;;  %15770 = vst [vmem:[#allocation9_spill] sm:$0xff] %v10965_v24  ;;  %v106_v55 = vld [vmem:[%s15715_s2 + $0x40] sm:$0xff]  ;;  %v109_v58 = vld [vmem:[%s15715_s2 + $0x58] sm:$0xff]  ;;  %v108_v59 = vld [vmem:[%s15715_s2 + $0x50] sm:$0xff]  ;;  %s10178_s21 = sshll.u32 %s10737_s17, 4  ;;  %vm10170_vm11 = vcmask 66560   ;;  %s10179_s21 = int_to_ptr.vmem [resolvable:$true] %s10178_s21 }
  0x15   :  { %337 = vrot.lane.b32.xlu1 %v10807_v3, %s10727_s13  ;;  %v111_v0 = vld [vmem:[%s15715_s2 + $0x68] sm:$0xff]  ;;  %v110_v1 = vld [vmem:[%s15715_s2 + $0x60] sm:$0xff]  ;;  %v113_v6 = vld [vmem:[%s15715_s2 + $0x78] sm:$0xff]  ;;  %p10705_p1 = scmp.lt.s32.totalorder %s10179_s21, %s10179_s21 }
  0x16   :  { %v115_v13 = vld [vmem:[%s15717_s4 + $0x8] sm:$0xff]  ;;  %v114_v16 = vld [vmem:[%s15717_s4] sm:$0xff] }
  0x18   :  { %339 = vrot.lane.b32.xlu0 %v10822_v8, %s10727_s13 }
  0x19   :  { %335 = vrot.lane.b32.xlu1 %v10818_v7, %s10727_s13 }
  0x1c   :  { %396 = vrot.lane.b32.xlu0 %v10822_v8, %s10728_s18 }
  0x1d   :  { %398 = vrot.lane.b32.xlu1 %v10852_v11, %s10728_s18 }
  0x20   :  { %394 = vrot.lane.b32.xlu0 %v10807_v3, %s10728_s18 }
  0x21   :  { %443 = vrot.lane.b32.xlu1 %v10822_v8, %s10729_s19 }
  0x24   :  { %445 = vrot.lane.b32.xlu0 %v10852_v11, %s10729_s19 }
  0x25   :  { %441 = vrot.lane.b32.xlu1 %v10807_v3, %s10729_s19 }
  0x28   :  { %490 = vrot.lane.b32.xlu0 %v10822_v8, %s10730_s20 }
  0x29   :  { %492 = vrot.lane.b32.xlu1 %v10852_v11, %s10730_s20 }
  0x2c   :  { %488 = vrot.lane.b32.xlu0 %v10807_v3, %s10730_s20 }
  0x2d   :  { %200 = vrot.lane.b32.xlu1 %v10852_v11, %s10724_s29 }
  0x30   :  { %202 = vrot.lane.b32.xlu0 %v10883_v15, %s10724_s29 }
  0x31   :  { %537 = vrot.lane.b32.xlu1 %v10822_v8, %s10731_s27 }
  0x34   :  { %539 = vrot.lane.b32.xlu0 %v10852_v11, %s10731_s27 }
  0x35   :  { %535 = vrot.lane.b32.xlu1 %v10807_v3, %s10731_s27 }
  0x38   :  { %247 = vrot.lane.b32.xlu0 %v10852_v11, %s10725_s30 }
  0x39   :  { %249 = vrot.lane.b32.xlu1 %v10883_v15, %s10725_s30 }
  0x3c   :  { %294 = vrot.lane.b32.xlu0 %v10852_v11, %s10726_s12 }
  0x3d   :  { %296 = vrot.lane.b32.xlu1 %v10883_v15, %s10726_s12 }
  0x40   :  { %341 = vrot.lane.b32.xlu0 %v10852_v11, %s10727_s13 }
  0x41   :  { %343 = vrot.lane.b32.xlu1 %v10883_v15, %s10727_s13 }
  0x44   :  { %400 = vrot.lane.b32.xlu0 %v10883_v15, %s10728_s18 }
  0x45   :  { %402 = vrot.lane.b32.xlu1 %v10917_v18, %s10728_s18 }
  0x48   :  { %447 = vrot.lane.b32.xlu0 %v10883_v15, %s10729_s19 }
  0x49   :  { %449 = vrot.lane.b32.xlu1 %v10917_v18, %s10729_s19 }
  0x4c   :  { %494 = vrot.lane.b32.xlu0 %v10883_v15, %s10730_s20 }
  0x4d   :  { %496 = vrot.lane.b32.xlu1 %v10917_v18, %s10730_s20 }
  0x50   :  { %204 = vrot.lane.b32.xlu0 %v10917_v18, %s10724_s29 }
  0x51   :  { %206 = vrot.lane.b32.xlu1 %v10937_v21, %s10724_s29 }
  0x54   :  { %541 = vrot.lane.b32.xlu0 %v10883_v15, %s10731_s27 }
  0x55   :  { %543 = vrot.lane.b32.xlu1 %v10917_v18, %s10731_s27 }
  0x58   :  { %251 = vrot.lane.b32.xlu0 %v10917_v18, %s10725_s30 }
  0x59   :  { %253 = vrot.lane.b32.xlu1 %v10937_v21, %s10725_s30 }
  0x5c   :  { %298 = vrot.lane.b32.xlu0 %v10917_v18, %s10726_s12 }
  0x5d   :  { %300 = vrot.lane.b32.xlu1 %v10937_v21, %s10726_s12 }
  0x60   :  { %345 = vrot.lane.b32.xlu0 %v10917_v18, %s10727_s13 }
  0x61   :  { %347 = vrot.lane.b32.xlu1 %v10937_v21, %s10727_s13 }
  0x64   :  { %404 = vrot.lane.b32.xlu0 %v10937_v21, %s10728_s18 }
  0x65   :  { %406 = vrot.lane.b32.xlu1 %v10965_v24, %s10728_s18 }
  0x68   :  { %451 = vrot.lane.b32.xlu0 %v10937_v21, %s10729_s19 }
  0x69   :  { %453 = vrot.lane.b32.xlu1 %v10965_v24, %s10729_s19 }
  0x6c   :  { %498 = vrot.lane.b32.xlu0 %v10937_v21, %s10730_s20 }
  0x6d   :  { %500 = vrot.lane.b32.xlu1 %v10965_v24, %s10730_s20 }
  0x70   :  { %545 = vrot.lane.b32.xlu0 %v10937_v21, %s10731_s27 }
  0x71   :  { %547 = vrot.lane.b32.xlu1 %v10965_v24, %s10731_s27 }
  0x74   :  { %624 = vperm.xlu0 %10541, %v98_v31  }
  0x75   :  { %629 = vperm.xlu1 %10542, %v99_v32   ;;  %v11103_v32 = vld [vmem:[%s15714_s1 + $0x14] ss:$8 sps:$4 sm:$0xff]  }
  0x76   :  { %v197_v25 = vpop.permute.xlu0 %196 }
  0x77   :  { %v195_v26 = vpop.permute.xlu1 %194 }
  0x78   :  { %v209_v30 = vsel %vm208_vm1, %v195_v26, %v197_v25  ;;  %639 = vperm.xlu0 %10541, %v101_v38  }
  0x79   :  { %634 = vperm.xlu1 %10542, %v100_v39  }
  0x7a   :  { %v10983_v27 = vpop.permute.xlu0 %198 }
  0x7b   :  { %v244_v28 = vpop.permute.xlu1 %243  ;;  %v210_v29 = vsel %vm208_vm1, %v197_v25, %v10983_v27 }
  0x7c   :  { %799 = vmatprep.subr.bf16.mxu0 %v210_v29  ;;  %649 = vperm.xlu0 %10541, %v103_v43  }
  0x7d   :  { %800 = vmatpush1.bf16.msra.mxu0 %v209_v30  ;;  %644 = vperm.xlu1 %10542, %v102_v44   ;;  %v11128_v44 = vld [vmem:[%s15714_s1 + $0x24] ss:$8 sps:$4 sm:$0xff]  }
  0x7e   :  { %v10994_v33 = vpop.permute.xlu0 %245 }
  0x7f   :  { %v242_v35 = vpop.permute.xlu1 %241  ;;  %v257_v36 = vsel %vm255_vm2, %v244_v28, %v10994_v33 }
  0x80   :  { %801 = vmatprep.subr.bf16.mxu0 %v257_v36  ;;  %v256_v37 = vsel %vm255_vm2, %v242_v35, %v244_v28  ;;  %659 = vperm.xlu0 %10541, %v105_v48  }
  0x81   :  { %802 = vmatpush1.bf16.msra.mxu0 %v256_v37  ;;  %654 = vperm.xlu1 %10542, %v104_v49  }
  0x82   :  { %v291_v40 = vpop.permute.xlu0 %290 }
  0x83   :  { %v11007_v41 = vpop.permute.xlu1 %292 }
  0x84   :  { %v304_v42 = vsel %vm302_vm3, %v291_v40, %v11007_v41  ;;  %669 = vperm.xlu0 %10541, %v107_v54  }
  0x85   :  { %803 = vmatprep.subr.bf16.mxu0 %v304_v42  ;;  %664 = vperm.xlu1 %10542, %v106_v55  }
  0x86   :  { %v289_v45 = vpop.permute.xlu0 %288 }
  0x87   :  { %v338_v46 = vpop.permute.xlu1 %337  ;;  %v303_v47 = vsel %vm302_vm3, %v289_v45, %v291_v40 }
  0x88   :  { %804 = vmatpush1.bf16.msra.mxu0 %v303_v47  ;;  %679 = vperm.xlu0 %10541, %v109_v58   ;;  %v11169_v58 = vld [vmem:[%s15714_s1 + $0x30] ss:$8 sps:$4 sm:$0xff]  }
  0x89   :  { %674 = vperm.xlu1 %10542, %v108_v59  }
  0x8a   :  { %v11024_v50 = vpop.permute.xlu0 %339 }
  0x8b   :  { %v336_v51 = vpop.permute.xlu1 %335  ;;  %v351_v52 = vsel %vm349_vm4, %v338_v46, %v11024_v50 }
  0x8c   :  { %805 = vmatprep.subr.bf16.mxu0 %v351_v52  ;;  %v350_v53 = vsel %vm349_vm4, %v336_v51, %v338_v46  ;;  %689 = vperm.xlu0 %10541, %v111_v0   ;;  %v11145_v51 = vld [vmem:[%s15714_s1 + $0x20] ss:$8 sps:$4 sm:$0xff]  }
  0x8d   :  { %806 = vmatpush1.bf16.msra.mxu0 %v350_v53  ;;  %684 = vperm.xlu1 %10542, %v110_v1  }
  0x8e   :  { %v397_v56 = vpop.permute.xlu0 %396  ;;  %807 = vmatprep.subr.bf16.mxu0 %v10822_v8  ;;  %v112_v8 = vld [vmem:[%s15715_s2 + $0x70] sm:$0xff] }
  0x8f   :  { %v11036_v57 = vpop.permute.xlu1 %398 }
  0x90   :  { %v410_v60 = vsel %vm408_vm5, %v397_v56, %v11036_v57  ;;  %699 = vperm.xlu0 %10541, %v113_v6   ;;  %v11197_v6 = vld [vmem:[%s15714_s1 + $0x40] ss:$8 sps:$4 sm:$0xff]  }
  0x91   :  { %808 = vmatpush1.bf16.msra.mxu0 %v10807_v3  ;;  %694 = vperm.xlu1 %10542, %v112_v8  }
  0x92   :  { %v395_v61 = vpop.permute.xlu0 %394  ;;  %809 = vmatprep.subr.bf16.mxu0 %v410_v60 }
  0x93   :  { %v444_v62 = vpop.permute.xlu1 %443  ;;  %v409_v63 = vsel %vm408_vm5, %v395_v61, %v397_v56 }
  0x94   :  { %1289 = vperm.xlu0 %10541, %v115_v13  }
  0x95   :  { %810 = vmatpush1.bf16.msra.mxu0 %v409_v63  ;;  %1284 = vperm.xlu1 %10542, %v114_v16  }
  0x96   :  { %v11054_v2 = vpop.permute.xlu0 %445 }
  0x97   :  { %v442_v3 = vpop.permute.xlu1 %441  ;;  %v457_v4 = vsel %vm455_vm6, %v444_v62, %v11054_v2 }
  0x98   :  { %811 = vmatprep.subr.bf16.mxu0 %v457_v4  ;;  %v456_v5 = vsel %vm455_vm6, %v442_v3, %v444_v62  ;;  %1567 = vrot.lane.b32.xlu0 %v10818_v7, %s10725_s30 }
  0x99   :  { %812 = vmatpush1.bf16.msra.mxu0 %v456_v5  ;;  %1521 = vrot.lane.b32.xlu1 %v10818_v7, %s10724_s29 }
  0x9a   :  { %v491_v9 = vpop.permute.xlu0 %490 }
  0x9b   :  { %v11065_v10 = vpop.permute.xlu1 %492 }
  0x9c   :  { %v504_v12 = vsel %vm502_vm7, %v491_v9, %v11065_v10  ;;  %1659 = vrot.lane.b32.xlu0 %v10818_v7, %s10727_s13 }
  0x9d   :  { %813 = vmatprep.subr.bf16.mxu0 %v504_v12  ;;  %1613 = vrot.lane.b32.xlu1 %v10818_v7, %s10726_s12 }
  0x9e   :  { %v489_v17 = vpop.permute.xlu0 %488 }
  0x9f   :  { %v201_v19 = vpop.permute.xlu1 %200  ;;  %v503_v20 = vsel %vm502_vm7, %v489_v17, %v491_v9  ;;  %v11202_v9 = vld [vmem:[%s15714_s1 + $0x54] ss:$8 sps:$4 sm:$0xff]  }
  0xa0   :  { %814 = vmatpush1.bf16.msra.mxu0 %v503_v20  ;;  %v211_v26 = vsel %vm208_vm1, %v10983_v27, %v201_v19  ;;  %v11098_v27 = vld [vmem:[%s15714_s1] ss:$8 sps:$4 sm:$0xff]  }
  0xa2   :  { %v11076_v22 = vpop.permute.xlu0 %202 }
  0xa3   :  { %v538_v23 = vpop.permute.xlu1 %537  ;;  %v212_v25 = vsel %vm208_vm1, %v201_v19, %v11076_v22 }
  0xa4   :  { %912 = vmatprep.subr.bf16.mxu1 %v212_v25  ;;  %v11224_v25 = vld [vmem:[%s15714_s1 + $0x64] ss:$8 sps:$4 sm:$0xff]  }
  0xa5   :  { %913 = vmatpush1.bf16.msra.mxu1 %v211_v26 }
  0xa6   :  { %v11086_v28 = vpop.permute.xlu0 %539 }
  0xa7   :  { %v536_v29 = vpop.permute.xlu1 %535  ;;  %v551_v30 = vsel %vm549_vm8, %v538_v23, %v11086_v28 }
  0xa8   :  { %815 = vmatprep.subr.bf16.mxu0 %v551_v30  ;;  %v550_v31 = vsel %vm549_vm8, %v536_v29, %v538_v23 }
  0xa9   :  { %816 = vmatpush1.bf16.msra.mxu0 %v550_v31 }
  0xaa   :  { %v248_v35 = vpop.permute.xlu0 %247 }
  0xab   :  { %v11105_v36 = vpop.permute.xlu1 %249  ;;  %v258_v37 = vsel %vm255_vm2, %v10994_v33, %v248_v35  ;;  %v11123_v33 = vld [vmem:[%s15714_s1 + $0x10] ss:$8 sps:$4 sm:$0xff]  }
  0xac   :  { %832 = vmatmul.mubr.bf16.vlgmr.msra.gmra.mrb[0].mxu0 %v11098_v27  ;;  %v259_v38 = vsel %vm255_vm2, %v248_v35, %v11105_v36  ;;  %v10563_v35 = vld [vmem:[%s15714_s1 + $0x60] ss:$8 sps:$4 sm:$0xff]  }
  0xad   :  { %914 = vmatprep.subr.bf16.mxu1 %v259_v38  ;;  %10203 = vmatprep.mubr.msk.bf16.mxu0 %vm774_vm0, %v11103_v32 }
  0xae   :  { %915 = vmatpush1.bf16.msra.mxu1 %v258_v37  ;;  %v295_v39 = vpop.permute.xlu0 %294  ;;  %v10564_v37 = vld [vmem:[%s15714_s1 + $0x74] ss:$8 sps:$4 sm:$0xff]  }
  0xaf   :  { %v11114_v40 = vpop.permute.xlu1 %296  ;;  %v305_v42 = vsel %vm302_vm3, %v11007_v41, %v295_v39 }
  0xb0   :  { %v306_v43 = vsel %vm302_vm3, %v295_v39, %v11114_v40 }
  0xb1   :  { %916 = vmatprep.subr.bf16.mxu1 %v306_v43  ;;  %v10566_v43 = vld [vmem:[%s15714_s1 + $0x70] ss:$8 sps:$4 sm:$0xff]  }
  0xb2   :  { %917 = vmatpush1.bf16.msra.mxu1 %v305_v42  ;;  %v342_v45 = vpop.permute.xlu0 %341 }
  0xb3   :  { %v11130_v46 = vpop.permute.xlu1 %343  ;;  %v352_v41 = vsel %vm349_vm4, %v11024_v50, %v342_v45  ;;  %v11150_v50 = vld [vmem:[%s15714_s1 + $0x34] ss:$8 sps:$4 sm:$0xff]  }
  0xb4   :  { %842 = vmatmul.mubr.bf16.gmra.mrb[4].mxu0 %v11123_v33  ;;  %v353_v47 = vsel %vm349_vm4, %v342_v45, %v11130_v46 }
  0xb5   :  { %918 = vmatprep.subr.bf16.mxu1 %v353_v47  ;;  %10204 = vmatprep.mubr.msk.bf16.mxu0 %vm774_vm0, %v11128_v44 }
  0xb6   :  { %919 = vmatpush1.bf16.msra.mxu1 %v352_v41  ;;  %v401_v48 = vpop.permute.xlu0 %400 }
  0xb7   :  { %v11139_v49 = vpop.permute.xlu1 %402  ;;  %920 = vmatprep.subr.bf16.mxu1 %v10883_v15  ;;  %v411_v15 = vsel %vm408_vm5, %v11036_v57, %v401_v48  ;;  %v11176_v57 = vld [vmem:[%s15714_s1 + $0x44] ss:$8 sps:$4 sm:$0xff]  }
  0xb8   :  { %v412_v53 = vsel %vm408_vm5, %v401_v48, %v11139_v49 }
  0xba   :  { %921 = vmatpush1.bf16.msra.mxu1 %v10852_v11  ;;  %v448_v52 = vpop.permute.xlu0 %447 }
  0xbb   :  { %922 = vmatprep.subr.bf16.mxu1 %v412_v53  ;;  %v11155_v54 = vpop.permute.xlu1 %449  ;;  %v458_v59 = vsel %vm455_vm6, %v11054_v2, %v448_v52 }
  0xbc   :  { %852 = vmatmul.mubr.bf16.gmra.mrb[8].mxu0 %v11145_v51  ;;  %v459_v11 = vsel %vm455_vm6, %v448_v52, %v11155_v54 }
  0xbd   :  { %10205 = vmatprep.mubr.msk.bf16.mxu0 %vm774_vm0, %v11150_v50 }
  0xbe   :  { %923 = vmatpush1.bf16.msra.mxu1 %v411_v15  ;;  %v495_v55 = vpop.permute.xlu0 %494 }
  0xbf   :  { %924 = vmatprep.subr.bf16.mxu1 %v459_v11  ;;  %v11164_v56 = vpop.permute.xlu1 %496  ;;  %v505_v1 = vsel %vm502_vm7, %v11065_v10, %v495_v55 }
  0xc0   :  { %v506_v61 = vsel %vm502_vm7, %v495_v55, %v11164_v56 }
  0xc2   :  { %925 = vmatpush1.bf16.msra.mxu1 %v458_v59  ;;  %v205_v60 = vpop.permute.xlu0 %204 }
  0xc3   :  { %926 = vmatprep.subr.bf16.mxu1 %v506_v61  ;;  %v207_v62 = vpop.permute.xlu1 %206  ;;  %v213_v63 = vsel %vm208_vm1, %v11076_v22, %v205_v60  ;;  %v11219_v22 = vld [vmem:[%s15714_s1 + $0x50] ss:$8 sps:$4 sm:$0xff]  }
  0xc4   :  { %862 = vmatmul.mubr.bf16.gmra.mrb[12].mxu0 %v11169_v58  ;;  %v214_v0 = vsel %vm208_vm1, %v205_v60, %v207_v62 }
  0xc5   :  { %1025 = vmatprep.subr.bf16.mxu0 %v214_v0  ;;  %10206 = vmatprep.mubr.msk.bf16.mxu0 %vm774_vm0, %v11176_v57 }
  0xc6   :  { %927 = vmatpush1.bf16.msra.mxu1 %v505_v1  ;;  %1026 = vmatpush1.bf16.msra.mxu0 %v213_v63  ;;  %v542_v2 = vpop.permute.xlu0 %541 }
  0xc7   :  { %v11188_v3 = vpop.permute.xlu1 %543  ;;  %v552_v4 = vsel %vm549_vm8, %v11086_v28, %v542_v2 }
  0xc8   :  { %v553_v5 = vsel %vm549_vm8, %v542_v2, %v11188_v3 }
  0xc9   :  { %928 = vmatprep.subr.bf16.mxu1 %v553_v5 }
  0xca   :  { %929 = vmatpush1.bf16.msra.mxu1 %v552_v4  ;;  %v252_v8 = vpop.permute.xlu0 %251 }
  0xcb   :  { %v254_v10 = vpop.permute.xlu1 %253  ;;  %v260_v12 = vsel %vm255_vm2, %v11105_v36, %v252_v8 }
  0xcc   :  { %872 = vmatmul.mubr.bf16.gmra.mrb[16].mxu0 %v11197_v6  ;;  %v261_v13 = vsel %vm255_vm2, %v252_v8, %v254_v10 }
  0xcd   :  { %945 = vmatmul.mubr.bf16.vlgmr.msra.gmra.mrb[0].mxu1 %v11098_v27  ;;  %1027 = vmatprep.subr.bf16.mxu0 %v261_v13 }
  0xce   :  { %1028 = vmatpush1.bf16.msra.mxu0 %v260_v12  ;;  %v299_v16 = vpop.permute.xlu0 %298  ;;  %10207 = vmatprep.mubr.msk.bf16.mxu0 %vm774_vm0, %v11202_v9 }
  0xcf   :  { %v301_v17 = vpop.permute.xlu1 %300  ;;  %v307_v19 = vsel %vm302_vm3, %v11114_v40, %v299_v16  ;;  %10211 = vmatprep.mubr.msk.bf16.mxu1 %vm774_vm0, %v11103_v32 }
  0xd0   :  { %v308_v20 = vsel %vm302_vm3, %v299_v16, %v301_v17 }
  0xd1   :  { %1029 = vmatprep.subr.bf16.mxu0 %v308_v20 }
  0xd2   :  { %1030 = vmatpush1.bf16.msra.mxu0 %v307_v19  ;;  %v346_v23 = vpop.permute.xlu0 %345 }
  0xd3   :  { %v348_v26 = vpop.permute.xlu1 %347  ;;  %v354_v28 = vsel %vm349_vm4, %v11130_v46, %v346_v23 }
  0xd4   :  { %882 = vmatmul.mubr.bf16.gmra.mrb[20].mxu0 %v11219_v22  ;;  %v355_v29 = vsel %vm349_vm4, %v346_v23, %v348_v26 }
  0xd5   :  { %955 = vmatmul.mubr.bf16.gmra.mrb[4].mxu1 %v11123_v33  ;;  %1031 = vmatprep.subr.bf16.mxu0 %v355_v29 }
  0xd6   :  { %1032 = vmatpush1.bf16.msra.mxu0 %v354_v28  ;;  %v405_v30 = vpop.permute.xlu0 %404  ;;  %10208 = vmatprep.mubr.msk.bf16.mxu0 %vm774_vm0, %v11224_v25 }
  0xd7   :  { %1033 = vmatprep.subr.bf16.mxu0 %v10937_v21  ;;  %v407_v31 = vpop.permute.xlu1 %406  ;;  %10212 = vmatprep.mubr.msk.bf16.mxu1 %vm774_vm0, %v11128_v44  ;;  %v413_v40 = vsel %vm408_vm5, %v11139_v49, %v405_v30 }
  0xd8   :  { %v414_v36 = vsel %vm408_vm5, %v405_v30, %v407_v31 }
  0xda   :  { %1034 = vmatpush1.bf16.msra.mxu0 %v10917_v18  ;;  %v452_v38 = vpop.permute.xlu0 %451 }
  0xdb   :  { %1035 = vmatprep.subr.bf16.mxu0 %v414_v36  ;;  %v454_v39 = vpop.permute.xlu1 %453  ;;  %v460_v46 = vsel %vm455_vm6, %v11155_v54, %v452_v38 }
  0xdc   :  { %892 = vmatmul.mubr.bf16.gmra.mrb[24].mxu0 %v10563_v35  ;;  %v461_v21 = vsel %vm455_vm6, %v452_v38, %v454_v39 }
  0xdd   :  { %965 = vmatmul.mubr.bf16.gmra.mrb[8].mxu1 %v11145_v51  ;;  %10209 = vmatprep.mubr.msk.bf16.mxu0 %vm774_vm0, %v10564_v37 }
  0xde   :  { %1036 = vmatpush1.bf16.msra.mxu0 %v413_v40  ;;  %v499_v42 = vpop.permute.xlu0 %498  ;;  %10213 = vmatprep.mubr.msk.bf16.mxu1 %vm774_vm0, %v11150_v50 }
  0xdf   :  { %1037 = vmatprep.subr.bf16.mxu0 %v461_v21  ;;  %v501_v18 = vpop.permute.xlu1 %500  ;;  %v507_v49 = vsel %vm502_vm7, %v11164_v56, %v499_v42 }
  0xe0   :  { %v508_v45 = vsel %vm502_vm7, %v499_v42, %v501_v18 }
  0xe2   :  { %1038 = vmatpush1.bf16.msra.mxu0 %v460_v46  ;;  %v546_v41 = vpop.permute.xlu0 %545 }
  0xe3   :  { %1039 = vmatprep.subr.bf16.mxu0 %v508_v45  ;;  %v548_v47 = vpop.permute.xlu1 %547  ;;  %v554_v52 = vsel %vm549_vm8, %v11188_v3, %v546_v41 }
  0xe4   :  { %902 = vmatmul.mubr.bf16.gmra.mrb[28].mxu0 %v10566_v43  ;;  %v555_v48 = vsel %vm549_vm8, %v546_v41, %v548_v47 }
  0xe5   :  { %975 = vmatmul.mubr.bf16.gmra.mrb[12].mxu1 %v11169_v58  ;;  %10218 = vmatprep.mubr.msk.bf16.mxu0 %vm774_vm0, %v10879_v14 }
  0xe6   :  { %1040 = vmatpush1.bf16.msra.mxu0 %v507_v49  ;;  %10214 = vmatprep.mubr.msk.bf16.mxu1 %vm774_vm0, %v11176_v57 }
  0xe7   :  { %1041 = vmatprep.subr.bf16.mxu0 %v555_v48 }
  0xea   :  { %1042 = vmatpush1.bf16.msra.mxu0 %v554_v52 }
  0xed   :  { %985 = vmatmul.mubr.bf16.gmra.mrb[16].mxu1 %v11197_v6  ;;  %1058 = vmatmul.mubr.bf16.vlgmr.msra.gmra.mrb[32].mxu0 %v11098_v27 }
  0xee   :  { %10215 = vmatprep.mubr.msk.bf16.mxu1 %vm774_vm0, %v11202_v9  ;;  %10219 = vmatprep.mubr.msk.bf16.mxu0 %vm774_vm0, %v11103_v32 }
  0xf3   :  { %v11295_v14 = vpop.permute.xlu0 %624 }
  0xf4   :  { %v11297_v32 = vpop.permute.xlu1 %629 }
  0xf5   :  { %995 = vmatmul.mubr.bf16.gmra.mrb[20].mxu1 %v11219_v22  ;;  %1068 = vmatmul.mubr.bf16.gmra.mrb[36].mxu0 %v11123_v33 }
  0xf6   :  { %10216 = vmatprep.mubr.msk.bf16.mxu1 %vm774_vm0, %v11224_v25  ;;  %10220 = vmatprep.mubr.msk.bf16.mxu0 %vm774_vm0, %v11128_v44 }
  0xf7   :  { %v11306_v0 = vpop.permute.xlu0 %639 }
  0xf8   :  { %v11303_v59 = vpop.permute.xlu1 %634 }
  0xfc   :  { %v11311_v13 = vpop.permute.xlu1 %644 }
  0xfd   :  { %1005 = vmatmul.mubr.bf16.gmra.mrb[24].mxu1 %v10563_v35  ;;  %1078 = vmatmul.mubr.bf16.gmra.mrb[40].mxu0 %v11145_v51 }
  0xfe   :  { %10217 = vmatprep.mubr.msk.bf16.mxu1 %vm774_vm0, %v10564_v37  ;;  %10221 = vmatprep.mubr.msk.bf16.mxu0 %vm774_vm0, %v11150_v50 }
 0x100   :  { %v11319_v38 = vpop.permute.xlu1 %654 }
 0x105   :  { %1015 = vmatmul.mubr.bf16.gmra.mrb[28].mxu1 %v10566_v43  ;;  %1088 = vmatmul.mubr.bf16.gmra.mrb[44].mxu0 %v11169_v58 }
 0x106   :  { %10222 = vmatprep.mubr.msk.bf16.mxu0 %vm774_vm0, %v11176_v57  ;;  %1330 = vmatprep.mubr.bf16.mxu1 %v15725_v34 }
 0x10d   :  { %1098 = vmatmul.mubr.bf16.gmra.mrb[48].mxu0 %v11197_v6 }
 0x10e   :  { %10223 = vmatprep.mubr.msk.bf16.mxu0 %vm774_vm0, %v11202_v9 }
 0x115   :  { %1108 = vmatmul.mubr.bf16.gmra.mrb[52].mxu0 %v11219_v22  ;;  %v11314_v22 = vpop.permute.xlu0 %649 }
 0x116   :  { %10224 = vmatprep.mubr.msk.bf16.mxu0 %vm774_vm0, %v11224_v25 }
 0x119   :  { %v11321_v40 = vpop.permute.xlu0 %659 }
 0x11d   :  { %1118 = vmatmul.mubr.bf16.gmra.mrb[56].mxu0 %v10563_v35 }
 0x11e   :  { %10225 = vmatprep.mubr.msk.bf16.mxu0 %vm774_vm0, %v10564_v37 }
 0x125   :  { %1128 = vmatmul.mubr.bf16.gmra.mrb[60].mxu0 %v10566_v43 }
 0x126   :  { %1416 = vmatprep.mubr.bf16.mxu0 %v15725_v34 }
 0x17f   :  { %v833_v27 = vpop.f32.mrb[0].mxu0 }
 0x180   :  { %v834_v33 = vadd.f32 %v833_v27, %v11295_v14  ;;  %v835_v44 = vpop.f32.mrb[1].mxu0 }
 0x181   :  { %v836_v51 = vadd.f32 %v835_v44, %v11295_v14  ;;  %v837_v50 = vpop.f32.mrb[2].mxu0 }
 0x182   :  { %v838_v53 = vadd.f32 %v837_v50, %v11297_v32  ;;  %v839_v54 = vpop.f32.mrb[3].mxu0  ;;  %v1138_v55 = vmax.f32 %v834_v33, 0.0  ;;  %v11327_v33 = vpop.permute.xlu0 %669 }
 0x183   :  { %v840_v15 = vadd.f32 %v839_v54, %v11297_v32  ;;  %v1139_v56 = vmax.f32 %v836_v51, 0.0  ;;  %v11329_v51 = vpop.permute.xlu1 %664 }
 0x184   :  { %v1144_v11 = vmax.f32 %v838_v53, 0.0 }
 0x185   :  { %v1145_v58 = vmax.f32 %v840_v15, 0.0 }
 0x186   :  { %v1234_v57 = vpack.c.bf16 %v1144_v11, %v1138_v55 }
 0x187   :  { %v843_v60 = vpop.f32.mrb[4].mxu0  ;;  %v1235_v61 = vpack.c.bf16 %v1145_v58, %v1139_v56 }
 0x188   :  { %v844_v62 = vadd.f32 %v843_v60, %v11303_v59  ;;  %v845_v63 = vpop.f32.mrb[5].mxu0 }
 0x189   :  { %v846_v1 = vadd.f32 %v845_v63, %v11303_v59  ;;  %v847_v2 = vpop.f32.mrb[6].mxu0  ;;  %1298 = vmatprep.subr.bf16.mxu1 %v1235_v61 }
 0x18a   :  { %v848_v3 = vadd.f32 %v847_v2, %v11306_v0  ;;  %v849_v4 = vpop.f32.mrb[7].mxu0  ;;  %1299 = vmatpush1.bf16.msra.mxu1 %v1234_v57  ;;  %v1150_v6 = vmax.f32 %v844_v62, 0.0 }
 0x18b   :  { %v850_v5 = vadd.f32 %v849_v4, %v11306_v0  ;;  %v1151_v9 = vmax.f32 %v846_v1, 0.0 }
 0x18c   :  { %v1156_v8 = vmax.f32 %v848_v3, 0.0 }
 0x18d   :  { %v1157_v10 = vmax.f32 %v850_v5, 0.0 }
 0x18e   :  { %v1240_v12 = vpack.c.bf16 %v1156_v8, %v1150_v6 }
 0x18f   :  { %v853_v16 = vpop.f32.mrb[8].mxu0  ;;  %v1241_v17 = vpack.c.bf16 %v1157_v10, %v1151_v9 }
 0x190   :  { %v854_v19 = vadd.f32 %v853_v16, %v11311_v13  ;;  %v855_v20 = vpop.f32.mrb[9].mxu0 }
 0x191   :  { %v856_v23 = vadd.f32 %v855_v20, %v11311_v13  ;;  %v857_v25 = vpop.f32.mrb[10].mxu0  ;;  %1300 = vmatprep.subr.bf16.mxu1 %v1241_v17  ;;  %v11339_v17 = vpop.permute.xlu0 %679 }
 0x192   :  { %v858_v26 = vadd.f32 %v857_v25, %v11314_v22  ;;  %v859_v28 = vpop.f32.mrb[11].mxu0  ;;  %1301 = vmatpush1.bf16.msra.mxu1 %v1240_v12  ;;  %v1162_v30 = vmax.f32 %v854_v19, 0.0 }
 0x193   :  { %v860_v29 = vadd.f32 %v859_v28, %v11314_v22  ;;  %v1163_v35 = vmax.f32 %v856_v23, 0.0  ;;  %v11341_v23 = vpop.permute.xlu1 %674 }
 0x194   :  { %v1168_v31 = vmax.f32 %v858_v26, 0.0 }
 0x195   :  { %v1169_v36 = vmax.f32 %v860_v29, 0.0 }
 0x196   :  { %v1246_v37 = vpack.c.bf16 %v1168_v31, %v1162_v30 }
 0x197   :  { %v863_v39 = vpop.f32.mrb[12].mxu0  ;;  %v1247_v21 = vpack.c.bf16 %v1169_v36, %v1163_v35 }
 0x198   :  { %v864_v42 = vadd.f32 %v863_v39, %v11319_v38  ;;  %v865_v18 = vpop.f32.mrb[13].mxu0 }
 0x199   :  { %v866_v43 = vadd.f32 %v865_v18, %v11319_v38  ;;  %v867_v45 = vpop.f32.mrb[14].mxu0  ;;  %1302 = vmatprep.subr.bf16.mxu1 %v1247_v21 }
 0x19a   :  { %v868_v46 = vadd.f32 %v867_v45, %v11321_v40  ;;  %v869_v41 = vpop.f32.mrb[15].mxu0  ;;  %1303 = vmatpush1.bf16.msra.mxu1 %v1246_v37  ;;  %v1174_v48 = vmax.f32 %v864_v42, 0.0 }
 0x19b   :  { %v870_v47 = vadd.f32 %v869_v41, %v11321_v40  ;;  %v1175_v52 = vmax.f32 %v866_v43, 0.0 }
 0x19c   :  { %v1180_v49 = vmax.f32 %v868_v46, 0.0 }
 0x19d   :  { %v1181_v27 = vmax.f32 %v870_v47, 0.0 }
 0x19e   :  { %v1252_v44 = vpack.c.bf16 %v1180_v49, %v1174_v48 }
 0x19f   :  { %v873_v50 = vpop.f32.mrb[16].mxu0  ;;  %v1253_v53 = vpack.c.bf16 %v1181_v27, %v1175_v52 }
 0x1a0   :  { %v874_v54 = vadd.f32 %v873_v50, %v11329_v51  ;;  %v946_v15 = vpop.f32.mrb[0].mxu1  ;;  %v875_v55 = vpop.f32.mrb[17].mxu0 }
 0x1a1   :  { %v947_v11 = vadd.f32 %v946_v15, %v11295_v14  ;;  %v876_v56 = vadd.f32 %v875_v55, %v11329_v51  ;;  %v948_v58 = vpop.f32.mrb[1].mxu1  ;;  %v877_v57 = vpop.f32.mrb[18].mxu0  ;;  %1304 = vmatprep.subr.bf16.mxu1 %v1253_v53 }
 0x1a2   :  { %v949_v60 = vadd.f32 %v948_v58, %v11295_v14  ;;  %v878_v61 = vadd.f32 %v877_v57, %v11327_v33  ;;  %v950_v62 = vpop.f32.mrb[2].mxu1  ;;  %v879_v63 = vpop.f32.mrb[19].mxu0  ;;  %1305 = vmatpush1.bf16.msra.mxu1 %v1252_v44  ;;  %v1186_v5 = vmax.f32 %v874_v54, 0.0 }
 0x1a3   :  { %v1140_v1 = vmax.f32 %v947_v11, 0.0  ;;  %v951_v2 = vadd.f32 %v950_v62, %v11297_v32  ;;  %v880_v3 = vadd.f32 %v879_v63, %v11327_v33  ;;  %v952_v4 = vpop.f32.mrb[3].mxu1  ;;  %v1187_v10 = vmax.f32 %v876_v56, 0.0  ;;  %v11355_v54 = vpop.permute.xlu0 %689 }
 0x1a4   :  { %v1141_v6 = vmax.f32 %v949_v60, 0.0  ;;  %v1192_v8 = vmax.f32 %v878_v61, 0.0  ;;  %v953_v9 = vadd.f32 %v952_v4, %v11297_v32  ;;  %v11357_v56 = vpop.permute.xlu1 %684 }
 0x1a5   :  { %v1146_v12 = vmax.f32 %v951_v2, 0.0  ;;  %v1193_v16 = vmax.f32 %v880_v3, 0.0 }
 0x1a6   :  { %v1258_v19 = vpack.c.bf16 %v1192_v8, %v1186_v5  ;;  %v1147_v20 = vmax.f32 %v953_v9, 0.0 }
 0x1a7   :  { %v11343_v25 = vpack.c.bf16 %v1146_v12, %v1140_v1  ;;  %v883_v26 = vpop.f32.mrb[20].mxu0  ;;  %v1259_v28 = vpack.c.bf16 %v1193_v16, %v1187_v10 }
 0x1a8   :  { %v884_v29 = vadd.f32 %v883_v26, %v11341_v23  ;;  %v956_v30 = vpop.f32.mrb[4].mxu1  ;;  %v885_v31 = vpop.f32.mrb[21].mxu0  ;;  %v11346_v35 = vpack.c.bf16 %v1147_v20, %v1141_v6 }
 0x1a9   :  { %v957_v36 = vadd.f32 %v956_v30, %v11303_v59  ;;  %v886_v37 = vadd.f32 %v885_v31, %v11341_v23  ;;  %v958_v39 = vpop.f32.mrb[5].mxu1  ;;  %v887_v21 = vpop.f32.mrb[22].mxu0  ;;  %1306 = vmatprep.subr.bf16.mxu1 %v1259_v28 }
 0x1aa   :  { %v959_v42 = vadd.f32 %v958_v39, %v11303_v59  ;;  %v888_v18 = vadd.f32 %v887_v21, %v11339_v17  ;;  %v960_v43 = vpop.f32.mrb[6].mxu1  ;;  %v889_v45 = vpop.f32.mrb[23].mxu0  ;;  %1307 = vmatpush1.bf16.msra.mxu1 %v1258_v19  ;;  %v1198_v48 = vmax.f32 %v884_v29, 0.0 }
 0x1ab   :  { %v961_v46 = vadd.f32 %v960_v43, %v11306_v0  ;;  %v890_v41 = vadd.f32 %v889_v45, %v11339_v17  ;;  %v962_v47 = vpop.f32.mrb[7].mxu1  ;;  %v1152_v27 = vmax.f32 %v957_v36, 0.0  ;;  %v1199_v44 = vmax.f32 %v886_v37, 0.0  ;;  %v11371_v37 = vpop.permute.xlu0 %699 }
 0x1ac   :  { %v1204_v49 = vmax.f32 %v888_v18, 0.0  ;;  %v963_v52 = vadd.f32 %v962_v47, %v11306_v0  ;;  %v1153_v15 = vmax.f32 %v959_v42, 0.0  ;;  %v11373_v18 = vpop.permute.xlu1 %694 }
 0x1ad   :  { %v1158_v50 = vmax.f32 %v961_v46, 0.0  ;;  %v1205_v53 = vmax.f32 %v890_v41, 0.0 }
 0x1ae   :  { %v1264_v55 = vpack.c.bf16 %v1204_v49, %v1198_v48  ;;  %v1159_v11 = vmax.f32 %v963_v52, 0.0 }
 0x1af   :  { %v11359_v58 = vpack.c.bf16 %v1158_v50, %v1152_v27  ;;  %v893_v57 = vpop.f32.mrb[24].mxu0  ;;  %v1265_v60 = vpack.c.bf16 %v1205_v53, %v1199_v44 }
 0x1b0   :  { %v894_v61 = vadd.f32 %v893_v57, %v11357_v56  ;;  %v966_v62 = vpop.f32.mrb[8].mxu1  ;;  %v895_v63 = vpop.f32.mrb[25].mxu0  ;;  %v11362_v1 = vpack.c.bf16 %v1159_v11, %v1153_v15 }
 0x1b1   :  { %v967_v2 = vadd.f32 %v966_v62, %v11311_v13  ;;  %v896_v3 = vadd.f32 %v895_v63, %v11357_v56  ;;  %v968_v4 = vpop.f32.mrb[9].mxu1  ;;  %v897_v5 = vpop.f32.mrb[26].mxu0  ;;  %1308 = vmatprep.subr.bf16.mxu1 %v1265_v60 }
 0x1b2   :  { %v969_v6 = vadd.f32 %v968_v4, %v11311_v13  ;;  %v898_v8 = vadd.f32 %v897_v5, %v11355_v54  ;;  %v970_v9 = vpop.f32.mrb[10].mxu1  ;;  %v899_v10 = vpop.f32.mrb[27].mxu0  ;;  %1309 = vmatpush1.bf16.msra.mxu1 %v1264_v55  ;;  %v1210_v20 = vmax.f32 %v894_v61, 0.0 }
 0x1b3   :  { %v971_v12 = vadd.f32 %v970_v9, %v11314_v22  ;;  %v900_v16 = vadd.f32 %v899_v10, %v11355_v54  ;;  %v972_v19 = vpop.f32.mrb[11].mxu1  ;;  %v1164_v29 = vmax.f32 %v967_v2, 0.0  ;;  %v1211_v30 = vmax.f32 %v896_v3, 0.0 }
 0x1b4   :  { %v1216_v26 = vmax.f32 %v898_v8, 0.0  ;;  %v973_v28 = vadd.f32 %v972_v19, %v11314_v22  ;;  %v1165_v39 = vmax.f32 %v969_v6, 0.0 }
 0x1b5   :  { %v1170_v31 = vmax.f32 %v971_v12, 0.0  ;;  %v1217_v36 = vmax.f32 %v900_v16, 0.0 }
 0x1b6   :  { %v1270_v21 = vpack.c.bf16 %v1216_v26, %v1210_v20  ;;  %v1171_v42 = vmax.f32 %v973_v28, 0.0 }
 0x1b7   :  { %v11375_v43 = vpack.c.bf16 %v1170_v31, %v1164_v29  ;;  %v903_v45 = vpop.f32.mrb[28].mxu0  ;;  %v1271_v46 = vpack.c.bf16 %v1217_v36, %v1211_v30  ;;  %v11396_v36 = vld [vmem:[%s15716_s3] sm:$0xff]  }
 0x1b8   :  { %v904_v41 = vadd.f32 %v903_v45, %v11373_v18  ;;  %v976_v47 = vpop.f32.mrb[12].mxu1  ;;  %v905_v48 = vpop.f32.mrb[29].mxu0  ;;  %v11378_v49 = vpack.c.bf16 %v1171_v42, %v1165_v39 }
 0x1b9   :  { %v977_v52 = vadd.f32 %v976_v47, %v11319_v38  ;;  %v906_v27 = vadd.f32 %v905_v48, %v11373_v18  ;;  %v978_v44 = vpop.f32.mrb[13].mxu1  ;;  %v907_v50 = vpop.f32.mrb[30].mxu0  ;;  %1310 = vmatprep.subr.bf16.mxu1 %v1271_v46 }
 0x1ba   :  { %v979_v53 = vadd.f32 %v978_v44, %v11319_v38  ;;  %v908_v15 = vadd.f32 %v907_v50, %v11371_v37  ;;  %v980_v55 = vpop.f32.mrb[14].mxu1  ;;  %v909_v11 = vpop.f32.mrb[31].mxu0  ;;  %1311 = vmatpush1.bf16.msra.mxu1 %v1270_v21  ;;  %v1222_v62 = vmax.f32 %v904_v41, 0.0 }
 0x1bb   :  { %v981_v57 = vadd.f32 %v980_v55, %v11321_v40  ;;  %v910_v60 = vadd.f32 %v909_v11, %v11371_v37  ;;  %v982_v61 = vpop.f32.mrb[15].mxu1  ;;  %v1176_v3 = vmax.f32 %v977_v52, 0.0  ;;  %v1223_v4 = vmax.f32 %v906_v27, 0.0 }
 0x1bc   :  { %v1228_v63 = vmax.f32 %v908_v15, 0.0  ;;  %v983_v2 = vadd.f32 %v982_v61, %v11321_v40  ;;  %v1177_v8 = vmax.f32 %v979_v53, 0.0 }
 0x1bd   :  { %v1182_v5 = vmax.f32 %v981_v57, 0.0  ;;  %v1229_v6 = vmax.f32 %v910_v60, 0.0 }
 0x1be   :  { %v1276_v9 = vpack.c.bf16 %v1228_v63, %v1222_v62  ;;  %v1183_v10 = vmax.f32 %v983_v2, 0.0 }
 0x1bf   :  { %v11387_v12 = vpack.c.bf16 %v1182_v5, %v1176_v3  ;;  %v1277_v16 = vpack.c.bf16 %v1229_v6, %v1223_v4 }
 0x1c0   :  { %v986_v19 = vpop.f32.mrb[16].mxu1  ;;  %v1059_v20 = vpop.f32.mrb[32].mxu0  ;;  %v11389_v26 = vpack.c.bf16 %v1183_v10, %v1177_v8 }
 0x1c1   :  { %v987_v28 = vadd.f32 %v986_v19, %v11329_v51  ;;  %v1060_v29 = vadd.f32 %v1059_v20, %v11295_v14  ;;  %v988_v30 = vpop.f32.mrb[17].mxu1  ;;  %v1061_v31 = vpop.f32.mrb[33].mxu0  ;;  %1312 = vmatprep.subr.bf16.mxu1 %v1277_v16 }
 0x1c2   :  { %v989_v39 = vadd.f32 %v988_v30, %v11329_v51  ;;  %v1062_v21 = vadd.f32 %v1061_v31, %v11295_v14  ;;  %v990_v42 = vpop.f32.mrb[18].mxu1  ;;  %v1063_v45 = vpop.f32.mrb[34].mxu0  ;;  %1313 = vmatpush1.bf16.msra.mxu1 %v1276_v9 }
 0x1c3   :  { %v991_v46 = vadd.f32 %v990_v42, %v11327_v33  ;;  %v1064_v41 = vadd.f32 %v1063_v45, %v11297_v32  ;;  %v992_v47 = vpop.f32.mrb[19].mxu1  ;;  %v1065_v48 = vpop.f32.mrb[35].mxu0  ;;  %1341 = vmatprep.subr.bf16.mxu1 %v11346_v35  ;;  %v1188_v44 = vmax.f32 %v987_v28, 0.0  ;;  %v1142_v50 = vmax.f32 %v1060_v29, 0.0 }
 0x1c4   :  { %v993_v52 = vadd.f32 %v992_v47, %v11327_v33  ;;  %v1066_v27 = vadd.f32 %v1065_v48, %v11297_v32  ;;  %v1189_v55 = vmax.f32 %v989_v39, 0.0  ;;  %v1143_v11 = vmax.f32 %v1062_v21, 0.0 }
 0x1c5   :  { %v1194_v53 = vmax.f32 %v991_v46, 0.0  ;;  %v1148_v15 = vmax.f32 %v1064_v41, 0.0  ;;  %1331 = vmatmul.mubr.bf16.vlgmr.msra.gmra.mrb[32].mxu1 %v11396_v36 }
 0x1c6   :  { %v1195_v57 = vmax.f32 %v993_v52, 0.0  ;;  %v1149_v60 = vmax.f32 %v1066_v27, 0.0  ;;  %1342 = vmatpush1.bf16.msra.mxu1 %v11343_v25  ;;  %1373 = vmatprep.mubr.bf16.mxu1 %v15725_v34 }
 0x1c7   :  { %v11408_v61 = vpack.c.bf16 %v1194_v53, %v1188_v44  ;;  %v1238_v35 = vpack.c.bf16 %v1148_v15, %v1142_v50  ;;  %1343 = vmatprep.subr.bf16.mxu1 %v11362_v1 }
 0x1c8   :  { %v996_v62 = vpop.f32.mrb[20].mxu1  ;;  %v1069_v63 = vpop.f32.mrb[36].mxu0  ;;  %v1239_v2 = vpack.c.bf16 %v1149_v60, %v1143_v11  ;;  %v1261_v3 = vpack.c.bf16 %v1195_v57, %v1189_v55 }
 0x1c9   :  { %v997_v4 = vadd.f32 %v996_v62, %v11341_v23  ;;  %v1070_v5 = vadd.f32 %v1069_v63, %v11303_v59  ;;  %v998_v6 = vpop.f32.mrb[21].mxu1  ;;  %v1071_v8 = vpop.f32.mrb[37].mxu0 }
 0x1ca   :  { %v999_v9 = vadd.f32 %v998_v6, %v11341_v23  ;;  %v1072_v25 = vadd.f32 %v1071_v8, %v11303_v59  ;;  %v1000_v10 = vpop.f32.mrb[22].mxu1  ;;  %v1073_v16 = vpop.f32.mrb[38].mxu0  ;;  %1384 = vmatprep.subr.bf16.mxu0 %v1239_v2  ;;  %1344 = vmatpush1.bf16.msra.mxu1 %v11359_v58 }
 0x1cb   :  { %v1001_v1 = vadd.f32 %v1000_v10, %v11339_v17  ;;  %v1074_v19 = vadd.f32 %v1073_v16, %v11306_v0  ;;  %v1002_v20 = vpop.f32.mrb[23].mxu1  ;;  %v1075_v28 = vpop.f32.mrb[39].mxu0  ;;  %1385 = vmatpush1.bf16.msra.mxu0 %v1238_v35  ;;  %1345 = vmatprep.subr.bf16.mxu1 %v11378_v49  ;;  %v1200_v31 = vmax.f32 %v997_v4, 0.0  ;;  %v1154_v39 = vmax.f32 %v1070_v5, 0.0 }
 0x1cc   :  { %v1003_v29 = vadd.f32 %v1002_v20, %v11339_v17  ;;  %v1076_v30 = vadd.f32 %v1075_v28, %v11306_v0  ;;  %v1201_v45 = vmax.f32 %v999_v9, 0.0  ;;  %v1155_v46 = vmax.f32 %v1072_v25, 0.0 }
 0x1cd   :  { %v1206_v21 = vmax.f32 %v1001_v1, 0.0  ;;  %v1160_v42 = vmax.f32 %v1074_v19, 0.0 }
 0x1ce   :  { %v1207_v58 = vmax.f32 %v1003_v29, 0.0  ;;  %v1161_v41 = vmax.f32 %v1076_v30, 0.0  ;;  %1346 = vmatpush1.bf16.msra.mxu1 %v11375_v43 }
 0x1cf   :  { %v1266_v47 = vpack.c.bf16 %v1206_v21, %v1200_v31  ;;  %v1244_v48 = vpack.c.bf16 %v1160_v42, %v1154_v39  ;;  %1347 = vmatprep.subr.bf16.mxu1 %v11389_v26 }
 0x1d0   :  { %v1006_v52 = vpop.f32.mrb[24].mxu1  ;;  %v1079_v49 = vpop.f32.mrb[40].mxu0  ;;  %v1245_v27 = vpack.c.bf16 %v1161_v41, %v1155_v46  ;;  %v1267_v44 = vpack.c.bf16 %v1207_v58, %v1201_v45 }
 0x1d1   :  { %v1007_v50 = vadd.f32 %v1006_v52, %v11357_v56  ;;  %v1080_v53 = vadd.f32 %v1079_v49, %v11311_v13  ;;  %v1008_v15 = vpop.f32.mrb[25].mxu1  ;;  %v1081_v55 = vpop.f32.mrb[41].mxu0 }
 0x1d2   :  { %v1009_v11 = vadd.f32 %v1008_v15, %v11357_v56  ;;  %v1082_v57 = vadd.f32 %v1081_v55, %v11311_v13  ;;  %v1010_v60 = vpop.f32.mrb[26].mxu1  ;;  %v1083_v43 = vpop.f32.mrb[42].mxu0  ;;  %1386 = vmatprep.subr.bf16.mxu0 %v1245_v27  ;;  %1348 = vmatpush1.bf16.msra.mxu1 %v11387_v12 }
 0x1d3   :  { %v1011_v26 = vadd.f32 %v1010_v60, %v11355_v54  ;;  %v1084_v35 = vadd.f32 %v1083_v43, %v11314_v22  ;;  %v1012_v62 = vpop.f32.mrb[27].mxu1  ;;  %v1085_v63 = vpop.f32.mrb[43].mxu0  ;;  %1387 = vmatpush1.bf16.msra.mxu0 %v1244_v48  ;;  %1349 = vmatprep.subr.bf16.mxu1 %v1261_v3  ;;  %v1212_v5 = vmax.f32 %v1007_v50, 0.0  ;;  %v1166_v6 = vmax.f32 %v1080_v53, 0.0 }
 0x1d4   :  { %v1013_v2 = vadd.f32 %v1012_v62, %v11355_v54  ;;  %v1086_v4 = vadd.f32 %v1085_v63, %v11314_v22  ;;  %v1213_v25 = vmax.f32 %v1009_v11, 0.0  ;;  %v1167_v10 = vmax.f32 %v1082_v57, 0.0 }
 0x1d5   :  { %v1218_v8 = vmax.f32 %v1011_v26, 0.0  ;;  %v1172_v9 = vmax.f32 %v1084_v35, 0.0 }
 0x1d6   :  { %v1219_v16 = vmax.f32 %v1013_v2, 0.0  ;;  %v1173_v12 = vmax.f32 %v1086_v4, 0.0  ;;  %1350 = vmatpush1.bf16.msra.mxu1 %v11408_v61 }
 0x1d7   :  { %v1272_v1 = vpack.c.bf16 %v1218_v8, %v1212_v5  ;;  %v1250_v19 = vpack.c.bf16 %v1172_v9, %v1166_v6  ;;  %1351 = vmatprep.subr.bf16.mxu1 %v1267_v44 }
 0x1d8   :  { %v1016_v20 = vpop.f32.mrb[28].mxu1  ;;  %v1089_v28 = vpop.f32.mrb[44].mxu0  ;;  %v1251_v3 = vpack.c.bf16 %v1173_v12, %v1167_v10  ;;  %v1273_v29 = vpack.c.bf16 %v1219_v16, %v1213_v25 }
 0x1d9   :  { %v1017_v30 = vadd.f32 %v1016_v20, %v11373_v18  ;;  %v1090_v31 = vadd.f32 %v1089_v28, %v11319_v38  ;;  %v1018_v39 = vpop.f32.mrb[29].mxu1  ;;  %v1091_v21 = vpop.f32.mrb[45].mxu0 }
 0x1da   :  { %v1019_v42 = vadd.f32 %v1018_v39, %v11373_v18  ;;  %v1092_v45 = vadd.f32 %v1091_v21, %v11319_v38  ;;  %v1020_v46 = vpop.f32.mrb[30].mxu1  ;;  %v1093_v58 = vpop.f32.mrb[46].mxu0  ;;  %1388 = vmatprep.subr.bf16.mxu0 %v1251_v3  ;;  %1352 = vmatpush1.bf16.msra.mxu1 %v1266_v47 }
 0x1db   :  { %v1021_v61 = vadd.f32 %v1020_v46, %v11371_v37  ;;  %v1094_v41 = vadd.f32 %v1093_v58, %v11321_v40  ;;  %v1022_v48 = vpop.f32.mrb[31].mxu1  ;;  %v1095_v52 = vpop.f32.mrb[47].mxu0  ;;  %1389 = vmatpush1.bf16.msra.mxu0 %v1250_v19  ;;  %1353 = vmatprep.subr.bf16.mxu1 %v1273_v29  ;;  %v1224_v44 = vmax.f32 %v1017_v30, 0.0  ;;  %v1178_v50 = vmax.f32 %v1090_v31, 0.0  ;;  %v11449_v19 = vld [vmem:[%s15714_s1 + $0x4] ss:$8 sps:$4 sm:$0xff]  }
 0x1dc   :  { %v1023_v49 = vadd.f32 %v1022_v48, %v11371_v37  ;;  %v1096_v27 = vadd.f32 %v1095_v52, %v11321_v40  ;;  %v1225_v55 = vmax.f32 %v1019_v42, 0.0  ;;  %v1179_v11 = vmax.f32 %v1092_v45, 0.0 }
 0x1dd   :  { %v1230_v53 = vmax.f32 %v1021_v61, 0.0  ;;  %v1184_v15 = vmax.f32 %v1094_v41, 0.0 }
 0x1de   :  { %v1231_v57 = vmax.f32 %v1023_v49, 0.0  ;;  %v1185_v47 = vmax.f32 %v1096_v27, 0.0  ;;  %1354 = vmatpush1.bf16.msra.mxu1 %v1272_v1 }
 0x1df   :  { %v1278_v60 = vpack.c.bf16 %v1230_v53, %v1224_v44  ;;  %v1256_v43 = vpack.c.bf16 %v1184_v15, %v1178_v50 }
 0x1e0   :  { %v1099_v26 = vpop.f32.mrb[48].mxu0  ;;  %v1279_v35 = vpack.c.bf16 %v1231_v57, %v1225_v55  ;;  %v1257_v62 = vpack.c.bf16 %v1185_v47, %v1179_v11 }
 0x1e1   :  { %v1100_v63 = vadd.f32 %v1099_v26, %v11329_v51  ;;  %v1101_v2 = vpop.f32.mrb[49].mxu0 }
 0x1e2   :  { %v1102_v4 = vadd.f32 %v1101_v2, %v11329_v51  ;;  %v1103_v5 = vpop.f32.mrb[50].mxu0  ;;  %1355 = vmatprep.subr.bf16.mxu1 %v1279_v35  ;;  %1390 = vmatprep.subr.bf16.mxu0 %v1257_v62 }
 0x1e3   :  { %v1104_v6 = vadd.f32 %v1103_v5, %v11327_v33  ;;  %v1105_v8 = vpop.f32.mrb[51].mxu0  ;;  %1356 = vmatpush1.bf16.msra.mxu1 %v1278_v60  ;;  %1391 = vmatpush1.bf16.msra.mxu0 %v1256_v43  ;;  %v1190_v25 = vmax.f32 %v1100_v63, 0.0 }
 0x1e4   :  { %v1106_v9 = vadd.f32 %v1105_v8, %v11327_v33  ;;  %v1191_v16 = vmax.f32 %v1102_v4, 0.0 }
 0x1e5   :  { %v1196_v10 = vmax.f32 %v1104_v6, 0.0 }
 0x1e6   :  { %v1197_v12 = vmax.f32 %v1106_v9, 0.0  ;;  %1374 = vmatmul.mubr.bf16.vlgmr.msra.gmra.mrb[36].mxu1 %v11396_v36 }
 0x1e7   :  { %v1262_v1 = vpack.c.bf16 %v1196_v10, %v1190_v25  ;;  %10227 = vmatprep.mubr.msk.bf16.mxu1 %vm774_vm0, %v11449_v19 }
 0x1e8   :  { %v1109_v20 = vpop.f32.mrb[52].mxu0  ;;  %v1263_v28 = vpack.c.bf16 %v1197_v12, %v1191_v16 }
 0x1e9   :  { %v1110_v3 = vadd.f32 %v1109_v20, %v11341_v23  ;;  %v1111_v29 = vpop.f32.mrb[53].mxu0  ;;  %v118_v20 = vlaneseq }
 0x1ea   :  { %v1112_v30 = vadd.f32 %v1111_v29, %v11341_v23  ;;  %v1113_v31 = vpop.f32.mrb[54].mxu0  ;;  %1392 = vmatprep.subr.bf16.mxu0 %v1263_v28  ;;  %v11474_v29 = vld [vmem:[%s15718_s5] sm:$0x3f] }
 0x1eb   :  { %v1114_v39 = vadd.f32 %v1113_v31, %v11339_v17  ;;  %v1115_v21 = vpop.f32.mrb[55].mxu0  ;;  %1393 = vmatpush1.bf16.msra.mxu0 %v1262_v1  ;;  %v1202_v45 = vmax.f32 %v1110_v3, 0.0  ;;  %v11468_v28 = vshrl.u32 %v118_v20, 7  ;;  %v11479_v31 = vpop.permute.xlu1 %1284 }
 0x1ec   :  { %v1116_v42 = vadd.f32 %v1115_v21, %v11339_v17  ;;  %v1203_v58 = vmax.f32 %v1112_v30, 0.0 }
 0x1ed   :  { %v1208_v46 = vmax.f32 %v1114_v39, 0.0  ;;  %15771 = vst [vmem:[#allocation10_spill] sm:$0xff] %v11468_v28  ;;  %v120_v3 = vsub.s32 0, %v11468_v28 }
 0x1ee   :  { %v1209_v61 = vmax.f32 %v1116_v42, 0.0  ;;  %v11482_v42 = vpop.permute.xlu0 %1289 }
 0x1ef   :  { %v1268_v41 = vpack.c.bf16 %v1208_v46, %v1202_v45  ;;  %v11477_v30 = vrot.slane %v11474_v29, %v120_v3 }
 0x1f0   :  { %v1119_v48 = vpop.f32.mrb[56].mxu0  ;;  %v1269_v52 = vpack.c.bf16 %v1209_v61, %v1203_v58  ;;  %v124_v58 = vsub.s32 1, %v11468_v28 }
 0x1f1   :  { %v1120_v49 = vadd.f32 %v1119_v48, %v11357_v56  ;;  %v1121_v27 = vpop.f32.mrb[57].mxu0 }
 0x1f2   :  { %v1122_v44 = vadd.f32 %v1121_v27, %v11357_v56  ;;  %v1123_v50 = vpop.f32.mrb[58].mxu0  ;;  %1394 = vmatprep.subr.bf16.mxu0 %v1269_v52 }
 0x1f3   :  { %v1124_v53 = vadd.f32 %v1123_v50, %v11355_v54  ;;  %v1125_v15 = vpop.f32.mrb[59].mxu0  ;;  %1395 = vmatpush1.bf16.msra.mxu0 %v1268_v41  ;;  %v1214_v11 = vmax.f32 %v1120_v49, 0.0  ;;  %v10570_v49 = vld [vmem:[%s15713_s0 + $0x10] sm:$0xff] }
 0x1f4   :  { %v1126_v55 = vadd.f32 %v1125_v15, %v11355_v54  ;;  %v1215_v47 = vmax.f32 %v1122_v44, 0.0  ;;  %v11495_v44 = vrot.slane %v11474_v29, %v124_v58 }
 0x1f5   :  { %v1220_v57 = vmax.f32 %v1124_v53, 0.0  ;;  %v10571_v53 = vld [vmem:[%s15713_s0 + $0x60] sm:$0xff] }
 0x1f6   :  { %v1221_v60 = vmax.f32 %v1126_v55, 0.0 }
 0x1f7   :  { %v1274_v43 = vpack.c.bf16 %v1220_v57, %v1214_v11 }
 0x1f8   :  { %v1129_v26 = vpop.f32.mrb[60].mxu0  ;;  %v1275_v35 = vpack.c.bf16 %v1221_v60, %v1215_v47  ;;  %v10572_v47 = vld [vmem:[%s15713_s0 + $0x68] sm:$0xff] }
 0x1f9   :  { %v1130_v62 = vadd.f32 %v1129_v26, %v11373_v18  ;;  %v1131_v63 = vpop.f32.mrb[61].mxu0 }
 0x1fa   :  { %v1132_v2 = vadd.f32 %v1131_v63, %v11373_v18  ;;  %v1133_v4 = vpop.f32.mrb[62].mxu0  ;;  %1396 = vmatprep.subr.bf16.mxu0 %v1275_v35 }
 0x1fb   :  { %v1134_v5 = vadd.f32 %v1133_v4, %v11371_v37  ;;  %v1135_v6 = vpop.f32.mrb[63].mxu0  ;;  %1397 = vmatpush1.bf16.msra.mxu0 %v1274_v43  ;;  %v1226_v9 = vmax.f32 %v1130_v62, 0.0  ;;  %v10573_v43 = vld [vmem:[%s15713_s0 + $0x18] sm:$0xff]  ;;  %v128_v62 = vsub.s32 2, %v11468_v28 }
 0x1fc   :  { %v1136_v8 = vadd.f32 %v1135_v6, %v11371_v37  ;;  %v1227_v10 = vmax.f32 %v1132_v2, 0.0 }
 0x1fd   :  { %v1232_v25 = vmax.f32 %v1134_v5, 0.0  ;;  %v11549_v63 = vrot.slane %v11474_v29, %v128_v62 }
 0x1fe   :  { %v1233_v16 = vmax.f32 %v1136_v8, 0.0 }
 0x1ff   :  { %v1280_v12 = vpack.c.bf16 %v1232_v25, %v1226_v9  ;;  %v132_v9 = vsub.s32 3, %v11468_v28 }
 0x200   :  { %v1281_v1 = vpack.c.bf16 %v1233_v16, %v1227_v10 }
 0x201   :  { %v11569_v3 = vrot.slane %v11474_v29, %v132_v9  ;;  %v10579_v9 = vld [vmem:[%s15713_s0 + $0x80] sm:$0xff] }
 0x202   :  { %1398 = vmatprep.subr.bf16.mxu0 %v1281_v1  ;;  %v10574_v1 = vld [vmem:[%s15713_s0 + $0x20] sm:$0xff] }
 0x203   :  { %1399 = vmatpush1.bf16.msra.mxu0 %v1280_v12 }
 0x206   :  { %1417 = vmatmul.mubr.bf16.vlgmr.msra.gmra.mrb[64].mxu0 %v11396_v36 }
 0x207   :  { %10235 = vmatprep.mubr.msk.bf16.mxu0 %vm774_vm0, %v11449_v19 }
 0x298   :  { %v1332_v39 = vpop.f32.mrb[32].mxu1 }
 0x299   :  { %v1333_v36 = vadd.f32 %v1332_v39, %v11479_v31  ;;  %v1334_v21 = vpop.f32.mrb[33].mxu1 }
 0x29a   :  { %v1336_v45 = vpop.f32.mrb[34].mxu1  ;;  %v1335_v50 = vadd.f32 %v1334_v21, %v11479_v31 }
 0x29b   :  { %v1439_v46 = vmul.f32 %v1333_v36, %v11477_v30  ;;  %v1337_v61 = vadd.f32 %v1336_v45, %v11482_v42  ;;  %v1338_v41 = vpop.f32.mrb[35].mxu1  ;;  %v10575_v36 = vld [vmem:[%s15713_s0 + $0x70] sm:$0xff] }
 0x29c   :  { %v1339_v52 = vadd.f32 %v1338_v41, %v11482_v42  ;;  %v1440_v57 = vmul.f32 %v1335_v50, %v11495_v44  ;;  %v136_v50 = vsub.s32 4, %v11468_v28 }
 0x29d   :  { %v1445_v48 = vmul.f32 %v1337_v61, %v11477_v30  ;;  %v11492_v27 = vadd.f32 %v10570_v49, %v1439_v46  ;;  %v10576_v61 = vld [vmem:[%s15713_s0 + $0x78] sm:$0xff] }
 0x29e   :  { %v1446_v11 = vmul.f32 %v1339_v52, %v11495_v44  ;;  %v11521_v26 = vadd.f32 %v10573_v43, %v1440_v57 }
 0x29f   :  { %v11501_v15 = vadd.f32 %v10571_v53, %v1445_v48  ;;  %v10577_v48 = vld [vmem:[%s15713_s0 + $0x28] sm:$0xff]  ;;  %v11623_v53 = vrot.slane %v11474_v29, %v136_v50 }
 0x2a0   :  { %v11516_v60 = vadd.f32 %v10572_v47, %v1446_v11 }
 0x2a1   :  { %v11505_v55 = vpack.c.bf16 %v11501_v15, %v11492_v27 }
 0x2a2   :  { %v11529_v35 = vpack.c.bf16 %v11516_v60, %v11521_v26 }
 0x2a3   :  { %1569 = vrot.lane.b32.xlu0 %v11505_v55, %s10725_s30  ;;  %1523 = vrot.lane.b32.xlu1 %v11505_v55, %s10724_s29 }
 0x2a7   :  { %1661 = vrot.lane.b32.xlu0 %v11505_v55, %s10727_s13  ;;  %1615 = vrot.lane.b32.xlu1 %v11505_v55, %s10726_s12 }
 0x2ab   :  { %1525 = vrot.lane.b32.xlu0 %v11529_v35, %s10724_s29  ;;  %1717 = vrot.lane.b32.xlu1 %v11505_v55, %s10728_s18 }
 0x2af   :  { %1763 = vrot.lane.b32.xlu0 %v11505_v55, %s10729_s19  ;;  %1571 = vrot.lane.b32.xlu1 %v11529_v35, %s10725_s30 }
 0x2b3   :  { %1617 = vrot.lane.b32.xlu0 %v11529_v35, %s10726_s12  ;;  %1809 = vrot.lane.b32.xlu1 %v11505_v55, %s10730_s20 }
 0x2b7   :  { %1765 = vrot.lane.b32.xlu0 %v11529_v35, %s10729_s19  ;;  %1663 = vrot.lane.b32.xlu1 %v11529_v35, %s10727_s13 }
 0x2b9   :  { %v1375_v2 = vpop.f32.mrb[36].mxu1 }
 0x2ba   :  { %v1376_v4 = vadd.f32 %v1375_v2, %v11479_v31  ;;  %v1377_v5 = vpop.f32.mrb[37].mxu1 }
 0x2bb   :  { %v1379_v6 = vpop.f32.mrb[38].mxu1  ;;  %1857 = vrot.lane.b32.xlu0 %v11529_v35, %s10731_s27  ;;  %1719 = vrot.lane.b32.xlu1 %v11529_v35, %s10728_s18  ;;  %v1378_v39 = vadd.f32 %v1377_v5, %v11479_v31 }
 0x2bc   :  { %v1441_v8 = vmul.f32 %v1376_v4, %v11549_v63  ;;  %v1380_v25 = vadd.f32 %v1379_v6, %v11482_v42  ;;  %v1381_v10 = vpop.f32.mrb[39].mxu1  ;;  %v10578_v6 = vld [vmem:[%s15713_s0 + $0x30] sm:$0xff] }
 0x2bd   :  { %v1382_v12 = vadd.f32 %v1381_v10, %v11482_v42  ;;  %v1442_v58 = vmul.f32 %v1378_v39, %v11569_v3 }
 0x2be   :  { %v1447_v16 = vmul.f32 %v1380_v25, %v11549_v63  ;;  %v11566_v20 = vadd.f32 %v10574_v1, %v1441_v8 }
 0x2bf   :  { %1811 = vrot.lane.b32.xlu1 %v11529_v35, %s10730_s20  ;;  %v1448_v46 = vmul.f32 %v1382_v12, %v11569_v3  ;;  %v11595_v52 = vadd.f32 %v10577_v48, %v1442_v58 }
 0x2c0   :  { %v11575_v21 = vadd.f32 %v10575_v36, %v1447_v16  ;;  %v140_v16 = vsub.s32 5, %v11468_v28 }
 0x2c1   :  { %v11590_v41 = vadd.f32 %v10576_v61, %v1448_v46  ;;  %v10581_v61 = vld [vmem:[%s15713_s0 + $0x38] sm:$0xff] }
 0x2c2   :  { %v11579_v45 = vpack.c.bf16 %v11575_v21, %v11566_v20  ;;  %v11656_v1 = vrot.slane %v11474_v29, %v140_v16  ;;  %v10580_v29 = vld [vmem:[%s15713_s0 + $0x88] sm:$0xff] }
 0x2c3   :  { %v11603_v49 = vpack.c.bf16 %v11590_v41, %v11595_v52 }
 0x2c4   :  { %1721 = vrot.lane.b32.xlu0 %v11579_v45, %s10728_s18  ;;  %1767 = vrot.lane.b32.xlu1 %v11579_v45, %s10729_s19  ;;  %15773 = vst [vmem:[#allocation12_spill] sm:$0xff] %v11656_v1 }
 0x2c8   :  { %1855 = vrot.lane.b32.xlu0 %v11505_v55, %s10731_s27  ;;  %1859 = vrot.lane.b32.xlu1 %v11579_v45, %s10731_s27 }
 0x2cc   :  { %1813 = vrot.lane.b32.xlu0 %v11579_v45, %s10730_s20  ;;  %1529 = vrot.lane.b32.xlu1 %v11603_v49, %s10724_s29 }
 0x2d0   :  { %1527 = vrot.lane.b32.xlu0 %v11579_v45, %s10724_s29  ;;  %1573 = vrot.lane.b32.xlu1 %v11579_v45, %s10725_s30 }
 0x2d4   :  { %1575 = vrot.lane.b32.xlu0 %v11603_v49, %s10725_s30  ;;  %1619 = vrot.lane.b32.xlu1 %v11579_v45, %s10726_s12 }
 0x2d8   :  { %1621 = vrot.lane.b32.xlu0 %v11603_v49, %s10726_s12  ;;  %1665 = vrot.lane.b32.xlu1 %v11579_v45, %s10727_s13 }
 0x2d9   :  { %v1418_v11 = vpop.f32.mrb[64].mxu0 }
 0x2da   :  { %v1419_v57 = vadd.f32 %v1418_v11, %v11479_v31  ;;  %v1420_v47 = vpop.f32.mrb[65].mxu0  ;;  %v1568_v11 = vpop.permute.xlu0 %1567 }
 0x2db   :  { %v1422_v43 = vpop.f32.mrb[66].mxu0  ;;  %v1421_v39 = vadd.f32 %v1420_v47, %v11479_v31 }
 0x2dc   :  { %v1443_v62 = vmul.f32 %v1419_v57, %v11623_v53  ;;  %v1423_v2 = vadd.f32 %v1422_v43, %v11482_v42  ;;  %v1424_v4 = vpop.f32.mrb[67].mxu0  ;;  %1667 = vrot.lane.b32.xlu0 %v11603_v49, %s10727_s13  ;;  %1723 = vrot.lane.b32.xlu1 %v11603_v49, %s10728_s18  ;;  %v1522_v57 = vpop.permute.xlu1 %1521 }
 0x2dd   :  { %v1425_v12 = vadd.f32 %v1424_v4, %v11482_v42  ;;  %v1444_v46 = vmul.f32 %v1421_v39, %v11656_v1 }
 0x2de   :  { %v1449_v5 = vmul.f32 %v1423_v2, %v11623_v53  ;;  %v11636_v8 = vadd.f32 %v10578_v6, %v1443_v62  ;;  %v1660_v47 = vpop.permute.xlu0 %1659 }
 0x2df   :  { %v1450_v36 = vmul.f32 %v1425_v12, %v11656_v1  ;;  %v11677_v48 = vadd.f32 %v10581_v61, %v1444_v46 }
 0x2e0   :  { %v11641_v25 = vadd.f32 %v10579_v9, %v1449_v5  ;;  %1769 = vrot.lane.b32.xlu1 %v11603_v49, %s10729_s19  ;;  %v1614_v43 = vpop.permute.xlu1 %1613 }
 0x2e1   :  { %v11672_v58 = vadd.f32 %v10580_v29, %v1450_v36  ;;  %15775 = vst [vmem:[#allocation14_spill] sm:$0xff] %v11677_v48 }
 0x2e2   :  { %15772 = vst [vmem:[#allocation11_spill] sm:$0xff] %v11641_v25  ;;  %v11647_v10 = vpack.c.bf16 %v11641_v25, %v11636_v8 }
 0x2e3   :  { %15774 = vst [vmem:[#allocation13_spill] sm:$0xff] %v11672_v58  ;;  %v11685_v50 = vpack.c.bf16 %v11672_v58, %v11677_v48  ;;  %v11855_v48 = vld [vmem:[%s15714_s1 + $0x40] ss:$8 sps:$4 sm:$0xff]   ;;  %v11877_v58 = vld [vmem:[%s15714_s1 + $0x50] ss:$8 sps:$4 sm:$0xff]  }
 0x2e4   :  { %1725 = vrot.lane.b32.xlu0 %v11647_v10, %s10728_s18  ;;  %1815 = vrot.lane.b32.xlu1 %v11603_v49, %s10730_s20 }
 0x2e8   :  { %1771 = vrot.lane.b32.xlu0 %v11647_v10, %s10729_s19  ;;  %1861 = vrot.lane.b32.xlu1 %v11603_v49, %s10731_s27 }
 0x2ec   :  { %1817 = vrot.lane.b32.xlu0 %v11647_v10, %s10730_s20  ;;  %1531 = vrot.lane.b32.xlu1 %v11647_v10, %s10724_s29 }
 0x2f0   :  { %1863 = vrot.lane.b32.xlu0 %v11647_v10, %s10731_s27  ;;  %1577 = vrot.lane.b32.xlu1 %v11647_v10, %s10725_s30 }
 0x2f4   :  { %1533 = vrot.lane.b32.xlu0 %v11685_v50, %s10724_s29  ;;  %1623 = vrot.lane.b32.xlu1 %v11647_v10, %s10726_s12 }
 0x2f8   :  { %1579 = vrot.lane.b32.xlu0 %v11685_v50, %s10725_s30  ;;  %1669 = vrot.lane.b32.xlu1 %v11647_v10, %s10727_s13 }
 0x2fc   :  { %1625 = vrot.lane.b32.xlu0 %v11685_v50, %s10726_s12  ;;  %1727 = vrot.lane.b32.xlu1 %v11685_v50, %s10728_s18 }
 0x300   :  { %1671 = vrot.lane.b32.xlu0 %v11685_v50, %s10727_s13  ;;  %1773 = vrot.lane.b32.xlu1 %v11685_v50, %s10729_s19 }
 0x304   :  { %1729 = vrot.lane.b32.xlu0 %v10965_v24, %s10728_s18  ;;  %1819 = vrot.lane.b32.xlu1 %v11685_v50, %s10730_s20 }
 0x308   :  { %1775 = vrot.lane.b32.xlu0 %v10965_v24, %s10729_s19  ;;  %1865 = vrot.lane.b32.xlu1 %v11685_v50, %s10731_s27 }
 0x30c   :  { %1821 = vrot.lane.b32.xlu0 %v10965_v24, %s10730_s20  ;;  %2647 = vrot.lane.b32.xlu1 %v10818_v7, %s10724_s29 }
 0x310   :  { %1867 = vrot.lane.b32.xlu0 %v10965_v24, %s10731_s27  ;;  %2739 = vrot.lane.b32.xlu1 %v10818_v7, %s10726_s12 }
 0x314   :  { %2693 = vrot.lane.b32.xlu0 %v10818_v7, %s10725_s30 }
 0x315   :  { %v1570_v62 = vpop.permute.xlu0 %1569  ;;  %v1524_v2 = vpop.permute.xlu1 %1523 }
 0x316   :  { %v1535_v12 = vsel %vm208_vm1, %v1522_v57, %v1524_v2  ;;  %v1581_v29 = vsel %vm255_vm2, %v1568_v11, %v1570_v62 }
 0x318   :  { %2785 = vrot.lane.b32.xlu0 %v10818_v7, %s10727_s13 }
 0x319   :  { %v1662_v4 = vpop.permute.xlu0 %1661  ;;  %v1616_v5 = vpop.permute.xlu1 %1615 }
 0x31a   :  { %v1627_v7 = vsel %vm302_vm3, %v1614_v43, %v1616_v5 }
 0x31d   :  { %v1526_v6 = vpop.permute.xlu0 %1525  ;;  %v1718_v9 = vpop.permute.xlu1 %1717 }
 0x31e   :  { %v1536_v16 = vsel %vm208_vm1, %v1524_v2, %v1526_v6  ;;  %v1673_v2 = vsel %vm349_vm4, %v1660_v47, %v1662_v4 }
 0x31f   :  { %1941 = vmatprep.subr.bf16.mxu1 %v1536_v16 }
 0x320   :  { %1942 = vmatpush1.bf16.msra.mxu1 %v1535_v12 }
 0x321   :  { %v1764_v39 = vpop.permute.xlu0 %1763  ;;  %v1572_v36 = vpop.permute.xlu1 %1571 }
 0x322   :  { %v1582_v46 = vsel %vm255_vm2, %v1570_v62, %v1572_v36 }
 0x323   :  { %1943 = vmatprep.subr.bf16.mxu1 %v1582_v46 }
 0x324   :  { %1944 = vmatpush1.bf16.msra.mxu1 %v1581_v29 }
 0x325   :  { %v1618_v61 = vpop.permute.xlu0 %1617  ;;  %v1810_v34 = vpop.permute.xlu1 %1809 }
 0x326   :  { %v1628_v28 = vsel %vm302_vm3, %v1616_v5, %v1618_v61 }
 0x327   :  { %1945 = vmatprep.subr.bf16.mxu1 %v1628_v28 }
 0x328   :  { %1946 = vmatpush1.bf16.msra.mxu1 %v1627_v7 }
 0x329   :  { %v1664_v16 = vpop.permute.xlu1 %1663  ;;  %v1766_v12 = vpop.permute.xlu0 %1765 }
 0x32a   :  { %v1674_v57 = vsel %vm349_vm4, %v1662_v4, %v1664_v16 }
 0x32b   :  { %1947 = vmatprep.subr.bf16.mxu1 %v1674_v57 }
 0x32c   :  { %1948 = vmatpush1.bf16.msra.mxu1 %v1673_v2 }
 0x32d   :  { %1949 = vmatprep.subr.bf16.mxu1 %v11529_v35  ;;  %v1720_v11 = vpop.permute.xlu1 %1719  ;;  %v1858_v46 = vpop.permute.xlu0 %1857 }
 0x32e   :  { %v1731_v43 = vsel %vm408_vm5, %v1718_v9, %v1720_v11 }
 0x330   :  { %1950 = vmatpush1.bf16.msra.mxu1 %v11505_v55  ;;  %v1777_v55 = vsel %vm455_vm6, %v1764_v39, %v1766_v12 }
 0x331   :  { %v1812_v62 = vpop.permute.xlu1 %1811 }
 0x332   :  { %v1823_v9 = vsel %vm502_vm7, %v1810_v34, %v1812_v62 }
 0x336   :  { %v11733_v29 = vpop.permute.xlu0 %1721  ;;  %v11735_v28 = vpop.permute.xlu1 %1767 }
 0x337   :  { %v1732_v7 = vsel %vm408_vm5, %v1720_v11, %v11733_v29  ;;  %v1778_v47 = vsel %vm455_vm6, %v1766_v12, %v11735_v28 }
 0x338   :  { %1951 = vmatprep.subr.bf16.mxu1 %v1732_v7 }
 0x339   :  { %1952 = vmatpush1.bf16.msra.mxu1 %v1731_v43 }
 0x33a   :  { %v1856_v35 = vpop.permute.xlu0 %1855  ;;  %1953 = vmatprep.subr.bf16.mxu1 %v1778_v47  ;;  %v11742_v4 = vpop.permute.xlu1 %1859 }
 0x33b   :  { %v1870_v11 = vsel %vm549_vm8, %v1858_v46, %v11742_v4  ;;  %v1869_v47 = vsel %vm549_vm8, %v1856_v35, %v1858_v46  ;;  %v11772_v46 = vld [vmem:[%s15714_s1 + $0x14] ss:$8 sps:$4 sm:$0xff]  }
 0x33d   :  { %1954 = vmatpush1.bf16.msra.mxu1 %v1777_v55 }
 0x33e   :  { %v11745_v5 = vpop.permute.xlu0 %1813  ;;  %v11747_v57 = vpop.permute.xlu1 %1529 }
 0x33f   :  { %v1824_v2 = vsel %vm502_vm7, %v1812_v62, %v11745_v5 }
 0x340   :  { %1955 = vmatprep.subr.bf16.mxu1 %v1824_v2  ;;  %v11765_v2 = vld [vmem:[%s15714_s1] ss:$8 sps:$4 sm:$0xff]  }
 0x341   :  { %1956 = vmatpush1.bf16.msra.mxu1 %v1823_v9 }
 0x342   :  { %v1528_v7 = vpop.permute.xlu0 %1527  ;;  %1957 = vmatprep.subr.bf16.mxu1 %v1870_v11  ;;  %v1574_v43 = vpop.permute.xlu1 %1573 }
 0x343   :  { %v1538_v39 = vsel %vm208_vm1, %v1528_v7, %v11747_v57  ;;  %v1537_v12 = vsel %vm208_vm1, %v1526_v6, %v1528_v7  ;;  %v1583_v6 = vsel %vm255_vm2, %v1572_v36, %v1574_v43 }
 0x344   :  { %2054 = vmatprep.subr.bf16.mxu0 %v1538_v39 }
 0x345   :  { %1958 = vmatpush1.bf16.msra.mxu1 %v1869_v47  ;;  %2055 = vmatpush1.bf16.msra.mxu0 %v1537_v12  ;;  %v11788_v12 = vld [vmem:[%s15714_s1 + $0x10] ss:$8 sps:$4 sm:$0xff]  }
 0x346   :  { %v11758_v55 = vpop.permute.xlu0 %1575  ;;  %v1620_v34 = vpop.permute.xlu1 %1619 }
 0x347   :  { %v1584_v62 = vsel %vm255_vm2, %v1574_v43, %v11758_v55  ;;  %v1629_v7 = vsel %vm302_vm3, %v1618_v61, %v1620_v34  ;;  %v11795_v61 = vld [vmem:[%s15714_s1 + $0x24] ss:$8 sps:$4 sm:$0xff]  }
 0x348   :  { %1974 = vmatmul.mubr.bf16.vlgmr.msra.gmra.mrb[40].mxu1 %v11765_v2  ;;  %2056 = vmatprep.subr.bf16.mxu0 %v1584_v62 }
 0x349   :  { %2057 = vmatpush1.bf16.msra.mxu0 %v1583_v6  ;;  %10228 = vmatprep.mubr.msk.bf16.mxu1 %vm774_vm0, %v11772_v46 }
 0x34a   :  { %v11776_v35 = vpop.permute.xlu0 %1621  ;;  %v1666_v9 = vpop.permute.xlu1 %1665 }
 0x34b   :  { %v1630_v11 = vsel %vm302_vm3, %v1620_v34, %v11776_v35  ;;  %v1675_v47 = vsel %vm349_vm4, %v1664_v16, %v1666_v9 }
 0x34c   :  { %2058 = vmatprep.subr.bf16.mxu0 %v1630_v11 }
 0x34d   :  { %2059 = vmatpush1.bf16.msra.mxu0 %v1629_v7 }
 0x34e   :  { %v11781_v36 = vpop.permute.xlu0 %1667  ;;  %v1724_v43 = vpop.permute.xlu1 %1723 }
 0x34f   :  { %v1676_v39 = vsel %vm349_vm4, %v1666_v9, %v11781_v36  ;;  %v11808_v9 = vld [vmem:[%s15714_s1 + $0x20] ss:$8 sps:$4 sm:$0xff]  }
 0x350   :  { %1984 = vmatmul.mubr.bf16.gmra.mrb[44].mxu1 %v11788_v12  ;;  %2060 = vmatprep.subr.bf16.mxu0 %v1676_v39 }
 0x351   :  { %2061 = vmatpush1.bf16.msra.mxu0 %v1675_v47  ;;  %10229 = vmatprep.mubr.msk.bf16.mxu1 %vm774_vm0, %v11795_v61 }
 0x352   :  { %2062 = vmatprep.subr.bf16.mxu0 %v11603_v49  ;;  %v1770_v34 = vpop.permute.xlu1 %1769  ;;  %v1733_v49 = vsel %vm408_vm5, %v11733_v29, %v1724_v43 }
 0x353   :  { %v1779_v47 = vsel %vm455_vm6, %v11735_v28, %v1770_v34  ;;  %v11841_v28 = vld [vmem:[%s15714_s1 + $0x44] ss:$8 sps:$4 sm:$0xff]  }
 0x355   :  { %2063 = vmatpush1.bf16.msra.mxu0 %v11579_v45  ;;  %v11816_v45 = vld [vmem:[%s15714_s1 + $0x34] ss:$8 sps:$4 sm:$0xff]  }
 0x356   :  { %v11801_v62 = vpop.permute.xlu0 %1725  ;;  %v1816_v6 = vpop.permute.xlu1 %1815 }
 0x357   :  { %v1734_v16 = vsel %vm408_vm5, %v1724_v43, %v11801_v62 }
 0x358   :  { %1994 = vmatmul.mubr.bf16.gmra.mrb[48].mxu1 %v11808_v9  ;;  %2064 = vmatprep.subr.bf16.mxu0 %v1734_v16 }
 0x359   :  { %2065 = vmatpush1.bf16.msra.mxu0 %v1733_v49  ;;  %10230 = vmatprep.mubr.msk.bf16.mxu1 %vm774_vm0, %v11816_v45  ;;  %v11833_v49 = vld [vmem:[%s15714_s1 + $0x30] ss:$8 sps:$4 sm:$0xff]  }
 0x35a   :  { %v11820_v11 = vpop.permute.xlu0 %1771  ;;  %v1862_v7 = vpop.permute.xlu1 %1861 }
 0x35b   :  { %v1780_v39 = vsel %vm455_vm6, %v1770_v34, %v11820_v11 }
 0x35c   :  { %2066 = vmatprep.subr.bf16.mxu0 %v1780_v39  ;;  %v1825_v39 = vsel %vm502_vm7, %v11745_v5, %v1816_v6 }
 0x35d   :  { %2067 = vmatpush1.bf16.msra.mxu0 %v1779_v47 }
 0x35e   :  { %v11826_v29 = vpop.permute.xlu0 %1817  ;;  %v1532_v43 = vpop.permute.xlu1 %1531 }
 0x35f   :  { %v1826_v16 = vsel %vm502_vm7, %v1816_v6, %v11826_v29 }
 0x360   :  { %2004 = vmatmul.mubr.bf16.gmra.mrb[52].mxu1 %v11833_v49  ;;  %2068 = vmatprep.subr.bf16.mxu0 %v1826_v16  ;;  %v1871_v16 = vsel %vm549_vm8, %v11742_v4, %v1862_v7  ;;  %v11864_v4 = vld [vmem:[%s15714_s1 + $0x54] ss:$8 sps:$4 sm:$0xff]  }
 0x361   :  { %2069 = vmatpush1.bf16.msra.mxu0 %v1825_v39  ;;  %10231 = vmatprep.mubr.msk.bf16.mxu1 %vm774_vm0, %v11841_v28 }
 0x362   :  { %v11845_v34 = vpop.permute.xlu0 %1863  ;;  %v1578_v47 = vpop.permute.xlu1 %1577 }
 0x363   :  { %v1872_v24 = vsel %vm549_vm8, %v1862_v7, %v11845_v34 }
 0x364   :  { %2070 = vmatprep.subr.bf16.mxu0 %v1872_v24  ;;  %v1539_v24 = vsel %vm208_vm1, %v11747_v57, %v1532_v43  ;;  %v1585_v57 = vsel %vm255_vm2, %v11758_v55, %v1578_v47  ;;  %v11886_v55 = vld [vmem:[%s15714_s1 + $0x64] ss:$8 sps:$4 sm:$0xff]  }
 0x365   :  { %2071 = vmatpush1.bf16.msra.mxu0 %v1871_v16 }
 0x366   :  { %v1534_v5 = vpop.permute.xlu0 %1533  ;;  %v1624_v6 = vpop.permute.xlu1 %1623 }
 0x367   :  { %v1540_v39 = vsel %vm208_vm1, %v1532_v43, %v1534_v5 }
 0x368   :  { %2014 = vmatmul.mubr.bf16.gmra.mrb[56].mxu1 %v11855_v48  ;;  %2087 = vmatmul.mubr.bf16.vlgmr.msra.gmra.mrb[68].mxu0 %v11765_v2 }
 0x369   :  { %2167 = vmatprep.subr.bf16.mxu1 %v1540_v39  ;;  %10232 = vmatprep.mubr.msk.bf16.mxu1 %vm774_vm0, %v11864_v4 }
 0x36a   :  { %2168 = vmatpush1.bf16.msra.mxu1 %v1539_v24  ;;  %v1580_v7 = vpop.permute.xlu0 %1579  ;;  %10236 = vmatprep.mubr.msk.bf16.mxu0 %vm774_vm0, %v11772_v46  ;;  %v1670_v5 = vpop.permute.xlu1 %1669  ;;  %v1631_v24 = vsel %vm302_vm3, %v11776_v35, %v1624_v6 }
 0x36b   :  { %v1586_v16 = vsel %vm255_vm2, %v1578_v47, %v1580_v7  ;;  %v1677_v35 = vsel %vm349_vm4, %v11781_v36, %v1670_v5 }
 0x36c   :  { %2169 = vmatprep.subr.bf16.mxu1 %v1586_v16 }
 0x36e   :  { %2170 = vmatpush1.bf16.msra.mxu1 %v1585_v57  ;;  %v1626_v43 = vpop.permute.xlu0 %1625  ;;  %v1728_v7 = vpop.permute.xlu1 %1727  ;;  %v10594_v57 = vld [vmem:[%s15714_s1 + $0x60] ss:$8 sps:$4 sm:$0xff]  }
 0x36f   :  { %v1632_v39 = vsel %vm302_vm3, %v1624_v6, %v1626_v43 }
 0x370   :  { %2024 = vmatmul.mubr.bf16.gmra.mrb[60].mxu1 %v11877_v58  ;;  %2097 = vmatmul.mubr.bf16.gmra.mrb[72].mxu0 %v11788_v12 }
 0x371   :  { %2171 = vmatprep.subr.bf16.mxu1 %v1632_v39  ;;  %10233 = vmatprep.mubr.msk.bf16.mxu1 %vm774_vm0, %v11886_v55  ;;  %v10595_v39 = vld [vmem:[%s15714_s1 + $0x74] ss:$8 sps:$4 sm:$0xff]  }
 0x372   :  { %2172 = vmatpush1.bf16.msra.mxu1 %v1631_v24  ;;  %v1672_v47 = vpop.permute.xlu0 %1671  ;;  %10237 = vmatprep.mubr.msk.bf16.mxu0 %vm774_vm0, %v11795_v61  ;;  %v1774_v43 = vpop.permute.xlu1 %1773 }
 0x373   :  { %v1678_v16 = vsel %vm349_vm4, %v1670_v5, %v1672_v47  ;;  %v1735_v5 = vsel %vm408_vm5, %v11801_v62, %v1728_v7 }
 0x374   :  { %2173 = vmatprep.subr.bf16.mxu1 %v1678_v16 }
 0x376   :  { %2174 = vmatpush1.bf16.msra.mxu1 %v1677_v35  ;;  %v1730_v6 = vpop.permute.xlu0 %1729  ;;  %v1820_v16 = vpop.permute.xlu1 %1819  ;;  %v10596_v35 = vld [vmem:[%s15714_s1 + $0x70] ss:$8 sps:$4 sm:$0xff]  }
 0x377   :  { %2175 = vmatprep.subr.bf16.mxu1 %v11685_v50  ;;  %v1736_v36 = vsel %vm408_vm5, %v1728_v7, %v1730_v6 }
 0x378   :  { %2034 = vmatmul.mubr.bf16.gmra.mrb[64].mxu1 %v10594_v57  ;;  %2107 = vmatmul.mubr.bf16.gmra.mrb[76].mxu0 %v11808_v9 }
 0x379   :  { %10234 = vmatprep.mubr.msk.bf16.mxu1 %vm774_vm0, %v10595_v39  ;;  %10238 = vmatprep.mubr.msk.bf16.mxu0 %vm774_vm0, %v11816_v45 }
 0x37a   :  { %2176 = vmatpush1.bf16.msra.mxu1 %v11647_v10  ;;  %v1776_v50 = vpop.permute.xlu0 %1775  ;;  %v1781_v10 = vsel %vm455_vm6, %v11820_v11, %v1774_v43  ;;  %v1866_v6 = vpop.permute.xlu1 %1865 }
 0x37b   :  { %2177 = vmatprep.subr.bf16.mxu1 %v1736_v36  ;;  %v1782_v47 = vsel %vm455_vm6, %v1774_v43, %v1776_v50  ;;  %v1827_v50 = vsel %vm502_vm7, %v11826_v29, %v1820_v16  ;;  %v1873_v11 = vsel %vm549_vm8, %v11845_v34, %v1866_v6 }
 0x37e   :  { %2178 = vmatpush1.bf16.msra.mxu1 %v1735_v5  ;;  %v1822_v24 = vpop.permute.xlu0 %1821 }
 0x37f   :  { %2179 = vmatprep.subr.bf16.mxu1 %v1782_v47  ;;  %v1828_v62 = vsel %vm502_vm7, %v1820_v16, %v1822_v24 }
 0x380   :  { %2044 = vmatmul.mubr.bf16.gmra.mrb[68].mxu1 %v10596_v35  ;;  %2117 = vmatmul.mubr.bf16.gmra.mrb[80].mxu0 %v11833_v49 }
 0x381   :  { %10239 = vmatprep.mubr.msk.bf16.mxu0 %vm774_vm0, %v11841_v28  ;;  %10243 = vmatprep.mubr.msk.bf16.mxu1 %vm774_vm0, %v11449_v19  ;;  %v15776_v19 = vmov 0  }
 0x382   :  { %2180 = vmatpush1.bf16.msra.mxu1 %v1781_v10  ;;  %v1868_v7 = vpop.permute.xlu0 %1867 }
 0x383   :  { %2181 = vmatprep.subr.bf16.mxu1 %v1828_v62  ;;  %v1874_v36 = vsel %vm549_vm8, %v1866_v6, %v1868_v7 }
 0x386   :  { %2182 = vmatpush1.bf16.msra.mxu1 %v1827_v50 }
 0x387   :  { %2183 = vmatprep.subr.bf16.mxu1 %v1874_v36 }
 0x388   :  { %2127 = vmatmul.mubr.bf16.gmra.mrb[84].mxu0 %v11855_v48 }
 0x389   :  { %10240 = vmatprep.mubr.msk.bf16.mxu0 %vm774_vm0, %v11864_v4 }
 0x38a   :  { %2184 = vmatpush1.bf16.msra.mxu1 %v1873_v11 }
 0x38d   :  { %2200 = vmatmul.mubr.bf16.vlgmr.msra.gmra.mrb[72].mxu1 %v11765_v2 }
 0x38e   :  { %10244 = vmatprep.mubr.msk.bf16.mxu1 %vm774_vm0, %v11772_v46 }
 0x390   :  { %2137 = vmatmul.mubr.bf16.gmra.mrb[88].mxu0 %v11877_v58 }
 0x391   :  { %10241 = vmatprep.mubr.msk.bf16.mxu0 %vm774_vm0, %v11886_v55 }
 0x395   :  { %2210 = vmatmul.mubr.bf16.gmra.mrb[76].mxu1 %v11788_v12 }
 0x396   :  { %10245 = vmatprep.mubr.msk.bf16.mxu1 %vm774_vm0, %v11795_v61 }
 0x398   :  { %2147 = vmatmul.mubr.bf16.gmra.mrb[92].mxu0 %v10594_v57 }
 0x399   :  { %10242 = vmatprep.mubr.msk.bf16.mxu0 %vm774_vm0, %v10595_v39 }
 0x39d   :  { %2220 = vmatmul.mubr.bf16.gmra.mrb[80].mxu1 %v11808_v9 }
 0x39e   :  { %10246 = vmatprep.mubr.msk.bf16.mxu1 %vm774_vm0, %v11816_v45 }
 0x3a0   :  { %2157 = vmatmul.mubr.bf16.gmra.mrb[96].mxu0 %v10596_v35 }
 0x3a1   :  { %2456 = vmatprep.mubr.bf16.mxu0 %v15776_v19 }
 0x3a5   :  { %2230 = vmatmul.mubr.bf16.gmra.mrb[84].mxu1 %v11833_v49 }
 0x3a6   :  { %10247 = vmatprep.mubr.msk.bf16.mxu1 %vm774_vm0, %v11841_v28 }
 0x3ad   :  { %2240 = vmatmul.mubr.bf16.gmra.mrb[88].mxu1 %v11855_v48 }
 0x3ae   :  { %10248 = vmatprep.mubr.msk.bf16.mxu1 %vm774_vm0, %v11864_v4 }
 0x3b5   :  { %2250 = vmatmul.mubr.bf16.gmra.mrb[92].mxu1 %v11877_v58 }
 0x3b6   :  { %10249 = vmatprep.mubr.msk.bf16.mxu1 %vm774_vm0, %v11886_v55 }
 0x3bd   :  { %2260 = vmatmul.mubr.bf16.gmra.mrb[96].mxu1 %v10594_v57 }
 0x3be   :  { %10250 = vmatprep.mubr.msk.bf16.mxu1 %vm774_vm0, %v10595_v39 }
 0x3c5   :  { %2270 = vmatmul.mubr.bf16.gmra.mrb[100].mxu1 %v10596_v35 }
 0x3c6   :  { %2542 = vmatprep.mubr.bf16.mxu1 %v15776_v19 }
 0x41b   :  { %v1975_v2 = vpop.f32.mrb[40].mxu1 }
 0x41c   :  { %v1976_v46 = vadd.f32 %v1975_v2, %v11295_v14  ;;  %v1977_v12 = vpop.f32.mrb[41].mxu1 }
 0x41d   :  { %v1978_v48 = vadd.f32 %v1977_v12, %v11295_v14  ;;  %v1979_v61 = vpop.f32.mrb[42].mxu1 }
 0x41e   :  { %v1980_v9 = vadd.f32 %v1979_v61, %v11297_v32  ;;  %v1981_v45 = vpop.f32.mrb[43].mxu1  ;;  %v2280_v29 = vmax.f32 %v1976_v46, 0.0 }
 0x41f   :  { %v1982_v58 = vadd.f32 %v1981_v45, %v11297_v32  ;;  %v2281_v28 = vmax.f32 %v1978_v48, 0.0 }
 0x420   :  { %v2286_v49 = vmax.f32 %v1980_v9, 0.0 }
 0x421   :  { %v2287_v34 = vmax.f32 %v1982_v58, 0.0 }
 0x422   :  { %v2376_v4 = vpack.c.bf16 %v2286_v49, %v2280_v29 }
 0x423   :  { %v1985_v55 = vpop.f32.mrb[44].mxu1  ;;  %v2377_v57 = vpack.c.bf16 %v2287_v34, %v2281_v28 }
 0x424   :  { %v1986_v43 = vadd.f32 %v1985_v55, %v11303_v59  ;;  %v1987_v39 = vpop.f32.mrb[45].mxu1 }
 0x425   :  { %v1988_v5 = vadd.f32 %v1987_v39, %v11303_v59  ;;  %v1989_v24 = vpop.f32.mrb[46].mxu1  ;;  %2424 = vmatprep.subr.bf16.mxu0 %v2377_v57 }
 0x426   :  { %v1990_v47 = vadd.f32 %v1989_v24, %v11306_v0  ;;  %v1991_v16 = vpop.f32.mrb[47].mxu1  ;;  %2425 = vmatpush1.bf16.msra.mxu0 %v2376_v4  ;;  %v2292_v10 = vmax.f32 %v1986_v43, 0.0 }
 0x427   :  { %v1992_v35 = vadd.f32 %v1991_v16, %v11306_v0  ;;  %v2293_v7 = vmax.f32 %v1988_v5, 0.0 }
 0x428   :  { %v2298_v62 = vmax.f32 %v1990_v47, 0.0 }
 0x429   :  { %v2299_v6 = vmax.f32 %v1992_v35, 0.0 }
 0x42a   :  { %v2382_v50 = vpack.c.bf16 %v2298_v62, %v2292_v10 }
 0x42b   :  { %v1995_v36 = vpop.f32.mrb[48].mxu1  ;;  %v2383_v11 = vpack.c.bf16 %v2299_v6, %v2293_v7 }
 0x42c   :  { %v1996_v2 = vadd.f32 %v1995_v36, %v11311_v13  ;;  %v1997_v46 = vpop.f32.mrb[49].mxu1 }
 0x42d   :  { %v1998_v12 = vadd.f32 %v1997_v46, %v11311_v13  ;;  %v1999_v48 = vpop.f32.mrb[50].mxu1  ;;  %2426 = vmatprep.subr.bf16.mxu0 %v2383_v11 }
 0x42e   :  { %v2000_v61 = vadd.f32 %v1999_v48, %v11314_v22  ;;  %v2001_v9 = vpop.f32.mrb[51].mxu1  ;;  %2427 = vmatpush1.bf16.msra.mxu0 %v2382_v50  ;;  %v2304_v58 = vmax.f32 %v1996_v2, 0.0 }
 0x42f   :  { %v2002_v45 = vadd.f32 %v2001_v9, %v11314_v22  ;;  %v2305_v49 = vmax.f32 %v1998_v12, 0.0 }
 0x430   :  { %v2310_v29 = vmax.f32 %v2000_v61, 0.0 }
 0x431   :  { %v2311_v28 = vmax.f32 %v2002_v45, 0.0 }
 0x432   :  { %v2388_v34 = vpack.c.bf16 %v2310_v29, %v2304_v58 }
 0x433   :  { %v2005_v4 = vpop.f32.mrb[52].mxu1  ;;  %v2389_v55 = vpack.c.bf16 %v2311_v28, %v2305_v49 }
 0x434   :  { %v2006_v57 = vadd.f32 %v2005_v4, %v11319_v38  ;;  %v2007_v43 = vpop.f32.mrb[53].mxu1 }
 0x435   :  { %v2008_v39 = vadd.f32 %v2007_v43, %v11319_v38  ;;  %v2009_v5 = vpop.f32.mrb[54].mxu1  ;;  %2428 = vmatprep.subr.bf16.mxu0 %v2389_v55 }
 0x436   :  { %v2010_v24 = vadd.f32 %v2009_v5, %v11321_v40  ;;  %v2011_v47 = vpop.f32.mrb[55].mxu1  ;;  %2429 = vmatpush1.bf16.msra.mxu0 %v2388_v34  ;;  %v2316_v35 = vmax.f32 %v2006_v57, 0.0 }
 0x437   :  { %v2012_v16 = vadd.f32 %v2011_v47, %v11321_v40  ;;  %v2317_v62 = vmax.f32 %v2008_v39, 0.0 }
 0x438   :  { %v2322_v10 = vmax.f32 %v2010_v24, 0.0 }
 0x439   :  { %v2323_v7 = vmax.f32 %v2012_v16, 0.0 }
 0x43a   :  { %v2394_v6 = vpack.c.bf16 %v2322_v10, %v2316_v35 }
 0x43b   :  { %v2015_v50 = vpop.f32.mrb[56].mxu1  ;;  %v2088_v36 = vpop.f32.mrb[68].mxu0  ;;  %v2395_v11 = vpack.c.bf16 %v2323_v7, %v2317_v62 }
 0x43c   :  { %v2016_v2 = vadd.f32 %v2015_v50, %v11329_v51  ;;  %v2089_v46 = vadd.f32 %v2088_v36, %v11295_v14  ;;  %v2017_v12 = vpop.f32.mrb[57].mxu1  ;;  %v2090_v48 = vpop.f32.mrb[69].mxu0 }
 0x43d   :  { %v2018_v61 = vadd.f32 %v2017_v12, %v11329_v51  ;;  %v2091_v9 = vadd.f32 %v2090_v48, %v11295_v14  ;;  %v2019_v45 = vpop.f32.mrb[58].mxu1  ;;  %v2092_v58 = vpop.f32.mrb[70].mxu0  ;;  %2430 = vmatprep.subr.bf16.mxu0 %v2395_v11 }
 0x43e   :  { %v2020_v29 = vadd.f32 %v2019_v45, %v11327_v33  ;;  %v2093_v49 = vadd.f32 %v2092_v58, %v11297_v32  ;;  %v2021_v28 = vpop.f32.mrb[59].mxu1  ;;  %v2094_v34 = vpop.f32.mrb[71].mxu0  ;;  %2431 = vmatpush1.bf16.msra.mxu0 %v2394_v6  ;;  %v2328_v57 = vmax.f32 %v2016_v2, 0.0  ;;  %v2282_v43 = vmax.f32 %v2089_v46, 0.0 }
 0x43f   :  { %v2022_v4 = vadd.f32 %v2021_v28, %v11327_v33  ;;  %v2095_v55 = vadd.f32 %v2094_v34, %v11297_v32  ;;  %v2329_v24 = vmax.f32 %v2018_v61, 0.0  ;;  %v2283_v47 = vmax.f32 %v2091_v9, 0.0 }
 0x440   :  { %v2334_v39 = vmax.f32 %v2020_v29, 0.0  ;;  %v2288_v5 = vmax.f32 %v2093_v49, 0.0 }
 0x441   :  { %v2335_v16 = vmax.f32 %v2022_v4, 0.0  ;;  %v2289_v35 = vmax.f32 %v2095_v55, 0.0 }
 0x442   :  { %v2400_v10 = vpack.c.bf16 %v2334_v39, %v2328_v57  ;;  %v11979_v62 = vpack.c.bf16 %v2288_v5, %v2282_v43 }
 0x443   :  { %v2025_v7 = vpop.f32.mrb[60].mxu1  ;;  %v2098_v50 = vpop.f32.mrb[72].mxu0  ;;  %v2401_v36 = vpack.c.bf16 %v2335_v16, %v2329_v24  ;;  %v11981_v11 = vpack.c.bf16 %v2289_v35, %v2283_v47 }
 0x444   :  { %v2026_v6 = vadd.f32 %v2025_v7, %v11341_v23  ;;  %v2099_v12 = vadd.f32 %v2098_v50, %v11303_v59  ;;  %v2027_v2 = vpop.f32.mrb[61].mxu1  ;;  %v2100_v46 = vpop.f32.mrb[73].mxu0 }
 0x445   :  { %v2028_v48 = vadd.f32 %v2027_v2, %v11341_v23  ;;  %v2101_v61 = vadd.f32 %v2100_v46, %v11303_v59  ;;  %v2029_v9 = vpop.f32.mrb[62].mxu1  ;;  %v2102_v45 = vpop.f32.mrb[74].mxu0  ;;  %2432 = vmatprep.subr.bf16.mxu0 %v2401_v36 }
 0x446   :  { %v2030_v58 = vadd.f32 %v2029_v9, %v11339_v17  ;;  %v2103_v29 = vadd.f32 %v2102_v45, %v11306_v0  ;;  %v2031_v49 = vpop.f32.mrb[63].mxu1  ;;  %v2104_v28 = vpop.f32.mrb[75].mxu0  ;;  %2433 = vmatpush1.bf16.msra.mxu0 %v2400_v10  ;;  %v2340_v55 = vmax.f32 %v2026_v6, 0.0  ;;  %v2294_v57 = vmax.f32 %v2099_v12, 0.0 }
 0x447   :  { %v2032_v34 = vadd.f32 %v2031_v49, %v11339_v17  ;;  %v2105_v4 = vadd.f32 %v2104_v28, %v11306_v0  ;;  %v2341_v5 = vmax.f32 %v2028_v48, 0.0  ;;  %v2295_v24 = vmax.f32 %v2101_v61, 0.0 }
 0x448   :  { %v2346_v43 = vmax.f32 %v2030_v58, 0.0  ;;  %v2300_v39 = vmax.f32 %v2103_v29, 0.0 }
 0x449   :  { %v2347_v47 = vmax.f32 %v2032_v34, 0.0  ;;  %v2301_v16 = vmax.f32 %v2105_v4, 0.0 }
 0x44a   :  { %v2406_v35 = vpack.c.bf16 %v2346_v43, %v2340_v55  ;;  %v11991_v7 = vpack.c.bf16 %v2300_v39, %v2294_v57 }
 0x44b   :  { %v2035_v50 = vpop.f32.mrb[64].mxu1  ;;  %v2108_v36 = vpop.f32.mrb[76].mxu0  ;;  %v2407_v2 = vpack.c.bf16 %v2347_v47, %v2341_v5  ;;  %v11993_v46 = vpack.c.bf16 %v2301_v16, %v2295_v24 }
 0x44c   :  { %v2036_v10 = vadd.f32 %v2035_v50, %v11357_v56  ;;  %v2109_v9 = vadd.f32 %v2108_v36, %v11311_v13  ;;  %v2037_v6 = vpop.f32.mrb[65].mxu1  ;;  %v2110_v12 = vpop.f32.mrb[77].mxu0 }
 0x44d   :  { %v2038_v45 = vadd.f32 %v2037_v6, %v11357_v56  ;;  %v2111_v48 = vadd.f32 %v2110_v12, %v11311_v13  ;;  %v2039_v61 = vpop.f32.mrb[66].mxu1  ;;  %v2112_v58 = vpop.f32.mrb[78].mxu0  ;;  %2434 = vmatprep.subr.bf16.mxu0 %v2407_v2 }
 0x44e   :  { %v2040_v29 = vadd.f32 %v2039_v61, %v11355_v54  ;;  %v2113_v49 = vadd.f32 %v2112_v58, %v11314_v22  ;;  %v2041_v28 = vpop.f32.mrb[67].mxu1  ;;  %v2114_v34 = vpop.f32.mrb[79].mxu0  ;;  %2435 = vmatpush1.bf16.msra.mxu0 %v2406_v35  ;;  %v2352_v57 = vmax.f32 %v2036_v10, 0.0  ;;  %v2306_v43 = vmax.f32 %v2109_v9, 0.0 }
 0x44f   :  { %v2042_v4 = vadd.f32 %v2041_v28, %v11355_v54  ;;  %v2115_v55 = vadd.f32 %v2114_v34, %v11314_v22  ;;  %v2353_v24 = vmax.f32 %v2038_v45, 0.0  ;;  %v2307_v47 = vmax.f32 %v2111_v48, 0.0 }
 0x450   :  { %v2358_v39 = vmax.f32 %v2040_v29, 0.0  ;;  %v2312_v5 = vmax.f32 %v2113_v49, 0.0 }
 0x451   :  { %v2359_v16 = vmax.f32 %v2042_v4, 0.0  ;;  %v2313_v50 = vmax.f32 %v2115_v55, 0.0 }
 0x452   :  { %v2412_v36 = vpack.c.bf16 %v2358_v39, %v2352_v57  ;;  %v12003_v2 = vpack.c.bf16 %v2312_v5, %v2306_v43 }
 0x453   :  { %v2045_v6 = vpop.f32.mrb[68].mxu1  ;;  %v2118_v12 = vpop.f32.mrb[80].mxu0  ;;  %v2413_v61 = vpack.c.bf16 %v2359_v16, %v2353_v24  ;;  %v12005_v58 = vpack.c.bf16 %v2313_v50, %v2307_v47 }
 0x454   :  { %v2046_v35 = vadd.f32 %v2045_v6, %v11373_v18  ;;  %v2119_v28 = vadd.f32 %v2118_v12, %v11319_v38  ;;  %v2047_v10 = vpop.f32.mrb[69].mxu1  ;;  %v2120_v9 = vpop.f32.mrb[81].mxu0 }
 0x455   :  { %v2048_v29 = vadd.f32 %v2047_v10, %v11373_v18  ;;  %v2121_v45 = vadd.f32 %v2120_v9, %v11319_v38  ;;  %v2049_v48 = vpop.f32.mrb[70].mxu1  ;;  %v2122_v49 = vpop.f32.mrb[82].mxu0  ;;  %2436 = vmatprep.subr.bf16.mxu0 %v2413_v61 }
 0x456   :  { %v2050_v34 = vadd.f32 %v2049_v48, %v11371_v37  ;;  %v2123_v4 = vadd.f32 %v2122_v49, %v11321_v40  ;;  %v2051_v55 = vpop.f32.mrb[71].mxu1  ;;  %v2124_v57 = vpop.f32.mrb[83].mxu0  ;;  %2437 = vmatpush1.bf16.msra.mxu0 %v2412_v36  ;;  %v2364_v5 = vmax.f32 %v2046_v35, 0.0  ;;  %v2318_v24 = vmax.f32 %v2119_v28, 0.0 }
 0x457   :  { %v2052_v43 = vadd.f32 %v2051_v55, %v11371_v37  ;;  %v2125_v39 = vadd.f32 %v2124_v57, %v11321_v40  ;;  %v2365_v50 = vmax.f32 %v2048_v29, 0.0  ;;  %v2319_v6 = vmax.f32 %v2121_v45, 0.0 }
 0x458   :  { %v2370_v47 = vmax.f32 %v2050_v34, 0.0  ;;  %v2324_v16 = vmax.f32 %v2123_v4, 0.0 }
 0x459   :  { %v2371_v12 = vmax.f32 %v2052_v43, 0.0  ;;  %v2325_v10 = vmax.f32 %v2125_v39, 0.0 }
 0x45a   :  { %v2418_v61 = vpack.c.bf16 %v2370_v47, %v2364_v5  ;;  %v12015_v9 = vpack.c.bf16 %v2324_v16, %v2318_v24 }
 0x45b   :  { %v2128_v48 = vpop.f32.mrb[84].mxu0  ;;  %v2419_v49 = vpack.c.bf16 %v2371_v12, %v2365_v50  ;;  %v2397_v1 = vpack.c.bf16 %v2325_v10, %v2319_v6 }
 0x45c   :  { %v2129_v36 = vadd.f32 %v2128_v48, %v11329_v51  ;;  %v2130_v25 = vpop.f32.mrb[85].mxu0 }
 0x45d   :  { %v2131_v55 = vadd.f32 %v2130_v25, %v11329_v51  ;;  %v2132_v57 = vpop.f32.mrb[86].mxu0  ;;  %2438 = vmatprep.subr.bf16.mxu0 %v2419_v49  ;;  %v12026_v25 = vld [vmem:[%s15716_s3] sm:$0xff]  }
 0x45e   :  { %v2133_v35 = vadd.f32 %v2132_v57, %v11327_v33  ;;  %v2134_v28 = vpop.f32.mrb[87].mxu0  ;;  %2439 = vmatpush1.bf16.msra.mxu0 %v2418_v61  ;;  %v2330_v45 = vmax.f32 %v2129_v36, 0.0 }
 0x45f   :  { %v2135_v29 = vadd.f32 %v2134_v28, %v11327_v33  ;;  %2467 = vmatprep.subr.bf16.mxu0 %v11981_v11  ;;  %v2331_v43 = vmax.f32 %v2131_v55, 0.0 }
 0x460   :  { %v2336_v34 = vmax.f32 %v2133_v35, 0.0  ;;  %v2201_v4 = vpop.f32.mrb[72].mxu1 }
 0x461   :  { %v2337_v39 = vmax.f32 %v2135_v29, 0.0  ;;  %v2202_v5 = vadd.f32 %v2201_v4, %v11295_v14  ;;  %v2203_v24 = vpop.f32.mrb[73].mxu1  ;;  %2457 = vmatmul.mubr.bf16.vlgmr.msra.gmra.mrb[100].mxu0 %v12026_v25 }
 0x462   :  { %v12029_v47 = vpack.c.bf16 %v2336_v34, %v2330_v45  ;;  %v2204_v16 = vadd.f32 %v2203_v24, %v11295_v14  ;;  %v2205_v11 = vpop.f32.mrb[74].mxu1  ;;  %2468 = vmatpush1.bf16.msra.mxu0 %v11979_v62  ;;  %2499 = vmatprep.mubr.bf16.mxu0 %v15776_v19 }
 0x463   :  { %v2206_v50 = vadd.f32 %v2205_v11, %v11297_v32  ;;  %v2207_v6 = vpop.f32.mrb[75].mxu1  ;;  %v2138_v12 = vpop.f32.mrb[88].mxu0  ;;  %2469 = vmatprep.subr.bf16.mxu0 %v11993_v46  ;;  %v2403_v10 = vpack.c.bf16 %v2337_v39, %v2331_v43  ;;  %v2284_v36 = vmax.f32 %v2202_v5, 0.0 }
 0x464   :  { %v2208_v61 = vadd.f32 %v2207_v6, %v11297_v32  ;;  %v2139_v48 = vadd.f32 %v2138_v12, %v11341_v23  ;;  %v2140_v49 = vpop.f32.mrb[89].mxu0  ;;  %v2285_v62 = vmax.f32 %v2204_v16, 0.0 }
 0x465   :  { %v2290_v55 = vmax.f32 %v2206_v50, 0.0  ;;  %v2141_v57 = vadd.f32 %v2140_v49, %v11341_v23  ;;  %v2142_v35 = vpop.f32.mrb[90].mxu0 }
 0x466   :  { %v2291_v28 = vmax.f32 %v2208_v61, 0.0  ;;  %v2143_v29 = vadd.f32 %v2142_v35, %v11339_v17  ;;  %v2144_v45 = vpop.f32.mrb[91].mxu0  ;;  %2470 = vmatpush1.bf16.msra.mxu0 %v11991_v7  ;;  %v2342_v4 = vmax.f32 %v2139_v48, 0.0 }
 0x467   :  { %v2380_v34 = vpack.c.bf16 %v2290_v55, %v2284_v36  ;;  %v2145_v46 = vadd.f32 %v2144_v45, %v11339_v17  ;;  %2471 = vmatprep.subr.bf16.mxu0 %v12005_v58  ;;  %v2343_v24 = vmax.f32 %v2141_v57, 0.0 }
 0x468   :  { %v2348_v43 = vmax.f32 %v2143_v29, 0.0  ;;  %v2211_v39 = vpop.f32.mrb[76].mxu1  ;;  %v2381_v5 = vpack.c.bf16 %v2291_v28, %v2285_v62 }
 0x469   :  { %v2349_v11 = vmax.f32 %v2145_v46, 0.0  ;;  %v2212_v50 = vadd.f32 %v2211_v39, %v11303_v59  ;;  %v2213_v16 = vpop.f32.mrb[77].mxu1 }
 0x46a   :  { %v2408_v6 = vpack.c.bf16 %v2348_v43, %v2342_v4  ;;  %v2214_v12 = vadd.f32 %v2213_v16, %v11303_v59  ;;  %v2215_v61 = vpop.f32.mrb[78].mxu1  ;;  %2510 = vmatprep.subr.bf16.mxu1 %v2381_v5  ;;  %2472 = vmatpush1.bf16.msra.mxu0 %v12003_v2 }
 0x46b   :  { %v2216_v7 = vadd.f32 %v2215_v61, %v11306_v0  ;;  %v2217_v49 = vpop.f32.mrb[79].mxu1  ;;  %2511 = vmatpush1.bf16.msra.mxu1 %v2380_v34  ;;  %v2148_v58 = vpop.f32.mrb[92].mxu0  ;;  %2473 = vmatprep.subr.bf16.mxu0 %v2397_v1  ;;  %v2409_v48 = vpack.c.bf16 %v2349_v11, %v2343_v24  ;;  %v2296_v35 = vmax.f32 %v2212_v50, 0.0 }
 0x46c   :  { %v2218_v36 = vadd.f32 %v2217_v49, %v11306_v0  ;;  %v2149_v55 = vadd.f32 %v2148_v58, %v11357_v56  ;;  %v2150_v57 = vpop.f32.mrb[93].mxu0  ;;  %v2297_v45 = vmax.f32 %v2214_v12, 0.0 }
 0x46d   :  { %v2302_v62 = vmax.f32 %v2216_v7, 0.0  ;;  %v2151_v28 = vadd.f32 %v2150_v57, %v11357_v56  ;;  %v2152_v29 = vpop.f32.mrb[94].mxu0 }
 0x46e   :  { %v2303_v46 = vmax.f32 %v2218_v36, 0.0  ;;  %v2153_v2 = vadd.f32 %v2152_v29, %v11355_v54  ;;  %v2154_v4 = vpop.f32.mrb[95].mxu0  ;;  %2474 = vmatpush1.bf16.msra.mxu0 %v12015_v9  ;;  %v2354_v43 = vmax.f32 %v2149_v55, 0.0 }
 0x46f   :  { %v2386_v34 = vpack.c.bf16 %v2302_v62, %v2296_v35  ;;  %v2155_v1 = vadd.f32 %v2154_v4, %v11355_v54  ;;  %2475 = vmatprep.subr.bf16.mxu0 %v2403_v10  ;;  %v2355_v11 = vmax.f32 %v2151_v28, 0.0 }
 0x470   :  { %v2360_v39 = vmax.f32 %v2153_v2, 0.0  ;;  %v2221_v5 = vpop.f32.mrb[80].mxu1  ;;  %v2387_v24 = vpack.c.bf16 %v2303_v46, %v2297_v45 }
 0x471   :  { %v2361_v50 = vmax.f32 %v2155_v1, 0.0  ;;  %v2222_v16 = vadd.f32 %v2221_v5, %v11311_v13  ;;  %v2223_v61 = vpop.f32.mrb[81].mxu1 }
 0x472   :  { %v2414_v12 = vpack.c.bf16 %v2360_v39, %v2354_v43  ;;  %v2224_v7 = vadd.f32 %v2223_v61, %v11311_v13  ;;  %v2225_v49 = vpop.f32.mrb[82].mxu1  ;;  %2512 = vmatprep.subr.bf16.mxu1 %v2387_v24  ;;  %2476 = vmatpush1.bf16.msra.mxu0 %v12029_v47 }
 0x473   :  { %v2226_v9 = vadd.f32 %v2225_v49, %v11314_v22  ;;  %v2227_v58 = vpop.f32.mrb[83].mxu1  ;;  %2513 = vmatpush1.bf16.msra.mxu1 %v2386_v34  ;;  %v2158_v10 = vpop.f32.mrb[96].mxu0  ;;  %2477 = vmatprep.subr.bf16.mxu0 %v2409_v48  ;;  %v2415_v36 = vpack.c.bf16 %v2361_v50, %v2355_v11  ;;  %v2308_v62 = vmax.f32 %v2222_v16, 0.0 }
 0x474   :  { %v2228_v55 = vadd.f32 %v2227_v58, %v11314_v22  ;;  %v2159_v57 = vadd.f32 %v2158_v10, %v11373_v18  ;;  %v2160_v35 = vpop.f32.mrb[97].mxu0  ;;  %v2309_v46 = vmax.f32 %v2224_v7, 0.0 }
 0x475   :  { %v2314_v28 = vmax.f32 %v2226_v9, 0.0  ;;  %v2161_v29 = vadd.f32 %v2160_v35, %v11373_v18  ;;  %v2162_v45 = vpop.f32.mrb[98].mxu0 }
 0x476   :  { %v2315_v2 = vmax.f32 %v2228_v55, 0.0  ;;  %v2163_v47 = vadd.f32 %v2162_v45, %v11371_v37  ;;  %v2164_v4 = vpop.f32.mrb[99].mxu0  ;;  %2478 = vmatpush1.bf16.msra.mxu0 %v2408_v6  ;;  %v2366_v1 = vmax.f32 %v2159_v57, 0.0 }
 0x477   :  { %v2392_v34 = vpack.c.bf16 %v2314_v28, %v2308_v62  ;;  %v2165_v48 = vadd.f32 %v2164_v4, %v11371_v37  ;;  %2479 = vmatprep.subr.bf16.mxu0 %v2415_v36  ;;  %v2367_v24 = vmax.f32 %v2161_v29, 0.0 }
 0x478   :  { %v2372_v43 = vmax.f32 %v2163_v47, 0.0  ;;  %v2231_v39 = vpop.f32.mrb[84].mxu1  ;;  %v2393_v5 = vpack.c.bf16 %v2315_v2, %v2309_v46  ;;  %v12072_v47 = vld [vmem:[%s15714_s1 + $0x4] ss:$8 sps:$4 sm:$0xff]  }
 0x479   :  { %v2373_v11 = vmax.f32 %v2165_v48, 0.0  ;;  %v2232_v50 = vadd.f32 %v2231_v39, %v11319_v38  ;;  %v2233_v16 = vpop.f32.mrb[85].mxu1 }
 0x47a   :  { %v2420_v61 = vpack.c.bf16 %v2372_v43, %v2366_v1  ;;  %v2234_v7 = vadd.f32 %v2233_v16, %v11319_v38  ;;  %v2235_v49 = vpop.f32.mrb[86].mxu1  ;;  %2514 = vmatprep.subr.bf16.mxu1 %v2393_v5  ;;  %2480 = vmatpush1.bf16.msra.mxu0 %v2414_v12 }
 0x47b   :  { %v2236_v6 = vadd.f32 %v2235_v49, %v11321_v40  ;;  %v2237_v9 = vpop.f32.mrb[87].mxu1  ;;  %2515 = vmatpush1.bf16.msra.mxu1 %v2392_v34  ;;  %v2421_v58 = vpack.c.bf16 %v2373_v11, %v2367_v24  ;;  %v2320_v36 = vmax.f32 %v2232_v50, 0.0 }
 0x47c   :  { %v2238_v10 = vadd.f32 %v2237_v9, %v11321_v40  ;;  %v2321_v57 = vmax.f32 %v2234_v7, 0.0 }
 0x47d   :  { %v2326_v55 = vmax.f32 %v2236_v6, 0.0  ;;  %2481 = vmatprep.subr.bf16.mxu0 %v2421_v58 }
 0x47e   :  { %v2327_v35 = vmax.f32 %v2238_v10, 0.0  ;;  %2482 = vmatpush1.bf16.msra.mxu0 %v2420_v61 }
 0x47f   :  { %v2398_v62 = vpack.c.bf16 %v2326_v55, %v2320_v36 }
 0x480   :  { %v2241_v28 = vpop.f32.mrb[88].mxu1  ;;  %v2399_v29 = vpack.c.bf16 %v2327_v35, %v2321_v57 }
 0x481   :  { %v2242_v45 = vadd.f32 %v2241_v28, %v11329_v51  ;;  %v2243_v46 = vpop.f32.mrb[89].mxu1  ;;  %2500 = vmatmul.mubr.bf16.vlgmr.msra.gmra.mrb[104].mxu0 %v12026_v25 }
 0x482   :  { %v2244_v12 = vadd.f32 %v2243_v46, %v11329_v51  ;;  %v2245_v2 = vpop.f32.mrb[90].mxu1  ;;  %2516 = vmatprep.subr.bf16.mxu1 %v2399_v29  ;;  %10251 = vmatprep.mubr.msk.bf16.mxu0 %vm774_vm0, %v12072_v47 }
 0x483   :  { %v2246_v4 = vadd.f32 %v2245_v2, %v11327_v33  ;;  %v2247_v34 = vpop.f32.mrb[91].mxu1  ;;  %2517 = vmatpush1.bf16.msra.mxu1 %v2398_v62  ;;  %v2332_v1 = vmax.f32 %v2242_v45, 0.0 }
 0x484   :  { %v2248_v48 = vadd.f32 %v2247_v34, %v11327_v33  ;;  %v2333_v39 = vmax.f32 %v2244_v12, 0.0 }
 0x485   :  { %v2338_v43 = vmax.f32 %v2246_v4, 0.0 }
 0x486   :  { %v2339_v5 = vmax.f32 %v2248_v48, 0.0 }
 0x487   :  { %v2404_v24 = vpack.c.bf16 %v2338_v43, %v2332_v1 }
 0x488   :  { %v2251_v11 = vpop.f32.mrb[92].mxu1  ;;  %v2405_v50 = vpack.c.bf16 %v2339_v5, %v2333_v39 }
 0x489   :  { %v2252_v16 = vadd.f32 %v2251_v11, %v11341_v23  ;;  %v2253_v61 = vpop.f32.mrb[93].mxu1 }
 0x48a   :  { %v2254_v7 = vadd.f32 %v2253_v61, %v11341_v23  ;;  %v2255_v49 = vpop.f32.mrb[94].mxu1  ;;  %2518 = vmatprep.subr.bf16.mxu1 %v2405_v50 }
 0x48b   :  { %v2256_v6 = vadd.f32 %v2255_v49, %v11339_v17  ;;  %v2257_v9 = vpop.f32.mrb[95].mxu1  ;;  %2519 = vmatpush1.bf16.msra.mxu1 %v2404_v24  ;;  %v2344_v10 = vmax.f32 %v2252_v16, 0.0 }
 0x48c   :  { %v2258_v58 = vadd.f32 %v2257_v9, %v11339_v17  ;;  %v2345_v55 = vmax.f32 %v2254_v7, 0.0 }
 0x48d   :  { %v2350_v36 = vmax.f32 %v2256_v6, 0.0 }
 0x48e   :  { %v2351_v57 = vmax.f32 %v2258_v58, 0.0 }
 0x48f   :  { %v2410_v35 = vpack.c.bf16 %v2350_v36, %v2344_v10 }
 0x490   :  { %v2261_v62 = vpop.f32.mrb[96].mxu1  ;;  %v2411_v28 = vpack.c.bf16 %v2351_v57, %v2345_v55 }
 0x491   :  { %v2262_v29 = vadd.f32 %v2261_v62, %v11357_v56  ;;  %v2263_v45 = vpop.f32.mrb[97].mxu1 }
 0x492   :  { %v2264_v46 = vadd.f32 %v2263_v45, %v11357_v56  ;;  %v2265_v12 = vpop.f32.mrb[98].mxu1  ;;  %2520 = vmatprep.subr.bf16.mxu1 %v2411_v28 }
 0x493   :  { %v2266_v2 = vadd.f32 %v2265_v12, %v11355_v54  ;;  %v2267_v4 = vpop.f32.mrb[99].mxu1  ;;  %2521 = vmatpush1.bf16.msra.mxu1 %v2410_v35  ;;  %v2356_v48 = vmax.f32 %v2262_v29, 0.0 }
 0x494   :  { %v2268_v34 = vadd.f32 %v2267_v4, %v11355_v54  ;;  %v2357_v43 = vmax.f32 %v2264_v46, 0.0 }
 0x495   :  { %v2362_v1 = vmax.f32 %v2266_v2, 0.0 }
 0x496   :  { %v2363_v39 = vmax.f32 %v2268_v34, 0.0 }
 0x497   :  { %v2416_v5 = vpack.c.bf16 %v2362_v1, %v2356_v48 }
 0x498   :  { %v2271_v24 = vpop.f32.mrb[100].mxu1  ;;  %v2417_v11 = vpack.c.bf16 %v2363_v39, %v2357_v43 }
 0x499   :  { %v2272_v50 = vadd.f32 %v2271_v24, %v11373_v18  ;;  %v2273_v16 = vpop.f32.mrb[101].mxu1 }
 0x49a   :  { %v2274_v61 = vadd.f32 %v2273_v16, %v11373_v18  ;;  %v2275_v7 = vpop.f32.mrb[102].mxu1  ;;  %2522 = vmatprep.subr.bf16.mxu1 %v2417_v11 }
 0x49b   :  { %v2276_v49 = vadd.f32 %v2275_v7, %v11371_v37  ;;  %v2277_v6 = vpop.f32.mrb[103].mxu1  ;;  %2523 = vmatpush1.bf16.msra.mxu1 %v2416_v5  ;;  %v2368_v58 = vmax.f32 %v2272_v50, 0.0 }
 0x49c   :  { %v2278_v9 = vadd.f32 %v2277_v6, %v11371_v37  ;;  %v2369_v36 = vmax.f32 %v2274_v61, 0.0 }
 0x49d   :  { %v2374_v10 = vmax.f32 %v2276_v49, 0.0 }
 0x49e   :  { %v2375_v55 = vmax.f32 %v2278_v9, 0.0 }
 0x49f   :  { %v2422_v57 = vpack.c.bf16 %v2374_v10, %v2368_v58 }
 0x4a0   :  { %v2423_v35 = vpack.c.bf16 %v2375_v55, %v2369_v36 }
 0x4a2   :  { %2524 = vmatprep.subr.bf16.mxu1 %v2423_v35 }
 0x4a3   :  { %2525 = vmatpush1.bf16.msra.mxu1 %v2422_v57 }
 0x4a6   :  { %2543 = vmatmul.mubr.bf16.vlgmr.msra.gmra.mrb[104].mxu1 %v12026_v25 }
 0x4a7   :  { %10259 = vmatprep.mubr.msk.bf16.mxu1 %vm774_vm0, %v12072_v47 }
 0x534   :  { %v2458_v62 = vpop.f32.mrb[100].mxu0 }
 0x535   :  { %v2459_v28 = vadd.f32 %v2458_v62, %v11479_v31  ;;  %v2460_v29 = vpop.f32.mrb[101].mxu0 }
 0x536   :  { %v2462_v45 = vpop.f32.mrb[102].mxu0  ;;  %v2461_v25 = vadd.f32 %v2460_v29, %v11479_v31 }
 0x537   :  { %v2565_v46 = vmul.f32 %v2459_v28, %v11477_v30  ;;  %v2463_v12 = vadd.f32 %v2462_v45, %v11482_v42  ;;  %v2464_v2 = vpop.f32.mrb[103].mxu0 }
 0x538   :  { %v2465_v34 = vadd.f32 %v2464_v2, %v11482_v42  ;;  %v2566_v5 = vmul.f32 %v2461_v25, %v11495_v44 }
 0x539   :  { %v2571_v4 = vmul.f32 %v2463_v12, %v11477_v30  ;;  %v12099_v48 = vadd.f32 %v2565_v46, %v11492_v27 }
 0x53a   :  { %v2572_v39 = vmul.f32 %v2465_v34, %v11495_v44 }
 0x53b   :  { %v12103_v1 = vadd.f32 %v2571_v4, %v11501_v15  ;;  %v12119_v15 = vadd.f32 %v2566_v5, %v11521_v26  ;;  %v15777_v4 = vld [vmem:[#allocation11_spill] sm:$0xff]  ;;  %v15778_v5 = vld [vmem:[#allocation12_spill] sm:$0xff] }
 0x53c   :  { %v12116_v27 = vadd.f32 %v2572_v39, %v11516_v60 }
 0x53d   :  { %v12107_v43 = vpack.c.bf16 %v12103_v1, %v12099_v48 }
 0x53e   :  { %v12127_v24 = vpack.c.bf16 %v12116_v27, %v12119_v15 }
 0x53f   :  { %2695 = vrot.lane.b32.xlu0 %v12107_v43, %s10725_s30  ;;  %2649 = vrot.lane.b32.xlu1 %v12107_v43, %s10724_s29 }
 0x543   :  { %2787 = vrot.lane.b32.xlu0 %v12107_v43, %s10727_s13  ;;  %2741 = vrot.lane.b32.xlu1 %v12107_v43, %s10726_s12 }
 0x547   :  { %2651 = vrot.lane.b32.xlu0 %v12127_v24, %s10724_s29  ;;  %2843 = vrot.lane.b32.xlu1 %v12107_v43, %s10728_s18 }
 0x54b   :  { %2889 = vrot.lane.b32.xlu0 %v12107_v43, %s10729_s19  ;;  %2697 = vrot.lane.b32.xlu1 %v12127_v24, %s10725_s30 }
 0x54f   :  { %2743 = vrot.lane.b32.xlu0 %v12127_v24, %s10726_s12  ;;  %2935 = vrot.lane.b32.xlu1 %v12107_v43, %s10730_s20 }
 0x553   :  { %2891 = vrot.lane.b32.xlu0 %v12127_v24, %s10729_s19  ;;  %2789 = vrot.lane.b32.xlu1 %v12127_v24, %s10727_s13 }
 0x554   :  { %v2501_v60 = vpop.f32.mrb[104].mxu0 }
 0x555   :  { %v2502_v26 = vadd.f32 %v2501_v60, %v11479_v31  ;;  %v2503_v11 = vpop.f32.mrb[105].mxu0 }
 0x556   :  { %v2505_v50 = vpop.f32.mrb[106].mxu0  ;;  %v2504_v58 = vadd.f32 %v2503_v11, %v11479_v31  ;;  %v15779_v11 = vld [vmem:[#allocation13_spill] sm:$0xff] }
 0x557   :  { %v2567_v16 = vmul.f32 %v2502_v26, %v11549_v63  ;;  %v2506_v61 = vadd.f32 %v2505_v50, %v11482_v42  ;;  %2983 = vrot.lane.b32.xlu0 %v12127_v24, %s10731_s27  ;;  %2845 = vrot.lane.b32.xlu1 %v12127_v24, %s10728_s18  ;;  %v2507_v7 = vpop.f32.mrb[107].mxu0 }
 0x558   :  { %v2508_v6 = vadd.f32 %v2507_v7, %v11482_v42  ;;  %v2568_v57 = vmul.f32 %v2504_v58, %v11569_v3  ;;  %v2648_v58 = vpop.permute.xlu1 %2647 }
 0x559   :  { %v2573_v49 = vmul.f32 %v2506_v61, %v11549_v63  ;;  %v12155_v9 = vadd.f32 %v2567_v16, %v11566_v20  ;;  %v15781_v16 = vld [vmem:[#allocation14_spill] sm:$0xff] }
 0x55a   :  { %v2574_v55 = vmul.f32 %v2508_v6, %v11569_v3  ;;  %v2694_v6 = vpop.permute.xlu0 %2693 }
 0x55b   :  { %v12159_v10 = vadd.f32 %v2573_v49, %v11575_v21  ;;  %2937 = vrot.lane.b32.xlu1 %v12127_v24, %s10730_s20  ;;  %v12177_v21 = vadd.f32 %v2568_v57, %v11595_v52  ;;  %v15783_v49 = vld [vmem:[#allocation9_spill] sm:$0xff] }
 0x55c   :  { %v12174_v20 = vadd.f32 %v2574_v55, %v11590_v41  ;;  %v15784_v55 = vld [vmem:[#allocation8_spill] sm:$0xff] }
 0x55d   :  { %v12165_v36 = vpack.c.bf16 %v12159_v10, %v12155_v9 }
 0x55e   :  { %v12185_v35 = vpack.c.bf16 %v12174_v20, %v12177_v21  ;;  %v2786_v57 = vpop.permute.xlu0 %2785 }
 0x55f   :  { %2893 = vrot.lane.b32.xlu1 %v12165_v36, %s10729_s19  ;;  %2847 = vrot.lane.b32.xlu0 %v12165_v36, %s10728_s18 }
 0x563   :  { %2985 = vrot.lane.b32.xlu1 %v12165_v36, %s10731_s27  ;;  %2981 = vrot.lane.b32.xlu0 %v12107_v43, %s10731_s27 }
 0x567   :  { %2655 = vrot.lane.b32.xlu1 %v12185_v35, %s10724_s29  ;;  %2939 = vrot.lane.b32.xlu0 %v12165_v36, %s10730_s20 }
 0x56b   :  { %2699 = vrot.lane.b32.xlu1 %v12165_v36, %s10725_s30  ;;  %2653 = vrot.lane.b32.xlu0 %v12165_v36, %s10724_s29 }
 0x56f   :  { %2745 = vrot.lane.b32.xlu1 %v12165_v36, %s10726_s12  ;;  %2701 = vrot.lane.b32.xlu0 %v12185_v35, %s10725_s30 }
 0x573   :  { %2791 = vrot.lane.b32.xlu1 %v12165_v36, %s10727_s13  ;;  %2747 = vrot.lane.b32.xlu0 %v12185_v35, %s10726_s12 }
 0x577   :  { %2849 = vrot.lane.b32.xlu1 %v12185_v35, %s10728_s18  ;;  %2793 = vrot.lane.b32.xlu0 %v12185_v35, %s10727_s13 }
 0x579   :  { %v2544_v41 = vpop.f32.mrb[104].mxu1 }
 0x57a   :  { %v2545_v52 = vadd.f32 %v2544_v41, %v11479_v31  ;;  %v2546_v62 = vpop.f32.mrb[105].mxu1  ;;  %v2740_v41 = vpop.permute.xlu1 %2739 }
 0x57b   :  { %v2548_v28 = vpop.f32.mrb[106].mxu1  ;;  %2895 = vrot.lane.b32.xlu1 %v12185_v35, %s10729_s19 }
 0x57c   :  { %v2569_v29 = vmul.f32 %v2545_v52, %v11623_v53  ;;  %v2549_v45 = vadd.f32 %v2548_v28, %v11482_v42  ;;  %v2550_v46 = vpop.f32.mrb[107].mxu1 }
 0x57d   :  { %v2551_v39 = vadd.f32 %v2550_v46, %v11482_v42 }
 0x57e   :  { %v2575_v12 = vmul.f32 %v2549_v45, %v11623_v53  ;;  %v12216_v2 = vadd.f32 %v2569_v29, %v11636_v8  ;;  %v2547_v8 = vadd.f32 %v2546_v62, %v11479_v31 }
 0x57f   :  { %2941 = vrot.lane.b32.xlu1 %v12185_v35, %s10730_s20  ;;  %v2576_v60 = vmul.f32 %v2551_v39, %v15778_v5 }
 0x580   :  { %v12219_v34 = vadd.f32 %v2575_v12, %v15777_v4  ;;  %v2570_v26 = vmul.f32 %v2547_v8, %v15778_v5 }
 0x581   :  { %v12242_v50 = vadd.f32 %v2576_v60, %v15779_v11 }
 0x582   :  { %v12223_v25 = vpack.c.bf16 %v12219_v34, %v12216_v2  ;;  %v12247_v61 = vadd.f32 %v2570_v26, %v15781_v16 }
 0x583   :  { %2987 = vrot.lane.b32.xlu1 %v12185_v35, %s10731_s27  ;;  %15780 = vst [vmem:[#allocation11_spill] sm:$0xff] %v12242_v50 }
 0x584   :  { %2851 = vrot.lane.b32.xlu0 %v12223_v25, %s10728_s18  ;;  %15782 = vst [vmem:[#allocation13_spill] sm:$0xff] %v12247_v61  ;;  %v12253_v7 = vpack.c.bf16 %v12242_v50, %v12247_v61 }
 0x587   :  { %2657 = vrot.lane.b32.xlu1 %v12223_v25, %s10724_s29 }
 0x588   :  { %2897 = vrot.lane.b32.xlu0 %v12223_v25, %s10729_s19 }
 0x58b   :  { %2703 = vrot.lane.b32.xlu1 %v12223_v25, %s10725_s30 }
 0x58c   :  { %2943 = vrot.lane.b32.xlu0 %v12223_v25, %s10730_s20 }
 0x58f   :  { %2749 = vrot.lane.b32.xlu1 %v12223_v25, %s10726_s12 }
 0x590   :  { %2989 = vrot.lane.b32.xlu0 %v12223_v25, %s10731_s27 }
 0x593   :  { %2795 = vrot.lane.b32.xlu1 %v12223_v25, %s10727_s13 }
 0x594   :  { %2659 = vrot.lane.b32.xlu0 %v12253_v7, %s10724_s29 }
 0x597   :  { %2853 = vrot.lane.b32.xlu1 %v12253_v7, %s10728_s18 }
 0x598   :  { %2705 = vrot.lane.b32.xlu0 %v12253_v7, %s10725_s30 }
 0x59b   :  { %2899 = vrot.lane.b32.xlu1 %v12253_v7, %s10729_s19 }
 0x59c   :  { %2751 = vrot.lane.b32.xlu0 %v12253_v7, %s10726_s12 }
 0x59f   :  { %2945 = vrot.lane.b32.xlu1 %v12253_v7, %s10730_s20 }
 0x5a0   :  { %2797 = vrot.lane.b32.xlu0 %v12253_v7, %s10727_s13 }
 0x5a3   :  { %2991 = vrot.lane.b32.xlu1 %v12253_v7, %s10731_s27 }
 0x5a4   :  { %2855 = vrot.lane.b32.xlu0 %v15783_v49, %s10728_s18 }
 0x5a7   :  { %3773 = vrot.lane.b32.xlu1 %v15784_v55, %s10724_s29 }
 0x5a8   :  { %2901 = vrot.lane.b32.xlu0 %v15783_v49, %s10729_s19 }
 0x5ab   :  { %3865 = vrot.lane.b32.xlu1 %v15784_v55, %s10726_s12 }
 0x5ac   :  { %2947 = vrot.lane.b32.xlu0 %v15783_v49, %s10730_s20 }
 0x5b0   :  { %2993 = vrot.lane.b32.xlu0 %v15783_v49, %s10731_s27 }
 0x5b1   :  { %v2696_v52 = vpop.permute.xlu0 %2695  ;;  %v2650_v62 = vpop.permute.xlu1 %2649 }
 0x5b2   :  { %v2661_v4 = vsel %vm208_vm1, %v2648_v58, %v2650_v62  ;;  %v2707_v26 = vsel %vm255_vm2, %v2694_v6, %v2696_v52 }
 0x5b4   :  { %3819 = vrot.lane.b32.xlu0 %v15784_v55, %s10725_s30 }
 0x5b5   :  { %v2788_v28 = vpop.permute.xlu0 %2787  ;;  %v2742_v29 = vpop.permute.xlu1 %2741 }
 0x5b6   :  { %v2753_v49 = vsel %vm302_vm3, %v2740_v41, %v2742_v29 }
 0x5b8   :  { %3911 = vrot.lane.b32.xlu0 %v15784_v55, %s10727_s13 }
 0x5b9   :  { %v2652_v45 = vpop.permute.xlu0 %2651  ;;  %v2844_v46 = vpop.permute.xlu1 %2843 }
 0x5ba   :  { %v2662_v12 = vsel %vm208_vm1, %v2650_v62, %v2652_v45 }
 0x5bb   :  { %3067 = vmatprep.subr.bf16.mxu0 %v2662_v12 }
 0x5bc   :  { %3068 = vmatpush1.bf16.msra.mxu0 %v2661_v4  ;;  %v2799_v4 = vsel %vm349_vm4, %v2786_v57, %v2788_v28 }
 0x5bd   :  { %v2890_v39 = vpop.permute.xlu0 %2889  ;;  %v2698_v8 = vpop.permute.xlu1 %2697 }
 0x5be   :  { %v2708_v60 = vsel %vm255_vm2, %v2696_v52, %v2698_v8 }
 0x5bf   :  { %3069 = vmatprep.subr.bf16.mxu0 %v2708_v60 }
 0x5c0   :  { %3070 = vmatpush1.bf16.msra.mxu0 %v2707_v26 }
 0x5c1   :  { %v2744_v11 = vpop.permute.xlu0 %2743  ;;  %v2936_v16 = vpop.permute.xlu1 %2935 }
 0x5c2   :  { %v2754_v55 = vsel %vm302_vm3, %v2742_v29, %v2744_v11 }
 0x5c3   :  { %3071 = vmatprep.subr.bf16.mxu0 %v2754_v55 }
 0x5c4   :  { %3072 = vmatpush1.bf16.msra.mxu0 %v2753_v49 }
 0x5c5   :  { %v2790_v12 = vpop.permute.xlu1 %2789  ;;  %v2892_v62 = vpop.permute.xlu0 %2891 }
 0x5c6   :  { %v2800_v58 = vsel %vm349_vm4, %v2788_v28, %v2790_v12 }
 0x5c7   :  { %3073 = vmatprep.subr.bf16.mxu0 %v2800_v58 }
 0x5c8   :  { %3074 = vmatpush1.bf16.msra.mxu0 %v2799_v4 }
 0x5c9   :  { %3075 = vmatprep.subr.bf16.mxu0 %v12127_v24  ;;  %v2846_v6 = vpop.permute.xlu1 %2845  ;;  %v2984_v52 = vpop.permute.xlu0 %2983 }
 0x5ca   :  { %v2857_v41 = vsel %vm408_vm5, %v2844_v46, %v2846_v6 }
 0x5cc   :  { %3076 = vmatpush1.bf16.msra.mxu0 %v12107_v43  ;;  %v2903_v43 = vsel %vm455_vm6, %v2890_v39, %v2892_v62 }
 0x5cd   :  { %v2938_v60 = vpop.permute.xlu1 %2937 }
 0x5ce   :  { %v2949_v46 = vsel %vm502_vm7, %v2936_v16, %v2938_v60 }
 0x5d1   :  { %v12299_v26 = vpop.permute.xlu0 %2847  ;;  %v12301_v55 = vpop.permute.xlu1 %2893 }
 0x5d2   :  { %v2858_v49 = vsel %vm408_vm5, %v2846_v6, %v12299_v26  ;;  %v2904_v57 = vsel %vm455_vm6, %v2892_v62, %v12301_v55 }
 0x5d3   :  { %3077 = vmatprep.subr.bf16.mxu0 %v2858_v49 }
 0x5d4   :  { %3078 = vmatpush1.bf16.msra.mxu0 %v2857_v41 }
 0x5d5   :  { %v2982_v24 = vpop.permute.xlu0 %2981  ;;  %3079 = vmatprep.subr.bf16.mxu0 %v2904_v57  ;;  %v12308_v28 = vpop.permute.xlu1 %2985 }
 0x5d6   :  { %v2996_v6 = vsel %vm549_vm8, %v2984_v52, %v12308_v28  ;;  %v2995_v57 = vsel %vm549_vm8, %v2982_v24, %v2984_v52  ;;  %v12338_v52 = vld [vmem:[%s15714_s1 + $0x14] ss:$8 sps:$4 sm:$0xff]  }
 0x5d8   :  { %3080 = vmatpush1.bf16.msra.mxu0 %v2903_v43 }
 0x5d9   :  { %v12311_v29 = vpop.permute.xlu0 %2939  ;;  %v12313_v58 = vpop.permute.xlu1 %2655 }
 0x5da   :  { %v2950_v4 = vsel %vm502_vm7, %v2938_v60, %v12311_v29 }
 0x5db   :  { %3081 = vmatprep.subr.bf16.mxu0 %v2950_v4  ;;  %v12331_v4 = vld [vmem:[%s15714_s1] ss:$8 sps:$4 sm:$0xff]  }
 0x5dc   :  { %3082 = vmatpush1.bf16.msra.mxu0 %v2949_v46 }
 0x5dd   :  { %v2654_v49 = vpop.permute.xlu0 %2653  ;;  %3083 = vmatprep.subr.bf16.mxu0 %v2996_v6  ;;  %v2700_v41 = vpop.permute.xlu1 %2699 }
 0x5de   :  { %v2664_v39 = vsel %vm208_vm1, %v2654_v49, %v12313_v58  ;;  %v2663_v62 = vsel %vm208_vm1, %v2652_v45, %v2654_v49  ;;  %v2709_v45 = vsel %vm255_vm2, %v2698_v8, %v2700_v41 }
 0x5df   :  { %3180 = vmatprep.subr.bf16.mxu1 %v2664_v39 }
 0x5e0   :  { %3084 = vmatpush1.bf16.msra.mxu0 %v2995_v57  ;;  %3181 = vmatpush1.bf16.msra.mxu1 %v2663_v62  ;;  %v12354_v62 = vld [vmem:[%s15714_s1 + $0x10] ss:$8 sps:$4 sm:$0xff]  }
 0x5e1   :  { %v12324_v43 = vpop.permute.xlu0 %2701  ;;  %v2746_v16 = vpop.permute.xlu1 %2745 }
 0x5e2   :  { %v2710_v60 = vsel %vm255_vm2, %v2700_v41, %v12324_v43  ;;  %v2755_v49 = vsel %vm302_vm3, %v2744_v11, %v2746_v16  ;;  %v12361_v11 = vld [vmem:[%s15714_s1 + $0x24] ss:$8 sps:$4 sm:$0xff]  }
 0x5e3   :  { %3100 = vmatmul.mubr.bf16.vlgmr.msra.gmra.mrb[108].mxu0 %v12331_v4  ;;  %3182 = vmatprep.subr.bf16.mxu1 %v2710_v60 }
 0x5e4   :  { %3183 = vmatpush1.bf16.msra.mxu1 %v2709_v45  ;;  %10252 = vmatprep.mubr.msk.bf16.mxu0 %vm774_vm0, %v12338_v52  ;;  %v12370_v45 = vld [vmem:[%s15714_s1 + $0x20] ss:$8 sps:$4 sm:$0xff]  }
 0x5e5   :  { %v12342_v24 = vpop.permute.xlu0 %2747  ;;  %v2792_v46 = vpop.permute.xlu1 %2791 }
 0x5e6   :  { %v2756_v6 = vsel %vm302_vm3, %v2746_v16, %v12342_v24  ;;  %v2801_v57 = vsel %vm349_vm4, %v2790_v12, %v2792_v46  ;;  %v12376_v12 = vld [vmem:[%s15714_s1 + $0x34] ss:$8 sps:$4 sm:$0xff]  }
 0x5e7   :  { %3184 = vmatprep.subr.bf16.mxu1 %v2756_v6 }
 0x5e8   :  { %3185 = vmatpush1.bf16.msra.mxu1 %v2755_v49 }
 0x5e9   :  { %v12347_v8 = vpop.permute.xlu0 %2793  ;;  %v2850_v41 = vpop.permute.xlu1 %2849 }
 0x5ea   :  { %v2802_v39 = vsel %vm349_vm4, %v2792_v46, %v12347_v8  ;;  %v2859_v6 = vsel %vm408_vm5, %v12299_v26, %v2850_v41  ;;  %v12401_v26 = vld [vmem:[%s15714_s1 + $0x44] ss:$8 sps:$4 sm:$0xff]  }
 0x5eb   :  { %3110 = vmatmul.mubr.bf16.gmra.mrb[112].mxu0 %v12354_v62  ;;  %3186 = vmatprep.subr.bf16.mxu1 %v2802_v39 }
 0x5ec   :  { %3187 = vmatpush1.bf16.msra.mxu1 %v2801_v57  ;;  %10253 = vmatprep.mubr.msk.bf16.mxu0 %vm774_vm0, %v12361_v11  ;;  %v12391_v57 = vld [vmem:[%s15714_s1 + $0x30] ss:$8 sps:$4 sm:$0xff]  }
 0x5ed   :  { %3188 = vmatprep.subr.bf16.mxu1 %v12185_v35  ;;  %v2896_v16 = vpop.permute.xlu1 %2895 }
 0x5f0   :  { %3189 = vmatpush1.bf16.msra.mxu1 %v12165_v36 }
 0x5f1   :  { %v2942_v60 = vpop.permute.xlu1 %2941 }
 0x5f3   :  { %3120 = vmatmul.mubr.bf16.gmra.mrb[116].mxu0 %v12370_v45 }
 0x5f4   :  { %10254 = vmatprep.mubr.msk.bf16.mxu0 %vm774_vm0, %v12376_v12 }
 0x5f5   :  { %v2988_v35 = vpop.permute.xlu1 %2987 }
 0x5f6   :  { %v12380_v46 = vpop.permute.xlu0 %2851 }
 0x5f7   :  { %v2860_v36 = vsel %vm408_vm5, %v2850_v41, %v12380_v46 }
 0x5f8   :  { %3190 = vmatprep.subr.bf16.mxu1 %v2860_v36  ;;  %v2905_v36 = vsel %vm455_vm6, %v12301_v55, %v2896_v16 }
 0x5f9   :  { %3191 = vmatpush1.bf16.msra.mxu1 %v2859_v6  ;;  %v2658_v39 = vpop.permute.xlu1 %2657 }
 0x5fa   :  { %v12386_v49 = vpop.permute.xlu0 %2897 }
 0x5fb   :  { %3130 = vmatmul.mubr.bf16.gmra.mrb[120].mxu0 %v12391_v57  ;;  %v2906_v61 = vsel %vm455_vm6, %v2896_v16, %v12386_v49  ;;  %v12416_v16 = vld [vmem:[%s15714_s1 + $0x40] ss:$8 sps:$4 sm:$0xff]  }
 0x5fc   :  { %3192 = vmatprep.subr.bf16.mxu1 %v2906_v61  ;;  %10255 = vmatprep.mubr.msk.bf16.mxu0 %vm774_vm0, %v12401_v26  ;;  %v2951_v61 = vsel %vm502_vm7, %v12311_v29, %v2942_v60  ;;  %v12426_v29 = vld [vmem:[%s15714_s1 + $0x54] ss:$8 sps:$4 sm:$0xff]  }
 0x5fd   :  { %3193 = vmatpush1.bf16.msra.mxu1 %v2905_v36  ;;  %v2704_v50 = vpop.permute.xlu1 %2703 }
 0x5fe   :  { %v12405_v41 = vpop.permute.xlu0 %2943 }
 0x5ff   :  { %v2952_v6 = vsel %vm502_vm7, %v2942_v60, %v12405_v41 }
 0x600   :  { %3194 = vmatprep.subr.bf16.mxu1 %v2952_v6  ;;  %v2997_v6 = vsel %vm549_vm8, %v12308_v28, %v2988_v35 }
 0x601   :  { %3195 = vmatpush1.bf16.msra.mxu1 %v2951_v61  ;;  %v2750_v60 = vpop.permute.xlu1 %2749 }
 0x602   :  { %v12411_v55 = vpop.permute.xlu0 %2989 }
 0x603   :  { %3140 = vmatmul.mubr.bf16.gmra.mrb[124].mxu0 %v12416_v16  ;;  %v2998_v36 = vsel %vm549_vm8, %v2988_v35, %v12411_v55  ;;  %v12439_v35 = vld [vmem:[%s15714_s1 + $0x50] ss:$8 sps:$4 sm:$0xff]  }
 0x604   :  { %3196 = vmatprep.subr.bf16.mxu1 %v2998_v36  ;;  %10256 = vmatprep.mubr.msk.bf16.mxu0 %vm774_vm0, %v12426_v29  ;;  %v2665_v36 = vsel %vm208_vm1, %v12313_v58, %v2658_v39  ;;  %v12448_v58 = vld [vmem:[%s15714_s1 + $0x64] ss:$8 sps:$4 sm:$0xff]  }
 0x605   :  { %3197 = vmatpush1.bf16.msra.mxu1 %v2997_v6 }
 0x606   :  { %v2660_v61 = vpop.permute.xlu0 %2659 }
 0x607   :  { %v2666_v5 = vsel %vm208_vm1, %v2658_v39, %v2660_v61  ;;  %v2796_v61 = vpop.permute.xlu1 %2795 }
 0x608   :  { %3213 = vmatmul.mubr.bf16.vlgmr.msra.gmra.mrb[108].mxu1 %v12331_v4  ;;  %3293 = vmatprep.subr.bf16.mxu0 %v2666_v5  ;;  %v2711_v5 = vsel %vm255_vm2, %v12324_v43, %v2704_v50 }
 0x609   :  { %3294 = vmatpush1.bf16.msra.mxu0 %v2665_v36  ;;  %10260 = vmatprep.mubr.msk.bf16.mxu1 %vm774_vm0, %v12338_v52 }
 0x60a   :  { %v2706_v28 = vpop.permute.xlu0 %2705 }
 0x60b   :  { %3150 = vmatmul.mubr.bf16.gmra.mrb[128].mxu0 %v12439_v35  ;;  %v2712_v6 = vsel %vm255_vm2, %v2704_v50, %v2706_v28  ;;  %v2757_v28 = vsel %vm302_vm3, %v12342_v24, %v2750_v60  ;;  %v2854_v50 = vpop.permute.xlu1 %2853  ;;  %v10612_v24 = vld [vmem:[%s15714_s1 + $0x74] ss:$8 sps:$4 sm:$0xff]  }
 0x60c   :  { %3295 = vmatprep.subr.bf16.mxu0 %v2712_v6  ;;  %10257 = vmatprep.mubr.msk.bf16.mxu0 %vm774_vm0, %v12448_v58  ;;  %v10611_v6 = vld [vmem:[%s15714_s1 + $0x60] ss:$8 sps:$4 sm:$0xff]  }
 0x60d   :  { %3296 = vmatpush1.bf16.msra.mxu0 %v2711_v5 }
 0x60e   :  { %v2752_v39 = vpop.permute.xlu0 %2751 }
 0x60f   :  { %v2758_v36 = vsel %vm302_vm3, %v2750_v60, %v2752_v39  ;;  %v2803_v39 = vsel %vm349_vm4, %v12347_v8, %v2796_v61 }
 0x610   :  { %3223 = vmatmul.mubr.bf16.gmra.mrb[112].mxu1 %v12354_v62  ;;  %3297 = vmatprep.subr.bf16.mxu0 %v2758_v36  ;;  %v2900_v36 = vpop.permute.xlu1 %2899 }
 0x611   :  { %3298 = vmatpush1.bf16.msra.mxu0 %v2757_v28  ;;  %10261 = vmatprep.mubr.msk.bf16.mxu1 %vm774_vm0, %v12361_v11 }
 0x612   :  { %v2798_v43 = vpop.permute.xlu0 %2797 }
 0x613   :  { %3160 = vmatmul.mubr.bf16.gmra.mrb[132].mxu0 %v10611_v6  ;;  %v2804_v5 = vsel %vm349_vm4, %v2796_v61, %v2798_v43  ;;  %v10613_v61 = vld [vmem:[%s15714_s1 + $0x70] ss:$8 sps:$4 sm:$0xff]  }
 0x614   :  { %3299 = vmatprep.subr.bf16.mxu0 %v2804_v5  ;;  %10258 = vmatprep.mubr.msk.bf16.mxu0 %vm774_vm0, %v10612_v24  ;;  %v2946_v43 = vpop.permute.xlu1 %2945 }
 0x615   :  { %3300 = vmatpush1.bf16.msra.mxu0 %v2803_v39  ;;  %v2907_v39 = vsel %vm455_vm6, %v12386_v49, %v2900_v36 }
 0x616   :  { %v2856_v60 = vpop.permute.xlu0 %2855  ;;  %3301 = vmatprep.subr.bf16.mxu0 %v12253_v7  ;;  %v2861_v7 = vsel %vm408_vm5, %v12380_v46, %v2854_v50 }
 0x617   :  { %v2862_v28 = vsel %vm408_vm5, %v2854_v50, %v2856_v60  ;;  %v2953_v50 = vsel %vm502_vm7, %v12405_v41, %v2946_v43 }
 0x618   :  { %3233 = vmatmul.mubr.bf16.gmra.mrb[116].mxu1 %v12370_v45 }
 0x619   :  { %3302 = vmatpush1.bf16.msra.mxu0 %v12223_v25  ;;  %10262 = vmatprep.mubr.msk.bf16.mxu1 %vm774_vm0, %v12376_v12 }
 0x61a   :  { %v2902_v8 = vpop.permute.xlu0 %2901  ;;  %3303 = vmatprep.subr.bf16.mxu0 %v2862_v28 }
 0x61b   :  { %3170 = vmatmul.mubr.bf16.gmra.mrb[136].mxu0 %v10613_v61  ;;  %v2908_v25 = vsel %vm455_vm6, %v2900_v36, %v2902_v8 }
 0x61c   :  { %10267 = vmatprep.mubr.msk.bf16.mxu0 %vm774_vm0, %v12072_v47  ;;  %v2992_v47 = vpop.permute.xlu1 %2991 }
 0x61d   :  { %3304 = vmatpush1.bf16.msra.mxu0 %v2861_v7  ;;  %v2999_v49 = vsel %vm549_vm8, %v12411_v55, %v2992_v47 }
 0x61e   :  { %v2948_v5 = vpop.permute.xlu0 %2947  ;;  %3305 = vmatprep.subr.bf16.mxu0 %v2908_v25 }
 0x61f   :  { %v2954_v60 = vsel %vm502_vm7, %v2946_v43, %v2948_v5 }
 0x620   :  { %3243 = vmatmul.mubr.bf16.gmra.mrb[120].mxu1 %v12391_v57 }
 0x621   :  { %3306 = vmatpush1.bf16.msra.mxu0 %v2907_v39  ;;  %10263 = vmatprep.mubr.msk.bf16.mxu1 %vm774_vm0, %v12401_v26 }
 0x622   :  { %v2994_v46 = vpop.permute.xlu0 %2993  ;;  %3307 = vmatprep.subr.bf16.mxu0 %v2954_v60 }
 0x623   :  { %v3000_v28 = vsel %vm549_vm8, %v2992_v47, %v2994_v46 }
 0x625   :  { %3308 = vmatpush1.bf16.msra.mxu0 %v2953_v50 }
 0x626   :  { %3309 = vmatprep.subr.bf16.mxu0 %v3000_v28 }
 0x628   :  { %3253 = vmatmul.mubr.bf16.gmra.mrb[124].mxu1 %v12416_v16 }
 0x629   :  { %3310 = vmatpush1.bf16.msra.mxu0 %v2999_v49  ;;  %10264 = vmatprep.mubr.msk.bf16.mxu1 %vm774_vm0, %v12426_v29 }
 0x62c   :  { %3326 = vmatmul.mubr.bf16.vlgmr.msra.gmra.mrb[140].mxu0 %v12331_v4 }
 0x62d   :  { %10268 = vmatprep.mubr.msk.bf16.mxu0 %vm774_vm0, %v12338_v52 }
 0x630   :  { %3263 = vmatmul.mubr.bf16.gmra.mrb[128].mxu1 %v12439_v35 }
 0x631   :  { %10265 = vmatprep.mubr.msk.bf16.mxu1 %vm774_vm0, %v12448_v58 }
 0x634   :  { %3336 = vmatmul.mubr.bf16.gmra.mrb[144].mxu0 %v12354_v62 }
 0x635   :  { %10269 = vmatprep.mubr.msk.bf16.mxu0 %vm774_vm0, %v12361_v11 }
 0x638   :  { %3273 = vmatmul.mubr.bf16.gmra.mrb[132].mxu1 %v10611_v6 }
 0x639   :  { %10266 = vmatprep.mubr.msk.bf16.mxu1 %vm774_vm0, %v10612_v24 }
 0x63c   :  { %3346 = vmatmul.mubr.bf16.gmra.mrb[148].mxu0 %v12370_v45 }
 0x63d   :  { %10270 = vmatprep.mubr.msk.bf16.mxu0 %vm774_vm0, %v12376_v12 }
 0x640   :  { %3283 = vmatmul.mubr.bf16.gmra.mrb[136].mxu1 %v10613_v61 }
 0x641   :  { %3582 = vmatprep.mubr.bf16.mxu1 %v15776_v19 }
 0x644   :  { %3356 = vmatmul.mubr.bf16.gmra.mrb[152].mxu0 %v12391_v57 }
 0x645   :  { %10271 = vmatprep.mubr.msk.bf16.mxu0 %vm774_vm0, %v12401_v26 }
 0x64c   :  { %3366 = vmatmul.mubr.bf16.gmra.mrb[156].mxu0 %v12416_v16 }
 0x64d   :  { %10272 = vmatprep.mubr.msk.bf16.mxu0 %vm774_vm0, %v12426_v29 }
 0x654   :  { %3376 = vmatmul.mubr.bf16.gmra.mrb[160].mxu0 %v12439_v35 }
 0x655   :  { %10273 = vmatprep.mubr.msk.bf16.mxu0 %vm774_vm0, %v12448_v58 }
 0x65c   :  { %3386 = vmatmul.mubr.bf16.gmra.mrb[164].mxu0 %v10611_v6 }
 0x65d   :  { %10274 = vmatprep.mubr.msk.bf16.mxu0 %vm774_vm0, %v10612_v24 }
 0x664   :  { %3396 = vmatmul.mubr.bf16.gmra.mrb[168].mxu0 %v10613_v61 }
 0x665   :  { %3668 = vmatprep.mubr.bf16.mxu0 %v15776_v19 }
 0x6b6   :  { %v3101_v4 = vpop.f32.mrb[108].mxu0 }
 0x6b7   :  { %v3102_v52 = vadd.f32 %v3101_v4, %v11295_v14  ;;  %v3103_v62 = vpop.f32.mrb[109].mxu0 }
 0x6b8   :  { %v3104_v11 = vadd.f32 %v3103_v62, %v11295_v14  ;;  %v3105_v45 = vpop.f32.mrb[110].mxu0 }
 0x6b9   :  { %v3106_v12 = vadd.f32 %v3105_v45, %v11297_v32  ;;  %v3107_v57 = vpop.f32.mrb[111].mxu0  ;;  %v3406_v41 = vmax.f32 %v3102_v52, 0.0 }
 0x6ba   :  { %v3108_v26 = vadd.f32 %v3107_v57, %v11297_v32  ;;  %v3407_v16 = vmax.f32 %v3104_v11, 0.0 }
 0x6bb   :  { %v3412_v55 = vmax.f32 %v3106_v12, 0.0 }
 0x6bc   :  { %v3413_v29 = vmax.f32 %v3108_v26, 0.0 }
 0x6bd   :  { %v3502_v35 = vpack.c.bf16 %v3412_v55, %v3406_v41 }
 0x6be   :  { %v3111_v58 = vpop.f32.mrb[112].mxu0  ;;  %v3503_v6 = vpack.c.bf16 %v3413_v29, %v3407_v16 }
 0x6bf   :  { %v3112_v24 = vadd.f32 %v3111_v58, %v11303_v59  ;;  %v3113_v36 = vpop.f32.mrb[113].mxu0 }
 0x6c0   :  { %v3114_v8 = vadd.f32 %v3113_v36, %v11303_v59  ;;  %v3115_v61 = vpop.f32.mrb[114].mxu0  ;;  %3550 = vmatprep.subr.bf16.mxu1 %v3503_v6 }
 0x6c1   :  { %v3116_v7 = vadd.f32 %v3115_v61, %v11306_v0  ;;  %v3117_v25 = vpop.f32.mrb[115].mxu0  ;;  %3551 = vmatpush1.bf16.msra.mxu1 %v3502_v35  ;;  %v3418_v5 = vmax.f32 %v3112_v24, 0.0 }
 0x6c2   :  { %v3118_v43 = vadd.f32 %v3117_v25, %v11306_v0  ;;  %v3419_v60 = vmax.f32 %v3114_v8, 0.0 }
 0x6c3   :  { %v3424_v39 = vmax.f32 %v3116_v7, 0.0 }
 0x6c4   :  { %v3425_v46 = vmax.f32 %v3118_v43, 0.0 }
 0x6c5   :  { %v3508_v47 = vpack.c.bf16 %v3424_v39, %v3418_v5 }
 0x6c6   :  { %v3121_v50 = vpop.f32.mrb[116].mxu0  ;;  %v3509_v28 = vpack.c.bf16 %v3425_v46, %v3419_v60 }
 0x6c7   :  { %v3122_v49 = vadd.f32 %v3121_v50, %v11311_v13  ;;  %v3123_v4 = vpop.f32.mrb[117].mxu0 }
 0x6c8   :  { %v3124_v52 = vadd.f32 %v3123_v4, %v11311_v13  ;;  %v3125_v62 = vpop.f32.mrb[118].mxu0  ;;  %3552 = vmatprep.subr.bf16.mxu1 %v3509_v28 }
 0x6c9   :  { %v3126_v11 = vadd.f32 %v3125_v62, %v11314_v22  ;;  %v3127_v45 = vpop.f32.mrb[119].mxu0  ;;  %3553 = vmatpush1.bf16.msra.mxu1 %v3508_v47  ;;  %v3430_v57 = vmax.f32 %v3122_v49, 0.0 }
 0x6ca   :  { %v3128_v12 = vadd.f32 %v3127_v45, %v11314_v22  ;;  %v3431_v41 = vmax.f32 %v3124_v52, 0.0 }
 0x6cb   :  { %v3436_v26 = vmax.f32 %v3126_v11, 0.0 }
 0x6cc   :  { %v3437_v55 = vmax.f32 %v3128_v12, 0.0 }
 0x6cd   :  { %v3514_v16 = vpack.c.bf16 %v3436_v26, %v3430_v57 }
 0x6ce   :  { %v3131_v29 = vpop.f32.mrb[120].mxu0  ;;  %v3515_v35 = vpack.c.bf16 %v3437_v55, %v3431_v41 }
 0x6cf   :  { %v3132_v58 = vadd.f32 %v3131_v29, %v11319_v38  ;;  %v3133_v6 = vpop.f32.mrb[121].mxu0 }
 0x6d0   :  { %v3134_v24 = vadd.f32 %v3133_v6, %v11319_v38  ;;  %v3135_v36 = vpop.f32.mrb[122].mxu0  ;;  %3554 = vmatprep.subr.bf16.mxu1 %v3515_v35 }
 0x6d1   :  { %v3136_v8 = vadd.f32 %v3135_v36, %v11321_v40  ;;  %v3137_v61 = vpop.f32.mrb[123].mxu0  ;;  %3555 = vmatpush1.bf16.msra.mxu1 %v3514_v16  ;;  %v3442_v25 = vmax.f32 %v3132_v58, 0.0 }
 0x6d2   :  { %v3138_v7 = vadd.f32 %v3137_v61, %v11321_v40  ;;  %v3443_v5 = vmax.f32 %v3134_v24, 0.0 }
 0x6d3   :  { %v3448_v43 = vmax.f32 %v3136_v8, 0.0 }
 0x6d4   :  { %v3449_v39 = vmax.f32 %v3138_v7, 0.0 }
 0x6d5   :  { %v3520_v60 = vpack.c.bf16 %v3448_v43, %v3442_v25 }
 0x6d6   :  { %v3141_v46 = vpop.f32.mrb[124].mxu0  ;;  %v3521_v47 = vpack.c.bf16 %v3449_v39, %v3443_v5 }
 0x6d7   :  { %v3142_v50 = vadd.f32 %v3141_v46, %v11329_v51  ;;  %v3143_v28 = vpop.f32.mrb[125].mxu0 }
 0x6d8   :  { %v3144_v49 = vadd.f32 %v3143_v28, %v11329_v51  ;;  %v3145_v4 = vpop.f32.mrb[126].mxu0  ;;  %3556 = vmatprep.subr.bf16.mxu1 %v3521_v47 }
 0x6d9   :  { %v3146_v52 = vadd.f32 %v3145_v4, %v11327_v33  ;;  %v3147_v62 = vpop.f32.mrb[127].mxu0  ;;  %3557 = vmatpush1.bf16.msra.mxu1 %v3520_v60  ;;  %v3454_v45 = vmax.f32 %v3142_v50, 0.0 }
 0x6da   :  { %v3148_v11 = vadd.f32 %v3147_v62, %v11327_v33  ;;  %v3455_v26 = vmax.f32 %v3144_v49, 0.0 }
 0x6db   :  { %v3460_v12 = vmax.f32 %v3146_v52, 0.0  ;;  %v3214_v57 = vpop.f32.mrb[108].mxu1 }
 0x6dc   :  { %v3461_v41 = vmax.f32 %v3148_v11, 0.0  ;;  %v3215_v55 = vadd.f32 %v3214_v57, %v11295_v14  ;;  %v3216_v16 = vpop.f32.mrb[109].mxu1 }
 0x6dd   :  { %v3526_v29 = vpack.c.bf16 %v3460_v12, %v3454_v45  ;;  %v3217_v35 = vadd.f32 %v3216_v16, %v11295_v14  ;;  %v3218_v58 = vpop.f32.mrb[110].mxu1 }
 0x6de   :  { %v3219_v6 = vadd.f32 %v3218_v58, %v11297_v32  ;;  %v3220_v24 = vpop.f32.mrb[111].mxu1  ;;  %v3151_v36 = vpop.f32.mrb[128].mxu0  ;;  %v3527_v8 = vpack.c.bf16 %v3461_v41, %v3455_v26  ;;  %v3408_v43 = vmax.f32 %v3215_v55, 0.0 }
 0x6df   :  { %v3221_v61 = vadd.f32 %v3220_v24, %v11297_v32  ;;  %v3152_v7 = vadd.f32 %v3151_v36, %v11341_v23  ;;  %v3153_v25 = vpop.f32.mrb[129].mxu0  ;;  %v3409_v46 = vmax.f32 %v3217_v35, 0.0 }
 0x6e0   :  { %v3414_v5 = vmax.f32 %v3219_v6, 0.0  ;;  %v3154_v39 = vadd.f32 %v3153_v25, %v11341_v23  ;;  %v3155_v60 = vpop.f32.mrb[130].mxu0  ;;  %3558 = vmatprep.subr.bf16.mxu1 %v3527_v8 }
 0x6e1   :  { %v3415_v47 = vmax.f32 %v3221_v61, 0.0  ;;  %v3156_v50 = vadd.f32 %v3155_v60, %v11339_v17  ;;  %v3157_v28 = vpop.f32.mrb[131].mxu0  ;;  %3559 = vmatpush1.bf16.msra.mxu1 %v3526_v29  ;;  %v3466_v52 = vmax.f32 %v3152_v7, 0.0 }
 0x6e2   :  { %v12548_v49 = vpack.c.bf16 %v3414_v5, %v3408_v43  ;;  %v3158_v4 = vadd.f32 %v3157_v28, %v11339_v17  ;;  %v3467_v12 = vmax.f32 %v3154_v39, 0.0 }
 0x6e3   :  { %v3472_v62 = vmax.f32 %v3156_v50, 0.0  ;;  %v3224_v11 = vpop.f32.mrb[112].mxu1  ;;  %v12551_v45 = vpack.c.bf16 %v3415_v47, %v3409_v46 }
 0x6e4   :  { %v3473_v57 = vmax.f32 %v3158_v4, 0.0  ;;  %v3225_v26 = vadd.f32 %v3224_v11, %v11303_v59  ;;  %v3226_v41 = vpop.f32.mrb[113].mxu1 }
 0x6e5   :  { %v3532_v55 = vpack.c.bf16 %v3472_v62, %v3466_v52  ;;  %v3227_v16 = vadd.f32 %v3226_v41, %v11303_v59  ;;  %v3228_v35 = vpop.f32.mrb[114].mxu1 }
 0x6e6   :  { %v3229_v29 = vadd.f32 %v3228_v35, %v11306_v0  ;;  %v3230_v58 = vpop.f32.mrb[115].mxu1  ;;  %v3161_v6 = vpop.f32.mrb[132].mxu0  ;;  %v3533_v24 = vpack.c.bf16 %v3473_v57, %v3467_v12  ;;  %v3420_v7 = vmax.f32 %v3225_v26, 0.0 }
 0x6e7   :  { %v3231_v36 = vadd.f32 %v3230_v58, %v11306_v0  ;;  %v3162_v8 = vadd.f32 %v3161_v6, %v11357_v56  ;;  %v3163_v61 = vpop.f32.mrb[133].mxu0  ;;  %v3421_v39 = vmax.f32 %v3227_v16, 0.0 }
 0x6e8   :  { %v3426_v25 = vmax.f32 %v3229_v29, 0.0  ;;  %v3164_v43 = vadd.f32 %v3163_v61, %v11357_v56  ;;  %v3165_v5 = vpop.f32.mrb[134].mxu0  ;;  %3560 = vmatprep.subr.bf16.mxu1 %v3533_v24 }
 0x6e9   :  { %v3427_v60 = vmax.f32 %v3231_v36, 0.0  ;;  %v3166_v46 = vadd.f32 %v3165_v5, %v11355_v54  ;;  %v3167_v47 = vpop.f32.mrb[135].mxu0  ;;  %3561 = vmatpush1.bf16.msra.mxu1 %v3532_v55  ;;  %v3478_v4 = vmax.f32 %v3162_v8, 0.0 }
 0x6ea   :  { %v12560_v50 = vpack.c.bf16 %v3426_v25, %v3420_v7  ;;  %v3168_v28 = vadd.f32 %v3167_v47, %v11355_v54  ;;  %v3479_v12 = vmax.f32 %v3164_v43, 0.0 }
 0x6eb   :  { %v3484_v52 = vmax.f32 %v3166_v46, 0.0  ;;  %v3234_v62 = vpop.f32.mrb[116].mxu1  ;;  %v3511_v11 = vpack.c.bf16 %v3427_v60, %v3421_v39 }
 0x6ec   :  { %v3485_v57 = vmax.f32 %v3168_v28, 0.0  ;;  %v3235_v26 = vadd.f32 %v3234_v62, %v11311_v13  ;;  %v3236_v41 = vpop.f32.mrb[117].mxu1 }
 0x6ed   :  { %v3538_v35 = vpack.c.bf16 %v3484_v52, %v3478_v4  ;;  %v3237_v16 = vadd.f32 %v3236_v41, %v11311_v13  ;;  %v3238_v29 = vpop.f32.mrb[118].mxu1 }
 0x6ee   :  { %v3239_v58 = vadd.f32 %v3238_v29, %v11314_v22  ;;  %v3240_v55 = vpop.f32.mrb[119].mxu1  ;;  %v3171_v6 = vpop.f32.mrb[136].mxu0  ;;  %v3539_v24 = vpack.c.bf16 %v3485_v57, %v3479_v12  ;;  %v3432_v7 = vmax.f32 %v3235_v26, 0.0 }
 0x6ef   :  { %v3241_v36 = vadd.f32 %v3240_v55, %v11314_v22  ;;  %v3172_v8 = vadd.f32 %v3171_v6, %v11373_v18  ;;  %v3173_v61 = vpop.f32.mrb[137].mxu0  ;;  %v3433_v39 = vmax.f32 %v3237_v16, 0.0 }
 0x6f0   :  { %v3438_v25 = vmax.f32 %v3239_v58, 0.0  ;;  %v3174_v43 = vadd.f32 %v3173_v61, %v11373_v18  ;;  %v3175_v5 = vpop.f32.mrb[138].mxu0  ;;  %3562 = vmatprep.subr.bf16.mxu1 %v3539_v24 }
 0x6f1   :  { %v3439_v60 = vmax.f32 %v3241_v36, 0.0  ;;  %v3176_v46 = vadd.f32 %v3175_v5, %v11371_v37  ;;  %v3177_v47 = vpop.f32.mrb[139].mxu0  ;;  %3563 = vmatpush1.bf16.msra.mxu1 %v3538_v35  ;;  %v3490_v52 = vmax.f32 %v3172_v8, 0.0 }
 0x6f2   :  { %v12570_v28 = vpack.c.bf16 %v3438_v25, %v3432_v7  ;;  %v3178_v4 = vadd.f32 %v3177_v47, %v11371_v37  ;;  %v3491_v26 = vmax.f32 %v3174_v43, 0.0 }
 0x6f3   :  { %v3496_v62 = vmax.f32 %v3176_v46, 0.0  ;;  %v3244_v12 = vpop.f32.mrb[120].mxu1  ;;  %v3517_v57 = vpack.c.bf16 %v3439_v60, %v3433_v39 }
 0x6f4   :  { %v3497_v41 = vmax.f32 %v3178_v4, 0.0  ;;  %v3245_v29 = vadd.f32 %v3244_v12, %v11319_v38  ;;  %v3246_v58 = vpop.f32.mrb[121].mxu1  ;;  %v12582_v4 = vld [vmem:[%s15716_s3] sm:$0xff]  }
 0x6f5   :  { %v3544_v55 = vpack.c.bf16 %v3496_v62, %v3490_v52  ;;  %v3247_v16 = vadd.f32 %v3246_v58, %v11319_v38  ;;  %v3248_v6 = vpop.f32.mrb[122].mxu1 }
 0x6f6   :  { %v3249_v24 = vadd.f32 %v3248_v6, %v11321_v40  ;;  %v3250_v35 = vpop.f32.mrb[123].mxu1  ;;  %v3545_v36 = vpack.c.bf16 %v3497_v41, %v3491_v26  ;;  %v3444_v7 = vmax.f32 %v3245_v29, 0.0 }
 0x6f7   :  { %v3251_v61 = vadd.f32 %v3250_v35, %v11321_v40  ;;  %v3445_v25 = vmax.f32 %v3247_v16, 0.0 }
 0x6f8   :  { %v3450_v8 = vmax.f32 %v3249_v24, 0.0  ;;  %3564 = vmatprep.subr.bf16.mxu1 %v3545_v36 }
 0x6f9   :  { %v3451_v5 = vmax.f32 %v3251_v61, 0.0  ;;  %3565 = vmatpush1.bf16.msra.mxu1 %v3544_v55 }
 0x6fa   :  { %v3522_v43 = vpack.c.bf16 %v3450_v8, %v3444_v7  ;;  %3593 = vmatprep.subr.bf16.mxu1 %v12551_v45 }
 0x6fb   :  { %v3254_v39 = vpop.f32.mrb[124].mxu1  ;;  %v3523_v60 = vpack.c.bf16 %v3451_v5, %v3445_v25 }
 0x6fc   :  { %v3255_v46 = vadd.f32 %v3254_v39, %v11329_v51  ;;  %v3256_v47 = vpop.f32.mrb[125].mxu1  ;;  %3583 = vmatmul.mubr.bf16.vlgmr.msra.gmra.mrb[140].mxu1 %v12582_v4 }
 0x6fd   :  { %v3257_v52 = vadd.f32 %v3256_v47, %v11329_v51  ;;  %v3258_v62 = vpop.f32.mrb[126].mxu1  ;;  %3594 = vmatpush1.bf16.msra.mxu1 %v12548_v49  ;;  %3625 = vmatprep.mubr.bf16.mxu1 %v15776_v19 }
 0x6fe   :  { %v3259_v45 = vadd.f32 %v3258_v62, %v11327_v33  ;;  %v3260_v12 = vpop.f32.mrb[127].mxu1  ;;  %3595 = vmatprep.subr.bf16.mxu1 %v3511_v11  ;;  %v3456_v29 = vmax.f32 %v3255_v46, 0.0 }
 0x6ff   :  { %v3261_v26 = vadd.f32 %v3260_v12, %v11327_v33  ;;  %v3327_v41 = vpop.f32.mrb[140].mxu0  ;;  %v3457_v6 = vmax.f32 %v3257_v52, 0.0 }
 0x700   :  { %v3462_v58 = vmax.f32 %v3259_v45, 0.0  ;;  %v3328_v55 = vadd.f32 %v3327_v41, %v11295_v14  ;;  %v3329_v16 = vpop.f32.mrb[141].mxu0 }
 0x701   :  { %v3463_v24 = vmax.f32 %v3261_v26, 0.0  ;;  %v3330_v35 = vadd.f32 %v3329_v16, %v11295_v14  ;;  %v3331_v36 = vpop.f32.mrb[142].mxu0  ;;  %3596 = vmatpush1.bf16.msra.mxu1 %v12560_v50 }
 0x702   :  { %v3528_v49 = vpack.c.bf16 %v3462_v58, %v3456_v29  ;;  %v3332_v61 = vadd.f32 %v3331_v36, %v11297_v32  ;;  %v3333_v7 = vpop.f32.mrb[143].mxu0  ;;  %3597 = vmatprep.subr.bf16.mxu1 %v3517_v57  ;;  %v3410_v5 = vmax.f32 %v3328_v55, 0.0 }
 0x703   :  { %v3334_v11 = vadd.f32 %v3333_v7, %v11297_v32  ;;  %v3264_v8 = vpop.f32.mrb[128].mxu1  ;;  %v3529_v25 = vpack.c.bf16 %v3463_v24, %v3457_v6  ;;  %v3411_v52 = vmax.f32 %v3330_v35, 0.0 }
 0x704   :  { %v3416_v39 = vmax.f32 %v3332_v61, 0.0  ;;  %v3265_v46 = vadd.f32 %v3264_v8, %v11341_v23  ;;  %v3266_v47 = vpop.f32.mrb[129].mxu1 }
 0x705   :  { %v3417_v62 = vmax.f32 %v3334_v11, 0.0  ;;  %v3267_v45 = vadd.f32 %v3266_v47, %v11341_v23  ;;  %v3268_v12 = vpop.f32.mrb[130].mxu1  ;;  %3598 = vmatpush1.bf16.msra.mxu1 %v12570_v28 }
 0x706   :  { %v3506_v50 = vpack.c.bf16 %v3416_v39, %v3410_v5  ;;  %v3269_v26 = vadd.f32 %v3268_v12, %v11339_v17  ;;  %v3270_v57 = vpop.f32.mrb[131].mxu1  ;;  %3599 = vmatprep.subr.bf16.mxu1 %v3523_v60  ;;  %v3468_v55 = vmax.f32 %v3265_v46, 0.0 }
 0x707   :  { %v3271_v41 = vadd.f32 %v3270_v57, %v11339_v17  ;;  %v3337_v29 = vpop.f32.mrb[144].mxu0  ;;  %v3507_v58 = vpack.c.bf16 %v3417_v62, %v3411_v52  ;;  %v3469_v35 = vmax.f32 %v3267_v45, 0.0 }
 0x708   :  { %v3474_v16 = vmax.f32 %v3269_v26, 0.0  ;;  %v3338_v6 = vadd.f32 %v3337_v29, %v11303_v59  ;;  %v3339_v24 = vpop.f32.mrb[145].mxu0 }
 0x709   :  { %v3475_v36 = vmax.f32 %v3271_v41, 0.0  ;;  %v3340_v61 = vadd.f32 %v3339_v24, %v11303_v59  ;;  %v3341_v7 = vpop.f32.mrb[146].mxu0  ;;  %3636 = vmatprep.subr.bf16.mxu0 %v3507_v58  ;;  %3600 = vmatpush1.bf16.msra.mxu1 %v3522_v43 }
 0x70a   :  { %v3534_v28 = vpack.c.bf16 %v3474_v16, %v3468_v55  ;;  %v3342_v11 = vadd.f32 %v3341_v7, %v11306_v0  ;;  %v3343_v60 = vpop.f32.mrb[147].mxu0  ;;  %3637 = vmatpush1.bf16.msra.mxu0 %v3506_v50  ;;  %3601 = vmatprep.subr.bf16.mxu1 %v3529_v25  ;;  %v3422_v46 = vmax.f32 %v3338_v6, 0.0 }
 0x70b   :  { %v3344_v8 = vadd.f32 %v3343_v60, %v11306_v0  ;;  %v3274_v5 = vpop.f32.mrb[132].mxu1  ;;  %v3535_v39 = vpack.c.bf16 %v3475_v36, %v3469_v35  ;;  %v3423_v45 = vmax.f32 %v3340_v61, 0.0 }
 0x70c   :  { %v3428_v47 = vmax.f32 %v3342_v11, 0.0  ;;  %v3275_v52 = vadd.f32 %v3274_v5, %v11357_v56  ;;  %v3276_v62 = vpop.f32.mrb[133].mxu1 }
 0x70d   :  { %v3429_v12 = vmax.f32 %v3344_v8, 0.0  ;;  %v3277_v26 = vadd.f32 %v3276_v62, %v11357_v56  ;;  %v3278_v43 = vpop.f32.mrb[134].mxu1  ;;  %3602 = vmatpush1.bf16.msra.mxu1 %v3528_v49 }
 0x70e   :  { %v3512_v57 = vpack.c.bf16 %v3428_v47, %v3422_v46  ;;  %v3279_v41 = vadd.f32 %v3278_v43, %v11355_v54  ;;  %v3280_v50 = vpop.f32.mrb[135].mxu1  ;;  %3603 = vmatprep.subr.bf16.mxu1 %v3535_v39  ;;  %v3480_v55 = vmax.f32 %v3275_v52, 0.0 }
 0x70f   :  { %v3281_v25 = vadd.f32 %v3280_v50, %v11355_v54  ;;  %v3347_v29 = vpop.f32.mrb[148].mxu0  ;;  %v3513_v58 = vpack.c.bf16 %v3429_v12, %v3423_v45  ;;  %v3481_v35 = vmax.f32 %v3277_v26, 0.0 }
 0x710   :  { %v3486_v16 = vmax.f32 %v3279_v41, 0.0  ;;  %v3348_v6 = vadd.f32 %v3347_v29, %v11311_v13  ;;  %v3349_v24 = vpop.f32.mrb[149].mxu0 }
 0x711   :  { %v3487_v36 = vmax.f32 %v3281_v25, 0.0  ;;  %v3350_v61 = vadd.f32 %v3349_v24, %v11311_v13  ;;  %v3351_v7 = vpop.f32.mrb[150].mxu0  ;;  %3638 = vmatprep.subr.bf16.mxu0 %v3513_v58  ;;  %3604 = vmatpush1.bf16.msra.mxu1 %v3534_v28 }
 0x712   :  { %v3540_v49 = vpack.c.bf16 %v3486_v16, %v3480_v55  ;;  %v3352_v11 = vadd.f32 %v3351_v7, %v11314_v22  ;;  %v3353_v60 = vpop.f32.mrb[151].mxu0  ;;  %3639 = vmatpush1.bf16.msra.mxu0 %v3512_v57  ;;  %v3434_v46 = vmax.f32 %v3348_v6, 0.0 }
 0x713   :  { %v3354_v8 = vadd.f32 %v3353_v60, %v11314_v22  ;;  %v3284_v5 = vpop.f32.mrb[136].mxu1  ;;  %v3541_v39 = vpack.c.bf16 %v3487_v36, %v3481_v35  ;;  %v3435_v45 = vmax.f32 %v3350_v61, 0.0 }
 0x714   :  { %v3440_v47 = vmax.f32 %v3352_v11, 0.0  ;;  %v3285_v52 = vadd.f32 %v3284_v5, %v11373_v18  ;;  %v3286_v62 = vpop.f32.mrb[137].mxu1 }
 0x715   :  { %v3441_v12 = vmax.f32 %v3354_v8, 0.0  ;;  %v3287_v26 = vadd.f32 %v3286_v62, %v11373_v18  ;;  %v3288_v43 = vpop.f32.mrb[138].mxu1  ;;  %3605 = vmatprep.subr.bf16.mxu1 %v3541_v39 }
 0x716   :  { %v3518_v28 = vpack.c.bf16 %v3440_v47, %v3434_v46  ;;  %v3289_v41 = vadd.f32 %v3288_v43, %v11371_v37  ;;  %v3290_v50 = vpop.f32.mrb[139].mxu1  ;;  %3606 = vmatpush1.bf16.msra.mxu1 %v3540_v49  ;;  %v3492_v58 = vmax.f32 %v3285_v52, 0.0 }
 0x717   :  { %v3291_v57 = vadd.f32 %v3290_v50, %v11371_v37  ;;  %v3357_v25 = vpop.f32.mrb[152].mxu0  ;;  %v3519_v29 = vpack.c.bf16 %v3441_v12, %v3435_v45  ;;  %v3493_v24 = vmax.f32 %v3287_v26, 0.0 }
 0x718   :  { %v3498_v55 = vmax.f32 %v3289_v41, 0.0  ;;  %v3358_v16 = vadd.f32 %v3357_v25, %v11319_v38  ;;  %v3359_v6 = vpop.f32.mrb[153].mxu0 }
 0x719   :  { %v3499_v35 = vmax.f32 %v3291_v57, 0.0  ;;  %v3360_v36 = vadd.f32 %v3359_v6, %v11319_v38  ;;  %v3361_v61 = vpop.f32.mrb[154].mxu0  ;;  %3640 = vmatprep.subr.bf16.mxu0 %v3519_v29  ;;  %v12627_v57 = vld [vmem:[%s15714_s1 + $0x4] ss:$8 sps:$4 sm:$0xff]  }
 0x71a   :  { %v3546_v7 = vpack.c.bf16 %v3498_v55, %v3492_v58  ;;  %v3362_v11 = vadd.f32 %v3361_v61, %v11321_v40  ;;  %v3363_v60 = vpop.f32.mrb[155].mxu0  ;;  %3641 = vmatpush1.bf16.msra.mxu0 %v3518_v28  ;;  %v3446_v5 = vmax.f32 %v3358_v16, 0.0 }
 0x71b   :  { %v3364_v49 = vadd.f32 %v3363_v60, %v11321_v40  ;;  %v3547_v8 = vpack.c.bf16 %v3499_v35, %v3493_v24  ;;  %v3447_v46 = vmax.f32 %v3360_v36, 0.0 }
 0x71c   :  { %v3452_v39 = vmax.f32 %v3362_v11, 0.0 }
 0x71d   :  { %v3453_v47 = vmax.f32 %v3364_v49, 0.0  ;;  %3607 = vmatprep.subr.bf16.mxu1 %v3547_v8 }
 0x71e   :  { %v3524_v52 = vpack.c.bf16 %v3452_v39, %v3446_v5  ;;  %3608 = vmatpush1.bf16.msra.mxu1 %v3546_v7 }
 0x71f   :  { %v3367_v62 = vpop.f32.mrb[156].mxu0  ;;  %v3525_v45 = vpack.c.bf16 %v3453_v47, %v3447_v46 }
 0x720   :  { %v3368_v12 = vadd.f32 %v3367_v62, %v11329_v51  ;;  %v3369_v26 = vpop.f32.mrb[157].mxu0 }
 0x721   :  { %v3370_v43 = vadd.f32 %v3369_v26, %v11329_v51  ;;  %v3371_v41 = vpop.f32.mrb[158].mxu0  ;;  %3626 = vmatmul.mubr.bf16.vlgmr.msra.gmra.mrb[144].mxu1 %v12582_v4  ;;  %3642 = vmatprep.subr.bf16.mxu0 %v3525_v45 }
 0x722   :  { %v3372_v28 = vadd.f32 %v3371_v41, %v11327_v33  ;;  %v3373_v50 = vpop.f32.mrb[159].mxu0  ;;  %3643 = vmatpush1.bf16.msra.mxu0 %v3524_v52  ;;  %10275 = vmatprep.mubr.msk.bf16.mxu1 %vm774_vm0, %v12627_v57  ;;  %v3458_v29 = vmax.f32 %v3368_v12, 0.0 }
 0x723   :  { %v3374_v25 = vadd.f32 %v3373_v50, %v11327_v33  ;;  %v3459_v55 = vmax.f32 %v3370_v43, 0.0 }
 0x724   :  { %v3464_v58 = vmax.f32 %v3372_v28, 0.0 }
 0x725   :  { %v3465_v16 = vmax.f32 %v3374_v25, 0.0 }
 0x726   :  { %v3530_v6 = vpack.c.bf16 %v3464_v58, %v3458_v29 }
 0x727   :  { %v3377_v24 = vpop.f32.mrb[160].mxu0  ;;  %v3531_v35 = vpack.c.bf16 %v3465_v16, %v3459_v55 }
 0x728   :  { %v3378_v36 = vadd.f32 %v3377_v24, %v11341_v23  ;;  %v3379_v61 = vpop.f32.mrb[161].mxu0 }
 0x729   :  { %v3380_v7 = vadd.f32 %v3379_v61, %v11341_v23  ;;  %v3381_v11 = vpop.f32.mrb[162].mxu0  ;;  %3644 = vmatprep.subr.bf16.mxu0 %v3531_v35 }
 0x72a   :  { %v3382_v60 = vadd.f32 %v3381_v11, %v11339_v17  ;;  %v3383_v49 = vpop.f32.mrb[163].mxu0  ;;  %3645 = vmatpush1.bf16.msra.mxu0 %v3530_v6  ;;  %v3470_v5 = vmax.f32 %v3378_v36, 0.0 }
 0x72b   :  { %v3384_v8 = vadd.f32 %v3383_v49, %v11339_v17  ;;  %v3471_v46 = vmax.f32 %v3380_v7, 0.0 }
 0x72c   :  { %v3476_v39 = vmax.f32 %v3382_v60, 0.0 }
 0x72d   :  { %v3477_v47 = vmax.f32 %v3384_v8, 0.0 }
 0x72e   :  { %v3536_v52 = vpack.c.bf16 %v3476_v39, %v3470_v5 }
 0x72f   :  { %v3387_v62 = vpop.f32.mrb[164].mxu0  ;;  %v3537_v45 = vpack.c.bf16 %v3477_v47, %v3471_v46 }
 0x730   :  { %v3388_v12 = vadd.f32 %v3387_v62, %v11357_v56  ;;  %v3389_v26 = vpop.f32.mrb[165].mxu0 }
 0x731   :  { %v3390_v43 = vadd.f32 %v3389_v26, %v11357_v56  ;;  %v3391_v41 = vpop.f32.mrb[166].mxu0  ;;  %3646 = vmatprep.subr.bf16.mxu0 %v3537_v45 }
 0x732   :  { %v3392_v28 = vadd.f32 %v3391_v41, %v11355_v54  ;;  %v3393_v50 = vpop.f32.mrb[167].mxu0  ;;  %3647 = vmatpush1.bf16.msra.mxu0 %v3536_v52  ;;  %v3482_v29 = vmax.f32 %v3388_v12, 0.0 }
 0x733   :  { %v3394_v25 = vadd.f32 %v3393_v50, %v11355_v54  ;;  %v3483_v55 = vmax.f32 %v3390_v43, 0.0 }
 0x734   :  { %v3488_v58 = vmax.f32 %v3392_v28, 0.0 }
 0x735   :  { %v3489_v16 = vmax.f32 %v3394_v25, 0.0 }
 0x736   :  { %v3542_v6 = vpack.c.bf16 %v3488_v58, %v3482_v29 }
 0x737   :  { %v3397_v24 = vpop.f32.mrb[168].mxu0  ;;  %v3543_v35 = vpack.c.bf16 %v3489_v16, %v3483_v55 }
 0x738   :  { %v3398_v36 = vadd.f32 %v3397_v24, %v11373_v18  ;;  %v3399_v61 = vpop.f32.mrb[169].mxu0 }
 0x739   :  { %v3400_v7 = vadd.f32 %v3399_v61, %v11373_v18  ;;  %v3401_v11 = vpop.f32.mrb[170].mxu0  ;;  %3648 = vmatprep.subr.bf16.mxu0 %v3543_v35 }
 0x73a   :  { %v3402_v60 = vadd.f32 %v3401_v11, %v11371_v37  ;;  %v3403_v49 = vpop.f32.mrb[171].mxu0  ;;  %3649 = vmatpush1.bf16.msra.mxu0 %v3542_v6  ;;  %v3494_v5 = vmax.f32 %v3398_v36, 0.0 }
 0x73b   :  { %v3404_v8 = vadd.f32 %v3403_v49, %v11371_v37  ;;  %v3495_v46 = vmax.f32 %v3400_v7, 0.0 }
 0x73c   :  { %v3500_v39 = vmax.f32 %v3402_v60, 0.0 }
 0x73d   :  { %v3501_v47 = vmax.f32 %v3404_v8, 0.0 }
 0x73e   :  { %v3548_v52 = vpack.c.bf16 %v3500_v39, %v3494_v5 }
 0x73f   :  { %v3549_v62 = vpack.c.bf16 %v3501_v47, %v3495_v46 }
 0x741   :  { %3650 = vmatprep.subr.bf16.mxu0 %v3549_v62 }
 0x742   :  { %3651 = vmatpush1.bf16.msra.mxu0 %v3548_v52 }
 0x745   :  { %3669 = vmatmul.mubr.bf16.vlgmr.msra.gmra.mrb[172].mxu0 %v12582_v4 }
 0x746   :  { %10283 = vmatprep.mubr.msk.bf16.mxu0 %vm774_vm0, %v12627_v57 }
 0x7cf   :  { %v3584_v45 = vpop.f32.mrb[140].mxu1 }
 0x7d0   :  { %v3585_v12 = vadd.f32 %v3584_v45, %v11479_v31  ;;  %v3586_v26 = vpop.f32.mrb[141].mxu1 }
 0x7d1   :  { %v3588_v43 = vpop.f32.mrb[142].mxu1  ;;  %v3587_v4 = vadd.f32 %v3586_v26, %v11479_v31 }
 0x7d2   :  { %v3691_v41 = vmul.f32 %v3585_v12, %v11477_v30  ;;  %v3589_v28 = vadd.f32 %v3588_v43, %v11482_v42  ;;  %v3590_v50 = vpop.f32.mrb[143].mxu1 }
 0x7d3   :  { %v3591_v29 = vadd.f32 %v3590_v50, %v11482_v42  ;;  %v3692_v24 = vmul.f32 %v3587_v4, %v11495_v44 }
 0x7d4   :  { %v3697_v25 = vmul.f32 %v3589_v28, %v11477_v30  ;;  %v12653_v58 = vadd.f32 %v3691_v41, %v12099_v48 }
 0x7d5   :  { %v3698_v6 = vmul.f32 %v3591_v29, %v11495_v44 }
 0x7d6   :  { %v12657_v55 = vadd.f32 %v3697_v25, %v12103_v1  ;;  %v12673_v1 = vadd.f32 %v3692_v24, %v12119_v15 }
 0x7d7   :  { %v12670_v48 = vadd.f32 %v3698_v6, %v12116_v27 }
 0x7d8   :  { %v12661_v16 = vpack.c.bf16 %v12657_v55, %v12653_v58 }
 0x7d9   :  { %v12681_v35 = vpack.c.bf16 %v12670_v48, %v12673_v1 }
 0x7da   :  { %3821 = vrot.lane.b32.xlu0 %v12661_v16, %s10725_s30  ;;  %3775 = vrot.lane.b32.xlu1 %v12661_v16, %s10724_s29 }
 0x7de   :  { %3913 = vrot.lane.b32.xlu0 %v12661_v16, %s10727_s13  ;;  %3867 = vrot.lane.b32.xlu1 %v12661_v16, %s10726_s12 }
 0x7e2   :  { %3777 = vrot.lane.b32.xlu0 %v12681_v35, %s10724_s29  ;;  %3969 = vrot.lane.b32.xlu1 %v12661_v16, %s10728_s18 }
 0x7e6   :  { %4015 = vrot.lane.b32.xlu0 %v12661_v16, %s10729_s19  ;;  %3823 = vrot.lane.b32.xlu1 %v12681_v35, %s10725_s30 }
 0x7ea   :  { %3869 = vrot.lane.b32.xlu0 %v12681_v35, %s10726_s12  ;;  %4061 = vrot.lane.b32.xlu1 %v12661_v16, %s10730_s20 }
 0x7ee   :  { %4017 = vrot.lane.b32.xlu0 %v12681_v35, %s10729_s19  ;;  %3915 = vrot.lane.b32.xlu1 %v12681_v35, %s10727_s13 }
 0x7f2   :  { %4109 = vrot.lane.b32.xlu0 %v12681_v35, %s10731_s27  ;;  %3971 = vrot.lane.b32.xlu1 %v12681_v35, %s10728_s18 }
 0x7f4   :  { %v3627_v27 = vpop.f32.mrb[144].mxu1 }
 0x7f5   :  { %v3628_v15 = vadd.f32 %v3627_v27, %v11479_v31  ;;  %v3629_v36 = vpop.f32.mrb[145].mxu1 }
 0x7f6   :  { %v3631_v61 = vpop.f32.mrb[146].mxu1  ;;  %4063 = vrot.lane.b32.xlu1 %v12681_v35, %s10730_s20  ;;  %v3630_v39 = vadd.f32 %v3629_v36, %v11479_v31 }
 0x7f7   :  { %v3693_v7 = vmul.f32 %v3628_v15, %v11549_v63  ;;  %v3632_v11 = vadd.f32 %v3631_v61, %v11482_v42  ;;  %v3633_v60 = vpop.f32.mrb[147].mxu1  ;;  %v15787_v15 = vld [vmem:[#allocation11_spill] sm:$0xff]  ;;  %v15789_v61 = vld [vmem:[#allocation13_spill] sm:$0xff] }
 0x7f8   :  { %v3634_v8 = vadd.f32 %v3633_v60, %v11482_v42  ;;  %v3694_v62 = vmul.f32 %v3630_v39, %v11569_v3  ;;  %v3820_v60 = vpop.permute.xlu0 %3819 }
 0x7f9   :  { %v3699_v49 = vmul.f32 %v3632_v11, %v11549_v63  ;;  %v12711_v5 = vadd.f32 %v3693_v7, %v12155_v9 }
 0x7fa   :  { %v3700_v52 = vmul.f32 %v3634_v8, %v11569_v3  ;;  %v15791_v8 = vld [vmem:[#allocation9_spill] sm:$0xff] }
 0x7fb   :  { %v12715_v46 = vadd.f32 %v3699_v49, %v12159_v10  ;;  %v12731_v10 = vadd.f32 %v3694_v62, %v12177_v21  ;;  %v3774_v49 = vpop.permute.xlu1 %3773  ;;  %v15792_v62 = vld [vmem:[#allocation8_spill] sm:$0xff] }
 0x7fc   :  { %v12728_v9 = vadd.f32 %v3700_v52, %v12174_v20  ;;  %v3912_v39 = vpop.permute.xlu0 %3911 }
 0x7fd   :  { %v12719_v47 = vpack.c.bf16 %v12715_v46, %v12711_v5 }
 0x7fe   :  { %v12739_v45 = vpack.c.bf16 %v12728_v9, %v12731_v10 }
 0x7ff   :  { %4019 = vrot.lane.b32.xlu1 %v12719_v47, %s10729_s19  ;;  %3973 = vrot.lane.b32.xlu0 %v12719_v47, %s10728_s18  ;;  %v3866_v52 = vpop.permute.xlu1 %3865 }
 0x803   :  { %4111 = vrot.lane.b32.xlu1 %v12719_v47, %s10731_s27  ;;  %4107 = vrot.lane.b32.xlu0 %v12661_v16, %s10731_s27 }
 0x807   :  { %3781 = vrot.lane.b32.xlu1 %v12739_v45, %s10724_s29  ;;  %4065 = vrot.lane.b32.xlu0 %v12719_v47, %s10730_s20 }
 0x80b   :  { %3825 = vrot.lane.b32.xlu1 %v12719_v47, %s10725_s30  ;;  %3779 = vrot.lane.b32.xlu0 %v12719_v47, %s10724_s29 }
 0x80f   :  { %3871 = vrot.lane.b32.xlu1 %v12719_v47, %s10726_s12  ;;  %3827 = vrot.lane.b32.xlu0 %v12739_v45, %s10725_s30 }
 0x813   :  { %3917 = vrot.lane.b32.xlu1 %v12719_v47, %s10727_s13  ;;  %3873 = vrot.lane.b32.xlu0 %v12739_v45, %s10726_s12 }
 0x817   :  { %3975 = vrot.lane.b32.xlu1 %v12739_v45, %s10728_s18  ;;  %3919 = vrot.lane.b32.xlu0 %v12739_v45, %s10727_s13 }
 0x818   :  { %v3670_v20 = vpop.f32.mrb[172].mxu0 }
 0x819   :  { %v3671_v21 = vadd.f32 %v3670_v20, %v11479_v31  ;;  %v3672_v12 = vpop.f32.mrb[173].mxu0 }
 0x81a   :  { %v3674_v26 = vpop.f32.mrb[174].mxu0 }
 0x81b   :  { %v3695_v43 = vmul.f32 %v3671_v21, %v11623_v53  ;;  %v3675_v41 = vadd.f32 %v3674_v26, %v11482_v42  ;;  %4021 = vrot.lane.b32.xlu1 %v12739_v45, %s10729_s19  ;;  %v3676_v28 = vpop.f32.mrb[175].mxu0 }
 0x81c   :  { %v3677_v6 = vadd.f32 %v3676_v28, %v11482_v42 }
 0x81d   :  { %v3701_v50 = vmul.f32 %v3675_v41, %v11623_v53  ;;  %v12768_v25 = vadd.f32 %v3695_v43, %v12216_v2  ;;  %v3673_v2 = vadd.f32 %v3672_v12, %v11479_v31 }
 0x81f   :  { %v12771_v29 = vadd.f32 %v3701_v50, %v12219_v34  ;;  %4067 = vrot.lane.b32.xlu1 %v12739_v45, %s10730_s20  ;;  %v15786_v34 = vld [vmem:[#allocation12_spill] sm:$0xff] }
 0x820   :  { %v3702_v24 = vmul.f32 %v3677_v6, %v15786_v34  ;;  %v3696_v27 = vmul.f32 %v3673_v2, %v15786_v34 }
 0x821   :  { %15785 = vst [vmem:[#allocation14_spill] sm:$0xff] %v12771_v29  ;;  %v12777_v4 = vpack.c.bf16 %v12771_v29, %v12768_v25  ;;  %v12994_v29 = vld [vmem:[%s15714_s1 + $0x50] ss:$8 sps:$4 sm:$0xff]  }
 0x822   :  { %v12796_v36 = vadd.f32 %v3702_v24, %v15787_v15  ;;  %v12799_v7 = vadd.f32 %v3696_v27, %v15789_v61 }
 0x823   :  { %4113 = vrot.lane.b32.xlu1 %v12739_v45, %s10731_s27  ;;  %3977 = vrot.lane.b32.xlu0 %v12777_v4, %s10728_s18 }
 0x824   :  { %15788 = vst [vmem:[#allocation11_spill] sm:$0xff] %v12796_v36  ;;  %15790 = vst [vmem:[#allocation13_spill] sm:$0xff] %v12799_v7  ;;  %v12807_v11 = vpack.c.bf16 %v12796_v36, %v12799_v7  ;;  %v12947_v7 = vld [vmem:[%s15714_s1 + $0x30] ss:$8 sps:$4 sm:$0xff]  }
 0x827   :  { %3783 = vrot.lane.b32.xlu1 %v12777_v4, %s10724_s29  ;;  %4023 = vrot.lane.b32.xlu0 %v12777_v4, %s10729_s19 }
 0x82b   :  { %3829 = vrot.lane.b32.xlu1 %v12777_v4, %s10725_s30  ;;  %4069 = vrot.lane.b32.xlu0 %v12777_v4, %s10730_s20 }
 0x82f   :  { %3875 = vrot.lane.b32.xlu1 %v12777_v4, %s10726_s12  ;;  %4115 = vrot.lane.b32.xlu0 %v12777_v4, %s10731_s27 }
 0x833   :  { %3921 = vrot.lane.b32.xlu1 %v12777_v4, %s10727_s13  ;;  %3785 = vrot.lane.b32.xlu0 %v12807_v11, %s10724_s29 }
 0x837   :  { %3979 = vrot.lane.b32.xlu1 %v12807_v11, %s10728_s18  ;;  %3831 = vrot.lane.b32.xlu0 %v12807_v11, %s10725_s30 }
 0x83b   :  { %4025 = vrot.lane.b32.xlu1 %v12807_v11, %s10729_s19  ;;  %3877 = vrot.lane.b32.xlu0 %v12807_v11, %s10726_s12 }
 0x83f   :  { %4071 = vrot.lane.b32.xlu1 %v12807_v11, %s10730_s20  ;;  %3923 = vrot.lane.b32.xlu0 %v12807_v11, %s10727_s13 }
 0x843   :  { %4117 = vrot.lane.b32.xlu1 %v12807_v11, %s10731_s27  ;;  %3981 = vrot.lane.b32.xlu0 %v15791_v8, %s10728_s18 }
 0x847   :  { %4027 = vrot.lane.b32.xlu0 %v15791_v8, %s10729_s19  ;;  %4899 = vrot.lane.b32.xlu1 %v15792_v62, %s10724_s29 }
 0x84b   :  { %4073 = vrot.lane.b32.xlu0 %v15791_v8, %s10730_s20  ;;  %4991 = vrot.lane.b32.xlu1 %v15792_v62, %s10726_s12 }
 0x84c   :  { %v3822_v20 = vpop.permute.xlu0 %3821  ;;  %v3776_v21 = vpop.permute.xlu1 %3775 }
 0x84d   :  { %v3787_v50 = vsel %vm208_vm1, %v3774_v49, %v3776_v21  ;;  %v3833_v27 = vsel %vm255_vm2, %v3820_v60, %v3822_v20 }
 0x84f   :  { %4119 = vrot.lane.b32.xlu0 %v15791_v8, %s10731_s27 }
 0x850   :  { %v3914_v12 = vpop.permute.xlu0 %3913  ;;  %v3868_v26 = vpop.permute.xlu1 %3867 }
 0x853   :  { %4945 = vrot.lane.b32.xlu0 %v15792_v62, %s10725_s30 }
 0x854   :  { %v3778_v43 = vpop.permute.xlu0 %3777  ;;  %v3970_v41 = vpop.permute.xlu1 %3969 }
 0x855   :  { %v3788_v28 = vsel %vm208_vm1, %v3776_v21, %v3778_v43 }
 0x856   :  { %4193 = vmatprep.subr.bf16.mxu1 %v3788_v28  ;;  %v3879_v28 = vsel %vm302_vm3, %v3866_v52, %v3868_v26 }
 0x857   :  { %4194 = vmatpush1.bf16.msra.mxu1 %v3787_v50  ;;  %5037 = vrot.lane.b32.xlu0 %v15792_v62, %s10727_s13  ;;  %v3925_v50 = vsel %vm349_vm4, %v3912_v39, %v3914_v12 }
 0x858   :  { %v4016_v6 = vpop.permute.xlu0 %4015  ;;  %v3824_v2 = vpop.permute.xlu1 %3823 }
 0x859   :  { %v3834_v24 = vsel %vm255_vm2, %v3822_v20, %v3824_v2 }
 0x85a   :  { %4195 = vmatprep.subr.bf16.mxu1 %v3834_v24 }
 0x85b   :  { %4196 = vmatpush1.bf16.msra.mxu1 %v3833_v27 }
 0x85c   :  { %v3870_v15 = vpop.permute.xlu0 %3869  ;;  %v4062_v61 = vpop.permute.xlu1 %4061 }
 0x85d   :  { %v3880_v8 = vsel %vm302_vm3, %v3868_v26, %v3870_v15 }
 0x85e   :  { %4197 = vmatprep.subr.bf16.mxu1 %v3880_v8 }
 0x85f   :  { %4198 = vmatpush1.bf16.msra.mxu1 %v3879_v28 }
 0x860   :  { %v3916_v49 = vpop.permute.xlu1 %3915  ;;  %v4018_v24 = vpop.permute.xlu0 %4017 }
 0x861   :  { %v3926_v21 = vsel %vm349_vm4, %v3914_v12, %v3916_v49 }
 0x862   :  { %4199 = vmatprep.subr.bf16.mxu1 %v3926_v21 }
 0x863   :  { %4200 = vmatpush1.bf16.msra.mxu1 %v3925_v50 }
 0x864   :  { %4201 = vmatprep.subr.bf16.mxu1 %v12681_v35  ;;  %v3972_v60 = vpop.permute.xlu1 %3971  ;;  %v4110_v20 = vpop.permute.xlu0 %4109 }
 0x865   :  { %v3983_v26 = vsel %vm408_vm5, %v3970_v41, %v3972_v60 }
 0x867   :  { %4202 = vmatpush1.bf16.msra.mxu1 %v12661_v16  ;;  %v4029_v16 = vsel %vm455_vm6, %v4016_v6, %v4018_v24 }
 0x868   :  { %v4064_v27 = vpop.permute.xlu1 %4063 }
 0x869   :  { %v4075_v41 = vsel %vm502_vm7, %v4062_v61, %v4064_v27 }
 0x871   :  { %v12853_v62 = vpop.permute.xlu0 %3973  ;;  %v12855_v8 = vpop.permute.xlu1 %4019 }
 0x872   :  { %v3984_v52 = vsel %vm408_vm5, %v3972_v60, %v12853_v62  ;;  %v4030_v35 = vsel %vm455_vm6, %v4018_v24, %v12855_v8 }
 0x873   :  { %4203 = vmatprep.subr.bf16.mxu1 %v3984_v52 }
 0x874   :  { %4204 = vmatpush1.bf16.msra.mxu1 %v3983_v26 }
 0x875   :  { %v4108_v39 = vpop.permute.xlu0 %4107  ;;  %4205 = vmatprep.subr.bf16.mxu1 %v4030_v35  ;;  %v12862_v12 = vpop.permute.xlu1 %4111 }
 0x876   :  { %v4122_v60 = vsel %vm549_vm8, %v4110_v20, %v12862_v12  ;;  %v4121_v35 = vsel %vm549_vm8, %v4108_v39, %v4110_v20  ;;  %v12892_v20 = vld [vmem:[%s15714_s1 + $0x14] ss:$8 sps:$4 sm:$0xff]  }
 0x878   :  { %4206 = vmatpush1.bf16.msra.mxu1 %v4029_v16 }
 0x879   :  { %v12865_v28 = vpop.permute.xlu0 %4065  ;;  %v12867_v21 = vpop.permute.xlu1 %3781 }
 0x87a   :  { %v4076_v50 = vsel %vm502_vm7, %v4064_v27, %v12865_v28 }
 0x87b   :  { %4207 = vmatprep.subr.bf16.mxu1 %v4076_v50  ;;  %v12885_v50 = vld [vmem:[%s15714_s1] ss:$8 sps:$4 sm:$0xff]  }
 0x87c   :  { %4208 = vmatpush1.bf16.msra.mxu1 %v4075_v41 }
 0x87d   :  { %v3780_v52 = vpop.permute.xlu0 %3779  ;;  %4209 = vmatprep.subr.bf16.mxu1 %v4122_v60  ;;  %v3826_v26 = vpop.permute.xlu1 %3825 }
 0x87e   :  { %v3790_v6 = vsel %vm208_vm1, %v3780_v52, %v12867_v21  ;;  %v3789_v24 = vsel %vm208_vm1, %v3778_v43, %v3780_v52  ;;  %v3835_v43 = vsel %vm255_vm2, %v3824_v2, %v3826_v26 }
 0x87f   :  { %4306 = vmatprep.subr.bf16.mxu0 %v3790_v6 }
 0x880   :  { %4210 = vmatpush1.bf16.msra.mxu1 %v4121_v35  ;;  %4307 = vmatpush1.bf16.msra.mxu0 %v3789_v24  ;;  %v12908_v24 = vld [vmem:[%s15714_s1 + $0x10] ss:$8 sps:$4 sm:$0xff]  }
 0x881   :  { %v12878_v16 = vpop.permute.xlu0 %3827  ;;  %v3872_v61 = vpop.permute.xlu1 %3871 }
 0x882   :  { %v3836_v27 = vsel %vm255_vm2, %v3826_v26, %v12878_v16  ;;  %v3881_v52 = vsel %vm302_vm3, %v3870_v15, %v3872_v61  ;;  %v12915_v15 = vld [vmem:[%s15714_s1 + $0x24] ss:$8 sps:$4 sm:$0xff]  }
 0x883   :  { %4226 = vmatmul.mubr.bf16.vlgmr.msra.gmra.mrb[148].mxu1 %v12885_v50  ;;  %4308 = vmatprep.subr.bf16.mxu0 %v3836_v27 }
 0x884   :  { %4309 = vmatpush1.bf16.msra.mxu0 %v3835_v43  ;;  %10276 = vmatprep.mubr.msk.bf16.mxu1 %vm774_vm0, %v12892_v20  ;;  %v12924_v43 = vld [vmem:[%s15714_s1 + $0x20] ss:$8 sps:$4 sm:$0xff]  }
 0x885   :  { %v12896_v39 = vpop.permute.xlu0 %3873  ;;  %v3918_v41 = vpop.permute.xlu1 %3917 }
 0x886   :  { %v3882_v60 = vsel %vm302_vm3, %v3872_v61, %v12896_v39  ;;  %v3927_v35 = vsel %vm349_vm4, %v3916_v49, %v3918_v41  ;;  %v12930_v49 = vld [vmem:[%s15714_s1 + $0x34] ss:$8 sps:$4 sm:$0xff]  }
 0x887   :  { %4310 = vmatprep.subr.bf16.mxu0 %v3882_v60 }
 0x888   :  { %4311 = vmatpush1.bf16.msra.mxu0 %v3881_v52 }
 0x889   :  { %v12901_v2 = vpop.permute.xlu0 %3919  ;;  %v3976_v26 = vpop.permute.xlu1 %3975 }
 0x88a   :  { %v3928_v6 = vsel %vm349_vm4, %v3918_v41, %v12901_v2  ;;  %v3985_v60 = vsel %vm408_vm5, %v12853_v62, %v3976_v26  ;;  %v12955_v62 = vld [vmem:[%s15714_s1 + $0x44] ss:$8 sps:$4 sm:$0xff]  }
 0x88b   :  { %4236 = vmatmul.mubr.bf16.gmra.mrb[152].mxu1 %v12908_v24  ;;  %4312 = vmatprep.subr.bf16.mxu0 %v3928_v6 }
 0x88c   :  { %4313 = vmatpush1.bf16.msra.mxu0 %v3927_v35  ;;  %10277 = vmatprep.mubr.msk.bf16.mxu1 %vm774_vm0, %v12915_v15 }
 0x88d   :  { %4314 = vmatprep.subr.bf16.mxu0 %v12739_v45  ;;  %v4022_v61 = vpop.permute.xlu1 %4021 }
 0x890   :  { %4315 = vmatpush1.bf16.msra.mxu0 %v12719_v47 }
 0x891   :  { %v4068_v27 = vpop.permute.xlu1 %4067 }
 0x893   :  { %4246 = vmatmul.mubr.bf16.gmra.mrb[156].mxu1 %v12924_v43 }
 0x894   :  { %10278 = vmatprep.mubr.msk.bf16.mxu1 %vm774_vm0, %v12930_v49 }
 0x895   :  { %v12934_v45 = vpop.permute.xlu0 %3977  ;;  %v4114_v41 = vpop.permute.xlu1 %4113 }
 0x896   :  { %v3986_v47 = vsel %vm408_vm5, %v3976_v26, %v12934_v45 }
 0x897   :  { %4316 = vmatprep.subr.bf16.mxu0 %v3986_v47  ;;  %v4031_v47 = vsel %vm455_vm6, %v12855_v8, %v4022_v61 }
 0x898   :  { %4317 = vmatpush1.bf16.msra.mxu0 %v3985_v60 }
 0x899   :  { %v12940_v52 = vpop.permute.xlu0 %4023  ;;  %v3784_v6 = vpop.permute.xlu1 %3783 }
 0x89a   :  { %v4032_v35 = vsel %vm455_vm6, %v4022_v61, %v12940_v52 }
 0x89b   :  { %4256 = vmatmul.mubr.bf16.gmra.mrb[160].mxu1 %v12947_v7  ;;  %4318 = vmatprep.subr.bf16.mxu0 %v4032_v35  ;;  %v4077_v35 = vsel %vm502_vm7, %v12865_v28, %v4068_v27  ;;  %v12980_v28 = vld [vmem:[%s15714_s1 + $0x54] ss:$8 sps:$4 sm:$0xff]  }
 0x89c   :  { %4319 = vmatpush1.bf16.msra.mxu0 %v4031_v47  ;;  %10279 = vmatprep.mubr.msk.bf16.mxu1 %vm774_vm0, %v12955_v62  ;;  %v12972_v47 = vld [vmem:[%s15714_s1 + $0x40] ss:$8 sps:$4 sm:$0xff]  }
 0x89d   :  { %v12959_v26 = vpop.permute.xlu0 %4069  ;;  %v3830_v36 = vpop.permute.xlu1 %3829 }
 0x89e   :  { %v4078_v60 = vsel %vm502_vm7, %v4068_v27, %v12959_v26 }
 0x89f   :  { %4320 = vmatprep.subr.bf16.mxu0 %v4078_v60  ;;  %v4123_v60 = vsel %vm549_vm8, %v12862_v12, %v4114_v41 }
 0x8a0   :  { %4321 = vmatpush1.bf16.msra.mxu0 %v4077_v35 }
 0x8a1   :  { %v12965_v8 = vpop.permute.xlu0 %4115  ;;  %v3876_v27 = vpop.permute.xlu1 %3875 }
 0x8a2   :  { %v4124_v61 = vsel %vm549_vm8, %v4114_v41, %v12965_v8 }
 0x8a3   :  { %4266 = vmatmul.mubr.bf16.gmra.mrb[164].mxu1 %v12972_v47  ;;  %4322 = vmatprep.subr.bf16.mxu0 %v4124_v61  ;;  %v3791_v61 = vsel %vm208_vm1, %v12867_v21, %v3784_v6  ;;  %v13002_v21 = vld [vmem:[%s15714_s1 + $0x64] ss:$8 sps:$4 sm:$0xff]  }
 0x8a4   :  { %4323 = vmatpush1.bf16.msra.mxu0 %v4123_v60  ;;  %10280 = vmatprep.mubr.msk.bf16.mxu1 %vm774_vm0, %v12980_v28 }
 0x8a5   :  { %v3786_v35 = vpop.permute.xlu0 %3785  ;;  %v3922_v60 = vpop.permute.xlu1 %3921 }
 0x8a6   :  { %v3792_v34 = vsel %vm208_vm1, %v3784_v6, %v3786_v35 }
 0x8a7   :  { %4339 = vmatmul.mubr.bf16.vlgmr.msra.gmra.mrb[176].mxu0 %v12885_v50  ;;  %4419 = vmatprep.subr.bf16.mxu1 %v3792_v34  ;;  %v3837_v34 = vsel %vm255_vm2, %v12878_v16, %v3830_v36 }
 0x8a8   :  { %4420 = vmatpush1.bf16.msra.mxu1 %v3791_v61  ;;  %10284 = vmatprep.mubr.msk.bf16.mxu0 %vm774_vm0, %v12892_v20  ;;  %v3883_v61 = vsel %vm302_vm3, %v12896_v39, %v3876_v27  ;;  %v10629_v39 = vld [vmem:[%s15714_s1 + $0x74] ss:$8 sps:$4 sm:$0xff]  }
 0x8a9   :  { %v3832_v12 = vpop.permute.xlu0 %3831 }
 0x8aa   :  { %v3838_v41 = vsel %vm255_vm2, %v3830_v36, %v3832_v12  ;;  %v3980_v36 = vpop.permute.xlu1 %3979 }
 0x8ab   :  { %4276 = vmatmul.mubr.bf16.gmra.mrb[168].mxu1 %v12994_v29  ;;  %4421 = vmatprep.subr.bf16.mxu1 %v3838_v41  ;;  %v10628_v41 = vld [vmem:[%s15714_s1 + $0x60] ss:$8 sps:$4 sm:$0xff]  }
 0x8ac   :  { %4422 = vmatpush1.bf16.msra.mxu1 %v3837_v34  ;;  %10281 = vmatprep.mubr.msk.bf16.mxu1 %vm774_vm0, %v13002_v21  ;;  %v3929_v34 = vsel %vm349_vm4, %v12901_v2, %v3922_v60 }
 0x8ad   :  { %v3878_v6 = vpop.permute.xlu0 %3877 }
 0x8ae   :  { %v3884_v35 = vsel %vm302_vm3, %v3876_v27, %v3878_v6  ;;  %v4026_v6 = vpop.permute.xlu1 %4025 }
 0x8af   :  { %4349 = vmatmul.mubr.bf16.gmra.mrb[180].mxu0 %v12908_v24  ;;  %4423 = vmatprep.subr.bf16.mxu1 %v3884_v35 }
 0x8b0   :  { %4424 = vmatpush1.bf16.msra.mxu1 %v3883_v61  ;;  %10285 = vmatprep.mubr.msk.bf16.mxu0 %vm774_vm0, %v12915_v15 }
 0x8b1   :  { %v3924_v16 = vpop.permute.xlu0 %3923 }
 0x8b2   :  { %v3930_v12 = vsel %vm349_vm4, %v3922_v60, %v3924_v16  ;;  %v10630_v60 = vld [vmem:[%s15714_s1 + $0x70] ss:$8 sps:$4 sm:$0xff]  }
 0x8b3   :  { %4286 = vmatmul.mubr.bf16.gmra.mrb[172].mxu1 %v10628_v41  ;;  %4425 = vmatprep.subr.bf16.mxu1 %v3930_v12  ;;  %v4033_v12 = vsel %vm455_vm6, %v12940_v52, %v4026_v6 }
 0x8b4   :  { %4426 = vmatpush1.bf16.msra.mxu1 %v3929_v34  ;;  %10282 = vmatprep.mubr.msk.bf16.mxu1 %vm774_vm0, %v10629_v39 }
 0x8b5   :  { %v3982_v27 = vpop.permute.xlu0 %3981  ;;  %4427 = vmatprep.subr.bf16.mxu1 %v12807_v11  ;;  %v3987_v11 = vsel %vm408_vm5, %v12934_v45, %v3980_v36 }
 0x8b6   :  { %v3988_v35 = vsel %vm408_vm5, %v3980_v36, %v3982_v27 }
 0x8b7   :  { %4359 = vmatmul.mubr.bf16.gmra.mrb[184].mxu0 %v12924_v43 }
 0x8b8   :  { %4428 = vmatpush1.bf16.msra.mxu1 %v12777_v4  ;;  %10286 = vmatprep.mubr.msk.bf16.mxu0 %vm774_vm0, %v12930_v49  ;;  %v4072_v4 = vpop.permute.xlu1 %4071 }
 0x8b9   :  { %v4028_v2 = vpop.permute.xlu0 %4027  ;;  %4429 = vmatprep.subr.bf16.mxu1 %v3988_v35 }
 0x8ba   :  { %v4034_v61 = vsel %vm455_vm6, %v4026_v6, %v4028_v2 }
 0x8bb   :  { %4296 = vmatmul.mubr.bf16.gmra.mrb[176].mxu1 %v10630_v60 }
 0x8bc   :  { %4430 = vmatpush1.bf16.msra.mxu1 %v3987_v11  ;;  %10291 = vmatprep.mubr.msk.bf16.mxu1 %vm774_vm0, %v12627_v57  ;;  %v4118_v36 = vpop.permute.xlu1 %4117  ;;  %v4079_v57 = vsel %vm502_vm7, %v12959_v26, %v4072_v4 }
 0x8bd   :  { %v4074_v16 = vpop.permute.xlu0 %4073  ;;  %4431 = vmatprep.subr.bf16.mxu1 %v4034_v61  ;;  %v4125_v52 = vsel %vm549_vm8, %v12965_v8, %v4118_v36 }
 0x8be   :  { %v4080_v34 = vsel %vm502_vm7, %v4072_v4, %v4074_v16 }
 0x8bf   :  { %4369 = vmatmul.mubr.bf16.gmra.mrb[188].mxu0 %v12947_v7 }
 0x8c0   :  { %4432 = vmatpush1.bf16.msra.mxu1 %v4033_v12  ;;  %10287 = vmatprep.mubr.msk.bf16.mxu0 %vm774_vm0, %v12955_v62 }
 0x8c1   :  { %v4120_v45 = vpop.permute.xlu0 %4119  ;;  %4433 = vmatprep.subr.bf16.mxu1 %v4080_v34 }
 0x8c2   :  { %v4126_v27 = vsel %vm549_vm8, %v4118_v36, %v4120_v45 }
 0x8c4   :  { %4434 = vmatpush1.bf16.msra.mxu1 %v4079_v57 }
 0x8c5   :  { %4435 = vmatprep.subr.bf16.mxu1 %v4126_v27 }
 0x8c7   :  { %4379 = vmatmul.mubr.bf16.gmra.mrb[192].mxu0 %v12972_v47 }
 0x8c8   :  { %4436 = vmatpush1.bf16.msra.mxu1 %v4125_v52  ;;  %10288 = vmatprep.mubr.msk.bf16.mxu0 %vm774_vm0, %v12980_v28 }
 0x8cb   :  { %4452 = vmatmul.mubr.bf16.vlgmr.msra.gmra.mrb[180].mxu1 %v12885_v50 }
 0x8cc   :  { %10292 = vmatprep.mubr.msk.bf16.mxu1 %vm774_vm0, %v12892_v20 }
 0x8cf   :  { %4389 = vmatmul.mubr.bf16.gmra.mrb[196].mxu0 %v12994_v29 }
 0x8d0   :  { %10289 = vmatprep.mubr.msk.bf16.mxu0 %vm774_vm0, %v13002_v21 }
 0x8d3   :  { %4462 = vmatmul.mubr.bf16.gmra.mrb[184].mxu1 %v12908_v24 }
 0x8d4   :  { %10293 = vmatprep.mubr.msk.bf16.mxu1 %vm774_vm0, %v12915_v15 }
 0x8d7   :  { %4399 = vmatmul.mubr.bf16.gmra.mrb[200].mxu0 %v10628_v41 }
 0x8d8   :  { %10290 = vmatprep.mubr.msk.bf16.mxu0 %vm774_vm0, %v10629_v39 }
 0x8db   :  { %4472 = vmatmul.mubr.bf16.gmra.mrb[188].mxu1 %v12924_v43 }
 0x8dc   :  { %10294 = vmatprep.mubr.msk.bf16.mxu1 %vm774_vm0, %v12930_v49 }
 0x8df   :  { %4409 = vmatmul.mubr.bf16.gmra.mrb[204].mxu0 %v10630_v60 }
 0x8e0   :  { %4708 = vmatprep.mubr.bf16.mxu0 %v15776_v19 }
 0x8e3   :  { %4482 = vmatmul.mubr.bf16.gmra.mrb[192].mxu1 %v12947_v7 }
 0x8e4   :  { %10295 = vmatprep.mubr.msk.bf16.mxu1 %vm774_vm0, %v12955_v62 }
 0x8eb   :  { %4492 = vmatmul.mubr.bf16.gmra.mrb[196].mxu1 %v12972_v47 }
 0x8ec   :  { %10296 = vmatprep.mubr.msk.bf16.mxu1 %vm774_vm0, %v12980_v28 }
 0x8f3   :  { %4502 = vmatmul.mubr.bf16.gmra.mrb[200].mxu1 %v12994_v29 }
 0x8f4   :  { %10297 = vmatprep.mubr.msk.bf16.mxu1 %vm774_vm0, %v13002_v21 }
 0x8fb   :  { %4512 = vmatmul.mubr.bf16.gmra.mrb[204].mxu1 %v10628_v41 }
 0x8fc   :  { %10298 = vmatprep.mubr.msk.bf16.mxu1 %vm774_vm0, %v10629_v39 }
 0x903   :  { %4522 = vmatmul.mubr.bf16.gmra.mrb[208].mxu1 %v10630_v60 }
 0x904   :  { %4794 = vmatprep.mubr.bf16.mxu1 %v15776_v19 }
 0x956   :  { %v4227_v7 = vpop.f32.mrb[148].mxu1 }
 0x957   :  { %v4228_v50 = vadd.f32 %v4227_v7, %v11295_v14  ;;  %v4229_v20 = vpop.f32.mrb[149].mxu1 }
 0x958   :  { %v4230_v24 = vadd.f32 %v4229_v20, %v11295_v14  ;;  %v4231_v15 = vpop.f32.mrb[150].mxu1 }
 0x959   :  { %v4232_v43 = vadd.f32 %v4231_v15, %v11297_v32  ;;  %v4233_v49 = vpop.f32.mrb[151].mxu1  ;;  %v4532_v62 = vmax.f32 %v4228_v50, 0.0 }
 0x95a   :  { %v4234_v29 = vadd.f32 %v4233_v49, %v11297_v32  ;;  %v4533_v8 = vmax.f32 %v4230_v24, 0.0 }
 0x95b   :  { %v4538_v26 = vmax.f32 %v4232_v43, 0.0 }
 0x95c   :  { %v4539_v47 = vmax.f32 %v4234_v29, 0.0 }
 0x95d   :  { %v4628_v28 = vpack.c.bf16 %v4538_v26, %v4532_v62 }
 0x95e   :  { %v4237_v21 = vpop.f32.mrb[152].mxu1  ;;  %v4629_v41 = vpack.c.bf16 %v4539_v47, %v4533_v8 }
 0x95f   :  { %v4238_v39 = vadd.f32 %v4237_v21, %v11303_v59  ;;  %v4239_v6 = vpop.f32.mrb[153].mxu1 }
 0x960   :  { %v4240_v35 = vadd.f32 %v4239_v6, %v11303_v59  ;;  %v4241_v2 = vpop.f32.mrb[154].mxu1  ;;  %4676 = vmatprep.subr.bf16.mxu0 %v4629_v41 }
 0x961   :  { %v4242_v60 = vadd.f32 %v4241_v2, %v11306_v0  ;;  %v4243_v11 = vpop.f32.mrb[155].mxu1  ;;  %4677 = vmatpush1.bf16.msra.mxu0 %v4628_v28  ;;  %v4544_v4 = vmax.f32 %v4238_v39, 0.0 }
 0x962   :  { %v4244_v61 = vadd.f32 %v4243_v11, %v11306_v0  ;;  %v4545_v12 = vmax.f32 %v4240_v35, 0.0 }
 0x963   :  { %v4550_v16 = vmax.f32 %v4242_v60, 0.0 }
 0x964   :  { %v4551_v34 = vmax.f32 %v4244_v61, 0.0 }
 0x965   :  { %v4634_v45 = vpack.c.bf16 %v4550_v16, %v4544_v4 }
 0x966   :  { %v4247_v36 = vpop.f32.mrb[156].mxu1  ;;  %v4635_v57 = vpack.c.bf16 %v4551_v34, %v4545_v12 }
 0x967   :  { %v4248_v27 = vadd.f32 %v4247_v36, %v11311_v13  ;;  %v4249_v52 = vpop.f32.mrb[157].mxu1 }
 0x968   :  { %v4250_v7 = vadd.f32 %v4249_v52, %v11311_v13  ;;  %v4251_v50 = vpop.f32.mrb[158].mxu1  ;;  %4678 = vmatprep.subr.bf16.mxu0 %v4635_v57 }
 0x969   :  { %v4252_v20 = vadd.f32 %v4251_v50, %v11314_v22  ;;  %v4253_v24 = vpop.f32.mrb[159].mxu1  ;;  %4679 = vmatpush1.bf16.msra.mxu0 %v4634_v45  ;;  %v4556_v43 = vmax.f32 %v4248_v27, 0.0 }
 0x96a   :  { %v4254_v15 = vadd.f32 %v4253_v24, %v11314_v22  ;;  %v4557_v29 = vmax.f32 %v4250_v7, 0.0 }
 0x96b   :  { %v4562_v49 = vmax.f32 %v4252_v20, 0.0 }
 0x96c   :  { %v4563_v62 = vmax.f32 %v4254_v15, 0.0 }
 0x96d   :  { %v4640_v26 = vpack.c.bf16 %v4562_v49, %v4556_v43 }
 0x96e   :  { %v4257_v8 = vpop.f32.mrb[160].mxu1  ;;  %v4641_v47 = vpack.c.bf16 %v4563_v62, %v4557_v29 }
 0x96f   :  { %v4258_v28 = vadd.f32 %v4257_v8, %v11319_v38  ;;  %v4259_v21 = vpop.f32.mrb[161].mxu1 }
 0x970   :  { %v4260_v41 = vadd.f32 %v4259_v21, %v11319_v38  ;;  %v4261_v39 = vpop.f32.mrb[162].mxu1  ;;  %4680 = vmatprep.subr.bf16.mxu0 %v4641_v47 }
 0x971   :  { %v4262_v6 = vadd.f32 %v4261_v39, %v11321_v40  ;;  %v4263_v35 = vpop.f32.mrb[163].mxu1  ;;  %4681 = vmatpush1.bf16.msra.mxu0 %v4640_v26  ;;  %v4568_v60 = vmax.f32 %v4258_v28, 0.0 }
 0x972   :  { %v4264_v2 = vadd.f32 %v4263_v35, %v11321_v40  ;;  %v4569_v61 = vmax.f32 %v4260_v41, 0.0 }
 0x973   :  { %v4574_v11 = vmax.f32 %v4262_v6, 0.0 }
 0x974   :  { %v4575_v4 = vmax.f32 %v4264_v2, 0.0 }
 0x975   :  { %v4646_v16 = vpack.c.bf16 %v4574_v11, %v4568_v60 }
 0x976   :  { %v4267_v12 = vpop.f32.mrb[164].mxu1  ;;  %v4647_v34 = vpack.c.bf16 %v4575_v4, %v4569_v61 }
 0x977   :  { %v4268_v45 = vadd.f32 %v4267_v12, %v11329_v51  ;;  %v4269_v36 = vpop.f32.mrb[165].mxu1 }
 0x978   :  { %v4270_v57 = vadd.f32 %v4269_v36, %v11329_v51  ;;  %v4271_v27 = vpop.f32.mrb[166].mxu1  ;;  %4682 = vmatprep.subr.bf16.mxu0 %v4647_v34 }
 0x979   :  { %v4272_v52 = vadd.f32 %v4271_v27, %v11327_v33  ;;  %v4273_v7 = vpop.f32.mrb[167].mxu1  ;;  %4683 = vmatpush1.bf16.msra.mxu0 %v4646_v16  ;;  %v4580_v24 = vmax.f32 %v4268_v45, 0.0 }
 0x97a   :  { %v4274_v50 = vadd.f32 %v4273_v7, %v11327_v33  ;;  %v4340_v20 = vpop.f32.mrb[176].mxu0  ;;  %v4581_v29 = vmax.f32 %v4270_v57, 0.0 }
 0x97b   :  { %v4586_v15 = vmax.f32 %v4272_v52, 0.0  ;;  %v4341_v43 = vadd.f32 %v4340_v20, %v11295_v14  ;;  %v4342_v49 = vpop.f32.mrb[177].mxu0 }
 0x97c   :  { %v4587_v62 = vmax.f32 %v4274_v50, 0.0  ;;  %v4343_v26 = vadd.f32 %v4342_v49, %v11295_v14  ;;  %v4344_v8 = vpop.f32.mrb[178].mxu0 }
 0x97d   :  { %v4652_v47 = vpack.c.bf16 %v4586_v15, %v4580_v24  ;;  %v4345_v28 = vadd.f32 %v4344_v8, %v11297_v32  ;;  %v4346_v21 = vpop.f32.mrb[179].mxu0  ;;  %v4534_v35 = vmax.f32 %v4341_v43, 0.0 }
 0x97e   :  { %v4347_v41 = vadd.f32 %v4346_v21, %v11297_v32  ;;  %v4277_v39 = vpop.f32.mrb[168].mxu1  ;;  %v4653_v6 = vpack.c.bf16 %v4587_v62, %v4581_v29  ;;  %v4535_v61 = vmax.f32 %v4343_v26, 0.0 }
 0x97f   :  { %v4540_v2 = vmax.f32 %v4345_v28, 0.0  ;;  %v4278_v60 = vadd.f32 %v4277_v39, %v11341_v23  ;;  %v4279_v11 = vpop.f32.mrb[169].mxu1 }
 0x980   :  { %v4541_v4 = vmax.f32 %v4347_v41, 0.0  ;;  %v4280_v16 = vadd.f32 %v4279_v11, %v11341_v23  ;;  %v4281_v12 = vpop.f32.mrb[170].mxu1  ;;  %4684 = vmatprep.subr.bf16.mxu0 %v4653_v6 }
 0x981   :  { %v13101_v34 = vpack.c.bf16 %v4540_v2, %v4534_v35  ;;  %v4282_v45 = vadd.f32 %v4281_v12, %v11339_v17  ;;  %v4283_v36 = vpop.f32.mrb[171].mxu1  ;;  %4685 = vmatpush1.bf16.msra.mxu0 %v4652_v47  ;;  %v4592_v7 = vmax.f32 %v4278_v60, 0.0 }
 0x982   :  { %v4284_v57 = vadd.f32 %v4283_v36, %v11339_v17  ;;  %v4350_v27 = vpop.f32.mrb[180].mxu0  ;;  %v13105_v52 = vpack.c.bf16 %v4541_v4, %v4535_v61  ;;  %v4593_v15 = vmax.f32 %v4280_v16, 0.0 }
 0x983   :  { %v4598_v50 = vmax.f32 %v4282_v45, 0.0  ;;  %v4351_v20 = vadd.f32 %v4350_v27, %v11303_v59  ;;  %v4352_v24 = vpop.f32.mrb[181].mxu0 }
 0x984   :  { %v4599_v43 = vmax.f32 %v4284_v57, 0.0  ;;  %v4353_v49 = vadd.f32 %v4352_v24, %v11303_v59  ;;  %v4354_v29 = vpop.f32.mrb[182].mxu0 }
 0x985   :  { %v4658_v62 = vpack.c.bf16 %v4598_v50, %v4592_v7  ;;  %v4355_v26 = vadd.f32 %v4354_v29, %v11306_v0  ;;  %v4356_v8 = vpop.f32.mrb[183].mxu0  ;;  %v4546_v41 = vmax.f32 %v4351_v20, 0.0 }
 0x986   :  { %v4357_v47 = vadd.f32 %v4356_v8, %v11306_v0  ;;  %v4287_v28 = vpop.f32.mrb[172].mxu1  ;;  %v4659_v21 = vpack.c.bf16 %v4599_v43, %v4593_v15  ;;  %v4547_v2 = vmax.f32 %v4353_v49, 0.0 }
 0x987   :  { %v4552_v39 = vmax.f32 %v4355_v26, 0.0  ;;  %v4288_v6 = vadd.f32 %v4287_v28, %v11357_v56  ;;  %v4289_v35 = vpop.f32.mrb[173].mxu1 }
 0x988   :  { %v4553_v60 = vmax.f32 %v4357_v47, 0.0  ;;  %v4290_v11 = vadd.f32 %v4289_v35, %v11357_v56  ;;  %v4291_v61 = vpop.f32.mrb[174].mxu1  ;;  %4686 = vmatprep.subr.bf16.mxu0 %v4659_v21 }
 0x989   :  { %v13113_v4 = vpack.c.bf16 %v4552_v39, %v4546_v41  ;;  %v4292_v16 = vadd.f32 %v4291_v61, %v11355_v54  ;;  %v4293_v12 = vpop.f32.mrb[175].mxu1  ;;  %4687 = vmatpush1.bf16.msra.mxu0 %v4658_v62  ;;  %v4604_v27 = vmax.f32 %v4288_v6, 0.0 }
 0x98a   :  { %v4294_v45 = vadd.f32 %v4293_v12, %v11355_v54  ;;  %v4360_v36 = vpop.f32.mrb[184].mxu0  ;;  %v13117_v57 = vpack.c.bf16 %v4553_v60, %v4547_v2  ;;  %v4605_v24 = vmax.f32 %v4290_v11, 0.0 }
 0x98b   :  { %v4610_v7 = vmax.f32 %v4292_v16, 0.0  ;;  %v4361_v50 = vadd.f32 %v4360_v36, %v11311_v13  ;;  %v4362_v20 = vpop.f32.mrb[185].mxu0 }
 0x98c   :  { %v4611_v15 = vmax.f32 %v4294_v45, 0.0  ;;  %v4363_v43 = vadd.f32 %v4362_v20, %v11311_v13  ;;  %v4364_v49 = vpop.f32.mrb[186].mxu0 }
 0x98d   :  { %v4664_v29 = vpack.c.bf16 %v4610_v7, %v4604_v27  ;;  %v4365_v26 = vadd.f32 %v4364_v49, %v11314_v22  ;;  %v4366_v8 = vpop.f32.mrb[187].mxu0  ;;  %v4558_v21 = vmax.f32 %v4361_v50, 0.0 }
 0x98e   :  { %v4367_v62 = vadd.f32 %v4366_v8, %v11314_v22  ;;  %v4297_v47 = vpop.f32.mrb[176].mxu1  ;;  %v4665_v28 = vpack.c.bf16 %v4611_v15, %v4605_v24  ;;  %v4559_v35 = vmax.f32 %v4363_v43, 0.0 }
 0x98f   :  { %v4564_v41 = vmax.f32 %v4365_v26, 0.0  ;;  %v4298_v39 = vadd.f32 %v4297_v47, %v11373_v18  ;;  %v4299_v6 = vpop.f32.mrb[177].mxu1 }
 0x990   :  { %v4565_v2 = vmax.f32 %v4367_v62, 0.0  ;;  %v4300_v60 = vadd.f32 %v4299_v6, %v11373_v18  ;;  %v4301_v11 = vpop.f32.mrb[178].mxu1  ;;  %4688 = vmatprep.subr.bf16.mxu0 %v4665_v28 }
 0x991   :  { %v13125_v61 = vpack.c.bf16 %v4564_v41, %v4558_v21  ;;  %v4302_v16 = vadd.f32 %v4301_v11, %v11371_v37  ;;  %v4303_v12 = vpop.f32.mrb[179].mxu1  ;;  %4689 = vmatpush1.bf16.msra.mxu0 %v4664_v29  ;;  %v4616_v7 = vmax.f32 %v4298_v39, 0.0 }
 0x992   :  { %v4304_v45 = vadd.f32 %v4303_v12, %v11371_v37  ;;  %v4370_v36 = vpop.f32.mrb[188].mxu0  ;;  %v4643_v27 = vpack.c.bf16 %v4565_v2, %v4559_v35  ;;  %v4617_v15 = vmax.f32 %v4300_v60, 0.0 }
 0x993   :  { %v4622_v50 = vmax.f32 %v4302_v16, 0.0  ;;  %v4371_v20 = vadd.f32 %v4370_v36, %v11319_v38  ;;  %v4372_v24 = vpop.f32.mrb[189].mxu0  ;;  %v13139_v36 = vld [vmem:[%s15716_s3] sm:$0xff]  }
 0x994   :  { %v4623_v43 = vmax.f32 %v4304_v45, 0.0  ;;  %v4373_v49 = vadd.f32 %v4372_v24, %v11319_v38  ;;  %v4374_v26 = vpop.f32.mrb[190].mxu0 }
 0x995   :  { %v4670_v8 = vpack.c.bf16 %v4622_v50, %v4616_v7  ;;  %v4375_v62 = vadd.f32 %v4374_v26, %v11321_v40  ;;  %v4376_v47 = vpop.f32.mrb[191].mxu0  ;;  %v4570_v21 = vmax.f32 %v4371_v20, 0.0 }
 0x996   :  { %v4377_v29 = vadd.f32 %v4376_v47, %v11321_v40  ;;  %v4671_v28 = vpack.c.bf16 %v4623_v43, %v4617_v15  ;;  %v4571_v6 = vmax.f32 %v4373_v49, 0.0 }
 0x997   :  { %v4576_v41 = vmax.f32 %v4375_v62, 0.0 }
 0x998   :  { %v4577_v39 = vmax.f32 %v4377_v29, 0.0  ;;  %4690 = vmatprep.subr.bf16.mxu0 %v4671_v28 }
 0x999   :  { %v4648_v35 = vpack.c.bf16 %v4576_v41, %v4570_v21  ;;  %4691 = vmatpush1.bf16.msra.mxu0 %v4670_v8 }
 0x99a   :  { %v4380_v2 = vpop.f32.mrb[192].mxu0  ;;  %4719 = vmatprep.subr.bf16.mxu0 %v13105_v52  ;;  %v4649_v60 = vpack.c.bf16 %v4577_v39, %v4571_v6 }
 0x99b   :  { %v4381_v11 = vadd.f32 %v4380_v2, %v11329_v51  ;;  %v4382_v16 = vpop.f32.mrb[193].mxu0 }
 0x99c   :  { %v4383_v12 = vadd.f32 %v4382_v16, %v11329_v51  ;;  %v4384_v45 = vpop.f32.mrb[194].mxu0  ;;  %4709 = vmatmul.mubr.bf16.vlgmr.msra.gmra.mrb[208].mxu0 %v13139_v36 }
 0x99d   :  { %v4385_v7 = vadd.f32 %v4384_v45, %v11327_v33  ;;  %v4386_v50 = vpop.f32.mrb[195].mxu0  ;;  %4720 = vmatpush1.bf16.msra.mxu0 %v13101_v34  ;;  %4751 = vmatprep.mubr.bf16.mxu0 %v15776_v19  ;;  %v4582_v24 = vmax.f32 %v4381_v11, 0.0 }
 0x99e   :  { %v4387_v52 = vadd.f32 %v4386_v50, %v11327_v33  ;;  %v4453_v20 = vpop.f32.mrb[180].mxu1  ;;  %4721 = vmatprep.subr.bf16.mxu0 %v13117_v57  ;;  %v4583_v26 = vmax.f32 %v4383_v12, 0.0 }
 0x99f   :  { %v4588_v15 = vmax.f32 %v4385_v7, 0.0  ;;  %v4454_v43 = vadd.f32 %v4453_v20, %v11295_v14  ;;  %v4455_v49 = vpop.f32.mrb[181].mxu1 }
 0x9a0   :  { %v4589_v8 = vmax.f32 %v4387_v52, 0.0  ;;  %v4456_v62 = vadd.f32 %v4455_v49, %v11295_v14  ;;  %v4457_v47 = vpop.f32.mrb[182].mxu1 }
 0x9a1   :  { %v4654_v29 = vpack.c.bf16 %v4588_v15, %v4582_v24  ;;  %v4458_v34 = vadd.f32 %v4457_v47, %v11297_v32  ;;  %v4459_v28 = vpop.f32.mrb[183].mxu1  ;;  %4722 = vmatpush1.bf16.msra.mxu0 %v13113_v4  ;;  %v4536_v6 = vmax.f32 %v4454_v43, 0.0 }
 0x9a2   :  { %v4460_v21 = vadd.f32 %v4459_v28, %v11297_v32  ;;  %v4390_v41 = vpop.f32.mrb[196].mxu0  ;;  %4723 = vmatprep.subr.bf16.mxu0 %v4643_v27  ;;  %v4655_v57 = vpack.c.bf16 %v4589_v8, %v4583_v26  ;;  %v4537_v16 = vmax.f32 %v4456_v62, 0.0 }
 0x9a3   :  { %v4542_v39 = vmax.f32 %v4458_v34, 0.0  ;;  %v4391_v2 = vadd.f32 %v4390_v41, %v11341_v23  ;;  %v4392_v11 = vpop.f32.mrb[197].mxu0 }
 0x9a4   :  { %v4543_v12 = vmax.f32 %v4460_v21, 0.0  ;;  %v4393_v45 = vadd.f32 %v4392_v11, %v11341_v23  ;;  %v4394_v7 = vpop.f32.mrb[198].mxu0 }
 0x9a5   :  { %v4632_v50 = vpack.c.bf16 %v4542_v39, %v4536_v6  ;;  %v4395_v52 = vadd.f32 %v4394_v7, %v11339_v17  ;;  %v4396_v20 = vpop.f32.mrb[199].mxu0  ;;  %4724 = vmatpush1.bf16.msra.mxu0 %v13125_v61  ;;  %v4594_v15 = vmax.f32 %v4391_v2, 0.0 }
 0x9a6   :  { %v4397_v4 = vadd.f32 %v4396_v20, %v11339_v17  ;;  %v4463_v27 = vpop.f32.mrb[184].mxu1  ;;  %4725 = vmatprep.subr.bf16.mxu0 %v4649_v60  ;;  %v4633_v24 = vpack.c.bf16 %v4543_v12, %v4537_v16  ;;  %v4595_v8 = vmax.f32 %v4393_v45, 0.0 }
 0x9a7   :  { %v4600_v43 = vmax.f32 %v4395_v52, 0.0  ;;  %v4464_v49 = vadd.f32 %v4463_v27, %v11303_v59  ;;  %v4465_v26 = vpop.f32.mrb[185].mxu1 }
 0x9a8   :  { %v4601_v62 = vmax.f32 %v4397_v4, 0.0  ;;  %v4466_v47 = vadd.f32 %v4465_v26, %v11303_v59  ;;  %v4467_v34 = vpop.f32.mrb[186].mxu1  ;;  %4762 = vmatprep.subr.bf16.mxu1 %v4633_v24 }
 0x9a9   :  { %v4660_v28 = vpack.c.bf16 %v4600_v43, %v4594_v15  ;;  %v4468_v21 = vadd.f32 %v4467_v34, %v11306_v0  ;;  %v4469_v61 = vpop.f32.mrb[187].mxu1  ;;  %4726 = vmatpush1.bf16.msra.mxu0 %v4648_v35  ;;  %4763 = vmatpush1.bf16.msra.mxu1 %v4632_v50  ;;  %v4548_v39 = vmax.f32 %v4464_v49, 0.0 }
 0x9aa   :  { %v4470_v60 = vadd.f32 %v4469_v61, %v11306_v0  ;;  %v4400_v41 = vpop.f32.mrb[200].mxu0  ;;  %4727 = vmatprep.subr.bf16.mxu0 %v4655_v57  ;;  %v4661_v6 = vpack.c.bf16 %v4601_v62, %v4595_v8  ;;  %v4549_v12 = vmax.f32 %v4466_v47, 0.0 }
 0x9ab   :  { %v4554_v2 = vmax.f32 %v4468_v21, 0.0  ;;  %v4401_v11 = vadd.f32 %v4400_v41, %v11357_v56  ;;  %v4402_v16 = vpop.f32.mrb[201].mxu0 }
 0x9ac   :  { %v4555_v45 = vmax.f32 %v4470_v60, 0.0  ;;  %v4403_v7 = vadd.f32 %v4402_v16, %v11357_v56  ;;  %v4404_v52 = vpop.f32.mrb[202].mxu0 }
 0x9ad   :  { %v4638_v20 = vpack.c.bf16 %v4554_v2, %v4548_v39  ;;  %v4405_v4 = vadd.f32 %v4404_v52, %v11355_v54  ;;  %v4406_v35 = vpop.f32.mrb[203].mxu0  ;;  %4728 = vmatpush1.bf16.msra.mxu0 %v4654_v29  ;;  %v4606_v24 = vmax.f32 %v4401_v11, 0.0 }
 0x9ae   :  { %v4407_v50 = vadd.f32 %v4406_v35, %v11355_v54  ;;  %v4473_v27 = vpop.f32.mrb[188].mxu1  ;;  %4729 = vmatprep.subr.bf16.mxu0 %v4661_v6  ;;  %v4639_v57 = vpack.c.bf16 %v4555_v45, %v4549_v12  ;;  %v4607_v26 = vmax.f32 %v4403_v7, 0.0 }
 0x9af   :  { %v4612_v15 = vmax.f32 %v4405_v4, 0.0  ;;  %v4474_v43 = vadd.f32 %v4473_v27, %v11311_v13  ;;  %v4475_v49 = vpop.f32.mrb[189].mxu1 }
 0x9b0   :  { %v4613_v8 = vmax.f32 %v4407_v50, 0.0  ;;  %v4476_v62 = vadd.f32 %v4475_v49, %v11311_v13  ;;  %v4477_v47 = vpop.f32.mrb[190].mxu1  ;;  %4764 = vmatprep.subr.bf16.mxu1 %v4639_v57 }
 0x9b1   :  { %v4666_v34 = vpack.c.bf16 %v4612_v15, %v4606_v24  ;;  %v4478_v21 = vadd.f32 %v4477_v47, %v11314_v22  ;;  %v4479_v29 = vpop.f32.mrb[191].mxu1  ;;  %4730 = vmatpush1.bf16.msra.mxu0 %v4660_v28  ;;  %4765 = vmatpush1.bf16.msra.mxu1 %v4638_v20  ;;  %v4560_v6 = vmax.f32 %v4474_v43, 0.0 }
 0x9b2   :  { %v4480_v61 = vadd.f32 %v4479_v29, %v11314_v22  ;;  %v4410_v60 = vpop.f32.mrb[204].mxu0  ;;  %v4667_v41 = vpack.c.bf16 %v4613_v8, %v4607_v26  ;;  %v4561_v16 = vmax.f32 %v4476_v62, 0.0 }
 0x9b3   :  { %v4566_v39 = vmax.f32 %v4478_v21, 0.0  ;;  %v4411_v2 = vadd.f32 %v4410_v60, %v11373_v18  ;;  %v4412_v11 = vpop.f32.mrb[205].mxu0 }
 0x9b4   :  { %v4567_v12 = vmax.f32 %v4480_v61, 0.0  ;;  %v4413_v45 = vadd.f32 %v4412_v11, %v11373_v18  ;;  %v4414_v7 = vpop.f32.mrb[206].mxu0  ;;  %4731 = vmatprep.subr.bf16.mxu0 %v4667_v41 }
 0x9b5   :  { %v4644_v52 = vpack.c.bf16 %v4566_v39, %v4560_v6  ;;  %v4415_v4 = vadd.f32 %v4414_v7, %v11371_v37  ;;  %v4416_v28 = vpop.f32.mrb[207].mxu0  ;;  %4732 = vmatpush1.bf16.msra.mxu0 %v4666_v34  ;;  %v4618_v27 = vmax.f32 %v4411_v2, 0.0 }
 0x9b6   :  { %v4417_v20 = vadd.f32 %v4416_v28, %v11371_v37  ;;  %v4483_v35 = vpop.f32.mrb[192].mxu1  ;;  %v4645_v50 = vpack.c.bf16 %v4567_v12, %v4561_v16  ;;  %v4619_v43 = vmax.f32 %v4413_v45, 0.0  ;;  %v13184_v28 = vld [vmem:[%s15714_s1 + $0x4] ss:$8 sps:$4 sm:$0xff]  }
 0x9b7   :  { %v4624_v57 = vmax.f32 %v4415_v4, 0.0  ;;  %v4484_v24 = vadd.f32 %v4483_v35, %v11319_v38  ;;  %v4485_v15 = vpop.f32.mrb[193].mxu1 }
 0x9b8   :  { %v4625_v49 = vmax.f32 %v4417_v20, 0.0  ;;  %v4486_v26 = vadd.f32 %v4485_v15, %v11319_v38  ;;  %v4487_v8 = vpop.f32.mrb[194].mxu1  ;;  %4766 = vmatprep.subr.bf16.mxu1 %v4645_v50 }
 0x9b9   :  { %v4672_v62 = vpack.c.bf16 %v4624_v57, %v4618_v27  ;;  %v4488_v47 = vadd.f32 %v4487_v8, %v11321_v40  ;;  %v4489_v21 = vpop.f32.mrb[195].mxu1  ;;  %4767 = vmatpush1.bf16.msra.mxu1 %v4644_v52  ;;  %v4572_v61 = vmax.f32 %v4484_v24, 0.0 }
 0x9ba   :  { %v4490_v34 = vadd.f32 %v4489_v21, %v11321_v40  ;;  %v4673_v29 = vpack.c.bf16 %v4625_v49, %v4619_v43  ;;  %v4573_v41 = vmax.f32 %v4486_v26, 0.0 }
 0x9bb   :  { %v4578_v60 = vmax.f32 %v4488_v47, 0.0 }
 0x9bc   :  { %v4579_v6 = vmax.f32 %v4490_v34, 0.0  ;;  %4733 = vmatprep.subr.bf16.mxu0 %v4673_v29 }
 0x9bd   :  { %v4650_v39 = vpack.c.bf16 %v4578_v60, %v4572_v61  ;;  %4734 = vmatpush1.bf16.msra.mxu0 %v4672_v62 }
 0x9be   :  { %v4493_v2 = vpop.f32.mrb[196].mxu1  ;;  %v4651_v11 = vpack.c.bf16 %v4579_v6, %v4573_v41 }
 0x9bf   :  { %v4495_v16 = vpop.f32.mrb[197].mxu1  ;;  %v4494_v12 = vadd.f32 %v4493_v2, %v11329_v51 }
 0x9c0   :  { %v4497_v45 = vpop.f32.mrb[198].mxu1  ;;  %4752 = vmatmul.mubr.bf16.vlgmr.msra.gmra.mrb[212].mxu0 %v13139_v36  ;;  %4768 = vmatprep.subr.bf16.mxu1 %v4651_v11  ;;  %v4496_v7 = vadd.f32 %v4495_v16, %v11329_v51 }
 0x9c1   :  { %v4498_v52 = vadd.f32 %v4497_v45, %v11327_v33  ;;  %v4499_v4 = vpop.f32.mrb[199].mxu1  ;;  %4769 = vmatpush1.bf16.msra.mxu1 %v4650_v39  ;;  %10299 = vmatprep.mubr.msk.bf16.mxu0 %vm774_vm0, %v13184_v28  ;;  %v4584_v35 = vmax.f32 %v4494_v12, 0.0 }
 0x9c2   :  { %v4500_v20 = vadd.f32 %v4499_v4, %v11327_v33  ;;  %v4585_v27 = vmax.f32 %v4496_v7, 0.0 }
 0x9c3   :  { %v4590_v50 = vmax.f32 %v4498_v52, 0.0 }
 0x9c4   :  { %v4591_v57 = vmax.f32 %v4500_v20, 0.0 }
 0x9c5   :  { %v4656_v24 = vpack.c.bf16 %v4590_v50, %v4584_v35 }
 0x9c6   :  { %v4657_v15 = vpack.c.bf16 %v4591_v57, %v4585_v27  ;;  %v4503_v43 = vpop.f32.mrb[200].mxu1 }
 0x9c7   :  { %v4504_v49 = vadd.f32 %v4503_v43, %v11341_v23  ;;  %v4505_v26 = vpop.f32.mrb[201].mxu1 }
 0x9c8   :  { %v4506_v8 = vadd.f32 %v4505_v26, %v11341_v23  ;;  %v4507_v62 = vpop.f32.mrb[202].mxu1  ;;  %4770 = vmatprep.subr.bf16.mxu1 %v4657_v15 }
 0x9c9   :  { %v4508_v47 = vadd.f32 %v4507_v62, %v11339_v17  ;;  %v4509_v21 = vpop.f32.mrb[203].mxu1  ;;  %4771 = vmatpush1.bf16.msra.mxu1 %v4656_v24  ;;  %v4596_v29 = vmax.f32 %v4504_v49, 0.0 }
 0x9ca   :  { %v4510_v34 = vadd.f32 %v4509_v21, %v11339_v17  ;;  %v4597_v60 = vmax.f32 %v4506_v8, 0.0 }
 0x9cb   :  { %v4602_v61 = vmax.f32 %v4508_v47, 0.0 }
 0x9cc   :  { %v4603_v41 = vmax.f32 %v4510_v34, 0.0 }
 0x9cd   :  { %v4662_v6 = vpack.c.bf16 %v4602_v61, %v4596_v29 }
 0x9ce   :  { %v4663_v39 = vpack.c.bf16 %v4603_v41, %v4597_v60  ;;  %v4513_v2 = vpop.f32.mrb[204].mxu1 }
 0x9cf   :  { %v4514_v11 = vadd.f32 %v4513_v2, %v11357_v56  ;;  %v4515_v16 = vpop.f32.mrb[205].mxu1 }
 0x9d0   :  { %v4516_v12 = vadd.f32 %v4515_v16, %v11357_v56  ;;  %v4517_v45 = vpop.f32.mrb[206].mxu1  ;;  %4772 = vmatprep.subr.bf16.mxu1 %v4663_v39 }
 0x9d1   :  { %v4518_v7 = vadd.f32 %v4517_v45, %v11355_v54  ;;  %v4519_v52 = vpop.f32.mrb[207].mxu1  ;;  %4773 = vmatpush1.bf16.msra.mxu1 %v4662_v6  ;;  %v4608_v20 = vmax.f32 %v4514_v11, 0.0 }
 0x9d2   :  { %v4520_v4 = vadd.f32 %v4519_v52, %v11355_v54  ;;  %v4609_v50 = vmax.f32 %v4516_v12, 0.0 }
 0x9d3   :  { %v4614_v35 = vmax.f32 %v4518_v7, 0.0 }
 0x9d4   :  { %v4615_v27 = vmax.f32 %v4520_v4, 0.0 }
 0x9d5   :  { %v4668_v57 = vpack.c.bf16 %v4614_v35, %v4608_v20 }
 0x9d6   :  { %v4669_v24 = vpack.c.bf16 %v4615_v27, %v4609_v50  ;;  %v4523_v15 = vpop.f32.mrb[208].mxu1 }
 0x9d7   :  { %v4524_v43 = vadd.f32 %v4523_v15, %v11373_v18  ;;  %v4525_v49 = vpop.f32.mrb[209].mxu1 }
 0x9d8   :  { %v4526_v26 = vadd.f32 %v4525_v49, %v11373_v18  ;;  %v4527_v8 = vpop.f32.mrb[210].mxu1  ;;  %4774 = vmatprep.subr.bf16.mxu1 %v4669_v24 }
 0x9d9   :  { %v4528_v62 = vadd.f32 %v4527_v8, %v11371_v37  ;;  %v4529_v47 = vpop.f32.mrb[211].mxu1  ;;  %4775 = vmatpush1.bf16.msra.mxu1 %v4668_v57  ;;  %v4620_v34 = vmax.f32 %v4524_v43, 0.0 }
 0x9da   :  { %v4530_v21 = vadd.f32 %v4529_v47, %v11371_v37  ;;  %v4621_v61 = vmax.f32 %v4526_v26, 0.0 }
 0x9db   :  { %v4626_v29 = vmax.f32 %v4528_v62, 0.0 }
 0x9dc   :  { %v4627_v60 = vmax.f32 %v4530_v21, 0.0 }
 0x9dd   :  { %v4674_v41 = vpack.c.bf16 %v4626_v29, %v4620_v34 }
 0x9de   :  { %v4675_v6 = vpack.c.bf16 %v4627_v60, %v4621_v61 }
 0x9e0   :  { %4776 = vmatprep.subr.bf16.mxu1 %v4675_v6 }
 0x9e1   :  { %4777 = vmatpush1.bf16.msra.mxu1 %v4674_v41 }
 0x9e4   :  { %4795 = vmatmul.mubr.bf16.vlgmr.msra.gmra.mrb[212].mxu1 %v13139_v36 }
 0x9e5   :  { %10307 = vmatprep.mubr.msk.bf16.mxu1 %vm774_vm0, %v13184_v28 }
 0xa6f   :  { %v4710_v39 = vpop.f32.mrb[208].mxu0 }
 0xa70   :  { %v4711_v2 = vadd.f32 %v4710_v39, %v11479_v31  ;;  %v4712_v11 = vpop.f32.mrb[209].mxu0 }
 0xa71   :  { %v4714_v16 = vpop.f32.mrb[210].mxu0  ;;  %v4713_v36 = vadd.f32 %v4712_v11, %v11479_v31 }
 0xa72   :  { %v4817_v12 = vmul.f32 %v4711_v2, %v11477_v30  ;;  %v4715_v45 = vadd.f32 %v4714_v16, %v11482_v42  ;;  %v4716_v7 = vpop.f32.mrb[211].mxu0 }
 0xa73   :  { %v4717_v4 = vadd.f32 %v4716_v7, %v11482_v42  ;;  %v4818_v57 = vmul.f32 %v4713_v36, %v11495_v44 }
 0xa74   :  { %v4823_v52 = vmul.f32 %v4715_v45, %v11477_v30  ;;  %v13210_v20 = vadd.f32 %v4817_v12, %v12653_v58 }
 0xa75   :  { %v4824_v27 = vmul.f32 %v4717_v4, %v11495_v44 }
 0xa76   :  { %v13214_v35 = vadd.f32 %v4823_v52, %v12657_v55  ;;  %v13230_v55 = vadd.f32 %v4818_v57, %v12673_v1  ;;  %v15793_v52 = vld [vmem:[#allocation14_spill] sm:$0xff]  ;;  %v15795_v57 = vld [vmem:[#allocation12_spill] sm:$0xff] }
 0xa77   :  { %v13227_v58 = vadd.f32 %v4824_v27, %v12670_v48 }
 0xa78   :  { %v13218_v50 = vpack.c.bf16 %v13214_v35, %v13210_v20 }
 0xa79   :  { %v13238_v24 = vpack.c.bf16 %v13227_v58, %v13230_v55 }
 0xa7a   :  { %4947 = vrot.lane.b32.xlu0 %v13218_v50, %s10725_s30  ;;  %4901 = vrot.lane.b32.xlu1 %v13218_v50, %s10724_s29 }
 0xa7e   :  { %5039 = vrot.lane.b32.xlu0 %v13218_v50, %s10727_s13  ;;  %4993 = vrot.lane.b32.xlu1 %v13218_v50, %s10726_s12 }
 0xa82   :  { %4903 = vrot.lane.b32.xlu0 %v13238_v24, %s10724_s29  ;;  %5095 = vrot.lane.b32.xlu1 %v13218_v50, %s10728_s18 }
 0xa86   :  { %5141 = vrot.lane.b32.xlu0 %v13218_v50, %s10729_s19  ;;  %4949 = vrot.lane.b32.xlu1 %v13238_v24, %s10725_s30 }
 0xa8a   :  { %4995 = vrot.lane.b32.xlu0 %v13238_v24, %s10726_s12  ;;  %5187 = vrot.lane.b32.xlu1 %v13218_v50, %s10730_s20 }
 0xa8e   :  { %5143 = vrot.lane.b32.xlu0 %v13238_v24, %s10729_s19  ;;  %5041 = vrot.lane.b32.xlu1 %v13238_v24, %s10727_s13 }
 0xa92   :  { %5235 = vrot.lane.b32.xlu0 %v13238_v24, %s10731_s27  ;;  %5097 = vrot.lane.b32.xlu1 %v13238_v24, %s10728_s18 }
 0xa93   :  { %v4753_v48 = vpop.f32.mrb[212].mxu0 }
 0xa94   :  { %v4754_v1 = vadd.f32 %v4753_v48, %v11479_v31  ;;  %v4755_v15 = vpop.f32.mrb[213].mxu0 }
 0xa95   :  { %v4757_v43 = vpop.f32.mrb[214].mxu0  ;;  %v4756_v34 = vadd.f32 %v4755_v15, %v11479_v31  ;;  %v15796_v15 = vld [vmem:[#allocation11_spill] sm:$0xff] }
 0xa96   :  { %v4819_v49 = vmul.f32 %v4754_v1, %v11549_v63  ;;  %v4758_v26 = vadd.f32 %v4757_v43, %v11482_v42  ;;  %5189 = vrot.lane.b32.xlu1 %v13238_v24, %s10730_s20  ;;  %v4759_v8 = vpop.f32.mrb[215].mxu0 }
 0xa97   :  { %v4760_v47 = vadd.f32 %v4759_v8, %v11482_v42  ;;  %v4820_v41 = vmul.f32 %v4756_v34, %v11569_v3  ;;  %v15800_v34 = vld [vmem:[#allocation9_spill] sm:$0xff] }
 0xa98   :  { %v4825_v62 = vmul.f32 %v4758_v26, %v11549_v63  ;;  %v13268_v21 = vadd.f32 %v4819_v49, %v12711_v5  ;;  %v15798_v49 = vld [vmem:[#allocation13_spill] sm:$0xff] }
 0xa99   :  { %v4826_v60 = vmul.f32 %v4760_v47, %v11569_v3  ;;  %v4900_v47 = vpop.permute.xlu1 %4899 }
 0xa9a   :  { %v13272_v29 = vadd.f32 %v4825_v62, %v12715_v46  ;;  %v13288_v46 = vadd.f32 %v4820_v41, %v12731_v10  ;;  %v4946_v62 = vpop.permute.xlu0 %4945 }
 0xa9b   :  { %v13285_v5 = vadd.f32 %v4826_v60, %v12728_v9 }
 0xa9c   :  { %v13276_v61 = vpack.c.bf16 %v13272_v29, %v13268_v21 }
 0xa9d   :  { %v13296_v6 = vpack.c.bf16 %v13285_v5, %v13288_v46  ;;  %v4992_v41 = vpop.permute.xlu1 %4991 }
 0xa9e   :  { %5145 = vrot.lane.b32.xlu1 %v13276_v61, %s10729_s19  ;;  %5099 = vrot.lane.b32.xlu0 %v13276_v61, %s10728_s18  ;;  %v5038_v60 = vpop.permute.xlu0 %5037 }
 0xaa2   :  { %5237 = vrot.lane.b32.xlu1 %v13276_v61, %s10731_s27  ;;  %5233 = vrot.lane.b32.xlu0 %v13218_v50, %s10731_s27 }
 0xaa6   :  { %4907 = vrot.lane.b32.xlu1 %v13296_v6, %s10724_s29  ;;  %5191 = vrot.lane.b32.xlu0 %v13276_v61, %s10730_s20 }
 0xaaa   :  { %4951 = vrot.lane.b32.xlu1 %v13276_v61, %s10725_s30  ;;  %4905 = vrot.lane.b32.xlu0 %v13276_v61, %s10724_s29 }
 0xaae   :  { %4997 = vrot.lane.b32.xlu1 %v13276_v61, %s10726_s12  ;;  %4953 = vrot.lane.b32.xlu0 %v13296_v6, %s10725_s30 }
 0xab2   :  { %5043 = vrot.lane.b32.xlu1 %v13276_v61, %s10727_s13  ;;  %4999 = vrot.lane.b32.xlu0 %v13296_v6, %s10726_s12 }
 0xab6   :  { %5101 = vrot.lane.b32.xlu1 %v13296_v6, %s10728_s18  ;;  %5045 = vrot.lane.b32.xlu0 %v13296_v6, %s10727_s13 }
 0xab7   :  { %v4796_v9 = vpop.f32.mrb[212].mxu1 }
 0xab8   :  { %v4797_v10 = vadd.f32 %v4796_v9, %v11479_v31  ;;  %v4798_v39 = vpop.f32.mrb[213].mxu1  ;;  %v15801_v9 = vld [vmem:[#allocation8_spill] sm:$0xff] }
 0xab9   :  { %v4800_v2 = vpop.f32.mrb[214].mxu1 }
 0xaba   :  { %v4821_v11 = vmul.f32 %v4797_v10, %v11623_v53  ;;  %v4801_v16 = vadd.f32 %v4800_v2, %v11482_v42  ;;  %5147 = vrot.lane.b32.xlu1 %v13296_v6, %s10729_s19  ;;  %v4802_v12 = vpop.f32.mrb[215].mxu1 }
 0xabb   :  { %v4803_v27 = vadd.f32 %v4802_v12, %v11482_v42 }
 0xabc   :  { %v4827_v45 = vmul.f32 %v4801_v16, %v11623_v53  ;;  %v13325_v7 = vadd.f32 %v4821_v11, %v12768_v25  ;;  %v4799_v25 = vadd.f32 %v4798_v39, %v11479_v31 }
 0xabd   :  { %v4828_v48 = vmul.f32 %v4803_v27, %v15795_v57 }
 0xabe   :  { %v13328_v4 = vadd.f32 %v4827_v45, %v15793_v52  ;;  %5193 = vrot.lane.b32.xlu1 %v13296_v6, %s10730_s20  ;;  %v4822_v1 = vmul.f32 %v4799_v25, %v15795_v57 }
 0xabf   :  { %v13353_v43 = vadd.f32 %v4828_v48, %v15796_v15 }
 0xac0   :  { %15794 = vst [vmem:[#allocation14_spill] sm:$0xff] %v13328_v4  ;;  %v13334_v36 = vpack.c.bf16 %v13328_v4, %v13325_v7  ;;  %v13356_v26 = vadd.f32 %v4822_v1, %v15798_v49  ;;  %v13551_v4 = vld [vmem:[%s15714_s1 + $0x50] ss:$8 sps:$4 sm:$0xff]  }
 0xac1   :  { %15797 = vst [vmem:[#allocation11_spill] sm:$0xff] %v13353_v43 }
 0xac2   :  { %5239 = vrot.lane.b32.xlu1 %v13296_v6, %s10731_s27  ;;  %5103 = vrot.lane.b32.xlu0 %v13334_v36, %s10728_s18  ;;  %15799 = vst [vmem:[#allocation13_spill] sm:$0xff] %v13356_v26  ;;  %v13364_v8 = vpack.c.bf16 %v13353_v43, %v13356_v26  ;;  %v13504_v26 = vld [vmem:[%s15714_s1 + $0x30] ss:$8 sps:$4 sm:$0xff]  }
 0xac6   :  { %4909 = vrot.lane.b32.xlu1 %v13334_v36, %s10724_s29  ;;  %5149 = vrot.lane.b32.xlu0 %v13334_v36, %s10729_s19 }
 0xaca   :  { %4955 = vrot.lane.b32.xlu1 %v13334_v36, %s10725_s30  ;;  %5195 = vrot.lane.b32.xlu0 %v13334_v36, %s10730_s20 }
 0xace   :  { %5001 = vrot.lane.b32.xlu1 %v13334_v36, %s10726_s12  ;;  %5241 = vrot.lane.b32.xlu0 %v13334_v36, %s10731_s27 }
 0xad2   :  { %5047 = vrot.lane.b32.xlu1 %v13334_v36, %s10727_s13  ;;  %4911 = vrot.lane.b32.xlu0 %v13364_v8, %s10724_s29 }
 0xad6   :  { %5105 = vrot.lane.b32.xlu1 %v13364_v8, %s10728_s18  ;;  %4957 = vrot.lane.b32.xlu0 %v13364_v8, %s10725_s30 }
 0xada   :  { %5151 = vrot.lane.b32.xlu1 %v13364_v8, %s10729_s19  ;;  %5003 = vrot.lane.b32.xlu0 %v13364_v8, %s10726_s12 }
 0xade   :  { %5197 = vrot.lane.b32.xlu1 %v13364_v8, %s10730_s20  ;;  %5049 = vrot.lane.b32.xlu0 %v13364_v8, %s10727_s13 }
 0xae2   :  { %5243 = vrot.lane.b32.xlu1 %v13364_v8, %s10731_s27  ;;  %5107 = vrot.lane.b32.xlu0 %v15800_v34, %s10728_s18 }
 0xae6   :  { %5153 = vrot.lane.b32.xlu0 %v15800_v34, %s10729_s19  ;;  %6025 = vrot.lane.b32.xlu1 %v15801_v9, %s10724_s29 }
 0xaea   :  { %5199 = vrot.lane.b32.xlu0 %v15800_v34, %s10730_s20  ;;  %6117 = vrot.lane.b32.xlu1 %v15801_v9, %s10726_s12 }
 0xaec   :  { %v4948_v10 = vpop.permute.xlu0 %4947  ;;  %v4902_v39 = vpop.permute.xlu1 %4901 }
 0xaed   :  { %v4913_v52 = vsel %vm208_vm1, %v4900_v47, %v4902_v39  ;;  %v4959_v1 = vsel %vm255_vm2, %v4946_v62, %v4948_v10 }
 0xaee   :  { %5245 = vrot.lane.b32.xlu0 %v15800_v34, %s10731_s27 }
 0xaf0   :  { %v5040_v2 = vpop.permute.xlu0 %5039  ;;  %v4994_v11 = vpop.permute.xlu1 %4993 }
 0xaf2   :  { %6071 = vrot.lane.b32.xlu0 %v15801_v9, %s10725_s30 }
 0xaf4   :  { %v4904_v16 = vpop.permute.xlu0 %4903  ;;  %v5096_v12 = vpop.permute.xlu1 %5095 }
 0xaf5   :  { %v4914_v45 = vsel %vm208_vm1, %v4902_v39, %v4904_v16 }
 0xaf6   :  { %5319 = vmatprep.subr.bf16.mxu0 %v4914_v45  ;;  %6163 = vrot.lane.b32.xlu0 %v15801_v9, %s10727_s13  ;;  %v5005_v45 = vsel %vm302_vm3, %v4992_v41, %v4994_v11 }
 0xaf7   :  { %5320 = vmatpush1.bf16.msra.mxu0 %v4913_v52  ;;  %v5051_v52 = vsel %vm349_vm4, %v5038_v60, %v5040_v2 }
 0xaf8   :  { %v5142_v27 = vpop.permute.xlu0 %5141  ;;  %v4950_v25 = vpop.permute.xlu1 %4949 }
 0xaf9   :  { %v4960_v48 = vsel %vm255_vm2, %v4948_v10, %v4950_v25 }
 0xafa   :  { %5321 = vmatprep.subr.bf16.mxu0 %v4960_v48 }
 0xafb   :  { %5322 = vmatpush1.bf16.msra.mxu0 %v4959_v1 }
 0xafc   :  { %v4996_v15 = vpop.permute.xlu0 %4995  ;;  %v5188_v49 = vpop.permute.xlu1 %5187 }
 0xafd   :  { %v5006_v34 = vsel %vm302_vm3, %v4994_v11, %v4996_v15 }
 0xafe   :  { %5323 = vmatprep.subr.bf16.mxu0 %v5006_v34 }
 0xaff   :  { %5324 = vmatpush1.bf16.msra.mxu0 %v5005_v45 }
 0xb00   :  { %v5042_v47 = vpop.permute.xlu1 %5041  ;;  %v5144_v48 = vpop.permute.xlu0 %5143 }
 0xb01   :  { %v5052_v39 = vsel %vm349_vm4, %v5040_v2, %v5042_v47 }
 0xb02   :  { %5325 = vmatprep.subr.bf16.mxu0 %v5052_v39 }
 0xb03   :  { %5326 = vmatpush1.bf16.msra.mxu0 %v5051_v52 }
 0xb04   :  { %5327 = vmatprep.subr.bf16.mxu0 %v13238_v24  ;;  %v5098_v62 = vpop.permute.xlu1 %5097  ;;  %v5236_v10 = vpop.permute.xlu0 %5235 }
 0xb05   :  { %v5109_v11 = vsel %vm408_vm5, %v5096_v12, %v5098_v62 }
 0xb07   :  { %5328 = vmatpush1.bf16.msra.mxu0 %v13218_v50  ;;  %v5155_v50 = vsel %vm455_vm6, %v5142_v27, %v5144_v48 }
 0xb08   :  { %v5190_v1 = vpop.permute.xlu1 %5189 }
 0xb09   :  { %v5201_v12 = vsel %vm502_vm7, %v5188_v49, %v5190_v1 }
 0xb10   :  { %v13410_v9 = vpop.permute.xlu0 %5099  ;;  %v13412_v34 = vpop.permute.xlu1 %5145 }
 0xb11   :  { %v5110_v41 = vsel %vm408_vm5, %v5098_v62, %v13410_v9  ;;  %v5156_v24 = vsel %vm455_vm6, %v5144_v48, %v13412_v34 }
 0xb12   :  { %5329 = vmatprep.subr.bf16.mxu0 %v5110_v41 }
 0xb13   :  { %5330 = vmatpush1.bf16.msra.mxu0 %v5109_v11 }
 0xb14   :  { %v5234_v60 = vpop.permute.xlu0 %5233  ;;  %5331 = vmatprep.subr.bf16.mxu0 %v5156_v24  ;;  %v13419_v2 = vpop.permute.xlu1 %5237 }
 0xb15   :  { %v5248_v62 = vsel %vm549_vm8, %v5236_v10, %v13419_v2  ;;  %v5247_v24 = vsel %vm549_vm8, %v5234_v60, %v5236_v10  ;;  %v13449_v10 = vld [vmem:[%s15714_s1 + $0x14] ss:$8 sps:$4 sm:$0xff]  }
 0xb17   :  { %5332 = vmatpush1.bf16.msra.mxu0 %v5155_v50 }
 0xb18   :  { %v13422_v45 = vpop.permute.xlu0 %5191  ;;  %v13424_v39 = vpop.permute.xlu1 %4907 }
 0xb19   :  { %v5202_v52 = vsel %vm502_vm7, %v5190_v1, %v13422_v45 }
 0xb1a   :  { %5333 = vmatprep.subr.bf16.mxu0 %v5202_v52  ;;  %v13442_v52 = vld [vmem:[%s15714_s1] ss:$8 sps:$4 sm:$0xff]  }
 0xb1b   :  { %5334 = vmatpush1.bf16.msra.mxu0 %v5201_v12 }
 0xb1c   :  { %v4906_v41 = vpop.permute.xlu0 %4905  ;;  %5335 = vmatprep.subr.bf16.mxu0 %v5248_v62  ;;  %v4952_v11 = vpop.permute.xlu1 %4951 }
 0xb1d   :  { %v4916_v27 = vsel %vm208_vm1, %v4906_v41, %v13424_v39  ;;  %v4915_v48 = vsel %vm208_vm1, %v4904_v16, %v4906_v41  ;;  %v4961_v16 = vsel %vm255_vm2, %v4950_v25, %v4952_v11 }
 0xb1e   :  { %5432 = vmatprep.subr.bf16.mxu1 %v4916_v27 }
 0xb1f   :  { %5336 = vmatpush1.bf16.msra.mxu0 %v5247_v24  ;;  %5433 = vmatpush1.bf16.msra.mxu1 %v4915_v48  ;;  %v13465_v48 = vld [vmem:[%s15714_s1 + $0x10] ss:$8 sps:$4 sm:$0xff]  }
 0xb20   :  { %v13435_v50 = vpop.permute.xlu0 %4953  ;;  %v4998_v49 = vpop.permute.xlu1 %4997 }
 0xb21   :  { %v4962_v1 = vsel %vm255_vm2, %v4952_v11, %v13435_v50  ;;  %v5007_v41 = vsel %vm302_vm3, %v4996_v15, %v4998_v49  ;;  %v13472_v15 = vld [vmem:[%s15714_s1 + $0x24] ss:$8 sps:$4 sm:$0xff]  }
 0xb22   :  { %5352 = vmatmul.mubr.bf16.vlgmr.msra.gmra.mrb[216].mxu0 %v13442_v52  ;;  %5434 = vmatprep.subr.bf16.mxu1 %v4962_v1 }
 0xb23   :  { %5435 = vmatpush1.bf16.msra.mxu1 %v4961_v16  ;;  %10300 = vmatprep.mubr.msk.bf16.mxu0 %vm774_vm0, %v13449_v10  ;;  %v13481_v16 = vld [vmem:[%s15714_s1 + $0x20] ss:$8 sps:$4 sm:$0xff]  }
 0xb24   :  { %v13453_v60 = vpop.permute.xlu0 %4999  ;;  %v5044_v12 = vpop.permute.xlu1 %5043 }
 0xb25   :  { %v5008_v62 = vsel %vm302_vm3, %v4998_v49, %v13453_v60  ;;  %v5053_v24 = vsel %vm349_vm4, %v5042_v47, %v5044_v12  ;;  %v13487_v47 = vld [vmem:[%s15714_s1 + $0x34] ss:$8 sps:$4 sm:$0xff]  }
 0xb26   :  { %5436 = vmatprep.subr.bf16.mxu1 %v5008_v62 }
 0xb27   :  { %5437 = vmatpush1.bf16.msra.mxu1 %v5007_v41 }
 0xb28   :  { %v13458_v25 = vpop.permute.xlu0 %5045  ;;  %v5102_v11 = vpop.permute.xlu1 %5101 }
 0xb29   :  { %v5054_v27 = vsel %vm349_vm4, %v5044_v12, %v13458_v25  ;;  %v5111_v62 = vsel %vm408_vm5, %v13410_v9, %v5102_v11  ;;  %v13512_v9 = vld [vmem:[%s15714_s1 + $0x44] ss:$8 sps:$4 sm:$0xff]  }
 0xb2a   :  { %5362 = vmatmul.mubr.bf16.gmra.mrb[220].mxu0 %v13465_v48  ;;  %5438 = vmatprep.subr.bf16.mxu1 %v5054_v27 }
 0xb2b   :  { %5439 = vmatpush1.bf16.msra.mxu1 %v5053_v24  ;;  %10301 = vmatprep.mubr.msk.bf16.mxu0 %vm774_vm0, %v13472_v15 }
 0xb2c   :  { %5440 = vmatprep.subr.bf16.mxu1 %v13296_v6  ;;  %v5148_v49 = vpop.permute.xlu1 %5147 }
 0xb2f   :  { %5441 = vmatpush1.bf16.msra.mxu1 %v13276_v61 }
 0xb30   :  { %v5194_v1 = vpop.permute.xlu1 %5193 }
 0xb32   :  { %5372 = vmatmul.mubr.bf16.gmra.mrb[224].mxu0 %v13481_v16 }
 0xb33   :  { %10302 = vmatprep.mubr.msk.bf16.mxu0 %vm774_vm0, %v13487_v47 }
 0xb34   :  { %v13491_v6 = vpop.permute.xlu0 %5103  ;;  %v5240_v12 = vpop.permute.xlu1 %5239 }
 0xb35   :  { %v5112_v61 = vsel %vm408_vm5, %v5102_v11, %v13491_v6 }
 0xb36   :  { %5442 = vmatprep.subr.bf16.mxu1 %v5112_v61  ;;  %v5157_v61 = vsel %vm455_vm6, %v13412_v34, %v5148_v49 }
 0xb37   :  { %5443 = vmatpush1.bf16.msra.mxu1 %v5111_v62 }
 0xb38   :  { %v13497_v41 = vpop.permute.xlu0 %5149  ;;  %v4910_v27 = vpop.permute.xlu1 %4909 }
 0xb39   :  { %v5158_v24 = vsel %vm455_vm6, %v5148_v49, %v13497_v41 }
 0xb3a   :  { %5382 = vmatmul.mubr.bf16.gmra.mrb[228].mxu0 %v13504_v26  ;;  %5444 = vmatprep.subr.bf16.mxu1 %v5158_v24  ;;  %v5203_v24 = vsel %vm502_vm7, %v13422_v45, %v5194_v1  ;;  %v13537_v45 = vld [vmem:[%s15714_s1 + $0x54] ss:$8 sps:$4 sm:$0xff]  }
 0xb3b   :  { %5445 = vmatpush1.bf16.msra.mxu1 %v5157_v61  ;;  %10303 = vmatprep.mubr.msk.bf16.mxu0 %vm774_vm0, %v13512_v9  ;;  %v13529_v61 = vld [vmem:[%s15714_s1 + $0x40] ss:$8 sps:$4 sm:$0xff]  }
 0xb3c   :  { %v13516_v11 = vpop.permute.xlu0 %5195  ;;  %v4956_v43 = vpop.permute.xlu1 %4955 }
 0xb3d   :  { %v5204_v62 = vsel %vm502_vm7, %v5194_v1, %v13516_v11 }
 0xb3e   :  { %5446 = vmatprep.subr.bf16.mxu1 %v5204_v62  ;;  %v5249_v62 = vsel %vm549_vm8, %v13419_v2, %v5240_v12 }
 0xb3f   :  { %5447 = vmatpush1.bf16.msra.mxu1 %v5203_v24 }
 0xb40   :  { %v13522_v34 = vpop.permute.xlu0 %5241  ;;  %v5002_v1 = vpop.permute.xlu1 %5001 }
 0xb41   :  { %v5250_v49 = vsel %vm549_vm8, %v5240_v12, %v13522_v34 }
 0xb42   :  { %5392 = vmatmul.mubr.bf16.gmra.mrb[232].mxu0 %v13529_v61  ;;  %5448 = vmatprep.subr.bf16.mxu1 %v5250_v49  ;;  %v4917_v49 = vsel %vm208_vm1, %v13424_v39, %v4910_v27  ;;  %v13559_v39 = vld [vmem:[%s15714_s1 + $0x64] ss:$8 sps:$4 sm:$0xff]  }
 0xb43   :  { %5449 = vmatpush1.bf16.msra.mxu1 %v5249_v62  ;;  %10304 = vmatprep.mubr.msk.bf16.mxu0 %vm774_vm0, %v13537_v45 }
 0xb44   :  { %v4912_v24 = vpop.permute.xlu0 %4911  ;;  %v5048_v62 = vpop.permute.xlu1 %5047 }
 0xb45   :  { %v4918_v57 = vsel %vm208_vm1, %v4910_v27, %v4912_v24 }
 0xb46   :  { %5465 = vmatmul.mubr.bf16.vlgmr.msra.gmra.mrb[216].mxu1 %v13442_v52  ;;  %5545 = vmatprep.subr.bf16.mxu0 %v4918_v57  ;;  %v4963_v57 = vsel %vm255_vm2, %v13435_v50, %v4956_v43 }
 0xb47   :  { %5546 = vmatpush1.bf16.msra.mxu0 %v4917_v49  ;;  %10308 = vmatprep.mubr.msk.bf16.mxu1 %vm774_vm0, %v13449_v10  ;;  %v5009_v49 = vsel %vm302_vm3, %v13453_v60, %v5002_v1  ;;  %v10646_v60 = vld [vmem:[%s15714_s1 + $0x74] ss:$8 sps:$4 sm:$0xff]  }
 0xb48   :  { %v4958_v2 = vpop.permute.xlu0 %4957 }
 0xb49   :  { %v4964_v12 = vsel %vm255_vm2, %v4956_v43, %v4958_v2  ;;  %v5106_v43 = vpop.permute.xlu1 %5105 }
 0xb4a   :  { %5402 = vmatmul.mubr.bf16.gmra.mrb[236].mxu0 %v13551_v4  ;;  %5547 = vmatprep.subr.bf16.mxu0 %v4964_v12  ;;  %v10645_v12 = vld [vmem:[%s15714_s1 + $0x60] ss:$8 sps:$4 sm:$0xff]  }
 0xb4b   :  { %5548 = vmatpush1.bf16.msra.mxu0 %v4963_v57  ;;  %10305 = vmatprep.mubr.msk.bf16.mxu0 %vm774_vm0, %v13559_v39  ;;  %v5055_v57 = vsel %vm349_vm4, %v13458_v25, %v5048_v62 }
 0xb4c   :  { %v5004_v27 = vpop.permute.xlu0 %5003 }
 0xb4d   :  { %v5010_v24 = vsel %vm302_vm3, %v5002_v1, %v5004_v27  ;;  %v5152_v27 = vpop.permute.xlu1 %5151 }
 0xb4e   :  { %5475 = vmatmul.mubr.bf16.gmra.mrb[220].mxu1 %v13465_v48  ;;  %5549 = vmatprep.subr.bf16.mxu0 %v5010_v24 }
 0xb4f   :  { %5550 = vmatpush1.bf16.msra.mxu0 %v5009_v49  ;;  %10309 = vmatprep.mubr.msk.bf16.mxu1 %vm774_vm0, %v13472_v15 }
 0xb50   :  { %v5050_v50 = vpop.permute.xlu0 %5049 }
 0xb51   :  { %v5056_v2 = vsel %vm349_vm4, %v5048_v62, %v5050_v50  ;;  %v10647_v62 = vld [vmem:[%s15714_s1 + $0x70] ss:$8 sps:$4 sm:$0xff]  }
 0xb52   :  { %5412 = vmatmul.mubr.bf16.gmra.mrb[240].mxu0 %v10645_v12  ;;  %5551 = vmatprep.subr.bf16.mxu0 %v5056_v2  ;;  %v5159_v2 = vsel %vm455_vm6, %v13497_v41, %v5152_v27 }
 0xb53   :  { %5552 = vmatpush1.bf16.msra.mxu0 %v5055_v57  ;;  %10306 = vmatprep.mubr.msk.bf16.mxu0 %vm774_vm0, %v10646_v60 }
 0xb54   :  { %v5108_v1 = vpop.permute.xlu0 %5107  ;;  %5553 = vmatprep.subr.bf16.mxu0 %v13364_v8  ;;  %v5113_v8 = vsel %vm408_vm5, %v13491_v6, %v5106_v43 }
 0xb55   :  { %v5114_v24 = vsel %vm408_vm5, %v5106_v43, %v5108_v1 }
 0xb56   :  { %5485 = vmatmul.mubr.bf16.gmra.mrb[224].mxu1 %v13481_v16 }
 0xb57   :  { %5554 = vmatpush1.bf16.msra.mxu0 %v13334_v36  ;;  %10310 = vmatprep.mubr.msk.bf16.mxu1 %vm774_vm0, %v13487_v47  ;;  %v5198_v36 = vpop.permute.xlu1 %5197 }
 0xb58   :  { %v5154_v25 = vpop.permute.xlu0 %5153  ;;  %5555 = vmatprep.subr.bf16.mxu0 %v5114_v24 }
 0xb59   :  { %v5160_v49 = vsel %vm455_vm6, %v5152_v27, %v5154_v25 }
 0xb5a   :  { %5422 = vmatmul.mubr.bf16.gmra.mrb[244].mxu0 %v10647_v62 }
 0xb5b   :  { %5556 = vmatpush1.bf16.msra.mxu0 %v5113_v8  ;;  %10315 = vmatprep.mubr.msk.bf16.mxu0 %vm774_vm0, %v13184_v28  ;;  %v5244_v43 = vpop.permute.xlu1 %5243  ;;  %v5205_v28 = vsel %vm502_vm7, %v13516_v11, %v5198_v36 }
 0xb5c   :  { %v5200_v50 = vpop.permute.xlu0 %5199  ;;  %5557 = vmatprep.subr.bf16.mxu0 %v5160_v49  ;;  %v5251_v41 = vsel %vm549_vm8, %v13522_v34, %v5244_v43 }
 0xb5d   :  { %v5206_v57 = vsel %vm502_vm7, %v5198_v36, %v5200_v50 }
 0xb5e   :  { %5495 = vmatmul.mubr.bf16.gmra.mrb[228].mxu1 %v13504_v26 }
 0xb5f   :  { %5558 = vmatpush1.bf16.msra.mxu0 %v5159_v2  ;;  %10311 = vmatprep.mubr.msk.bf16.mxu1 %vm774_vm0, %v13512_v9 }
 0xb60   :  { %v5246_v6 = vpop.permute.xlu0 %5245  ;;  %5559 = vmatprep.subr.bf16.mxu0 %v5206_v57 }
 0xb61   :  { %v5252_v1 = vsel %vm549_vm8, %v5244_v43, %v5246_v6 }
 0xb63   :  { %5560 = vmatpush1.bf16.msra.mxu0 %v5205_v28 }
 0xb64   :  { %5561 = vmatprep.subr.bf16.mxu0 %v5252_v1 }
 0xb66   :  { %5505 = vmatmul.mubr.bf16.gmra.mrb[232].mxu1 %v13529_v61 }
 0xb67   :  { %5562 = vmatpush1.bf16.msra.mxu0 %v5251_v41  ;;  %10312 = vmatprep.mubr.msk.bf16.mxu1 %vm774_vm0, %v13537_v45 }
 0xb6a   :  { %5578 = vmatmul.mubr.bf16.vlgmr.msra.gmra.mrb[248].mxu0 %v13442_v52 }
 0xb6b   :  { %10316 = vmatprep.mubr.msk.bf16.mxu0 %vm774_vm0, %v13449_v10 }
 0xb6e   :  { %5515 = vmatmul.mubr.bf16.gmra.mrb[236].mxu1 %v13551_v4 }
 0xb6f   :  { %10313 = vmatprep.mubr.msk.bf16.mxu1 %vm774_vm0, %v13559_v39 }
 0xb72   :  { %5588 = vmatmul.mubr.bf16.gmra.mrb[252].mxu0 %v13465_v48 }
 0xb73   :  { %10317 = vmatprep.mubr.msk.bf16.mxu0 %vm774_vm0, %v13472_v15 }
 0xb76   :  { %5525 = vmatmul.mubr.bf16.gmra.mrb[240].mxu1 %v10645_v12 }
 0xb77   :  { %10314 = vmatprep.mubr.msk.bf16.mxu1 %vm774_vm0, %v10646_v60 }
 0xb7a   :  { %5598 = vmatmul.mubr.bf16.gmra.mrb[0].mxu0 %v13481_v16 }
 0xb7b   :  { %10318 = vmatprep.mubr.msk.bf16.mxu0 %vm774_vm0, %v13487_v47 }
 0xb7e   :  { %5535 = vmatmul.mubr.bf16.gmra.mrb[244].mxu1 %v10647_v62 }
 0xb7f   :  { %5834 = vmatprep.mubr.bf16.mxu1 %v15776_v19 }
 0xb82   :  { %5608 = vmatmul.mubr.bf16.gmra.mrb[4].mxu0 %v13504_v26 }
 0xb83   :  { %10319 = vmatprep.mubr.msk.bf16.mxu0 %vm774_vm0, %v13512_v9 }
 0xb8a   :  { %5618 = vmatmul.mubr.bf16.gmra.mrb[8].mxu0 %v13529_v61 }
 0xb8b   :  { %10320 = vmatprep.mubr.msk.bf16.mxu0 %vm774_vm0, %v13537_v45 }
 0xb92   :  { %5628 = vmatmul.mubr.bf16.gmra.mrb[12].mxu0 %v13551_v4 }
 0xb93   :  { %10321 = vmatprep.mubr.msk.bf16.mxu0 %vm774_vm0, %v13559_v39 }
 0xb9a   :  { %5638 = vmatmul.mubr.bf16.gmra.mrb[16].mxu0 %v10645_v12 }
 0xb9b   :  { %10322 = vmatprep.mubr.msk.bf16.mxu0 %vm774_vm0, %v10646_v60 }
 0xba2   :  { %5648 = vmatmul.mubr.bf16.gmra.mrb[20].mxu0 %v10647_v62 }
 0xba3   :  { %5920 = vmatprep.mubr.bf16.mxu0 %v15776_v19 }
 0xbf5   :  { %v5353_v26 = vpop.f32.mrb[216].mxu0 }
 0xbf6   :  { %v5354_v52 = vadd.f32 %v5353_v26, %v11295_v14  ;;  %v5355_v10 = vpop.f32.mrb[217].mxu0 }
 0xbf7   :  { %v5356_v48 = vadd.f32 %v5355_v10, %v11295_v14  ;;  %v5357_v15 = vpop.f32.mrb[218].mxu0 }
 0xbf8   :  { %v5358_v16 = vadd.f32 %v5357_v15, %v11297_v32  ;;  %v5359_v47 = vpop.f32.mrb[219].mxu0  ;;  %v5658_v9 = vmax.f32 %v5354_v52, 0.0 }
 0xbf9   :  { %v5360_v4 = vadd.f32 %v5359_v47, %v11297_v32  ;;  %v5659_v34 = vmax.f32 %v5356_v48, 0.0 }
 0xbfa   :  { %v5664_v11 = vmax.f32 %v5358_v16, 0.0 }
 0xbfb   :  { %v5665_v61 = vmax.f32 %v5360_v4, 0.0 }
 0xbfc   :  { %v5754_v45 = vpack.c.bf16 %v5664_v11, %v5658_v9 }
 0xbfd   :  { %v5755_v39 = vpack.c.bf16 %v5665_v61, %v5659_v34  ;;  %v5363_v12 = vpop.f32.mrb[220].mxu0 }
 0xbfe   :  { %v5364_v60 = vadd.f32 %v5363_v12, %v11303_v59  ;;  %v5365_v27 = vpop.f32.mrb[221].mxu0 }
 0xbff   :  { %v5366_v24 = vadd.f32 %v5365_v27, %v11303_v59  ;;  %v5367_v25 = vpop.f32.mrb[222].mxu0  ;;  %5802 = vmatprep.subr.bf16.mxu1 %v5755_v39 }
 0xc00   :  { %v5368_v62 = vadd.f32 %v5367_v25, %v11306_v0  ;;  %v5369_v8 = vpop.f32.mrb[223].mxu0  ;;  %5803 = vmatpush1.bf16.msra.mxu1 %v5754_v45  ;;  %v5670_v36 = vmax.f32 %v5364_v60, 0.0 }
 0xc01   :  { %v5370_v49 = vadd.f32 %v5369_v8, %v11306_v0  ;;  %v5671_v2 = vmax.f32 %v5366_v24, 0.0 }
 0xc02   :  { %v5676_v50 = vmax.f32 %v5368_v62, 0.0 }
 0xc03   :  { %v5677_v57 = vmax.f32 %v5370_v49, 0.0 }
 0xc04   :  { %v5760_v6 = vpack.c.bf16 %v5676_v50, %v5670_v36 }
 0xc05   :  { %v5761_v43 = vpack.c.bf16 %v5677_v57, %v5671_v2  ;;  %v5373_v28 = vpop.f32.mrb[224].mxu0 }
 0xc06   :  { %v5374_v1 = vadd.f32 %v5373_v28, %v11311_v13  ;;  %v5375_v41 = vpop.f32.mrb[225].mxu0 }
 0xc07   :  { %v5376_v26 = vadd.f32 %v5375_v41, %v11311_v13  ;;  %v5377_v52 = vpop.f32.mrb[226].mxu0  ;;  %5804 = vmatprep.subr.bf16.mxu1 %v5761_v43 }
 0xc08   :  { %v5378_v10 = vadd.f32 %v5377_v52, %v11314_v22  ;;  %v5379_v48 = vpop.f32.mrb[227].mxu0  ;;  %5805 = vmatpush1.bf16.msra.mxu1 %v5760_v6  ;;  %v5682_v16 = vmax.f32 %v5374_v1, 0.0 }
 0xc09   :  { %v5380_v15 = vadd.f32 %v5379_v48, %v11314_v22  ;;  %v5683_v4 = vmax.f32 %v5376_v26, 0.0 }
 0xc0a   :  { %v5688_v47 = vmax.f32 %v5378_v10, 0.0 }
 0xc0b   :  { %v5689_v9 = vmax.f32 %v5380_v15, 0.0 }
 0xc0c   :  { %v5766_v11 = vpack.c.bf16 %v5688_v47, %v5682_v16 }
 0xc0d   :  { %v5767_v34 = vpack.c.bf16 %v5689_v9, %v5683_v4  ;;  %v5383_v61 = vpop.f32.mrb[228].mxu0 }
 0xc0e   :  { %v5384_v45 = vadd.f32 %v5383_v61, %v11319_v38  ;;  %v5385_v39 = vpop.f32.mrb[229].mxu0 }
 0xc0f   :  { %v5386_v12 = vadd.f32 %v5385_v39, %v11319_v38  ;;  %v5387_v60 = vpop.f32.mrb[230].mxu0  ;;  %5806 = vmatprep.subr.bf16.mxu1 %v5767_v34 }
 0xc10   :  { %v5388_v27 = vadd.f32 %v5387_v60, %v11321_v40  ;;  %v5389_v24 = vpop.f32.mrb[231].mxu0  ;;  %5807 = vmatpush1.bf16.msra.mxu1 %v5766_v11  ;;  %v5694_v62 = vmax.f32 %v5384_v45, 0.0 }
 0xc11   :  { %v5390_v25 = vadd.f32 %v5389_v24, %v11321_v40  ;;  %v5695_v49 = vmax.f32 %v5386_v12, 0.0 }
 0xc12   :  { %v5700_v8 = vmax.f32 %v5388_v27, 0.0 }
 0xc13   :  { %v5701_v36 = vmax.f32 %v5390_v25, 0.0 }
 0xc14   :  { %v5772_v50 = vpack.c.bf16 %v5700_v8, %v5694_v62 }
 0xc15   :  { %v5773_v2 = vpack.c.bf16 %v5701_v36, %v5695_v49  ;;  %v5393_v57 = vpop.f32.mrb[232].mxu0 }
 0xc16   :  { %v5394_v6 = vadd.f32 %v5393_v57, %v11329_v51  ;;  %v5395_v43 = vpop.f32.mrb[233].mxu0 }
 0xc17   :  { %v5396_v28 = vadd.f32 %v5395_v43, %v11329_v51  ;;  %v5397_v1 = vpop.f32.mrb[234].mxu0  ;;  %5808 = vmatprep.subr.bf16.mxu1 %v5773_v2 }
 0xc18   :  { %v5398_v41 = vadd.f32 %v5397_v1, %v11327_v33  ;;  %v5399_v26 = vpop.f32.mrb[235].mxu0  ;;  %5809 = vmatpush1.bf16.msra.mxu1 %v5772_v50  ;;  %v5706_v48 = vmax.f32 %v5394_v6, 0.0 }
 0xc19   :  { %v5400_v52 = vadd.f32 %v5399_v26, %v11327_v33  ;;  %v5466_v10 = vpop.f32.mrb[216].mxu1  ;;  %v5707_v4 = vmax.f32 %v5396_v28, 0.0 }
 0xc1a   :  { %v5712_v15 = vmax.f32 %v5398_v41, 0.0  ;;  %v5467_v16 = vadd.f32 %v5466_v10, %v11295_v14  ;;  %v5468_v47 = vpop.f32.mrb[217].mxu1 }
 0xc1b   :  { %v5713_v9 = vmax.f32 %v5400_v52, 0.0  ;;  %v5469_v11 = vadd.f32 %v5468_v47, %v11295_v14  ;;  %v5470_v34 = vpop.f32.mrb[218].mxu1 }
 0xc1c   :  { %v5778_v61 = vpack.c.bf16 %v5712_v15, %v5706_v48  ;;  %v5471_v45 = vadd.f32 %v5470_v34, %v11297_v32  ;;  %v5472_v39 = vpop.f32.mrb[219].mxu1  ;;  %v5660_v24 = vmax.f32 %v5467_v16, 0.0 }
 0xc1d   :  { %v5779_v12 = vpack.c.bf16 %v5713_v9, %v5707_v4  ;;  %v5473_v60 = vadd.f32 %v5472_v39, %v11297_v32  ;;  %v5403_v27 = vpop.f32.mrb[236].mxu0  ;;  %v5661_v49 = vmax.f32 %v5469_v11, 0.0 }
 0xc1e   :  { %v5666_v25 = vmax.f32 %v5471_v45, 0.0  ;;  %v5404_v62 = vadd.f32 %v5403_v27, %v11341_v23  ;;  %v5405_v8 = vpop.f32.mrb[237].mxu0 }
 0xc1f   :  { %v5667_v36 = vmax.f32 %v5473_v60, 0.0  ;;  %v5406_v50 = vadd.f32 %v5405_v8, %v11341_v23  ;;  %v5407_v2 = vpop.f32.mrb[238].mxu0  ;;  %5810 = vmatprep.subr.bf16.mxu1 %v5779_v12 }
 0xc20   :  { %v13658_v57 = vpack.c.bf16 %v5666_v25, %v5660_v24  ;;  %v5408_v6 = vadd.f32 %v5407_v2, %v11339_v17  ;;  %v5409_v43 = vpop.f32.mrb[239].mxu0  ;;  %5811 = vmatpush1.bf16.msra.mxu1 %v5778_v61  ;;  %v5718_v26 = vmax.f32 %v5404_v62, 0.0 }
 0xc21   :  { %v13661_v28 = vpack.c.bf16 %v5667_v36, %v5661_v49  ;;  %v5410_v1 = vadd.f32 %v5409_v43, %v11339_v17  ;;  %v5476_v41 = vpop.f32.mrb[220].mxu1  ;;  %v5719_v15 = vmax.f32 %v5406_v50, 0.0 }
 0xc22   :  { %v5724_v52 = vmax.f32 %v5408_v6, 0.0  ;;  %v5477_v10 = vadd.f32 %v5476_v41, %v11303_v59  ;;  %v5478_v48 = vpop.f32.mrb[221].mxu1 }
 0xc23   :  { %v5725_v16 = vmax.f32 %v5410_v1, 0.0  ;;  %v5479_v47 = vadd.f32 %v5478_v48, %v11303_v59  ;;  %v5480_v4 = vpop.f32.mrb[222].mxu1 }
 0xc24   :  { %v5784_v9 = vpack.c.bf16 %v5724_v52, %v5718_v26  ;;  %v5481_v11 = vadd.f32 %v5480_v4, %v11306_v0  ;;  %v5482_v34 = vpop.f32.mrb[223].mxu1  ;;  %v5672_v12 = vmax.f32 %v5477_v10, 0.0 }
 0xc25   :  { %v5785_v61 = vpack.c.bf16 %v5725_v16, %v5719_v15  ;;  %v5483_v45 = vadd.f32 %v5482_v34, %v11306_v0  ;;  %v5413_v39 = vpop.f32.mrb[240].mxu0  ;;  %v5673_v25 = vmax.f32 %v5479_v47, 0.0 }
 0xc26   :  { %v5678_v60 = vmax.f32 %v5481_v11, 0.0  ;;  %v5414_v27 = vadd.f32 %v5413_v39, %v11357_v56  ;;  %v5415_v24 = vpop.f32.mrb[241].mxu0 }
 0xc27   :  { %v5679_v62 = vmax.f32 %v5483_v45, 0.0  ;;  %v5416_v8 = vadd.f32 %v5415_v24, %v11357_v56  ;;  %v5417_v49 = vpop.f32.mrb[242].mxu0  ;;  %5812 = vmatprep.subr.bf16.mxu1 %v5785_v61 }
 0xc28   :  { %v13670_v36 = vpack.c.bf16 %v5678_v60, %v5672_v12  ;;  %v5418_v50 = vadd.f32 %v5417_v49, %v11355_v54  ;;  %v5419_v2 = vpop.f32.mrb[243].mxu0  ;;  %5813 = vmatpush1.bf16.msra.mxu1 %v5784_v9  ;;  %v5730_v41 = vmax.f32 %v5414_v27, 0.0 }
 0xc29   :  { %v13673_v6 = vpack.c.bf16 %v5679_v62, %v5673_v25  ;;  %v5420_v43 = vadd.f32 %v5419_v2, %v11355_v54  ;;  %v5486_v1 = vpop.f32.mrb[224].mxu1  ;;  %v5731_v48 = vmax.f32 %v5416_v8, 0.0 }
 0xc2a   :  { %v5736_v26 = vmax.f32 %v5418_v50, 0.0  ;;  %v5487_v52 = vadd.f32 %v5486_v1, %v11311_v13  ;;  %v5488_v10 = vpop.f32.mrb[225].mxu1 }
 0xc2b   :  { %v5737_v15 = vmax.f32 %v5420_v43, 0.0  ;;  %v5489_v16 = vadd.f32 %v5488_v10, %v11311_v13  ;;  %v5490_v47 = vpop.f32.mrb[226].mxu1 }
 0xc2c   :  { %v5790_v4 = vpack.c.bf16 %v5736_v26, %v5730_v41  ;;  %v5491_v11 = vadd.f32 %v5490_v47, %v11314_v22  ;;  %v5492_v34 = vpop.f32.mrb[227].mxu1  ;;  %v5684_v39 = vmax.f32 %v5487_v52, 0.0 }
 0xc2d   :  { %v5791_v9 = vpack.c.bf16 %v5737_v15, %v5731_v48  ;;  %v5493_v61 = vadd.f32 %v5492_v34, %v11314_v22  ;;  %v5423_v45 = vpop.f32.mrb[244].mxu0  ;;  %v5685_v24 = vmax.f32 %v5489_v16, 0.0 }
 0xc2e   :  { %v5690_v12 = vmax.f32 %v5491_v11, 0.0  ;;  %v5424_v60 = vadd.f32 %v5423_v45, %v11373_v18  ;;  %v5425_v27 = vpop.f32.mrb[245].mxu0 }
 0xc2f   :  { %v5691_v25 = vmax.f32 %v5493_v61, 0.0  ;;  %v5426_v62 = vadd.f32 %v5425_v27, %v11373_v18  ;;  %v5427_v8 = vpop.f32.mrb[246].mxu0  ;;  %5814 = vmatprep.subr.bf16.mxu1 %v5791_v9 }
 0xc30   :  { %v13682_v49 = vpack.c.bf16 %v5690_v12, %v5684_v39  ;;  %v5428_v50 = vadd.f32 %v5427_v8, %v11371_v37  ;;  %v5429_v2 = vpop.f32.mrb[247].mxu0  ;;  %5815 = vmatpush1.bf16.msra.mxu1 %v5790_v4  ;;  %v5742_v26 = vmax.f32 %v5424_v60, 0.0 }
 0xc31   :  { %v5769_v43 = vpack.c.bf16 %v5691_v25, %v5685_v24  ;;  %v5430_v1 = vadd.f32 %v5429_v2, %v11371_v37  ;;  %v5496_v41 = vpop.f32.mrb[228].mxu1  ;;  %v5743_v15 = vmax.f32 %v5426_v62, 0.0 }
 0xc32   :  { %v5748_v52 = vmax.f32 %v5428_v50, 0.0  ;;  %v5497_v10 = vadd.f32 %v5496_v41, %v11319_v38  ;;  %v5498_v48 = vpop.f32.mrb[229].mxu1  ;;  %v13696_v41 = vld [vmem:[%s15716_s3] sm:$0xff]  }
 0xc33   :  { %v5749_v16 = vmax.f32 %v5430_v1, 0.0  ;;  %v5499_v47 = vadd.f32 %v5498_v48, %v11319_v38  ;;  %v5500_v11 = vpop.f32.mrb[230].mxu1 }
 0xc34   :  { %v5796_v34 = vpack.c.bf16 %v5748_v52, %v5742_v26  ;;  %v5501_v9 = vadd.f32 %v5500_v11, %v11321_v40  ;;  %v5502_v61 = vpop.f32.mrb[231].mxu1  ;;  %v5696_v39 = vmax.f32 %v5497_v10, 0.0 }
 0xc35   :  { %v5797_v45 = vpack.c.bf16 %v5749_v16, %v5743_v15  ;;  %v5503_v4 = vadd.f32 %v5502_v61, %v11321_v40  ;;  %v5697_v27 = vmax.f32 %v5499_v47, 0.0 }
 0xc36   :  { %v5702_v12 = vmax.f32 %v5501_v9, 0.0 }
 0xc37   :  { %v5703_v60 = vmax.f32 %v5503_v4, 0.0  ;;  %5816 = vmatprep.subr.bf16.mxu1 %v5797_v45 }
 0xc38   :  { %v5774_v24 = vpack.c.bf16 %v5702_v12, %v5696_v39  ;;  %5817 = vmatpush1.bf16.msra.mxu1 %v5796_v34 }
 0xc39   :  { %v5775_v25 = vpack.c.bf16 %v5703_v60, %v5697_v27  ;;  %v5506_v62 = vpop.f32.mrb[232].mxu1  ;;  %5845 = vmatprep.subr.bf16.mxu1 %v13661_v28 }
 0xc3a   :  { %v5507_v8 = vadd.f32 %v5506_v62, %v11329_v51  ;;  %v5508_v50 = vpop.f32.mrb[233].mxu1 }
 0xc3b   :  { %v5509_v2 = vadd.f32 %v5508_v50, %v11329_v51  ;;  %v5510_v1 = vpop.f32.mrb[234].mxu1  ;;  %5835 = vmatmul.mubr.bf16.vlgmr.msra.gmra.mrb[248].mxu1 %v13696_v41 }
 0xc3c   :  { %v5511_v26 = vadd.f32 %v5510_v1, %v11327_v33  ;;  %v5512_v52 = vpop.f32.mrb[235].mxu1  ;;  %5846 = vmatpush1.bf16.msra.mxu1 %v13658_v57  ;;  %5877 = vmatprep.mubr.bf16.mxu1 %v15776_v19  ;;  %v5708_v48 = vmax.f32 %v5507_v8, 0.0 }
 0xc3d   :  { %v5513_v28 = vadd.f32 %v5512_v52, %v11327_v33  ;;  %v5579_v10 = vpop.f32.mrb[248].mxu0  ;;  %5847 = vmatprep.subr.bf16.mxu1 %v13673_v6  ;;  %v5709_v11 = vmax.f32 %v5509_v2, 0.0 }
 0xc3e   :  { %v5714_v15 = vmax.f32 %v5511_v26, 0.0  ;;  %v5580_v16 = vadd.f32 %v5579_v10, %v11295_v14  ;;  %v5581_v47 = vpop.f32.mrb[249].mxu0 }
 0xc3f   :  { %v5715_v34 = vmax.f32 %v5513_v28, 0.0  ;;  %v5582_v9 = vadd.f32 %v5581_v47, %v11295_v14  ;;  %v5583_v61 = vpop.f32.mrb[250].mxu0 }
 0xc40   :  { %v5780_v45 = vpack.c.bf16 %v5714_v15, %v5708_v48  ;;  %v5584_v57 = vadd.f32 %v5583_v61, %v11297_v32  ;;  %v5585_v4 = vpop.f32.mrb[251].mxu0  ;;  %5848 = vmatpush1.bf16.msra.mxu1 %v13670_v36  ;;  %v5662_v27 = vmax.f32 %v5580_v16, 0.0 }
 0xc41   :  { %v5781_v39 = vpack.c.bf16 %v5715_v34, %v5709_v11  ;;  %v5586_v12 = vadd.f32 %v5585_v4, %v11297_v32  ;;  %v5516_v6 = vpop.f32.mrb[236].mxu1  ;;  %5849 = vmatprep.subr.bf16.mxu1 %v5769_v43  ;;  %v5663_v50 = vmax.f32 %v5582_v9, 0.0 }
 0xc42   :  { %v5668_v60 = vmax.f32 %v5584_v57, 0.0  ;;  %v5517_v62 = vadd.f32 %v5516_v6, %v11341_v23  ;;  %v5518_v8 = vpop.f32.mrb[237].mxu1 }
 0xc43   :  { %v5669_v2 = vmax.f32 %v5586_v12, 0.0  ;;  %v5519_v1 = vadd.f32 %v5518_v8, %v11341_v23  ;;  %v5520_v26 = vpop.f32.mrb[238].mxu1 }
 0xc44   :  { %v5758_v52 = vpack.c.bf16 %v5668_v60, %v5662_v27  ;;  %v5521_v28 = vadd.f32 %v5520_v26, %v11339_v17  ;;  %v5522_v10 = vpop.f32.mrb[239].mxu1  ;;  %5850 = vmatpush1.bf16.msra.mxu1 %v13682_v49  ;;  %v5720_v15 = vmax.f32 %v5517_v62, 0.0 }
 0xc45   :  { %v5759_v36 = vpack.c.bf16 %v5669_v2, %v5663_v50  ;;  %v5523_v48 = vadd.f32 %v5522_v10, %v11339_v17  ;;  %v5589_v43 = vpop.f32.mrb[252].mxu0  ;;  %5851 = vmatprep.subr.bf16.mxu1 %v5775_v25  ;;  %v5721_v34 = vmax.f32 %v5519_v1, 0.0 }
 0xc46   :  { %v5726_v16 = vmax.f32 %v5521_v28, 0.0  ;;  %v5590_v47 = vadd.f32 %v5589_v43, %v11303_v59  ;;  %v5591_v11 = vpop.f32.mrb[253].mxu0 }
 0xc47   :  { %v5727_v9 = vmax.f32 %v5523_v48, 0.0  ;;  %v5592_v61 = vadd.f32 %v5591_v11, %v11303_v59  ;;  %v5593_v57 = vpop.f32.mrb[254].mxu0  ;;  %5888 = vmatprep.subr.bf16.mxu0 %v5759_v36 }
 0xc48   :  { %v5786_v4 = vpack.c.bf16 %v5726_v16, %v5720_v15  ;;  %v5594_v12 = vadd.f32 %v5593_v57, %v11306_v0  ;;  %v5595_v49 = vpop.f32.mrb[255].mxu0  ;;  %5852 = vmatpush1.bf16.msra.mxu1 %v5774_v24  ;;  %5889 = vmatpush1.bf16.msra.mxu0 %v5758_v52  ;;  %v5674_v60 = vmax.f32 %v5590_v47, 0.0 }
 0xc49   :  { %v5787_v6 = vpack.c.bf16 %v5727_v9, %v5721_v34  ;;  %v5596_v25 = vadd.f32 %v5595_v49, %v11306_v0  ;;  %v5526_v27 = vpop.f32.mrb[240].mxu1  ;;  %5853 = vmatprep.subr.bf16.mxu1 %v5781_v39  ;;  %v5675_v2 = vmax.f32 %v5592_v61, 0.0 }
 0xc4a   :  { %v5680_v62 = vmax.f32 %v5594_v12, 0.0  ;;  %v5527_v8 = vadd.f32 %v5526_v27, %v11357_v56  ;;  %v5528_v50 = vpop.f32.mrb[241].mxu1 }
 0xc4b   :  { %v5681_v1 = vmax.f32 %v5596_v25, 0.0  ;;  %v5529_v26 = vadd.f32 %v5528_v50, %v11357_v56  ;;  %v5530_v28 = vpop.f32.mrb[242].mxu1 }
 0xc4c   :  { %v5764_v10 = vpack.c.bf16 %v5680_v62, %v5674_v60  ;;  %v5531_v36 = vadd.f32 %v5530_v28, %v11355_v54  ;;  %v5532_v24 = vpop.f32.mrb[243].mxu1  ;;  %5854 = vmatpush1.bf16.msra.mxu1 %v5780_v45  ;;  %v5732_v39 = vmax.f32 %v5527_v8, 0.0 }
 0xc4d   :  { %v5765_v52 = vpack.c.bf16 %v5681_v1, %v5675_v2  ;;  %v5533_v48 = vadd.f32 %v5532_v24, %v11355_v54  ;;  %v5599_v43 = vpop.f32.mrb[0].mxu0  ;;  %5855 = vmatprep.subr.bf16.mxu1 %v5787_v6  ;;  %v5733_v11 = vmax.f32 %v5529_v26, 0.0 }
 0xc4e   :  { %v5738_v15 = vmax.f32 %v5531_v36, 0.0  ;;  %v5600_v16 = vadd.f32 %v5599_v43, %v11311_v13  ;;  %v5601_v47 = vpop.f32.mrb[1].mxu0 }
 0xc4f   :  { %v5739_v34 = vmax.f32 %v5533_v48, 0.0  ;;  %v5602_v9 = vadd.f32 %v5601_v47, %v11311_v13  ;;  %v5603_v61 = vpop.f32.mrb[2].mxu0  ;;  %5890 = vmatprep.subr.bf16.mxu0 %v5765_v52 }
 0xc50   :  { %v5792_v57 = vpack.c.bf16 %v5738_v15, %v5732_v39  ;;  %v5604_v12 = vadd.f32 %v5603_v61, %v11314_v22  ;;  %v5605_v45 = vpop.f32.mrb[3].mxu0  ;;  %5856 = vmatpush1.bf16.msra.mxu1 %v5786_v4  ;;  %5891 = vmatpush1.bf16.msra.mxu0 %v5764_v10  ;;  %v5686_v27 = vmax.f32 %v5600_v16, 0.0 }
 0xc51   :  { %v5793_v49 = vpack.c.bf16 %v5739_v34, %v5733_v11  ;;  %v5606_v6 = vadd.f32 %v5605_v45, %v11314_v22  ;;  %v5536_v25 = vpop.f32.mrb[244].mxu1  ;;  %v5687_v50 = vmax.f32 %v5602_v9, 0.0 }
 0xc52   :  { %v5692_v60 = vmax.f32 %v5604_v12, 0.0  ;;  %v5537_v62 = vadd.f32 %v5536_v25, %v11373_v18  ;;  %v5538_v8 = vpop.f32.mrb[245].mxu1 }
 0xc53   :  { %v5693_v2 = vmax.f32 %v5606_v6, 0.0  ;;  %v5539_v1 = vadd.f32 %v5538_v8, %v11373_v18  ;;  %v5540_v26 = vpop.f32.mrb[246].mxu1  ;;  %5857 = vmatprep.subr.bf16.mxu1 %v5793_v49 }
 0xc54   :  { %v5770_v28 = vpack.c.bf16 %v5692_v60, %v5686_v27  ;;  %v5541_v36 = vadd.f32 %v5540_v26, %v11371_v37  ;;  %v5542_v4 = vpop.f32.mrb[247].mxu1  ;;  %5858 = vmatpush1.bf16.msra.mxu1 %v5792_v57  ;;  %v5744_v48 = vmax.f32 %v5537_v62, 0.0 }
 0xc55   :  { %v5771_v10 = vpack.c.bf16 %v5693_v2, %v5687_v50  ;;  %v5543_v24 = vadd.f32 %v5542_v4, %v11371_v37  ;;  %v5609_v52 = vpop.f32.mrb[4].mxu0  ;;  %v5745_v16 = vmax.f32 %v5539_v1, 0.0  ;;  %v13741_v4 = vld [vmem:[%s15714_s1 + $0x4] ss:$8 sps:$4 sm:$0xff]  }
 0xc56   :  { %v5750_v43 = vmax.f32 %v5541_v36, 0.0  ;;  %v5610_v39 = vadd.f32 %v5609_v52, %v11319_v38  ;;  %v5611_v15 = vpop.f32.mrb[5].mxu0 }
 0xc57   :  { %v5751_v47 = vmax.f32 %v5543_v24, 0.0  ;;  %v5612_v11 = vadd.f32 %v5611_v15, %v11319_v38  ;;  %v5613_v34 = vpop.f32.mrb[6].mxu0  ;;  %5892 = vmatprep.subr.bf16.mxu0 %v5771_v10 }
 0xc58   :  { %v5798_v9 = vpack.c.bf16 %v5750_v43, %v5744_v48  ;;  %v5614_v61 = vadd.f32 %v5613_v34, %v11321_v40  ;;  %v5615_v12 = vpop.f32.mrb[7].mxu0  ;;  %5893 = vmatpush1.bf16.msra.mxu0 %v5770_v28  ;;  %v5698_v49 = vmax.f32 %v5610_v39, 0.0 }
 0xc59   :  { %v5799_v57 = vpack.c.bf16 %v5751_v47, %v5745_v16  ;;  %v5616_v45 = vadd.f32 %v5615_v12, %v11321_v40  ;;  %v5699_v25 = vmax.f32 %v5612_v11, 0.0 }
 0xc5a   :  { %v5704_v6 = vmax.f32 %v5614_v61, 0.0 }
 0xc5b   :  { %v5705_v27 = vmax.f32 %v5616_v45, 0.0  ;;  %5859 = vmatprep.subr.bf16.mxu1 %v5799_v57 }
 0xc5c   :  { %v5776_v60 = vpack.c.bf16 %v5704_v6, %v5698_v49  ;;  %5860 = vmatpush1.bf16.msra.mxu1 %v5798_v9 }
 0xc5d   :  { %v5777_v62 = vpack.c.bf16 %v5705_v27, %v5699_v25  ;;  %v5619_v8 = vpop.f32.mrb[8].mxu0 }
 0xc5e   :  { %v5620_v50 = vadd.f32 %v5619_v8, %v11329_v51  ;;  %v5621_v2 = vpop.f32.mrb[9].mxu0 }
 0xc5f   :  { %v5622_v1 = vadd.f32 %v5621_v2, %v11329_v51  ;;  %v5623_v26 = vpop.f32.mrb[10].mxu0  ;;  %5878 = vmatmul.mubr.bf16.vlgmr.msra.gmra.mrb[252].mxu1 %v13696_v41  ;;  %5894 = vmatprep.subr.bf16.mxu0 %v5777_v62 }
 0xc60   :  { %v5624_v28 = vadd.f32 %v5623_v26, %v11327_v33  ;;  %v5625_v36 = vpop.f32.mrb[11].mxu0  ;;  %5895 = vmatpush1.bf16.msra.mxu0 %v5776_v60  ;;  %10323 = vmatprep.mubr.msk.bf16.mxu1 %vm774_vm0, %v13741_v4  ;;  %v5710_v24 = vmax.f32 %v5620_v50, 0.0 }
 0xc61   :  { %v5626_v10 = vadd.f32 %v5625_v36, %v11327_v33  ;;  %v5711_v48 = vmax.f32 %v5622_v1, 0.0 }
 0xc62   :  { %v5716_v52 = vmax.f32 %v5624_v28, 0.0 }
 0xc63   :  { %v5717_v43 = vmax.f32 %v5626_v10, 0.0 }
 0xc64   :  { %v5782_v39 = vpack.c.bf16 %v5716_v52, %v5710_v24 }
 0xc65   :  { %v5783_v15 = vpack.c.bf16 %v5717_v43, %v5711_v48  ;;  %v5629_v16 = vpop.f32.mrb[12].mxu0 }
 0xc66   :  { %v5630_v47 = vadd.f32 %v5629_v16, %v11341_v23  ;;  %v5631_v11 = vpop.f32.mrb[13].mxu0 }
 0xc67   :  { %v5632_v34 = vadd.f32 %v5631_v11, %v11341_v23  ;;  %v5633_v9 = vpop.f32.mrb[14].mxu0  ;;  %5896 = vmatprep.subr.bf16.mxu0 %v5783_v15 }
 0xc68   :  { %v5634_v61 = vadd.f32 %v5633_v9, %v11339_v17  ;;  %v5635_v12 = vpop.f32.mrb[15].mxu0  ;;  %5897 = vmatpush1.bf16.msra.mxu0 %v5782_v39  ;;  %v5722_v45 = vmax.f32 %v5630_v47, 0.0 }
 0xc69   :  { %v5636_v57 = vadd.f32 %v5635_v12, %v11339_v17  ;;  %v5723_v6 = vmax.f32 %v5632_v34, 0.0 }
 0xc6a   :  { %v5728_v49 = vmax.f32 %v5634_v61, 0.0 }
 0xc6b   :  { %v5729_v25 = vmax.f32 %v5636_v57, 0.0 }
 0xc6c   :  { %v5788_v27 = vpack.c.bf16 %v5728_v49, %v5722_v45 }
 0xc6d   :  { %v5789_v60 = vpack.c.bf16 %v5729_v25, %v5723_v6  ;;  %v5639_v62 = vpop.f32.mrb[16].mxu0 }
 0xc6e   :  { %v5640_v8 = vadd.f32 %v5639_v62, %v11357_v56  ;;  %v5641_v50 = vpop.f32.mrb[17].mxu0 }
 0xc6f   :  { %v5642_v2 = vadd.f32 %v5641_v50, %v11357_v56  ;;  %v5643_v1 = vpop.f32.mrb[18].mxu0  ;;  %5898 = vmatprep.subr.bf16.mxu0 %v5789_v60 }
 0xc70   :  { %v5644_v26 = vadd.f32 %v5643_v1, %v11355_v54  ;;  %v5645_v28 = vpop.f32.mrb[19].mxu0  ;;  %5899 = vmatpush1.bf16.msra.mxu0 %v5788_v27  ;;  %v5734_v10 = vmax.f32 %v5640_v8, 0.0 }
 0xc71   :  { %v5646_v36 = vadd.f32 %v5645_v28, %v11355_v54  ;;  %v5735_v52 = vmax.f32 %v5642_v2, 0.0 }
 0xc72   :  { %v5740_v24 = vmax.f32 %v5644_v26, 0.0 }
 0xc73   :  { %v5741_v48 = vmax.f32 %v5646_v36, 0.0 }
 0xc74   :  { %v5794_v43 = vpack.c.bf16 %v5740_v24, %v5734_v10 }
 0xc75   :  { %v5795_v39 = vpack.c.bf16 %v5741_v48, %v5735_v52  ;;  %v5649_v15 = vpop.f32.mrb[20].mxu0 }
 0xc76   :  { %v5650_v16 = vadd.f32 %v5649_v15, %v11373_v18  ;;  %v5651_v47 = vpop.f32.mrb[21].mxu0 }
 0xc77   :  { %v5652_v11 = vadd.f32 %v5651_v47, %v11373_v18  ;;  %v5653_v34 = vpop.f32.mrb[22].mxu0  ;;  %5900 = vmatprep.subr.bf16.mxu0 %v5795_v39 }
 0xc78   :  { %v5654_v9 = vadd.f32 %v5653_v34, %v11371_v37  ;;  %v5655_v61 = vpop.f32.mrb[23].mxu0  ;;  %5901 = vmatpush1.bf16.msra.mxu0 %v5794_v43  ;;  %v5746_v57 = vmax.f32 %v5650_v16, 0.0 }
 0xc79   :  { %v5656_v12 = vadd.f32 %v5655_v61, %v11371_v37  ;;  %v5747_v49 = vmax.f32 %v5652_v11, 0.0 }
 0xc7a   :  { %v5752_v45 = vmax.f32 %v5654_v9, 0.0 }
 0xc7b   :  { %v5753_v6 = vmax.f32 %v5656_v12, 0.0 }
 0xc7c   :  { %v5800_v25 = vpack.c.bf16 %v5752_v45, %v5746_v57 }
 0xc7d   :  { %v5801_v27 = vpack.c.bf16 %v5753_v6, %v5747_v49 }
 0xc7f   :  { %5902 = vmatprep.subr.bf16.mxu0 %v5801_v27 }
 0xc80   :  { %5903 = vmatpush1.bf16.msra.mxu0 %v5800_v25 }
 0xc83   :  { %5921 = vmatmul.mubr.bf16.vlgmr.msra.gmra.mrb[24].mxu0 %v13696_v41 }
 0xc84   :  { %10331 = vmatprep.mubr.msk.bf16.mxu0 %vm774_vm0, %v13741_v4 }
 0xd0e   :  { %v5836_v60 = vpop.f32.mrb[248].mxu1 }
 0xd0f   :  { %v5837_v62 = vadd.f32 %v5836_v60, %v11479_v31  ;;  %v5838_v8 = vpop.f32.mrb[249].mxu1 }
 0xd10   :  { %v5840_v50 = vpop.f32.mrb[250].mxu1  ;;  %v5839_v41 = vadd.f32 %v5838_v8, %v11479_v31 }
 0xd11   :  { %v5943_v2 = vmul.f32 %v5837_v62, %v11477_v30  ;;  %v5841_v1 = vadd.f32 %v5840_v50, %v11482_v42  ;;  %v5842_v26 = vpop.f32.mrb[251].mxu1 }
 0xd12   :  { %v5843_v36 = vadd.f32 %v5842_v26, %v11482_v42  ;;  %v5944_v43 = vmul.f32 %v5839_v41, %v11495_v44 }
 0xd13   :  { %v5949_v28 = vmul.f32 %v5841_v1, %v11477_v30  ;;  %v13767_v10 = vadd.f32 %v5943_v2, %v13210_v20 }
 0xd14   :  { %v5950_v48 = vmul.f32 %v5843_v36, %v11495_v44 }
 0xd15   :  { %v13771_v24 = vadd.f32 %v5949_v28, %v13214_v35  ;;  %v13787_v35 = vadd.f32 %v5944_v43, %v13230_v55  ;;  %v15802_v28 = vld [vmem:[#allocation14_spill] sm:$0xff]  ;;  %v15804_v43 = vld [vmem:[#allocation12_spill] sm:$0xff] }
 0xd16   :  { %v13784_v20 = vadd.f32 %v5950_v48, %v13227_v58 }
 0xd17   :  { %v13775_v52 = vpack.c.bf16 %v13771_v24, %v13767_v10 }
 0xd18   :  { %v13795_v39 = vpack.c.bf16 %v13784_v20, %v13787_v35 }
 0xd19   :  { %6073 = vrot.lane.b32.xlu0 %v13775_v52, %s10725_s30  ;;  %6027 = vrot.lane.b32.xlu1 %v13775_v52, %s10724_s29 }
 0xd1d   :  { %6165 = vrot.lane.b32.xlu0 %v13775_v52, %s10727_s13  ;;  %6119 = vrot.lane.b32.xlu1 %v13775_v52, %s10726_s12 }
 0xd21   :  { %6029 = vrot.lane.b32.xlu0 %v13795_v39, %s10724_s29  ;;  %6221 = vrot.lane.b32.xlu1 %v13775_v52, %s10728_s18 }
 0xd25   :  { %6267 = vrot.lane.b32.xlu0 %v13775_v52, %s10729_s19  ;;  %6075 = vrot.lane.b32.xlu1 %v13795_v39, %s10725_s30 }
 0xd29   :  { %6121 = vrot.lane.b32.xlu0 %v13795_v39, %s10726_s12  ;;  %6313 = vrot.lane.b32.xlu1 %v13775_v52, %s10730_s20 }
 0xd2d   :  { %6269 = vrot.lane.b32.xlu0 %v13795_v39, %s10729_s19  ;;  %6167 = vrot.lane.b32.xlu1 %v13795_v39, %s10727_s13 }
 0xd31   :  { %6361 = vrot.lane.b32.xlu0 %v13795_v39, %s10731_s27  ;;  %6223 = vrot.lane.b32.xlu1 %v13795_v39, %s10728_s18 }
 0xd32   :  { %v5879_v58 = vpop.f32.mrb[252].mxu1 }
 0xd33   :  { %v5880_v55 = vadd.f32 %v5879_v58, %v11479_v31  ;;  %v5881_v15 = vpop.f32.mrb[253].mxu1 }
 0xd34   :  { %v5883_v16 = vpop.f32.mrb[254].mxu1  ;;  %v5882_v57 = vadd.f32 %v5881_v15, %v11479_v31  ;;  %v15805_v15 = vld [vmem:[#allocation11_spill] sm:$0xff] }
 0xd35   :  { %v5945_v47 = vmul.f32 %v5880_v55, %v11549_v63  ;;  %v5884_v11 = vadd.f32 %v5883_v16, %v11482_v42  ;;  %6315 = vrot.lane.b32.xlu1 %v13795_v39, %s10730_s20  ;;  %v5885_v34 = vpop.f32.mrb[255].mxu1 }
 0xd36   :  { %v5886_v61 = vadd.f32 %v5885_v34, %v11482_v42  ;;  %v5946_v25 = vmul.f32 %v5882_v57, %v11569_v3  ;;  %v15809_v57 = vld [vmem:[#allocation9_spill] sm:$0xff] }
 0xd37   :  { %v5951_v9 = vmul.f32 %v5884_v11, %v11549_v63  ;;  %v13825_v12 = vadd.f32 %v5945_v47, %v13268_v21  ;;  %v15807_v47 = vld [vmem:[#allocation13_spill] sm:$0xff] }
 0xd38   :  { %v5952_v6 = vmul.f32 %v5886_v61, %v11569_v3  ;;  %v6026_v61 = vpop.permute.xlu1 %6025 }
 0xd39   :  { %v13829_v45 = vadd.f32 %v5951_v9, %v13272_v29  ;;  %v13845_v29 = vadd.f32 %v5946_v25, %v13288_v46  ;;  %v6072_v9 = vpop.permute.xlu0 %6071 }
 0xd3a   :  { %v13842_v21 = vadd.f32 %v5952_v6, %v13285_v5 }
 0xd3b   :  { %v13833_v49 = vpack.c.bf16 %v13829_v45, %v13825_v12 }
 0xd3c   :  { %v13853_v27 = vpack.c.bf16 %v13842_v21, %v13845_v29  ;;  %v6118_v25 = vpop.permute.xlu1 %6117 }
 0xd3d   :  { %6271 = vrot.lane.b32.xlu1 %v13833_v49, %s10729_s19  ;;  %6225 = vrot.lane.b32.xlu0 %v13833_v49, %s10728_s18  ;;  %v6164_v6 = vpop.permute.xlu0 %6163 }
 0xd41   :  { %6363 = vrot.lane.b32.xlu1 %v13833_v49, %s10731_s27  ;;  %6359 = vrot.lane.b32.xlu0 %v13775_v52, %s10731_s27 }
 0xd45   :  { %6033 = vrot.lane.b32.xlu1 %v13853_v27, %s10724_s29  ;;  %6317 = vrot.lane.b32.xlu0 %v13833_v49, %s10730_s20 }
 0xd49   :  { %6077 = vrot.lane.b32.xlu1 %v13833_v49, %s10725_s30  ;;  %6031 = vrot.lane.b32.xlu0 %v13833_v49, %s10724_s29 }
 0xd4d   :  { %6123 = vrot.lane.b32.xlu1 %v13833_v49, %s10726_s12  ;;  %6079 = vrot.lane.b32.xlu0 %v13853_v27, %s10725_s30 }
 0xd51   :  { %6169 = vrot.lane.b32.xlu1 %v13833_v49, %s10727_s13  ;;  %6125 = vrot.lane.b32.xlu0 %v13853_v27, %s10726_s12 }
 0xd55   :  { %6227 = vrot.lane.b32.xlu1 %v13853_v27, %s10728_s18  ;;  %6171 = vrot.lane.b32.xlu0 %v13853_v27, %s10727_s13 }
 0xd56   :  { %v5922_v5 = vpop.f32.mrb[24].mxu0 }
 0xd57   :  { %v5923_v46 = vadd.f32 %v5922_v5, %v11479_v31  ;;  %v5924_v60 = vpop.f32.mrb[25].mxu0  ;;  %v15810_v5 = vld [vmem:[#allocation8_spill] sm:$0xff] }
 0xd58   :  { %v5926_v62 = vpop.f32.mrb[26].mxu0 }
 0xd59   :  { %v5947_v8 = vmul.f32 %v5923_v46, %v11623_v53  ;;  %v5927_v50 = vadd.f32 %v5926_v62, %v11482_v42  ;;  %6273 = vrot.lane.b32.xlu1 %v13853_v27, %s10729_s19  ;;  %v5928_v2 = vpop.f32.mrb[27].mxu0 }
 0xd5a   :  { %v5929_v48 = vadd.f32 %v5928_v2, %v11482_v42 }
 0xd5b   :  { %v5953_v1 = vmul.f32 %v5927_v50, %v11623_v53  ;;  %v13882_v26 = vadd.f32 %v5947_v8, %v13325_v7  ;;  %v5925_v7 = vadd.f32 %v5924_v60, %v11479_v31 }
 0xd5c   :  { %v5954_v58 = vmul.f32 %v5929_v48, %v15804_v43 }
 0xd5d   :  { %v13885_v36 = vadd.f32 %v5953_v1, %v15802_v28  ;;  %6319 = vrot.lane.b32.xlu1 %v13853_v27, %s10730_s20  ;;  %v5948_v55 = vmul.f32 %v5925_v7, %v15804_v43 }
 0xd5e   :  { %v13910_v16 = vadd.f32 %v5954_v58, %v15805_v15 }
 0xd5f   :  { %15803 = vst [vmem:[#allocation14_spill] sm:$0xff] %v13885_v36  ;;  %v13891_v41 = vpack.c.bf16 %v13885_v36, %v13882_v26  ;;  %v13913_v11 = vadd.f32 %v5948_v55, %v15807_v47  ;;  %v14108_v36 = vld [vmem:[%s15714_s1 + $0x50] ss:$8 sps:$4 sm:$0xff]  }
 0xd60   :  { %15806 = vst [vmem:[#allocation11_spill] sm:$0xff] %v13910_v16 }
 0xd61   :  { %6365 = vrot.lane.b32.xlu1 %v13853_v27, %s10731_s27  ;;  %6229 = vrot.lane.b32.xlu0 %v13891_v41, %s10728_s18  ;;  %15808 = vst [vmem:[#allocation13_spill] sm:$0xff] %v13913_v11  ;;  %v13921_v34 = vpack.c.bf16 %v13910_v16, %v13913_v11  ;;  %v14061_v11 = vld [vmem:[%s15714_s1 + $0x30] ss:$8 sps:$4 sm:$0xff]  }
 0xd65   :  { %6035 = vrot.lane.b32.xlu1 %v13891_v41, %s10724_s29  ;;  %6275 = vrot.lane.b32.xlu0 %v13891_v41, %s10729_s19 }
 0xd69   :  { %6081 = vrot.lane.b32.xlu1 %v13891_v41, %s10725_s30  ;;  %6321 = vrot.lane.b32.xlu0 %v13891_v41, %s10730_s20 }
 0xd6d   :  { %6127 = vrot.lane.b32.xlu1 %v13891_v41, %s10726_s12  ;;  %6367 = vrot.lane.b32.xlu0 %v13891_v41, %s10731_s27 }
 0xd71   :  { %6173 = vrot.lane.b32.xlu1 %v13891_v41, %s10727_s13  ;;  %6037 = vrot.lane.b32.xlu0 %v13921_v34, %s10724_s29 }
 0xd75   :  { %6231 = vrot.lane.b32.xlu1 %v13921_v34, %s10728_s18  ;;  %6083 = vrot.lane.b32.xlu0 %v13921_v34, %s10725_s30 }
 0xd79   :  { %6277 = vrot.lane.b32.xlu1 %v13921_v34, %s10729_s19  ;;  %6129 = vrot.lane.b32.xlu0 %v13921_v34, %s10726_s12 }
 0xd7d   :  { %6323 = vrot.lane.b32.xlu1 %v13921_v34, %s10730_s20  ;;  %6175 = vrot.lane.b32.xlu0 %v13921_v34, %s10727_s13 }
 0xd81   :  { %6369 = vrot.lane.b32.xlu1 %v13921_v34, %s10731_s27  ;;  %6233 = vrot.lane.b32.xlu0 %v15809_v57, %s10728_s18 }
 0xd85   :  { %6279 = vrot.lane.b32.xlu0 %v15809_v57, %s10729_s19  ;;  %7151 = vrot.lane.b32.xlu1 %v15810_v5, %s10724_s29 }
 0xd89   :  { %6325 = vrot.lane.b32.xlu0 %v15809_v57, %s10730_s20  ;;  %7243 = vrot.lane.b32.xlu1 %v15810_v5, %s10726_s12 }
 0xd8b   :  { %v6074_v46 = vpop.permute.xlu0 %6073  ;;  %v6028_v60 = vpop.permute.xlu1 %6027 }
 0xd8c   :  { %v6039_v28 = vsel %vm208_vm1, %v6026_v61, %v6028_v60  ;;  %v6085_v55 = vsel %vm255_vm2, %v6072_v9, %v6074_v46 }
 0xd8d   :  { %6371 = vrot.lane.b32.xlu0 %v15809_v57, %s10731_s27 }
 0xd8f   :  { %v6166_v62 = vpop.permute.xlu0 %6165  ;;  %v6120_v8 = vpop.permute.xlu1 %6119 }
 0xd91   :  { %7197 = vrot.lane.b32.xlu0 %v15810_v5, %s10725_s30 }
 0xd93   :  { %v6030_v50 = vpop.permute.xlu0 %6029  ;;  %v6222_v2 = vpop.permute.xlu1 %6221 }
 0xd94   :  { %v6040_v1 = vsel %vm208_vm1, %v6028_v60, %v6030_v50 }
 0xd95   :  { %6445 = vmatprep.subr.bf16.mxu1 %v6040_v1  ;;  %7289 = vrot.lane.b32.xlu0 %v15810_v5, %s10727_s13  ;;  %v6131_v1 = vsel %vm302_vm3, %v6118_v25, %v6120_v8 }
 0xd96   :  { %6446 = vmatpush1.bf16.msra.mxu1 %v6039_v28  ;;  %v6177_v28 = vsel %vm349_vm4, %v6164_v6, %v6166_v62 }
 0xd97   :  { %v6268_v48 = vpop.permute.xlu0 %6267  ;;  %v6076_v7 = vpop.permute.xlu1 %6075 }
 0xd98   :  { %v6086_v58 = vsel %vm255_vm2, %v6074_v46, %v6076_v7 }
 0xd99   :  { %6447 = vmatprep.subr.bf16.mxu1 %v6086_v58 }
 0xd9a   :  { %6448 = vmatpush1.bf16.msra.mxu1 %v6085_v55 }
 0xd9b   :  { %v6122_v15 = vpop.permute.xlu0 %6121  ;;  %v6314_v47 = vpop.permute.xlu1 %6313 }
 0xd9c   :  { %v6132_v57 = vsel %vm302_vm3, %v6120_v8, %v6122_v15 }
 0xd9d   :  { %6449 = vmatprep.subr.bf16.mxu1 %v6132_v57 }
 0xd9e   :  { %6450 = vmatpush1.bf16.msra.mxu1 %v6131_v1 }
 0xd9f   :  { %v6168_v61 = vpop.permute.xlu1 %6167  ;;  %v6270_v58 = vpop.permute.xlu0 %6269 }
 0xda0   :  { %v6178_v60 = vsel %vm349_vm4, %v6166_v62, %v6168_v61 }
 0xda1   :  { %6451 = vmatprep.subr.bf16.mxu1 %v6178_v60 }
 0xda2   :  { %6452 = vmatpush1.bf16.msra.mxu1 %v6177_v28 }
 0xda3   :  { %6453 = vmatprep.subr.bf16.mxu1 %v13795_v39  ;;  %v6224_v9 = vpop.permute.xlu1 %6223  ;;  %v6362_v46 = vpop.permute.xlu0 %6361 }
 0xda4   :  { %v6235_v8 = vsel %vm408_vm5, %v6222_v2, %v6224_v9 }
 0xda6   :  { %6454 = vmatpush1.bf16.msra.mxu1 %v13775_v52  ;;  %v6281_v52 = vsel %vm455_vm6, %v6268_v48, %v6270_v58 }
 0xda7   :  { %v6316_v55 = vpop.permute.xlu1 %6315 }
 0xda8   :  { %v6327_v2 = vsel %vm502_vm7, %v6314_v47, %v6316_v55 }
 0xdaf   :  { %v13967_v5 = vpop.permute.xlu0 %6225  ;;  %v13969_v57 = vpop.permute.xlu1 %6271 }
 0xdb0   :  { %v6236_v25 = vsel %vm408_vm5, %v6224_v9, %v13967_v5  ;;  %v6282_v39 = vsel %vm455_vm6, %v6270_v58, %v13969_v57 }
 0xdb1   :  { %6455 = vmatprep.subr.bf16.mxu1 %v6236_v25 }
 0xdb2   :  { %6456 = vmatpush1.bf16.msra.mxu1 %v6235_v8 }
 0xdb3   :  { %v6360_v6 = vpop.permute.xlu0 %6359  ;;  %6457 = vmatprep.subr.bf16.mxu1 %v6282_v39  ;;  %v13976_v62 = vpop.permute.xlu1 %6363 }
 0xdb4   :  { %v6374_v9 = vsel %vm549_vm8, %v6362_v46, %v13976_v62  ;;  %v6373_v39 = vsel %vm549_vm8, %v6360_v6, %v6362_v46  ;;  %v14006_v46 = vld [vmem:[%s15714_s1 + $0x14] ss:$8 sps:$4 sm:$0xff]  }
 0xdb6   :  { %6458 = vmatpush1.bf16.msra.mxu1 %v6281_v52 }
 0xdb7   :  { %v13979_v1 = vpop.permute.xlu0 %6317  ;;  %v13981_v60 = vpop.permute.xlu1 %6033 }
 0xdb8   :  { %v6328_v28 = vsel %vm502_vm7, %v6316_v55, %v13979_v1 }
 0xdb9   :  { %6459 = vmatprep.subr.bf16.mxu1 %v6328_v28  ;;  %v13999_v28 = vld [vmem:[%s15714_s1] ss:$8 sps:$4 sm:$0xff]  }
 0xdba   :  { %6460 = vmatpush1.bf16.msra.mxu1 %v6327_v2 }
 0xdbb   :  { %v6032_v25 = vpop.permute.xlu0 %6031  ;;  %6461 = vmatprep.subr.bf16.mxu1 %v6374_v9  ;;  %v6078_v8 = vpop.permute.xlu1 %6077 }
 0xdbc   :  { %v6042_v48 = vsel %vm208_vm1, %v6032_v25, %v13981_v60  ;;  %v6041_v58 = vsel %vm208_vm1, %v6030_v50, %v6032_v25  ;;  %v6087_v50 = vsel %vm255_vm2, %v6076_v7, %v6078_v8 }
 0xdbd   :  { %6558 = vmatprep.subr.bf16.mxu0 %v6042_v48 }
 0xdbe   :  { %6462 = vmatpush1.bf16.msra.mxu1 %v6373_v39  ;;  %6559 = vmatpush1.bf16.msra.mxu0 %v6041_v58  ;;  %v14022_v58 = vld [vmem:[%s15714_s1 + $0x10] ss:$8 sps:$4 sm:$0xff]  }
 0xdbf   :  { %v13992_v52 = vpop.permute.xlu0 %6079  ;;  %v6124_v47 = vpop.permute.xlu1 %6123 }
 0xdc0   :  { %v6088_v55 = vsel %vm255_vm2, %v6078_v8, %v13992_v52  ;;  %v6133_v25 = vsel %vm302_vm3, %v6122_v15, %v6124_v47  ;;  %v14029_v15 = vld [vmem:[%s15714_s1 + $0x24] ss:$8 sps:$4 sm:$0xff]  }
 0xdc1   :  { %6478 = vmatmul.mubr.bf16.vlgmr.msra.gmra.mrb[0].mxu1 %v13999_v28  ;;  %6560 = vmatprep.subr.bf16.mxu0 %v6088_v55 }
 0xdc2   :  { %6561 = vmatpush1.bf16.msra.mxu0 %v6087_v50  ;;  %10324 = vmatprep.mubr.msk.bf16.mxu1 %vm774_vm0, %v14006_v46  ;;  %v14038_v50 = vld [vmem:[%s15714_s1 + $0x20] ss:$8 sps:$4 sm:$0xff]  }
 0xdc3   :  { %v14010_v6 = vpop.permute.xlu0 %6125  ;;  %v6170_v2 = vpop.permute.xlu1 %6169 }
 0xdc4   :  { %v6134_v9 = vsel %vm302_vm3, %v6124_v47, %v14010_v6  ;;  %v6179_v39 = vsel %vm349_vm4, %v6168_v61, %v6170_v2  ;;  %v14044_v61 = vld [vmem:[%s15714_s1 + $0x34] ss:$8 sps:$4 sm:$0xff]  }
 0xdc5   :  { %6562 = vmatprep.subr.bf16.mxu0 %v6134_v9 }
 0xdc6   :  { %6563 = vmatpush1.bf16.msra.mxu0 %v6133_v25 }
 0xdc7   :  { %v14015_v7 = vpop.permute.xlu0 %6171  ;;  %v6228_v8 = vpop.permute.xlu1 %6227 }
 0xdc8   :  { %v6180_v48 = vsel %vm349_vm4, %v6170_v2, %v14015_v7  ;;  %v6237_v9 = vsel %vm408_vm5, %v13967_v5, %v6228_v8  ;;  %v14069_v5 = vld [vmem:[%s15714_s1 + $0x44] ss:$8 sps:$4 sm:$0xff]  }
 0xdc9   :  { %6488 = vmatmul.mubr.bf16.gmra.mrb[4].mxu1 %v14022_v58  ;;  %6564 = vmatprep.subr.bf16.mxu0 %v6180_v48 }
 0xdca   :  { %6565 = vmatpush1.bf16.msra.mxu0 %v6179_v39  ;;  %10325 = vmatprep.mubr.msk.bf16.mxu1 %vm774_vm0, %v14029_v15 }
 0xdcb   :  { %6566 = vmatprep.subr.bf16.mxu0 %v13853_v27  ;;  %v6274_v47 = vpop.permute.xlu1 %6273 }
 0xdce   :  { %6567 = vmatpush1.bf16.msra.mxu0 %v13833_v49 }
 0xdcf   :  { %v6320_v55 = vpop.permute.xlu1 %6319 }
 0xdd1   :  { %6498 = vmatmul.mubr.bf16.gmra.mrb[8].mxu1 %v14038_v50 }
 0xdd2   :  { %10326 = vmatprep.mubr.msk.bf16.mxu1 %vm774_vm0, %v14044_v61 }
 0xdd3   :  { %v14048_v27 = vpop.permute.xlu0 %6229  ;;  %v6366_v2 = vpop.permute.xlu1 %6365 }
 0xdd4   :  { %v6238_v49 = vsel %vm408_vm5, %v6228_v8, %v14048_v27 }
 0xdd5   :  { %6568 = vmatprep.subr.bf16.mxu0 %v6238_v49  ;;  %v6283_v49 = vsel %vm455_vm6, %v13969_v57, %v6274_v47 }
 0xdd6   :  { %6569 = vmatpush1.bf16.msra.mxu0 %v6237_v9 }
 0xdd7   :  { %v14054_v25 = vpop.permute.xlu0 %6275  ;;  %v6036_v48 = vpop.permute.xlu1 %6035 }
 0xdd8   :  { %v6284_v39 = vsel %vm455_vm6, %v6274_v47, %v14054_v25 }
 0xdd9   :  { %6508 = vmatmul.mubr.bf16.gmra.mrb[12].mxu1 %v14061_v11  ;;  %6570 = vmatprep.subr.bf16.mxu0 %v6284_v39  ;;  %v6329_v39 = vsel %vm502_vm7, %v13979_v1, %v6320_v55  ;;  %v14094_v1 = vld [vmem:[%s15714_s1 + $0x54] ss:$8 sps:$4 sm:$0xff]  }
 0xdda   :  { %6571 = vmatpush1.bf16.msra.mxu0 %v6283_v49  ;;  %10327 = vmatprep.mubr.msk.bf16.mxu1 %vm774_vm0, %v14069_v5  ;;  %v14086_v49 = vld [vmem:[%s15714_s1 + $0x40] ss:$8 sps:$4 sm:$0xff]  }
 0xddb   :  { %v14073_v8 = vpop.permute.xlu0 %6321  ;;  %v6082_v16 = vpop.permute.xlu1 %6081 }
 0xddc   :  { %v6330_v9 = vsel %vm502_vm7, %v6320_v55, %v14073_v8 }
 0xddd   :  { %6572 = vmatprep.subr.bf16.mxu0 %v6330_v9  ;;  %v6375_v9 = vsel %vm549_vm8, %v13976_v62, %v6366_v2 }
 0xdde   :  { %6573 = vmatpush1.bf16.msra.mxu0 %v6329_v39 }
 0xddf   :  { %v14079_v57 = vpop.permute.xlu0 %6367  ;;  %v6128_v55 = vpop.permute.xlu1 %6127 }
 0xde0   :  { %v6376_v47 = vsel %vm549_vm8, %v6366_v2, %v14079_v57 }
 0xde1   :  { %6518 = vmatmul.mubr.bf16.gmra.mrb[16].mxu1 %v14086_v49  ;;  %6574 = vmatprep.subr.bf16.mxu0 %v6376_v47  ;;  %v6043_v47 = vsel %vm208_vm1, %v13981_v60, %v6036_v48  ;;  %v14116_v60 = vld [vmem:[%s15714_s1 + $0x64] ss:$8 sps:$4 sm:$0xff]  }
 0xde2   :  { %6575 = vmatpush1.bf16.msra.mxu0 %v6375_v9  ;;  %10328 = vmatprep.mubr.msk.bf16.mxu1 %vm774_vm0, %v14094_v1 }
 0xde3   :  { %v6038_v39 = vpop.permute.xlu0 %6037  ;;  %v6174_v9 = vpop.permute.xlu1 %6173 }
 0xde4   :  { %v6044_v43 = vsel %vm208_vm1, %v6036_v48, %v6038_v39 }
 0xde5   :  { %6591 = vmatmul.mubr.bf16.vlgmr.msra.gmra.mrb[28].mxu0 %v13999_v28  ;;  %6671 = vmatprep.subr.bf16.mxu1 %v6044_v43  ;;  %v6089_v43 = vsel %vm255_vm2, %v13992_v52, %v6082_v16 }
 0xde6   :  { %6672 = vmatpush1.bf16.msra.mxu1 %v6043_v47  ;;  %10332 = vmatprep.mubr.msk.bf16.mxu0 %vm774_vm0, %v14006_v46  ;;  %v6135_v47 = vsel %vm302_vm3, %v14010_v6, %v6128_v55  ;;  %v10663_v6 = vld [vmem:[%s15714_s1 + $0x74] ss:$8 sps:$4 sm:$0xff]  }
 0xde7   :  { %v6084_v62 = vpop.permute.xlu0 %6083 }
 0xde8   :  { %v6090_v2 = vsel %vm255_vm2, %v6082_v16, %v6084_v62  ;;  %v6232_v16 = vpop.permute.xlu1 %6231 }
 0xde9   :  { %6528 = vmatmul.mubr.bf16.gmra.mrb[20].mxu1 %v14108_v36  ;;  %6673 = vmatprep.subr.bf16.mxu1 %v6090_v2  ;;  %v10662_v2 = vld [vmem:[%s15714_s1 + $0x60] ss:$8 sps:$4 sm:$0xff]  }
 0xdea   :  { %6674 = vmatpush1.bf16.msra.mxu1 %v6089_v43  ;;  %10329 = vmatprep.mubr.msk.bf16.mxu1 %vm774_vm0, %v14116_v60  ;;  %v6181_v43 = vsel %vm349_vm4, %v14015_v7, %v6174_v9 }
 0xdeb   :  { %v6130_v48 = vpop.permute.xlu0 %6129 }
 0xdec   :  { %v6136_v39 = vsel %vm302_vm3, %v6128_v55, %v6130_v48  ;;  %v6278_v48 = vpop.permute.xlu1 %6277 }
 0xded   :  { %6601 = vmatmul.mubr.bf16.gmra.mrb[32].mxu0 %v14022_v58  ;;  %6675 = vmatprep.subr.bf16.mxu1 %v6136_v39 }
 0xdee   :  { %6676 = vmatpush1.bf16.msra.mxu1 %v6135_v47  ;;  %10333 = vmatprep.mubr.msk.bf16.mxu0 %vm774_vm0, %v14029_v15 }
 0xdef   :  { %v6176_v52 = vpop.permute.xlu0 %6175 }
 0xdf0   :  { %v6182_v62 = vsel %vm349_vm4, %v6174_v9, %v6176_v52  ;;  %v10664_v9 = vld [vmem:[%s15714_s1 + $0x70] ss:$8 sps:$4 sm:$0xff]  }
 0xdf1   :  { %6538 = vmatmul.mubr.bf16.gmra.mrb[24].mxu1 %v10662_v2  ;;  %6677 = vmatprep.subr.bf16.mxu1 %v6182_v62  ;;  %v6285_v62 = vsel %vm455_vm6, %v14054_v25, %v6278_v48 }
 0xdf2   :  { %6678 = vmatpush1.bf16.msra.mxu1 %v6181_v43  ;;  %10330 = vmatprep.mubr.msk.bf16.mxu1 %vm774_vm0, %v10663_v6 }
 0xdf3   :  { %v6234_v55 = vpop.permute.xlu0 %6233  ;;  %6679 = vmatprep.subr.bf16.mxu1 %v13921_v34  ;;  %v6239_v34 = vsel %vm408_vm5, %v14048_v27, %v6232_v16 }
 0xdf4   :  { %v6240_v39 = vsel %vm408_vm5, %v6232_v16, %v6234_v55 }
 0xdf5   :  { %6611 = vmatmul.mubr.bf16.gmra.mrb[36].mxu0 %v14038_v50 }
 0xdf6   :  { %6680 = vmatpush1.bf16.msra.mxu1 %v13891_v41  ;;  %10334 = vmatprep.mubr.msk.bf16.mxu0 %vm774_vm0, %v14044_v61  ;;  %v6324_v41 = vpop.permute.xlu1 %6323 }
 0xdf7   :  { %v6280_v7 = vpop.permute.xlu0 %6279  ;;  %6681 = vmatprep.subr.bf16.mxu1 %v6240_v39 }
 0xdf8   :  { %v6286_v47 = vsel %vm455_vm6, %v6278_v48, %v6280_v7 }
 0xdf9   :  { %6548 = vmatmul.mubr.bf16.gmra.mrb[28].mxu1 %v10664_v9 }
 0xdfa   :  { %6682 = vmatpush1.bf16.msra.mxu1 %v6239_v34  ;;  %10339 = vmatprep.mubr.msk.bf16.mxu1 %vm774_vm0, %v13741_v4  ;;  %v6370_v16 = vpop.permute.xlu1 %6369  ;;  %v6331_v4 = vsel %vm502_vm7, %v14073_v8, %v6324_v41 }
 0xdfb   :  { %v6326_v52 = vpop.permute.xlu0 %6325  ;;  %6683 = vmatprep.subr.bf16.mxu1 %v6286_v47  ;;  %v6377_v25 = vsel %vm549_vm8, %v14079_v57, %v6370_v16 }
 0xdfc   :  { %v6332_v43 = vsel %vm502_vm7, %v6324_v41, %v6326_v52 }
 0xdfd   :  { %6621 = vmatmul.mubr.bf16.gmra.mrb[40].mxu0 %v14061_v11 }
 0xdfe   :  { %6684 = vmatpush1.bf16.msra.mxu1 %v6285_v62  ;;  %10335 = vmatprep.mubr.msk.bf16.mxu0 %vm774_vm0, %v14069_v5 }
 0xdff   :  { %v6372_v27 = vpop.permute.xlu0 %6371  ;;  %6685 = vmatprep.subr.bf16.mxu1 %v6332_v43 }
 0xe00   :  { %v6378_v55 = vsel %vm549_vm8, %v6370_v16, %v6372_v27 }
 0xe02   :  { %6686 = vmatpush1.bf16.msra.mxu1 %v6331_v4 }
 0xe03   :  { %6687 = vmatprep.subr.bf16.mxu1 %v6378_v55 }
 0xe05   :  { %6631 = vmatmul.mubr.bf16.gmra.mrb[44].mxu0 %v14086_v49 }
 0xe06   :  { %6688 = vmatpush1.bf16.msra.mxu1 %v6377_v25  ;;  %10336 = vmatprep.mubr.msk.bf16.mxu0 %vm774_vm0, %v14094_v1 }
 0xe09   :  { %6704 = vmatmul.mubr.bf16.vlgmr.msra.gmra.mrb[32].mxu1 %v13999_v28 }
 0xe0a   :  { %10340 = vmatprep.mubr.msk.bf16.mxu1 %vm774_vm0, %v14006_v46 }
 0xe0d   :  { %6641 = vmatmul.mubr.bf16.gmra.mrb[48].mxu0 %v14108_v36 }
 0xe0e   :  { %10337 = vmatprep.mubr.msk.bf16.mxu0 %vm774_vm0, %v14116_v60 }
 0xe11   :  { %6714 = vmatmul.mubr.bf16.gmra.mrb[36].mxu1 %v14022_v58 }
 0xe12   :  { %10341 = vmatprep.mubr.msk.bf16.mxu1 %vm774_vm0, %v14029_v15 }
 0xe15   :  { %6651 = vmatmul.mubr.bf16.gmra.mrb[52].mxu0 %v10662_v2 }
 0xe16   :  { %10338 = vmatprep.mubr.msk.bf16.mxu0 %vm774_vm0, %v10663_v6 }
 0xe19   :  { %6724 = vmatmul.mubr.bf16.gmra.mrb[40].mxu1 %v14038_v50 }
 0xe1a   :  { %10342 = vmatprep.mubr.msk.bf16.mxu1 %vm774_vm0, %v14044_v61 }
 0xe1d   :  { %6661 = vmatmul.mubr.bf16.gmra.mrb[56].mxu0 %v10664_v9 }
 0xe1e   :  { %6960 = vmatprep.mubr.bf16.mxu0 %v15776_v19 }
 0xe21   :  { %6734 = vmatmul.mubr.bf16.gmra.mrb[44].mxu1 %v14061_v11 }
 0xe22   :  { %10343 = vmatprep.mubr.msk.bf16.mxu1 %vm774_vm0, %v14069_v5 }
 0xe29   :  { %6744 = vmatmul.mubr.bf16.gmra.mrb[48].mxu1 %v14086_v49 }
 0xe2a   :  { %10344 = vmatprep.mubr.msk.bf16.mxu1 %vm774_vm0, %v14094_v1 }
 0xe31   :  { %6754 = vmatmul.mubr.bf16.gmra.mrb[52].mxu1 %v14108_v36 }
 0xe32   :  { %10345 = vmatprep.mubr.msk.bf16.mxu1 %vm774_vm0, %v14116_v60 }
 0xe39   :  { %6764 = vmatmul.mubr.bf16.gmra.mrb[56].mxu1 %v10662_v2 }
 0xe3a   :  { %10346 = vmatprep.mubr.msk.bf16.mxu1 %vm774_vm0, %v10663_v6 }
 0xe41   :  { %6774 = vmatmul.mubr.bf16.gmra.mrb[60].mxu1 %v10664_v9 }
 0xe42   :  { %7046 = vmatprep.mubr.bf16.mxu1 %v15776_v19 }
 0xe94   :  { %v6479_v11 = vpop.f32.mrb[0].mxu1 }
 0xe95   :  { %v6480_v28 = vadd.f32 %v6479_v11, %v11295_v14  ;;  %v6481_v46 = vpop.f32.mrb[1].mxu1 }
 0xe96   :  { %v6482_v58 = vadd.f32 %v6481_v46, %v11295_v14  ;;  %v6483_v15 = vpop.f32.mrb[2].mxu1 }
 0xe97   :  { %v6484_v50 = vadd.f32 %v6483_v15, %v11297_v32  ;;  %v6485_v61 = vpop.f32.mrb[3].mxu1  ;;  %v6784_v5 = vmax.f32 %v6480_v28, 0.0 }
 0xe98   :  { %v6486_v36 = vadd.f32 %v6485_v61, %v11297_v32  ;;  %v6785_v57 = vmax.f32 %v6482_v58, 0.0 }
 0xe99   :  { %v6790_v8 = vmax.f32 %v6484_v50, 0.0 }
 0xe9a   :  { %v6791_v49 = vmax.f32 %v6486_v36, 0.0 }
 0xe9b   :  { %v6880_v1 = vpack.c.bf16 %v6790_v8, %v6784_v5 }
 0xe9c   :  { %v6881_v60 = vpack.c.bf16 %v6791_v49, %v6785_v57  ;;  %v6489_v2 = vpop.f32.mrb[4].mxu1 }
 0xe9d   :  { %v6490_v6 = vadd.f32 %v6489_v2, %v11303_v59  ;;  %v6491_v48 = vpop.f32.mrb[5].mxu1 }
 0xe9e   :  { %v6492_v39 = vadd.f32 %v6491_v48, %v11303_v59  ;;  %v6493_v7 = vpop.f32.mrb[6].mxu1  ;;  %6928 = vmatprep.subr.bf16.mxu0 %v6881_v60 }
 0xe9f   :  { %v6494_v9 = vadd.f32 %v6493_v7, %v11306_v0  ;;  %v6495_v34 = vpop.f32.mrb[7].mxu1  ;;  %6929 = vmatpush1.bf16.msra.mxu0 %v6880_v1  ;;  %v6796_v41 = vmax.f32 %v6490_v6, 0.0 }
 0xea0   :  { %v6496_v47 = vadd.f32 %v6495_v34, %v11306_v0  ;;  %v6797_v62 = vmax.f32 %v6492_v39, 0.0 }
 0xea1   :  { %v6802_v52 = vmax.f32 %v6494_v9, 0.0 }
 0xea2   :  { %v6803_v43 = vmax.f32 %v6496_v47, 0.0 }
 0xea3   :  { %v6886_v27 = vpack.c.bf16 %v6802_v52, %v6796_v41 }
 0xea4   :  { %v6887_v16 = vpack.c.bf16 %v6803_v43, %v6797_v62  ;;  %v6499_v4 = vpop.f32.mrb[8].mxu1 }
 0xea5   :  { %v6500_v55 = vadd.f32 %v6499_v4, %v11311_v13  ;;  %v6501_v25 = vpop.f32.mrb[9].mxu1 }
 0xea6   :  { %v6502_v11 = vadd.f32 %v6501_v25, %v11311_v13  ;;  %v6503_v28 = vpop.f32.mrb[10].mxu1  ;;  %6930 = vmatprep.subr.bf16.mxu0 %v6887_v16 }
 0xea7   :  { %v6504_v46 = vadd.f32 %v6503_v28, %v11314_v22  ;;  %v6505_v58 = vpop.f32.mrb[11].mxu1  ;;  %6931 = vmatpush1.bf16.msra.mxu0 %v6886_v27  ;;  %v6808_v50 = vmax.f32 %v6500_v55, 0.0 }
 0xea8   :  { %v6506_v15 = vadd.f32 %v6505_v58, %v11314_v22  ;;  %v6809_v36 = vmax.f32 %v6502_v11, 0.0 }
 0xea9   :  { %v6814_v61 = vmax.f32 %v6504_v46, 0.0 }
 0xeaa   :  { %v6815_v5 = vmax.f32 %v6506_v15, 0.0 }
 0xeab   :  { %v6892_v8 = vpack.c.bf16 %v6814_v61, %v6808_v50 }
 0xeac   :  { %v6893_v57 = vpack.c.bf16 %v6815_v5, %v6809_v36  ;;  %v6509_v49 = vpop.f32.mrb[12].mxu1 }
 0xead   :  { %v6510_v1 = vadd.f32 %v6509_v49, %v11319_v38  ;;  %v6511_v60 = vpop.f32.mrb[13].mxu1 }
 0xeae   :  { %v6512_v2 = vadd.f32 %v6511_v60, %v11319_v38  ;;  %v6513_v6 = vpop.f32.mrb[14].mxu1  ;;  %6932 = vmatprep.subr.bf16.mxu0 %v6893_v57 }
 0xeaf   :  { %v6514_v48 = vadd.f32 %v6513_v6, %v11321_v40  ;;  %v6515_v39 = vpop.f32.mrb[15].mxu1  ;;  %6933 = vmatpush1.bf16.msra.mxu0 %v6892_v8  ;;  %v6820_v9 = vmax.f32 %v6510_v1, 0.0 }
 0xeb0   :  { %v6516_v7 = vadd.f32 %v6515_v39, %v11321_v40  ;;  %v6821_v47 = vmax.f32 %v6512_v2, 0.0 }
 0xeb1   :  { %v6826_v34 = vmax.f32 %v6514_v48, 0.0 }
 0xeb2   :  { %v6827_v41 = vmax.f32 %v6516_v7, 0.0 }
 0xeb3   :  { %v6898_v52 = vpack.c.bf16 %v6826_v34, %v6820_v9 }
 0xeb4   :  { %v6899_v62 = vpack.c.bf16 %v6827_v41, %v6821_v47  ;;  %v6519_v43 = vpop.f32.mrb[16].mxu1 }
 0xeb5   :  { %v6520_v27 = vadd.f32 %v6519_v43, %v11329_v51  ;;  %v6521_v16 = vpop.f32.mrb[17].mxu1 }
 0xeb6   :  { %v6522_v4 = vadd.f32 %v6521_v16, %v11329_v51  ;;  %v6523_v55 = vpop.f32.mrb[18].mxu1  ;;  %6934 = vmatprep.subr.bf16.mxu0 %v6899_v62 }
 0xeb7   :  { %v6524_v25 = vadd.f32 %v6523_v55, %v11327_v33  ;;  %v6525_v11 = vpop.f32.mrb[19].mxu1  ;;  %6935 = vmatpush1.bf16.msra.mxu0 %v6898_v52  ;;  %v6832_v58 = vmax.f32 %v6520_v27, 0.0 }
 0xeb8   :  { %v6526_v28 = vadd.f32 %v6525_v11, %v11327_v33  ;;  %v6592_v46 = vpop.f32.mrb[28].mxu0  ;;  %v6833_v36 = vmax.f32 %v6522_v4, 0.0 }
 0xeb9   :  { %v6838_v15 = vmax.f32 %v6524_v25, 0.0  ;;  %v6593_v50 = vadd.f32 %v6592_v46, %v11295_v14  ;;  %v6594_v61 = vpop.f32.mrb[29].mxu0 }
 0xeba   :  { %v6839_v5 = vmax.f32 %v6526_v28, 0.0  ;;  %v6595_v8 = vadd.f32 %v6594_v61, %v11295_v14  ;;  %v6596_v57 = vpop.f32.mrb[30].mxu0 }
 0xebb   :  { %v6904_v49 = vpack.c.bf16 %v6838_v15, %v6832_v58  ;;  %v6597_v1 = vadd.f32 %v6596_v57, %v11297_v32  ;;  %v6598_v60 = vpop.f32.mrb[31].mxu0  ;;  %v6786_v39 = vmax.f32 %v6593_v50, 0.0 }
 0xebc   :  { %v6905_v2 = vpack.c.bf16 %v6839_v5, %v6833_v36  ;;  %v6599_v6 = vadd.f32 %v6598_v60, %v11297_v32  ;;  %v6529_v48 = vpop.f32.mrb[20].mxu1  ;;  %v6787_v47 = vmax.f32 %v6595_v8, 0.0 }
 0xebd   :  { %v6792_v7 = vmax.f32 %v6597_v1, 0.0  ;;  %v6530_v9 = vadd.f32 %v6529_v48, %v11341_v23  ;;  %v6531_v34 = vpop.f32.mrb[21].mxu1 }
 0xebe   :  { %v6793_v41 = vmax.f32 %v6599_v6, 0.0  ;;  %v6532_v52 = vadd.f32 %v6531_v34, %v11341_v23  ;;  %v6533_v62 = vpop.f32.mrb[22].mxu1  ;;  %6936 = vmatprep.subr.bf16.mxu0 %v6905_v2 }
 0xebf   :  { %v14215_v43 = vpack.c.bf16 %v6792_v7, %v6786_v39  ;;  %v6534_v27 = vadd.f32 %v6533_v62, %v11339_v17  ;;  %v6535_v16 = vpop.f32.mrb[23].mxu1  ;;  %6937 = vmatpush1.bf16.msra.mxu0 %v6904_v49  ;;  %v6844_v11 = vmax.f32 %v6530_v9, 0.0 }
 0xec0   :  { %v14218_v4 = vpack.c.bf16 %v6793_v41, %v6787_v47  ;;  %v6536_v55 = vadd.f32 %v6535_v16, %v11339_v17  ;;  %v6602_v25 = vpop.f32.mrb[32].mxu0  ;;  %v6845_v15 = vmax.f32 %v6532_v52, 0.0 }
 0xec1   :  { %v6850_v28 = vmax.f32 %v6534_v27, 0.0  ;;  %v6603_v46 = vadd.f32 %v6602_v25, %v11303_v59  ;;  %v6604_v58 = vpop.f32.mrb[33].mxu0 }
 0xec2   :  { %v6851_v50 = vmax.f32 %v6536_v55, 0.0  ;;  %v6605_v61 = vadd.f32 %v6604_v58, %v11303_v59  ;;  %v6606_v36 = vpop.f32.mrb[34].mxu0 }
 0xec3   :  { %v6910_v5 = vpack.c.bf16 %v6850_v28, %v6844_v11  ;;  %v6607_v8 = vadd.f32 %v6606_v36, %v11306_v0  ;;  %v6608_v57 = vpop.f32.mrb[35].mxu0  ;;  %v6798_v2 = vmax.f32 %v6603_v46, 0.0 }
 0xec4   :  { %v6911_v49 = vpack.c.bf16 %v6851_v50, %v6845_v15  ;;  %v6609_v1 = vadd.f32 %v6608_v57, %v11306_v0  ;;  %v6539_v60 = vpop.f32.mrb[24].mxu1  ;;  %v6799_v7 = vmax.f32 %v6605_v61, 0.0 }
 0xec5   :  { %v6804_v6 = vmax.f32 %v6607_v8, 0.0  ;;  %v6540_v48 = vadd.f32 %v6539_v60, %v11357_v56  ;;  %v6541_v39 = vpop.f32.mrb[25].mxu1 }
 0xec6   :  { %v6805_v9 = vmax.f32 %v6609_v1, 0.0  ;;  %v6542_v34 = vadd.f32 %v6541_v39, %v11357_v56  ;;  %v6543_v47 = vpop.f32.mrb[26].mxu1  ;;  %6938 = vmatprep.subr.bf16.mxu0 %v6911_v49 }
 0xec7   :  { %v14227_v41 = vpack.c.bf16 %v6804_v6, %v6798_v2  ;;  %v6544_v52 = vadd.f32 %v6543_v47, %v11355_v54  ;;  %v6545_v62 = vpop.f32.mrb[27].mxu1  ;;  %6939 = vmatpush1.bf16.msra.mxu0 %v6910_v5  ;;  %v6856_v25 = vmax.f32 %v6540_v48, 0.0 }
 0xec8   :  { %v14230_v27 = vpack.c.bf16 %v6805_v9, %v6799_v7  ;;  %v6546_v16 = vadd.f32 %v6545_v62, %v11355_v54  ;;  %v6612_v55 = vpop.f32.mrb[36].mxu0  ;;  %v6857_v58 = vmax.f32 %v6542_v34, 0.0 }
 0xec9   :  { %v6862_v11 = vmax.f32 %v6544_v52, 0.0  ;;  %v6613_v28 = vadd.f32 %v6612_v55, %v11311_v13  ;;  %v6614_v46 = vpop.f32.mrb[37].mxu0 }
 0xeca   :  { %v6863_v15 = vmax.f32 %v6546_v16, 0.0  ;;  %v6615_v50 = vadd.f32 %v6614_v46, %v11311_v13  ;;  %v6616_v61 = vpop.f32.mrb[38].mxu0 }
 0xecb   :  { %v6916_v36 = vpack.c.bf16 %v6862_v11, %v6856_v25  ;;  %v6617_v8 = vadd.f32 %v6616_v61, %v11314_v22  ;;  %v6618_v57 = vpop.f32.mrb[39].mxu0  ;;  %v6810_v60 = vmax.f32 %v6613_v28, 0.0 }
 0xecc   :  { %v6917_v5 = vpack.c.bf16 %v6863_v15, %v6857_v58  ;;  %v6619_v49 = vadd.f32 %v6618_v57, %v11314_v22  ;;  %v6549_v1 = vpop.f32.mrb[28].mxu1  ;;  %v6811_v39 = vmax.f32 %v6615_v50, 0.0 }
 0xecd   :  { %v6816_v2 = vmax.f32 %v6617_v8, 0.0  ;;  %v6550_v6 = vadd.f32 %v6549_v1, %v11373_v18  ;;  %v6551_v48 = vpop.f32.mrb[29].mxu1 }
 0xece   :  { %v6817_v7 = vmax.f32 %v6619_v49, 0.0  ;;  %v6552_v9 = vadd.f32 %v6551_v48, %v11373_v18  ;;  %v6553_v34 = vpop.f32.mrb[30].mxu1  ;;  %6940 = vmatprep.subr.bf16.mxu0 %v6917_v5 }
 0xecf   :  { %v14239_v47 = vpack.c.bf16 %v6816_v2, %v6810_v60  ;;  %v6554_v52 = vadd.f32 %v6553_v34, %v11371_v37  ;;  %v6555_v62 = vpop.f32.mrb[31].mxu1  ;;  %6941 = vmatpush1.bf16.msra.mxu0 %v6916_v36  ;;  %v6868_v11 = vmax.f32 %v6550_v6, 0.0 }
 0xed0   :  { %v6895_v16 = vpack.c.bf16 %v6817_v7, %v6811_v39  ;;  %v6556_v55 = vadd.f32 %v6555_v62, %v11371_v37  ;;  %v6622_v25 = vpop.f32.mrb[40].mxu0  ;;  %v6869_v15 = vmax.f32 %v6552_v9, 0.0 }
 0xed1   :  { %v6874_v28 = vmax.f32 %v6554_v52, 0.0  ;;  %v6623_v46 = vadd.f32 %v6622_v25, %v11319_v38  ;;  %v6624_v58 = vpop.f32.mrb[41].mxu0  ;;  %v14253_v25 = vld [vmem:[%s15716_s3] sm:$0xff]  }
 0xed2   :  { %v6875_v50 = vmax.f32 %v6556_v55, 0.0  ;;  %v6625_v61 = vadd.f32 %v6624_v58, %v11319_v38  ;;  %v6626_v8 = vpop.f32.mrb[42].mxu0 }
 0xed3   :  { %v6922_v57 = vpack.c.bf16 %v6874_v28, %v6868_v11  ;;  %v6627_v5 = vadd.f32 %v6626_v8, %v11321_v40  ;;  %v6628_v49 = vpop.f32.mrb[43].mxu0  ;;  %v6822_v60 = vmax.f32 %v6623_v46, 0.0 }
 0xed4   :  { %v6923_v1 = vpack.c.bf16 %v6875_v50, %v6869_v15  ;;  %v6629_v36 = vadd.f32 %v6628_v49, %v11321_v40  ;;  %v6823_v48 = vmax.f32 %v6625_v61, 0.0 }
 0xed5   :  { %v6828_v2 = vmax.f32 %v6627_v5, 0.0 }
 0xed6   :  { %v6829_v6 = vmax.f32 %v6629_v36, 0.0  ;;  %6942 = vmatprep.subr.bf16.mxu0 %v6923_v1 }
 0xed7   :  { %v6900_v39 = vpack.c.bf16 %v6828_v2, %v6822_v60  ;;  %6943 = vmatpush1.bf16.msra.mxu0 %v6922_v57 }
 0xed8   :  { %v6901_v7 = vpack.c.bf16 %v6829_v6, %v6823_v48  ;;  %v6632_v9 = vpop.f32.mrb[44].mxu0  ;;  %6971 = vmatprep.subr.bf16.mxu0 %v14218_v4 }
 0xed9   :  { %v6633_v34 = vadd.f32 %v6632_v9, %v11329_v51  ;;  %v6634_v52 = vpop.f32.mrb[45].mxu0 }
 0xeda   :  { %v6635_v62 = vadd.f32 %v6634_v52, %v11329_v51  ;;  %v6636_v55 = vpop.f32.mrb[46].mxu0  ;;  %6961 = vmatmul.mubr.bf16.vlgmr.msra.gmra.mrb[60].mxu0 %v14253_v25 }
 0xedb   :  { %v6637_v11 = vadd.f32 %v6636_v55, %v11327_v33  ;;  %v6638_v28 = vpop.f32.mrb[47].mxu0  ;;  %6972 = vmatpush1.bf16.msra.mxu0 %v14215_v43  ;;  %7003 = vmatprep.mubr.bf16.mxu0 %v15776_v19  ;;  %v6834_v58 = vmax.f32 %v6633_v34, 0.0 }
 0xedc   :  { %v6639_v4 = vadd.f32 %v6638_v28, %v11327_v33  ;;  %v6705_v46 = vpop.f32.mrb[32].mxu1  ;;  %6973 = vmatprep.subr.bf16.mxu0 %v14230_v27  ;;  %v6835_v8 = vmax.f32 %v6635_v62, 0.0 }
 0xedd   :  { %v6840_v15 = vmax.f32 %v6637_v11, 0.0  ;;  %v6706_v50 = vadd.f32 %v6705_v46, %v11295_v14  ;;  %v6707_v61 = vpop.f32.mrb[33].mxu1 }
 0xede   :  { %v6841_v57 = vmax.f32 %v6639_v4, 0.0  ;;  %v6708_v5 = vadd.f32 %v6707_v61, %v11295_v14  ;;  %v6709_v49 = vpop.f32.mrb[34].mxu1 }
 0xedf   :  { %v6906_v1 = vpack.c.bf16 %v6840_v15, %v6834_v58  ;;  %v6710_v43 = vadd.f32 %v6709_v49, %v11297_v32  ;;  %v6711_v36 = vpop.f32.mrb[35].mxu1  ;;  %6974 = vmatpush1.bf16.msra.mxu0 %v14227_v41  ;;  %v6788_v48 = vmax.f32 %v6706_v50, 0.0 }
 0xee0   :  { %v6907_v60 = vpack.c.bf16 %v6841_v57, %v6835_v8  ;;  %v6712_v2 = vadd.f32 %v6711_v36, %v11297_v32  ;;  %v6642_v27 = vpop.f32.mrb[48].mxu0  ;;  %6975 = vmatprep.subr.bf16.mxu0 %v6895_v16  ;;  %v6789_v52 = vmax.f32 %v6708_v5, 0.0 }
 0xee1   :  { %v6794_v6 = vmax.f32 %v6710_v43, 0.0  ;;  %v6643_v9 = vadd.f32 %v6642_v27, %v11341_v23  ;;  %v6644_v34 = vpop.f32.mrb[49].mxu0 }
 0xee2   :  { %v6795_v62 = vmax.f32 %v6712_v2, 0.0  ;;  %v6645_v55 = vadd.f32 %v6644_v34, %v11341_v23  ;;  %v6646_v11 = vpop.f32.mrb[50].mxu0 }
 0xee3   :  { %v6884_v28 = vpack.c.bf16 %v6794_v6, %v6788_v48  ;;  %v6647_v4 = vadd.f32 %v6646_v11, %v11339_v17  ;;  %v6648_v46 = vpop.f32.mrb[51].mxu0  ;;  %6976 = vmatpush1.bf16.msra.mxu0 %v14239_v47  ;;  %v6846_v15 = vmax.f32 %v6643_v9, 0.0 }
 0xee4   :  { %v6885_v41 = vpack.c.bf16 %v6795_v62, %v6789_v52  ;;  %v6649_v58 = vadd.f32 %v6648_v46, %v11339_v17  ;;  %v6715_v16 = vpop.f32.mrb[36].mxu1  ;;  %6977 = vmatprep.subr.bf16.mxu0 %v6901_v7  ;;  %v6847_v57 = vmax.f32 %v6645_v55, 0.0 }
 0xee5   :  { %v6852_v50 = vmax.f32 %v6647_v4, 0.0  ;;  %v6716_v61 = vadd.f32 %v6715_v16, %v11303_v59  ;;  %v6717_v8 = vpop.f32.mrb[37].mxu1 }
 0xee6   :  { %v6853_v5 = vmax.f32 %v6649_v58, 0.0  ;;  %v6718_v49 = vadd.f32 %v6717_v8, %v11303_v59  ;;  %v6719_v43 = vpop.f32.mrb[38].mxu1  ;;  %7014 = vmatprep.subr.bf16.mxu1 %v6885_v41 }
 0xee7   :  { %v6912_v36 = vpack.c.bf16 %v6852_v50, %v6846_v15  ;;  %v6720_v2 = vadd.f32 %v6719_v43, %v11306_v0  ;;  %v6721_v47 = vpop.f32.mrb[39].mxu1  ;;  %6978 = vmatpush1.bf16.msra.mxu0 %v6900_v39  ;;  %7015 = vmatpush1.bf16.msra.mxu1 %v6884_v28  ;;  %v6800_v6 = vmax.f32 %v6716_v61, 0.0 }
 0xee8   :  { %v6913_v27 = vpack.c.bf16 %v6853_v5, %v6847_v57  ;;  %v6722_v7 = vadd.f32 %v6721_v47, %v11306_v0  ;;  %v6652_v48 = vpop.f32.mrb[52].mxu0  ;;  %6979 = vmatprep.subr.bf16.mxu0 %v6907_v60  ;;  %v6801_v62 = vmax.f32 %v6718_v49, 0.0 }
 0xee9   :  { %v6806_v9 = vmax.f32 %v6720_v2, 0.0  ;;  %v6653_v34 = vadd.f32 %v6652_v48, %v11357_v56  ;;  %v6654_v52 = vpop.f32.mrb[53].mxu0 }
 0xeea   :  { %v6807_v55 = vmax.f32 %v6722_v7, 0.0  ;;  %v6655_v11 = vadd.f32 %v6654_v52, %v11357_v56  ;;  %v6656_v4 = vpop.f32.mrb[54].mxu0 }
 0xeeb   :  { %v6890_v46 = vpack.c.bf16 %v6806_v9, %v6800_v6  ;;  %v6657_v41 = vadd.f32 %v6656_v4, %v11355_v54  ;;  %v6658_v39 = vpop.f32.mrb[55].mxu0  ;;  %6980 = vmatpush1.bf16.msra.mxu0 %v6906_v1  ;;  %v6858_v60 = vmax.f32 %v6653_v34, 0.0 }
 0xeec   :  { %v6891_v28 = vpack.c.bf16 %v6807_v55, %v6801_v62  ;;  %v6659_v58 = vadd.f32 %v6658_v39, %v11355_v54  ;;  %v6725_v16 = vpop.f32.mrb[40].mxu1  ;;  %6981 = vmatprep.subr.bf16.mxu0 %v6913_v27  ;;  %v6859_v8 = vmax.f32 %v6655_v11, 0.0 }
 0xeed   :  { %v6864_v15 = vmax.f32 %v6657_v41, 0.0  ;;  %v6726_v50 = vadd.f32 %v6725_v16, %v11311_v13  ;;  %v6727_v61 = vpop.f32.mrb[41].mxu1 }
 0xeee   :  { %v6865_v57 = vmax.f32 %v6659_v58, 0.0  ;;  %v6728_v5 = vadd.f32 %v6727_v61, %v11311_v13  ;;  %v6729_v49 = vpop.f32.mrb[42].mxu1  ;;  %7016 = vmatprep.subr.bf16.mxu1 %v6891_v28 }
 0xeef   :  { %v6918_v43 = vpack.c.bf16 %v6864_v15, %v6858_v60  ;;  %v6730_v2 = vadd.f32 %v6729_v49, %v11314_v22  ;;  %v6731_v1 = vpop.f32.mrb[43].mxu1  ;;  %6982 = vmatpush1.bf16.msra.mxu0 %v6912_v36  ;;  %7017 = vmatpush1.bf16.msra.mxu1 %v6890_v46  ;;  %v6812_v48 = vmax.f32 %v6726_v50, 0.0 }
 0xef0   :  { %v6919_v47 = vpack.c.bf16 %v6865_v57, %v6859_v8  ;;  %v6732_v27 = vadd.f32 %v6731_v1, %v11314_v22  ;;  %v6662_v7 = vpop.f32.mrb[56].mxu0  ;;  %v6813_v52 = vmax.f32 %v6728_v5, 0.0 }
 0xef1   :  { %v6818_v6 = vmax.f32 %v6730_v2, 0.0  ;;  %v6663_v9 = vadd.f32 %v6662_v7, %v11373_v18  ;;  %v6664_v34 = vpop.f32.mrb[57].mxu0 }
 0xef2   :  { %v6819_v62 = vmax.f32 %v6732_v27, 0.0  ;;  %v6665_v55 = vadd.f32 %v6664_v34, %v11373_v18  ;;  %v6666_v11 = vpop.f32.mrb[58].mxu0  ;;  %6983 = vmatprep.subr.bf16.mxu0 %v6919_v47 }
 0xef3   :  { %v6896_v4 = vpack.c.bf16 %v6818_v6, %v6812_v48  ;;  %v6667_v41 = vadd.f32 %v6666_v11, %v11371_v37  ;;  %v6668_v36 = vpop.f32.mrb[59].mxu0  ;;  %6984 = vmatpush1.bf16.msra.mxu0 %v6918_v43  ;;  %v6870_v58 = vmax.f32 %v6663_v9, 0.0 }
 0xef4   :  { %v6897_v46 = vpack.c.bf16 %v6819_v62, %v6813_v52  ;;  %v6669_v39 = vadd.f32 %v6668_v36, %v11371_v37  ;;  %v6735_v28 = vpop.f32.mrb[44].mxu1  ;;  %v6871_v50 = vmax.f32 %v6665_v55, 0.0  ;;  %v14298_v36 = vld [vmem:[%s15714_s1 + $0x4] ss:$8 sps:$4 sm:$0xff]  }
 0xef5   :  { %v6876_v16 = vmax.f32 %v6667_v41, 0.0  ;;  %v6736_v60 = vadd.f32 %v6735_v28, %v11319_v38  ;;  %v6737_v15 = vpop.f32.mrb[45].mxu1 }
 0xef6   :  { %v6877_v61 = vmax.f32 %v6669_v39, 0.0  ;;  %v6738_v8 = vadd.f32 %v6737_v15, %v11319_v38  ;;  %v6739_v57 = vpop.f32.mrb[46].mxu1  ;;  %7018 = vmatprep.subr.bf16.mxu1 %v6897_v46 }
 0xef7   :  { %v6924_v5 = vpack.c.bf16 %v6876_v16, %v6870_v58  ;;  %v6740_v49 = vadd.f32 %v6739_v57, %v11321_v40  ;;  %v6741_v2 = vpop.f32.mrb[47].mxu1  ;;  %7019 = vmatpush1.bf16.msra.mxu1 %v6896_v4  ;;  %v6824_v47 = vmax.f32 %v6736_v60, 0.0 }
 0xef8   :  { %v6925_v43 = vpack.c.bf16 %v6877_v61, %v6871_v50  ;;  %v6742_v1 = vadd.f32 %v6741_v2, %v11321_v40  ;;  %v6825_v7 = vmax.f32 %v6738_v8, 0.0 }
 0xef9   :  { %v6830_v27 = vmax.f32 %v6740_v49, 0.0 }
 0xefa   :  { %v6831_v48 = vmax.f32 %v6742_v1, 0.0  ;;  %6985 = vmatprep.subr.bf16.mxu0 %v6925_v43 }
 0xefb   :  { %v6902_v6 = vpack.c.bf16 %v6830_v27, %v6824_v47  ;;  %6986 = vmatpush1.bf16.msra.mxu0 %v6924_v5 }
 0xefc   :  { %v6903_v9 = vpack.c.bf16 %v6831_v48, %v6825_v7  ;;  %v6745_v34 = vpop.f32.mrb[48].mxu1 }
 0xefd   :  { %v6746_v52 = vadd.f32 %v6745_v34, %v11329_v51  ;;  %v6747_v62 = vpop.f32.mrb[49].mxu1 }
 0xefe   :  { %v6748_v55 = vadd.f32 %v6747_v62, %v11329_v51  ;;  %v6749_v11 = vpop.f32.mrb[50].mxu1  ;;  %7004 = vmatmul.mubr.bf16.vlgmr.msra.gmra.mrb[64].mxu0 %v14253_v25  ;;  %7020 = vmatprep.subr.bf16.mxu1 %v6903_v9 }
 0xeff   :  { %v6750_v4 = vadd.f32 %v6749_v11, %v11327_v33  ;;  %v6751_v41 = vpop.f32.mrb[51].mxu1  ;;  %7021 = vmatpush1.bf16.msra.mxu1 %v6902_v6  ;;  %10347 = vmatprep.mubr.msk.bf16.mxu0 %vm774_vm0, %v14298_v36  ;;  %v6836_v39 = vmax.f32 %v6746_v52, 0.0 }
 0xf00   :  { %v6752_v46 = vadd.f32 %v6751_v41, %v11327_v33  ;;  %v6837_v58 = vmax.f32 %v6748_v55, 0.0 }
 0xf01   :  { %v6842_v28 = vmax.f32 %v6750_v4, 0.0 }
 0xf02   :  { %v6843_v16 = vmax.f32 %v6752_v46, 0.0 }
 0xf03   :  { %v6908_v60 = vpack.c.bf16 %v6842_v28, %v6836_v39 }
 0xf04   :  { %v6909_v15 = vpack.c.bf16 %v6843_v16, %v6837_v58  ;;  %v6755_v50 = vpop.f32.mrb[52].mxu1 }
 0xf05   :  { %v6756_v61 = vadd.f32 %v6755_v50, %v11341_v23  ;;  %v6757_v8 = vpop.f32.mrb[53].mxu1 }
 0xf06   :  { %v6758_v57 = vadd.f32 %v6757_v8, %v11341_v23  ;;  %v6759_v5 = vpop.f32.mrb[54].mxu1  ;;  %7022 = vmatprep.subr.bf16.mxu1 %v6909_v15 }
 0xf07   :  { %v6760_v49 = vadd.f32 %v6759_v5, %v11339_v17  ;;  %v6761_v2 = vpop.f32.mrb[55].mxu1  ;;  %7023 = vmatpush1.bf16.msra.mxu1 %v6908_v60  ;;  %v6848_v1 = vmax.f32 %v6756_v61, 0.0 }
 0xf08   :  { %v6762_v43 = vadd.f32 %v6761_v2, %v11339_v17  ;;  %v6849_v27 = vmax.f32 %v6758_v57, 0.0 }
 0xf09   :  { %v6854_v47 = vmax.f32 %v6760_v49, 0.0 }
 0xf0a   :  { %v6855_v7 = vmax.f32 %v6762_v43, 0.0 }
 0xf0b   :  { %v6914_v48 = vpack.c.bf16 %v6854_v47, %v6848_v1 }
 0xf0c   :  { %v6915_v6 = vpack.c.bf16 %v6855_v7, %v6849_v27  ;;  %v6765_v9 = vpop.f32.mrb[56].mxu1 }
 0xf0d   :  { %v6766_v34 = vadd.f32 %v6765_v9, %v11357_v56  ;;  %v6767_v52 = vpop.f32.mrb[57].mxu1 }
 0xf0e   :  { %v6768_v62 = vadd.f32 %v6767_v52, %v11357_v56  ;;  %v6769_v55 = vpop.f32.mrb[58].mxu1  ;;  %7024 = vmatprep.subr.bf16.mxu1 %v6915_v6 }
 0xf0f   :  { %v6770_v11 = vadd.f32 %v6769_v55, %v11355_v54  ;;  %v6771_v4 = vpop.f32.mrb[59].mxu1  ;;  %7025 = vmatpush1.bf16.msra.mxu1 %v6914_v48  ;;  %v6860_v46 = vmax.f32 %v6766_v34, 0.0 }
 0xf10   :  { %v6772_v41 = vadd.f32 %v6771_v4, %v11355_v54  ;;  %v6861_v28 = vmax.f32 %v6768_v62, 0.0 }
 0xf11   :  { %v6866_v39 = vmax.f32 %v6770_v11, 0.0 }
 0xf12   :  { %v6867_v58 = vmax.f32 %v6772_v41, 0.0 }
 0xf13   :  { %v6920_v16 = vpack.c.bf16 %v6866_v39, %v6860_v46 }
 0xf14   :  { %v6921_v60 = vpack.c.bf16 %v6867_v58, %v6861_v28  ;;  %v6775_v15 = vpop.f32.mrb[60].mxu1 }
 0xf15   :  { %v6776_v50 = vadd.f32 %v6775_v15, %v11373_v18  ;;  %v6777_v61 = vpop.f32.mrb[61].mxu1 }
 0xf16   :  { %v6778_v8 = vadd.f32 %v6777_v61, %v11373_v18  ;;  %v6779_v57 = vpop.f32.mrb[62].mxu1  ;;  %7026 = vmatprep.subr.bf16.mxu1 %v6921_v60 }
 0xf17   :  { %v6780_v5 = vadd.f32 %v6779_v57, %v11371_v37  ;;  %v6781_v49 = vpop.f32.mrb[63].mxu1  ;;  %7027 = vmatpush1.bf16.msra.mxu1 %v6920_v16  ;;  %v6872_v43 = vmax.f32 %v6776_v50, 0.0 }
 0xf18   :  { %v6782_v2 = vadd.f32 %v6781_v49, %v11371_v37  ;;  %v6873_v47 = vmax.f32 %v6778_v8, 0.0 }
 0xf19   :  { %v6878_v1 = vmax.f32 %v6780_v5, 0.0 }
 0xf1a   :  { %v6879_v27 = vmax.f32 %v6782_v2, 0.0 }
 0xf1b   :  { %v6926_v7 = vpack.c.bf16 %v6878_v1, %v6872_v43 }
 0xf1c   :  { %v6927_v48 = vpack.c.bf16 %v6879_v27, %v6873_v47 }
 0xf1e   :  { %7028 = vmatprep.subr.bf16.mxu1 %v6927_v48 }
 0xf1f   :  { %7029 = vmatpush1.bf16.msra.mxu1 %v6926_v7 }
 0xf22   :  { %7047 = vmatmul.mubr.bf16.vlgmr.msra.gmra.mrb[64].mxu1 %v14253_v25 }
 0xf23   :  { %10355 = vmatprep.mubr.msk.bf16.mxu1 %vm774_vm0, %v14298_v36 }
 0xfad   :  { %v6962_v6 = vpop.f32.mrb[60].mxu0 }
 0xfae   :  { %v6963_v9 = vadd.f32 %v6962_v6, %v11479_v31  ;;  %v6964_v34 = vpop.f32.mrb[61].mxu0 }
 0xfaf   :  { %v6966_v52 = vpop.f32.mrb[62].mxu0  ;;  %v6965_v25 = vadd.f32 %v6964_v34, %v11479_v31 }
 0xfb0   :  { %v7069_v62 = vmul.f32 %v6963_v9, %v11477_v30  ;;  %v6967_v55 = vadd.f32 %v6966_v52, %v11482_v42  ;;  %v6968_v11 = vpop.f32.mrb[63].mxu0 }
 0xfb1   :  { %v6969_v41 = vadd.f32 %v6968_v11, %v11482_v42  ;;  %v7070_v16 = vmul.f32 %v6965_v25, %v11495_v44 }
 0xfb2   :  { %v7075_v4 = vmul.f32 %v6967_v55, %v11477_v30  ;;  %v14324_v46 = vadd.f32 %v7069_v62, %v13767_v10 }
 0xfb3   :  { %v7076_v58 = vmul.f32 %v6969_v41, %v11495_v44 }
 0xfb4   :  { %v14328_v39 = vadd.f32 %v7075_v4, %v13771_v24  ;;  %v14344_v24 = vadd.f32 %v7070_v16, %v13787_v35  ;;  %v15811_v4 = vld [vmem:[#allocation14_spill] sm:$0xff]  ;;  %v15813_v16 = vld [vmem:[#allocation12_spill] sm:$0xff] }
 0xfb5   :  { %v14341_v10 = vadd.f32 %v7076_v58, %v13784_v20 }
 0xfb6   :  { %v14332_v28 = vpack.c.bf16 %v14328_v39, %v14324_v46 }
 0xfb7   :  { %v14352_v60 = vpack.c.bf16 %v14341_v10, %v14344_v24 }
 0xfb8   :  { %7199 = vrot.lane.b32.xlu0 %v14332_v28, %s10725_s30  ;;  %7153 = vrot.lane.b32.xlu1 %v14332_v28, %s10724_s29 }
 0xfbc   :  { %7291 = vrot.lane.b32.xlu0 %v14332_v28, %s10727_s13  ;;  %7245 = vrot.lane.b32.xlu1 %v14332_v28, %s10726_s12 }
 0xfc0   :  { %7155 = vrot.lane.b32.xlu0 %v14352_v60, %s10724_s29  ;;  %7347 = vrot.lane.b32.xlu1 %v14332_v28, %s10728_s18 }
 0xfc4   :  { %7393 = vrot.lane.b32.xlu0 %v14332_v28, %s10729_s19  ;;  %7201 = vrot.lane.b32.xlu1 %v14352_v60, %s10725_s30 }
 0xfc8   :  { %7247 = vrot.lane.b32.xlu0 %v14352_v60, %s10726_s12  ;;  %7439 = vrot.lane.b32.xlu1 %v14332_v28, %s10730_s20 }
 0xfcc   :  { %7395 = vrot.lane.b32.xlu0 %v14352_v60, %s10729_s19  ;;  %7293 = vrot.lane.b32.xlu1 %v14352_v60, %s10727_s13 }
 0xfd0   :  { %7487 = vrot.lane.b32.xlu0 %v14352_v60, %s10731_s27  ;;  %7349 = vrot.lane.b32.xlu1 %v14352_v60, %s10728_s18 }
 0xfd1   :  { %v7005_v20 = vpop.f32.mrb[64].mxu0 }
 0xfd2   :  { %v7006_v35 = vadd.f32 %v7005_v20, %v11479_v31  ;;  %v7007_v15 = vpop.f32.mrb[65].mxu0 }
 0xfd3   :  { %v7009_v50 = vpop.f32.mrb[66].mxu0  ;;  %v7008_v43 = vadd.f32 %v7007_v15, %v11479_v31  ;;  %v15814_v15 = vld [vmem:[#allocation11_spill] sm:$0xff] }
 0xfd4   :  { %v7071_v61 = vmul.f32 %v7006_v35, %v11549_v63  ;;  %v7010_v8 = vadd.f32 %v7009_v50, %v11482_v42  ;;  %7441 = vrot.lane.b32.xlu1 %v14352_v60, %s10730_s20  ;;  %v7011_v57 = vpop.f32.mrb[67].mxu0 }
 0xfd5   :  { %v7012_v49 = vadd.f32 %v7011_v57, %v11482_v42  ;;  %v7072_v7 = vmul.f32 %v7008_v43, %v11569_v3  ;;  %v15818_v43 = vld [vmem:[#allocation9_spill] sm:$0xff] }
 0xfd6   :  { %v7077_v5 = vmul.f32 %v7010_v8, %v11549_v63  ;;  %v14382_v2 = vadd.f32 %v7071_v61, %v13825_v12  ;;  %v15816_v61 = vld [vmem:[#allocation13_spill] sm:$0xff] }
 0xfd7   :  { %v7078_v27 = vmul.f32 %v7012_v49, %v11569_v3  ;;  %v7152_v49 = vpop.permute.xlu1 %7151 }
 0xfd8   :  { %v14386_v1 = vadd.f32 %v7077_v5, %v13829_v45  ;;  %v14402_v45 = vadd.f32 %v7072_v7, %v13845_v29  ;;  %v7198_v5 = vpop.permute.xlu0 %7197 }
 0xfd9   :  { %v14399_v12 = vadd.f32 %v7078_v27, %v13842_v21 }
 0xfda   :  { %v14390_v47 = vpack.c.bf16 %v14386_v1, %v14382_v2 }
 0xfdb   :  { %v14410_v48 = vpack.c.bf16 %v14399_v12, %v14402_v45  ;;  %v7244_v7 = vpop.permute.xlu1 %7243 }
 0xfdc   :  { %7397 = vrot.lane.b32.xlu1 %v14390_v47, %s10729_s19  ;;  %7351 = vrot.lane.b32.xlu0 %v14390_v47, %s10728_s18  ;;  %v7290_v27 = vpop.permute.xlu0 %7289 }
 0xfe0   :  { %7489 = vrot.lane.b32.xlu1 %v14390_v47, %s10731_s27  ;;  %7485 = vrot.lane.b32.xlu0 %v14332_v28, %s10731_s27 }
 0xfe4   :  { %7159 = vrot.lane.b32.xlu1 %v14410_v48, %s10724_s29  ;;  %7443 = vrot.lane.b32.xlu0 %v14390_v47, %s10730_s20 }
 0xfe8   :  { %7203 = vrot.lane.b32.xlu1 %v14390_v47, %s10725_s30  ;;  %7157 = vrot.lane.b32.xlu0 %v14390_v47, %s10724_s29 }
 0xfec   :  { %7249 = vrot.lane.b32.xlu1 %v14390_v47, %s10726_s12  ;;  %7205 = vrot.lane.b32.xlu0 %v14410_v48, %s10725_s30 }
 0xff0   :  { %7295 = vrot.lane.b32.xlu1 %v14390_v47, %s10727_s13  ;;  %7251 = vrot.lane.b32.xlu0 %v14410_v48, %s10726_s12 }
 0xff4   :  { %7353 = vrot.lane.b32.xlu1 %v14410_v48, %s10728_s18  ;;  %7297 = vrot.lane.b32.xlu0 %v14410_v48, %s10727_s13 }
 0xff5   :  { %v7048_v21 = vpop.f32.mrb[64].mxu1 }
 0xff6   :  { %v7049_v29 = vadd.f32 %v7048_v21, %v11479_v31  ;;  %v7050_v6 = vpop.f32.mrb[65].mxu1  ;;  %v15819_v21 = vld [vmem:[#allocation8_spill] sm:$0xff] }
 0xff7   :  { %v7052_v9 = vpop.f32.mrb[66].mxu1 }
 0xff8   :  { %v7073_v34 = vmul.f32 %v7049_v29, %v11623_v53  ;;  %v7053_v52 = vadd.f32 %v7052_v9, %v11482_v42  ;;  %7399 = vrot.lane.b32.xlu1 %v14410_v48, %s10729_s19  ;;  %v7054_v62 = vpop.f32.mrb[67].mxu1 }
 0xff9   :  { %v7055_v58 = vadd.f32 %v7054_v62, %v11482_v42 }
 0xffa   :  { %v7079_v55 = vmul.f32 %v7053_v52, %v11623_v53  ;;  %v14439_v11 = vadd.f32 %v7073_v34, %v13882_v26  ;;  %v7051_v26 = vadd.f32 %v7050_v6, %v11479_v31 }
 0xffb   :  { %v7080_v20 = vmul.f32 %v7055_v58, %v15813_v16 }
 0xffc   :  { %v14442_v41 = vadd.f32 %v7079_v55, %v15811_v4  ;;  %7445 = vrot.lane.b32.xlu1 %v14410_v48, %s10730_s20  ;;  %v7074_v35 = vmul.f32 %v7051_v26, %v15813_v16  ;;  %v14645_v16 = vld [vmem:[%s15714_s1 + $0x40] ss:$8 sps:$4 sm:$0xff]  }
 0xffd   :  { %v14467_v50 = vadd.f32 %v7080_v20, %v15814_v15 }
 0xffe   :  { %15812 = vst [vmem:[#allocation14_spill] sm:$0xff] %v14442_v41  ;;  %v14448_v25 = vpack.c.bf16 %v14442_v41, %v14439_v11  ;;  %v14470_v8 = vadd.f32 %v7074_v35, %v15816_v61 }
 0xfff   :  { %15815 = vst [vmem:[#allocation11_spill] sm:$0xff] %v14467_v50 }
0x1000   :  { %7491 = vrot.lane.b32.xlu1 %v14410_v48, %s10731_s27  ;;  %7355 = vrot.lane.b32.xlu0 %v14448_v25, %s10728_s18  ;;  %15817 = vst [vmem:[#allocation13_spill] sm:$0xff] %v14470_v8  ;;  %v14478_v57 = vpack.c.bf16 %v14467_v50, %v14470_v8  ;;  %v14620_v50 = vld [vmem:[%s15714_s1 + $0x30] ss:$8 sps:$4 sm:$0xff]  }
0x1004   :  { %7161 = vrot.lane.b32.xlu1 %v14448_v25, %s10724_s29  ;;  %7401 = vrot.lane.b32.xlu0 %v14448_v25, %s10729_s19 }
0x1008   :  { %7207 = vrot.lane.b32.xlu1 %v14448_v25, %s10725_s30  ;;  %7447 = vrot.lane.b32.xlu0 %v14448_v25, %s10730_s20 }
0x100c   :  { %7253 = vrot.lane.b32.xlu1 %v14448_v25, %s10726_s12  ;;  %7493 = vrot.lane.b32.xlu0 %v14448_v25, %s10731_s27 }
0x1010   :  { %7299 = vrot.lane.b32.xlu1 %v14448_v25, %s10727_s13  ;;  %7163 = vrot.lane.b32.xlu0 %v14478_v57, %s10724_s29 }
0x1014   :  { %7357 = vrot.lane.b32.xlu1 %v14478_v57, %s10728_s18  ;;  %7209 = vrot.lane.b32.xlu0 %v14478_v57, %s10725_s30 }
0x1018   :  { %7403 = vrot.lane.b32.xlu1 %v14478_v57, %s10729_s19  ;;  %7255 = vrot.lane.b32.xlu0 %v14478_v57, %s10726_s12 }
0x101c   :  { %7449 = vrot.lane.b32.xlu1 %v14478_v57, %s10730_s20  ;;  %7301 = vrot.lane.b32.xlu0 %v14478_v57, %s10727_s13 }
0x1020   :  { %7495 = vrot.lane.b32.xlu1 %v14478_v57, %s10731_s27  ;;  %7359 = vrot.lane.b32.xlu0 %v15818_v43, %s10728_s18 }
0x1024   :  { %7405 = vrot.lane.b32.xlu0 %v15818_v43, %s10729_s19  ;;  %8277 = vrot.lane.b32.xlu1 %v15819_v21, %s10724_s29 }
0x1028   :  { %7451 = vrot.lane.b32.xlu0 %v15818_v43, %s10730_s20  ;;  %8369 = vrot.lane.b32.xlu1 %v15819_v21, %s10726_s12 }
0x102a   :  { %v7200_v29 = vpop.permute.xlu0 %7199  ;;  %v7154_v6 = vpop.permute.xlu1 %7153 }
0x102b   :  { %v7165_v4 = vsel %vm208_vm1, %v7152_v49, %v7154_v6  ;;  %v7211_v35 = vsel %vm255_vm2, %v7198_v5, %v7200_v29 }
0x102c   :  { %7497 = vrot.lane.b32.xlu0 %v15818_v43, %s10731_s27 }
0x102e   :  { %v7292_v9 = vpop.permute.xlu0 %7291  ;;  %v7246_v34 = vpop.permute.xlu1 %7245 }
0x1030   :  { %8323 = vrot.lane.b32.xlu0 %v15819_v21, %s10725_s30 }
0x1032   :  { %v7156_v52 = vpop.permute.xlu0 %7155  ;;  %v7348_v62 = vpop.permute.xlu1 %7347 }
0x1033   :  { %v7166_v55 = vsel %vm208_vm1, %v7154_v6, %v7156_v52  ;;  %v7303_v6 = vsel %vm349_vm4, %v7290_v27, %v7292_v9 }
0x1034   :  { %7571 = vmatprep.subr.bf16.mxu0 %v7166_v55  ;;  %8415 = vrot.lane.b32.xlu0 %v15819_v21, %s10727_s13  ;;  %v7257_v55 = vsel %vm302_vm3, %v7244_v7, %v7246_v34 }
0x1035   :  { %7572 = vmatpush1.bf16.msra.mxu0 %v7165_v4 }
0x1036   :  { %v7394_v58 = vpop.permute.xlu0 %7393  ;;  %v7202_v26 = vpop.permute.xlu1 %7201 }
0x1037   :  { %v7212_v20 = vsel %vm255_vm2, %v7200_v29, %v7202_v26 }
0x1038   :  { %7573 = vmatprep.subr.bf16.mxu0 %v7212_v20 }
0x1039   :  { %7574 = vmatpush1.bf16.msra.mxu0 %v7211_v35 }
0x103a   :  { %v7248_v15 = vpop.permute.xlu0 %7247  ;;  %v7440_v61 = vpop.permute.xlu1 %7439 }
0x103b   :  { %v7258_v43 = vsel %vm302_vm3, %v7246_v34, %v7248_v15 }
0x103c   :  { %7575 = vmatprep.subr.bf16.mxu0 %v7258_v43 }
0x103d   :  { %7576 = vmatpush1.bf16.msra.mxu0 %v7257_v55 }
0x103e   :  { %v7294_v49 = vpop.permute.xlu1 %7293  ;;  %v7396_v4 = vpop.permute.xlu0 %7395 }
0x103f   :  { %v7304_v21 = vsel %vm349_vm4, %v7292_v9, %v7294_v49 }
0x1040   :  { %7577 = vmatprep.subr.bf16.mxu0 %v7304_v21 }
0x1041   :  { %7578 = vmatpush1.bf16.msra.mxu0 %v7303_v6 }
0x1042   :  { %7579 = vmatprep.subr.bf16.mxu0 %v14352_v60  ;;  %v7350_v5 = vpop.permute.xlu1 %7349  ;;  %v7488_v29 = vpop.permute.xlu0 %7487 }
0x1043   :  { %v7361_v34 = vsel %vm408_vm5, %v7348_v62, %v7350_v5 }
0x1045   :  { %7580 = vmatpush1.bf16.msra.mxu0 %v14332_v28  ;;  %v7407_v28 = vsel %vm455_vm6, %v7394_v58, %v7396_v4 }
0x1046   :  { %v7442_v20 = vpop.permute.xlu1 %7441 }
0x1047   :  { %v7453_v62 = vsel %vm502_vm7, %v7440_v61, %v7442_v20 }
0x104e   :  { %v14524_v35 = vpop.permute.xlu0 %7351  ;;  %v14526_v43 = vpop.permute.xlu1 %7397 }
0x104f   :  { %v7362_v7 = vsel %vm408_vm5, %v7350_v5, %v14524_v35  ;;  %v7408_v60 = vsel %vm455_vm6, %v7396_v4, %v14526_v43 }
0x1050   :  { %7581 = vmatprep.subr.bf16.mxu0 %v7362_v7 }
0x1051   :  { %7582 = vmatpush1.bf16.msra.mxu0 %v7361_v34 }
0x1052   :  { %v7486_v27 = vpop.permute.xlu0 %7485  ;;  %7583 = vmatprep.subr.bf16.mxu0 %v7408_v60  ;;  %v14533_v9 = vpop.permute.xlu1 %7489 }
0x1053   :  { %v7500_v5 = vsel %vm549_vm8, %v7488_v29, %v14533_v9  ;;  %v7499_v60 = vsel %vm549_vm8, %v7486_v27, %v7488_v29  ;;  %v14563_v29 = vld [vmem:[%s15714_s1 + $0x14] ss:$8 sps:$4 sm:$0xff]  }
0x1055   :  { %7584 = vmatpush1.bf16.msra.mxu0 %v7407_v28 }
0x1056   :  { %v14536_v55 = vpop.permute.xlu0 %7443  ;;  %v14538_v21 = vpop.permute.xlu1 %7159 }
0x1057   :  { %v7454_v6 = vsel %vm502_vm7, %v7442_v20, %v14536_v55 }
0x1058   :  { %7585 = vmatprep.subr.bf16.mxu0 %v7454_v6 }
0x1059   :  { %7586 = vmatpush1.bf16.msra.mxu0 %v7453_v62 }
0x105a   :  { %v7158_v7 = vpop.permute.xlu0 %7157  ;;  %7587 = vmatprep.subr.bf16.mxu0 %v7500_v5  ;;  %v7204_v34 = vpop.permute.xlu1 %7203 }
0x105b   :  { %v7167_v58 = vsel %vm208_vm1, %v7156_v52, %v7158_v7  ;;  %v7168_v4 = vsel %vm208_vm1, %v7158_v7, %v14538_v21  ;;  %v7213_v6 = vsel %vm255_vm2, %v7202_v26, %v7204_v34  ;;  %v14557_v52 = vld [vmem:[%s15714_s1] ss:$8 sps:$4 sm:$0xff]  }
0x105c   :  { %7684 = vmatprep.subr.bf16.mxu1 %v7168_v4 }
0x105d   :  { %7588 = vmatpush1.bf16.msra.mxu0 %v7499_v60  ;;  %7685 = vmatpush1.bf16.msra.mxu1 %v7167_v58  ;;  %v14580_v60 = vld [vmem:[%s15714_s1 + $0x10] ss:$8 sps:$4 sm:$0xff]  }
0x105e   :  { %v14549_v28 = vpop.permute.xlu0 %7205  ;;  %v7250_v61 = vpop.permute.xlu1 %7249 }
0x105f   :  { %v7214_v20 = vsel %vm255_vm2, %v7204_v34, %v14549_v28  ;;  %v7259_v5 = vsel %vm302_vm3, %v7248_v15, %v7250_v61  ;;  %v14586_v15 = vld [vmem:[%s15714_s1 + $0x24] ss:$8 sps:$4 sm:$0xff]  }
0x1060   :  { %7604 = vmatmul.mubr.bf16.vlgmr.msra.gmra.mrb[68].mxu0 %v14557_v52  ;;  %7686 = vmatprep.subr.bf16.mxu1 %v7214_v20  ;;  %v14595_v20 = vld [vmem:[%s15714_s1 + $0x20] ss:$8 sps:$4 sm:$0xff]  }
0x1061   :  { %7687 = vmatpush1.bf16.msra.mxu1 %v7213_v6  ;;  %10348 = vmatprep.mubr.msk.bf16.mxu0 %vm774_vm0, %v14563_v29  ;;  %v14601_v6 = vld [vmem:[%s15714_s1 + $0x34] ss:$8 sps:$4 sm:$0xff]  }
0x1062   :  { %v14567_v27 = vpop.permute.xlu0 %7251  ;;  %v7296_v26 = vpop.permute.xlu1 %7295 }
0x1063   :  { %v7260_v62 = vsel %vm302_vm3, %v7250_v61, %v14567_v27  ;;  %v7305_v4 = vsel %vm349_vm4, %v7294_v49, %v7296_v26 }
0x1064   :  { %7688 = vmatprep.subr.bf16.mxu1 %v7260_v62 }
0x1065   :  { %7689 = vmatpush1.bf16.msra.mxu1 %v7259_v5 }
0x1066   :  { %v14572_v7 = vpop.permute.xlu0 %7297  ;;  %v7354_v34 = vpop.permute.xlu1 %7353 }
0x1067   :  { %v7306_v58 = vsel %vm349_vm4, %v7296_v26, %v14572_v7  ;;  %v7363_v62 = vsel %vm408_vm5, %v14524_v35, %v7354_v34  ;;  %v14626_v35 = vld [vmem:[%s15714_s1 + $0x44] ss:$8 sps:$4 sm:$0xff]  }
0x1068   :  { %7614 = vmatmul.mubr.bf16.gmra.mrb[72].mxu0 %v14580_v60  ;;  %7690 = vmatprep.subr.bf16.mxu1 %v7306_v58 }
0x1069   :  { %7691 = vmatpush1.bf16.msra.mxu1 %v7305_v4  ;;  %10349 = vmatprep.mubr.msk.bf16.mxu0 %vm774_vm0, %v14586_v15 }
0x106a   :  { %7692 = vmatprep.subr.bf16.mxu1 %v14410_v48  ;;  %v7400_v49 = vpop.permute.xlu1 %7399 }
0x106b   :  { %v7409_v8 = vsel %vm455_vm6, %v14526_v43, %v7400_v49 }
0x106d   :  { %7693 = vmatpush1.bf16.msra.mxu1 %v14390_v47 }
0x106e   :  { %v7446_v61 = vpop.permute.xlu1 %7445 }
0x1070   :  { %7624 = vmatmul.mubr.bf16.gmra.mrb[76].mxu0 %v14595_v20 }
0x1071   :  { %10350 = vmatprep.mubr.msk.bf16.mxu0 %vm774_vm0, %v14601_v6 }
0x1072   :  { %v14605_v48 = vpop.permute.xlu0 %7355  ;;  %v7492_v26 = vpop.permute.xlu1 %7491 }
0x1073   :  { %v7364_v47 = vsel %vm408_vm5, %v7354_v34, %v14605_v48 }
0x1074   :  { %7694 = vmatprep.subr.bf16.mxu1 %v7364_v47 }
0x1075   :  { %7695 = vmatpush1.bf16.msra.mxu1 %v7363_v62 }
0x1076   :  { %v14611_v5 = vpop.permute.xlu0 %7401  ;;  %v7162_v58 = vpop.permute.xlu1 %7161 }
0x1077   :  { %v7410_v4 = vsel %vm455_vm6, %v7400_v49, %v14611_v5  ;;  %v7455_v49 = vsel %vm502_vm7, %v14536_v55, %v7446_v61  ;;  %v14651_v55 = vld [vmem:[%s15714_s1 + $0x54] ss:$8 sps:$4 sm:$0xff]  }
0x1078   :  { %7634 = vmatmul.mubr.bf16.gmra.mrb[80].mxu0 %v14620_v50  ;;  %7696 = vmatprep.subr.bf16.mxu1 %v7410_v4  ;;  %v7501_v4 = vsel %vm549_vm8, %v14533_v9, %v7492_v26 }
0x1079   :  { %7697 = vmatpush1.bf16.msra.mxu1 %v7409_v8  ;;  %10351 = vmatprep.mubr.msk.bf16.mxu0 %vm774_vm0, %v14626_v35 }
0x107a   :  { %v14630_v34 = vpop.permute.xlu0 %7447  ;;  %v7208_v47 = vpop.permute.xlu1 %7207 }
0x107b   :  { %v7456_v43 = vsel %vm502_vm7, %v7446_v61, %v14630_v34 }
0x107c   :  { %7698 = vmatprep.subr.bf16.mxu1 %v7456_v43 }
0x107d   :  { %7699 = vmatpush1.bf16.msra.mxu1 %v7455_v49 }
0x107e   :  { %v14636_v8 = vpop.permute.xlu0 %7493  ;;  %v7254_v61 = vpop.permute.xlu1 %7253 }
0x107f   :  { %v7502_v62 = vsel %vm549_vm8, %v7492_v26, %v14636_v8  ;;  %v7169_v26 = vsel %vm208_vm1, %v14538_v21, %v7162_v58  ;;  %v14673_v21 = vld [vmem:[%s15714_s1 + $0x64] ss:$8 sps:$4 sm:$0xff]  }
0x1080   :  { %7644 = vmatmul.mubr.bf16.gmra.mrb[84].mxu0 %v14645_v16  ;;  %7700 = vmatprep.subr.bf16.mxu1 %v7502_v62 }
0x1081   :  { %7701 = vmatpush1.bf16.msra.mxu1 %v7501_v4  ;;  %10352 = vmatprep.mubr.msk.bf16.mxu0 %vm774_vm0, %v14651_v55  ;;  %v7215_v4 = vsel %vm255_vm2, %v14549_v28, %v7208_v47 }
0x1082   :  { %v7164_v43 = vpop.permute.xlu0 %7163  ;;  %v7300_v41 = vpop.permute.xlu1 %7299 }
0x1083   :  { %v7170_v9 = vsel %vm208_vm1, %v7162_v58, %v7164_v43  ;;  %v14667_v43 = vld [vmem:[%s15714_s1 + $0x50] ss:$8 sps:$4 sm:$0xff]  }
0x1084   :  { %7717 = vmatmul.mubr.bf16.vlgmr.msra.gmra.mrb[68].mxu1 %v14557_v52  ;;  %7797 = vmatprep.subr.bf16.mxu0 %v7170_v9 }
0x1085   :  { %7798 = vmatpush1.bf16.msra.mxu0 %v7169_v26  ;;  %10356 = vmatprep.mubr.msk.bf16.mxu1 %vm774_vm0, %v14563_v29 }
0x1086   :  { %v7210_v49 = vpop.permute.xlu0 %7209  ;;  %v7358_v9 = vpop.permute.xlu1 %7357 }
0x1087   :  { %v7216_v62 = vsel %vm255_vm2, %v7208_v47, %v7210_v49  ;;  %v7261_v47 = vsel %vm302_vm3, %v14567_v27, %v7254_v61  ;;  %v10680_v27 = vld [vmem:[%s15714_s1 + $0x74] ss:$8 sps:$4 sm:$0xff]  }
0x1088   :  { %7654 = vmatmul.mubr.bf16.gmra.mrb[88].mxu0 %v14667_v43  ;;  %7799 = vmatprep.subr.bf16.mxu0 %v7216_v62  ;;  %v7307_v62 = vsel %vm349_vm4, %v14572_v7, %v7300_v41 }
0x1089   :  { %7800 = vmatpush1.bf16.msra.mxu0 %v7215_v4  ;;  %10353 = vmatprep.mubr.msk.bf16.mxu0 %vm774_vm0, %v14673_v21  ;;  %v10679_v4 = vld [vmem:[%s15714_s1 + $0x60] ss:$8 sps:$4 sm:$0xff]  }
0x108a   :  { %v7256_v58 = vpop.permute.xlu0 %7255 }
0x108b   :  { %v7262_v28 = vsel %vm302_vm3, %v7254_v61, %v7256_v58  ;;  %v7404_v58 = vpop.permute.xlu1 %7403 }
0x108c   :  { %7727 = vmatmul.mubr.bf16.gmra.mrb[72].mxu1 %v14580_v60  ;;  %7801 = vmatprep.subr.bf16.mxu0 %v7262_v28  ;;  %v7365_v28 = vsel %vm408_vm5, %v14605_v48, %v7358_v9 }
0x108d   :  { %7802 = vmatpush1.bf16.msra.mxu0 %v7261_v47  ;;  %10357 = vmatprep.mubr.msk.bf16.mxu1 %vm774_vm0, %v14586_v15  ;;  %v10681_v47 = vld [vmem:[%s15714_s1 + $0x70] ss:$8 sps:$4 sm:$0xff]  }
0x108e   :  { %v7302_v26 = vpop.permute.xlu0 %7301 }
0x108f   :  { %v7308_v49 = vsel %vm349_vm4, %v7300_v41, %v7302_v26 }
0x1090   :  { %7664 = vmatmul.mubr.bf16.gmra.mrb[92].mxu0 %v10679_v4  ;;  %7803 = vmatprep.subr.bf16.mxu0 %v7308_v49  ;;  %v7411_v49 = vsel %vm455_vm6, %v14611_v5, %v7404_v58 }
0x1091   :  { %7804 = vmatpush1.bf16.msra.mxu0 %v7307_v62  ;;  %10354 = vmatprep.mubr.msk.bf16.mxu0 %vm774_vm0, %v10680_v27 }
0x1092   :  { %v7360_v61 = vpop.permute.xlu0 %7359  ;;  %7805 = vmatprep.subr.bf16.mxu0 %v14478_v57 }
0x1093   :  { %v7366_v41 = vsel %vm408_vm5, %v7358_v9, %v7360_v61 }
0x1094   :  { %7737 = vmatmul.mubr.bf16.gmra.mrb[76].mxu1 %v14595_v20 }
0x1095   :  { %7806 = vmatpush1.bf16.msra.mxu0 %v14448_v25  ;;  %10358 = vmatprep.mubr.msk.bf16.mxu1 %vm774_vm0, %v14601_v6  ;;  %v7450_v25 = vpop.permute.xlu1 %7449 }
0x1096   :  { %v7406_v7 = vpop.permute.xlu0 %7405  ;;  %7807 = vmatprep.subr.bf16.mxu0 %v7366_v41  ;;  %v7457_v62 = vsel %vm502_vm7, %v14630_v34, %v7450_v25 }
0x1097   :  { %v7412_v57 = vsel %vm455_vm6, %v7404_v58, %v7406_v7 }
0x1098   :  { %7674 = vmatmul.mubr.bf16.gmra.mrb[96].mxu0 %v10681_v47 }
0x1099   :  { %7808 = vmatpush1.bf16.msra.mxu0 %v7365_v28  ;;  %10363 = vmatprep.mubr.msk.bf16.mxu0 %vm774_vm0, %v14298_v36  ;;  %v7496_v36 = vpop.permute.xlu1 %7495 }
0x109a   :  { %v7452_v26 = vpop.permute.xlu0 %7451  ;;  %7809 = vmatprep.subr.bf16.mxu0 %v7412_v57  ;;  %v7503_v5 = vsel %vm549_vm8, %v14636_v8, %v7496_v36 }
0x109b   :  { %v7458_v48 = vsel %vm502_vm7, %v7450_v25, %v7452_v26 }
0x109c   :  { %7747 = vmatmul.mubr.bf16.gmra.mrb[80].mxu1 %v14620_v50 }
0x109d   :  { %7810 = vmatpush1.bf16.msra.mxu0 %v7411_v49  ;;  %10359 = vmatprep.mubr.msk.bf16.mxu1 %vm774_vm0, %v14626_v35 }
0x109e   :  { %v7498_v9 = vpop.permute.xlu0 %7497  ;;  %7811 = vmatprep.subr.bf16.mxu0 %v7458_v48 }
0x109f   :  { %v7504_v61 = vsel %vm549_vm8, %v7496_v36, %v7498_v9 }
0x10a1   :  { %7812 = vmatpush1.bf16.msra.mxu0 %v7457_v62 }
0x10a2   :  { %7813 = vmatprep.subr.bf16.mxu0 %v7504_v61 }
0x10a4   :  { %7757 = vmatmul.mubr.bf16.gmra.mrb[84].mxu1 %v14645_v16 }
0x10a5   :  { %7814 = vmatpush1.bf16.msra.mxu0 %v7503_v5  ;;  %10360 = vmatprep.mubr.msk.bf16.mxu1 %vm774_vm0, %v14651_v55 }
0x10a8   :  { %7830 = vmatmul.mubr.bf16.vlgmr.msra.gmra.mrb[100].mxu0 %v14557_v52 }
0x10a9   :  { %10364 = vmatprep.mubr.msk.bf16.mxu0 %vm774_vm0, %v14563_v29 }
0x10ac   :  { %7767 = vmatmul.mubr.bf16.gmra.mrb[88].mxu1 %v14667_v43 }
0x10ad   :  { %10361 = vmatprep.mubr.msk.bf16.mxu1 %vm774_vm0, %v14673_v21 }
0x10b0   :  { %7840 = vmatmul.mubr.bf16.gmra.mrb[104].mxu0 %v14580_v60 }
0x10b1   :  { %10365 = vmatprep.mubr.msk.bf16.mxu0 %vm774_vm0, %v14586_v15 }
0x10b4   :  { %7777 = vmatmul.mubr.bf16.gmra.mrb[92].mxu1 %v10679_v4 }
0x10b5   :  { %10362 = vmatprep.mubr.msk.bf16.mxu1 %vm774_vm0, %v10680_v27 }
0x10b8   :  { %7850 = vmatmul.mubr.bf16.gmra.mrb[108].mxu0 %v14595_v20 }
0x10b9   :  { %10366 = vmatprep.mubr.msk.bf16.mxu0 %vm774_vm0, %v14601_v6 }
0x10bc   :  { %7787 = vmatmul.mubr.bf16.gmra.mrb[96].mxu1 %v10681_v47 }
0x10bd   :  { %8086 = vmatprep.mubr.bf16.mxu1 %v15776_v19 }
0x10c0   :  { %7860 = vmatmul.mubr.bf16.gmra.mrb[112].mxu0 %v14620_v50 }
0x10c1   :  { %10367 = vmatprep.mubr.msk.bf16.mxu0 %vm774_vm0, %v14626_v35 }
0x10c8   :  { %7870 = vmatmul.mubr.bf16.gmra.mrb[116].mxu0 %v14645_v16 }
0x10c9   :  { %10368 = vmatprep.mubr.msk.bf16.mxu0 %vm774_vm0, %v14651_v55 }
0x10d0   :  { %7880 = vmatmul.mubr.bf16.gmra.mrb[120].mxu0 %v14667_v43 }
0x10d1   :  { %10369 = vmatprep.mubr.msk.bf16.mxu0 %vm774_vm0, %v14673_v21 }
0x10d8   :  { %7890 = vmatmul.mubr.bf16.gmra.mrb[124].mxu0 %v10679_v4 }
0x10d9   :  { %10370 = vmatprep.mubr.msk.bf16.mxu0 %vm774_vm0, %v10680_v27 }
0x10e0   :  { %7900 = vmatmul.mubr.bf16.gmra.mrb[128].mxu0 %v10681_v47 }
0x10e1   :  { %8172 = vmatprep.mubr.bf16.mxu0 %v15776_v19 }
0x1133   :  { %v7605_v50 = vpop.f32.mrb[68].mxu0 }
0x1134   :  { %v7606_v52 = vadd.f32 %v7605_v50, %v11295_v14  ;;  %v7607_v29 = vpop.f32.mrb[69].mxu0 }
0x1135   :  { %v7608_v16 = vadd.f32 %v7607_v29, %v11295_v14  ;;  %v7609_v60 = vpop.f32.mrb[70].mxu0 }
0x1136   :  { %v7610_v15 = vadd.f32 %v7609_v60, %v11297_v32  ;;  %v7611_v20 = vpop.f32.mrb[71].mxu0  ;;  %v7910_v35 = vmax.f32 %v7606_v52, 0.0 }
0x1137   :  { %v7612_v6 = vadd.f32 %v7611_v20, %v11297_v32  ;;  %v7911_v8 = vmax.f32 %v7608_v16, 0.0 }
0x1138   :  { %v7916_v34 = vmax.f32 %v7610_v15, 0.0 }
0x1139   :  { %v7917_v55 = vmax.f32 %v7612_v6, 0.0 }
0x113a   :  { %v8006_v43 = vpack.c.bf16 %v7916_v34, %v7910_v35 }
0x113b   :  { %v8007_v21 = vpack.c.bf16 %v7917_v55, %v7911_v8  ;;  %v7615_v4 = vpop.f32.mrb[72].mxu0 }
0x113c   :  { %v7616_v27 = vadd.f32 %v7615_v4, %v11303_v59  ;;  %v7617_v58 = vpop.f32.mrb[73].mxu0 }
0x113d   :  { %v7618_v41 = vadd.f32 %v7617_v58, %v11303_v59  ;;  %v7619_v7 = vpop.f32.mrb[74].mxu0  ;;  %8054 = vmatprep.subr.bf16.mxu1 %v8007_v21 }
0x113e   :  { %v7620_v28 = vadd.f32 %v7619_v7, %v11306_v0  ;;  %v7621_v47 = vpop.f32.mrb[75].mxu0  ;;  %8055 = vmatpush1.bf16.msra.mxu1 %v8006_v43  ;;  %v7922_v25 = vmax.f32 %v7616_v27, 0.0 }
0x113f   :  { %v7622_v57 = vadd.f32 %v7621_v47, %v11306_v0  ;;  %v7923_v49 = vmax.f32 %v7618_v41, 0.0 }
0x1140   :  { %v7928_v26 = vmax.f32 %v7620_v28, 0.0 }
0x1141   :  { %v7929_v48 = vmax.f32 %v7622_v57, 0.0 }
0x1142   :  { %v8012_v9 = vpack.c.bf16 %v7928_v26, %v7922_v25 }
0x1143   :  { %v8013_v62 = vpack.c.bf16 %v7929_v48, %v7923_v49  ;;  %v7625_v36 = vpop.f32.mrb[76].mxu0 }
0x1144   :  { %v7626_v61 = vadd.f32 %v7625_v36, %v11311_v13  ;;  %v7627_v5 = vpop.f32.mrb[77].mxu0 }
0x1145   :  { %v7628_v50 = vadd.f32 %v7627_v5, %v11311_v13  ;;  %v7629_v52 = vpop.f32.mrb[78].mxu0  ;;  %8056 = vmatprep.subr.bf16.mxu1 %v8013_v62 }
0x1146   :  { %v7630_v29 = vadd.f32 %v7629_v52, %v11314_v22  ;;  %v7631_v16 = vpop.f32.mrb[79].mxu0  ;;  %8057 = vmatpush1.bf16.msra.mxu1 %v8012_v9  ;;  %v7934_v15 = vmax.f32 %v7626_v61, 0.0 }
0x1147   :  { %v7632_v60 = vadd.f32 %v7631_v16, %v11314_v22  ;;  %v7935_v6 = vmax.f32 %v7628_v50, 0.0 }
0x1148   :  { %v7940_v20 = vmax.f32 %v7630_v29, 0.0 }
0x1149   :  { %v7941_v35 = vmax.f32 %v7632_v60, 0.0 }
0x114a   :  { %v8018_v34 = vpack.c.bf16 %v7940_v20, %v7934_v15 }
0x114b   :  { %v8019_v8 = vpack.c.bf16 %v7941_v35, %v7935_v6  ;;  %v7635_v55 = vpop.f32.mrb[80].mxu0 }
0x114c   :  { %v7636_v43 = vadd.f32 %v7635_v55, %v11319_v38  ;;  %v7637_v21 = vpop.f32.mrb[81].mxu0 }
0x114d   :  { %v7638_v4 = vadd.f32 %v7637_v21, %v11319_v38  ;;  %v7639_v27 = vpop.f32.mrb[82].mxu0  ;;  %8058 = vmatprep.subr.bf16.mxu1 %v8019_v8 }
0x114e   :  { %v7640_v58 = vadd.f32 %v7639_v27, %v11321_v40  ;;  %v7641_v41 = vpop.f32.mrb[83].mxu0  ;;  %8059 = vmatpush1.bf16.msra.mxu1 %v8018_v34  ;;  %v7946_v28 = vmax.f32 %v7636_v43, 0.0 }
0x114f   :  { %v7642_v7 = vadd.f32 %v7641_v41, %v11321_v40  ;;  %v7947_v57 = vmax.f32 %v7638_v4, 0.0 }
0x1150   :  { %v7952_v47 = vmax.f32 %v7640_v58, 0.0 }
0x1151   :  { %v7953_v25 = vmax.f32 %v7642_v7, 0.0 }
0x1152   :  { %v8024_v26 = vpack.c.bf16 %v7952_v47, %v7946_v28 }
0x1153   :  { %v8025_v49 = vpack.c.bf16 %v7953_v25, %v7947_v57  ;;  %v7645_v48 = vpop.f32.mrb[84].mxu0 }
0x1154   :  { %v7646_v9 = vadd.f32 %v7645_v48, %v11329_v51  ;;  %v7647_v62 = vpop.f32.mrb[85].mxu0 }
0x1155   :  { %v7648_v36 = vadd.f32 %v7647_v62, %v11329_v51  ;;  %v7649_v61 = vpop.f32.mrb[86].mxu0  ;;  %8060 = vmatprep.subr.bf16.mxu1 %v8025_v49 }
0x1156   :  { %v7650_v5 = vadd.f32 %v7649_v61, %v11327_v33  ;;  %v7651_v50 = vpop.f32.mrb[87].mxu0  ;;  %8061 = vmatpush1.bf16.msra.mxu1 %v8024_v26  ;;  %v7958_v16 = vmax.f32 %v7646_v9, 0.0 }
0x1157   :  { %v7652_v52 = vadd.f32 %v7651_v50, %v11327_v33  ;;  %v7718_v29 = vpop.f32.mrb[68].mxu1  ;;  %v7959_v6 = vmax.f32 %v7648_v36, 0.0 }
0x1158   :  { %v7964_v60 = vmax.f32 %v7650_v5, 0.0  ;;  %v7719_v15 = vadd.f32 %v7718_v29, %v11295_v14  ;;  %v7720_v20 = vpop.f32.mrb[69].mxu1 }
0x1159   :  { %v7965_v35 = vmax.f32 %v7652_v52, 0.0  ;;  %v7721_v34 = vadd.f32 %v7720_v20, %v11295_v14  ;;  %v7722_v8 = vpop.f32.mrb[70].mxu1 }
0x115a   :  { %v8030_v55 = vpack.c.bf16 %v7964_v60, %v7958_v16  ;;  %v7723_v43 = vadd.f32 %v7722_v8, %v11297_v32  ;;  %v7724_v21 = vpop.f32.mrb[71].mxu1  ;;  %v7912_v41 = vmax.f32 %v7719_v15, 0.0 }
0x115b   :  { %v8031_v4 = vpack.c.bf16 %v7965_v35, %v7959_v6  ;;  %v7725_v27 = vadd.f32 %v7724_v21, %v11297_v32  ;;  %v7655_v58 = vpop.f32.mrb[88].mxu0  ;;  %v7913_v57 = vmax.f32 %v7721_v34, 0.0 }
0x115c   :  { %v7918_v7 = vmax.f32 %v7723_v43, 0.0  ;;  %v7656_v28 = vadd.f32 %v7655_v58, %v11341_v23  ;;  %v7657_v47 = vpop.f32.mrb[89].mxu0 }
0x115d   :  { %v7919_v25 = vmax.f32 %v7725_v27, 0.0  ;;  %v7658_v26 = vadd.f32 %v7657_v47, %v11341_v23  ;;  %v7659_v49 = vpop.f32.mrb[90].mxu0  ;;  %8062 = vmatprep.subr.bf16.mxu1 %v8031_v4 }
0x115e   :  { %v14772_v48 = vpack.c.bf16 %v7918_v7, %v7912_v41  ;;  %v7660_v9 = vadd.f32 %v7659_v49, %v11339_v17  ;;  %v7661_v62 = vpop.f32.mrb[91].mxu0  ;;  %8063 = vmatpush1.bf16.msra.mxu1 %v8030_v55  ;;  %v7970_v50 = vmax.f32 %v7656_v28, 0.0 }
0x115f   :  { %v14775_v36 = vpack.c.bf16 %v7919_v25, %v7913_v57  ;;  %v7662_v61 = vadd.f32 %v7661_v62, %v11339_v17  ;;  %v7728_v5 = vpop.f32.mrb[72].mxu1  ;;  %v7971_v60 = vmax.f32 %v7658_v26, 0.0 }
0x1160   :  { %v7976_v52 = vmax.f32 %v7660_v9, 0.0  ;;  %v7729_v29 = vadd.f32 %v7728_v5, %v11303_v59  ;;  %v7730_v16 = vpop.f32.mrb[73].mxu1 }
0x1161   :  { %v7977_v15 = vmax.f32 %v7662_v61, 0.0  ;;  %v7731_v20 = vadd.f32 %v7730_v16, %v11303_v59  ;;  %v7732_v6 = vpop.f32.mrb[74].mxu1 }
0x1162   :  { %v8036_v35 = vpack.c.bf16 %v7976_v52, %v7970_v50  ;;  %v7733_v34 = vadd.f32 %v7732_v6, %v11306_v0  ;;  %v7734_v8 = vpop.f32.mrb[75].mxu1  ;;  %v7924_v4 = vmax.f32 %v7729_v29, 0.0 }
0x1163   :  { %v8037_v55 = vpack.c.bf16 %v7977_v15, %v7971_v60  ;;  %v7735_v43 = vadd.f32 %v7734_v8, %v11306_v0  ;;  %v7665_v21 = vpop.f32.mrb[92].mxu0  ;;  %v7925_v7 = vmax.f32 %v7731_v20, 0.0 }
0x1164   :  { %v7930_v27 = vmax.f32 %v7733_v34, 0.0  ;;  %v7666_v58 = vadd.f32 %v7665_v21, %v11357_v56  ;;  %v7667_v41 = vpop.f32.mrb[93].mxu0 }
0x1165   :  { %v7931_v28 = vmax.f32 %v7735_v43, 0.0  ;;  %v7668_v47 = vadd.f32 %v7667_v41, %v11357_v56  ;;  %v7669_v57 = vpop.f32.mrb[94].mxu0  ;;  %8064 = vmatprep.subr.bf16.mxu1 %v8037_v55 }
0x1166   :  { %v14784_v25 = vpack.c.bf16 %v7930_v27, %v7924_v4  ;;  %v7670_v26 = vadd.f32 %v7669_v57, %v11355_v54  ;;  %v7671_v49 = vpop.f32.mrb[95].mxu0  ;;  %8065 = vmatpush1.bf16.msra.mxu1 %v8036_v35  ;;  %v7982_v5 = vmax.f32 %v7666_v58, 0.0 }
0x1167   :  { %v14787_v9 = vpack.c.bf16 %v7931_v28, %v7925_v7  ;;  %v7672_v62 = vadd.f32 %v7671_v49, %v11355_v54  ;;  %v7738_v61 = vpop.f32.mrb[76].mxu1  ;;  %v7983_v16 = vmax.f32 %v7668_v47, 0.0 }
0x1168   :  { %v7988_v50 = vmax.f32 %v7670_v26, 0.0  ;;  %v7739_v52 = vadd.f32 %v7738_v61, %v11311_v13  ;;  %v7740_v29 = vpop.f32.mrb[77].mxu1 }
0x1169   :  { %v7989_v60 = vmax.f32 %v7672_v62, 0.0  ;;  %v7741_v15 = vadd.f32 %v7740_v29, %v11311_v13  ;;  %v7742_v20 = vpop.f32.mrb[78].mxu1 }
0x116a   :  { %v8042_v6 = vpack.c.bf16 %v7988_v50, %v7982_v5  ;;  %v7743_v34 = vadd.f32 %v7742_v20, %v11314_v22  ;;  %v7744_v8 = vpop.f32.mrb[79].mxu1  ;;  %v7936_v21 = vmax.f32 %v7739_v52, 0.0 }
0x116b   :  { %v8043_v35 = vpack.c.bf16 %v7989_v60, %v7983_v16  ;;  %v7745_v55 = vadd.f32 %v7744_v8, %v11314_v22  ;;  %v7675_v43 = vpop.f32.mrb[96].mxu0  ;;  %v7937_v41 = vmax.f32 %v7741_v15, 0.0 }
0x116c   :  { %v7942_v4 = vmax.f32 %v7743_v34, 0.0  ;;  %v7676_v27 = vadd.f32 %v7675_v43, %v11373_v18  ;;  %v7677_v58 = vpop.f32.mrb[97].mxu0 }
0x116d   :  { %v7943_v7 = vmax.f32 %v7745_v55, 0.0  ;;  %v7678_v28 = vadd.f32 %v7677_v58, %v11373_v18  ;;  %v7679_v47 = vpop.f32.mrb[98].mxu0  ;;  %8066 = vmatprep.subr.bf16.mxu1 %v8043_v35 }
0x116e   :  { %v14796_v57 = vpack.c.bf16 %v7942_v4, %v7936_v21  ;;  %v7680_v26 = vadd.f32 %v7679_v47, %v11371_v37  ;;  %v7681_v49 = vpop.f32.mrb[99].mxu0  ;;  %8067 = vmatpush1.bf16.msra.mxu1 %v8042_v6  ;;  %v7994_v50 = vmax.f32 %v7676_v27, 0.0 }
0x116f   :  { %v8021_v62 = vpack.c.bf16 %v7943_v7, %v7937_v41  ;;  %v7682_v61 = vadd.f32 %v7681_v49, %v11371_v37  ;;  %v7748_v5 = vpop.f32.mrb[80].mxu1  ;;  %v7995_v60 = vmax.f32 %v7678_v28, 0.0 }
0x1170   :  { %v8000_v52 = vmax.f32 %v7680_v26, 0.0  ;;  %v7749_v29 = vadd.f32 %v7748_v5, %v11319_v38  ;;  %v7750_v16 = vpop.f32.mrb[81].mxu1  ;;  %v14810_v5 = vld [vmem:[%s15716_s3] sm:$0xff]  }
0x1171   :  { %v8001_v15 = vmax.f32 %v7682_v61, 0.0  ;;  %v7751_v20 = vadd.f32 %v7750_v16, %v11319_v38  ;;  %v7752_v34 = vpop.f32.mrb[82].mxu1 }
0x1172   :  { %v8048_v8 = vpack.c.bf16 %v8000_v52, %v7994_v50  ;;  %v7753_v35 = vadd.f32 %v7752_v34, %v11321_v40  ;;  %v7754_v55 = vpop.f32.mrb[83].mxu1  ;;  %v7948_v21 = vmax.f32 %v7749_v29, 0.0 }
0x1173   :  { %v8049_v43 = vpack.c.bf16 %v8001_v15, %v7995_v60  ;;  %v7755_v6 = vadd.f32 %v7754_v55, %v11321_v40  ;;  %v7949_v58 = vmax.f32 %v7751_v20, 0.0 }
0x1174   :  { %v7954_v4 = vmax.f32 %v7753_v35, 0.0 }
0x1175   :  { %v7955_v27 = vmax.f32 %v7755_v6, 0.0  ;;  %8068 = vmatprep.subr.bf16.mxu1 %v8049_v43 }
0x1176   :  { %v8026_v41 = vpack.c.bf16 %v7954_v4, %v7948_v21  ;;  %8069 = vmatpush1.bf16.msra.mxu1 %v8048_v8 }
0x1177   :  { %v8027_v7 = vpack.c.bf16 %v7955_v27, %v7949_v58  ;;  %v7758_v28 = vpop.f32.mrb[84].mxu1  ;;  %8097 = vmatprep.subr.bf16.mxu1 %v14775_v36 }
0x1178   :  { %v7759_v47 = vadd.f32 %v7758_v28, %v11329_v51  ;;  %v7760_v26 = vpop.f32.mrb[85].mxu1 }
0x1179   :  { %v7761_v49 = vadd.f32 %v7760_v26, %v11329_v51  ;;  %v7762_v61 = vpop.f32.mrb[86].mxu1  ;;  %8087 = vmatmul.mubr.bf16.vlgmr.msra.gmra.mrb[100].mxu1 %v14810_v5 }
0x117a   :  { %v7763_v50 = vadd.f32 %v7762_v61, %v11327_v33  ;;  %v7764_v52 = vpop.f32.mrb[87].mxu1  ;;  %8098 = vmatpush1.bf16.msra.mxu1 %v14772_v48  ;;  %8129 = vmatprep.mubr.bf16.mxu1 %v15776_v19  ;;  %v7960_v16 = vmax.f32 %v7759_v47, 0.0 }
0x117b   :  { %v7765_v36 = vadd.f32 %v7764_v52, %v11327_v33  ;;  %v7831_v29 = vpop.f32.mrb[100].mxu0  ;;  %8099 = vmatprep.subr.bf16.mxu1 %v14787_v9  ;;  %v7961_v34 = vmax.f32 %v7761_v49, 0.0 }
0x117c   :  { %v7966_v60 = vmax.f32 %v7763_v50, 0.0  ;;  %v7832_v15 = vadd.f32 %v7831_v29, %v11295_v14  ;;  %v7833_v20 = vpop.f32.mrb[101].mxu0 }
0x117d   :  { %v7967_v8 = vmax.f32 %v7765_v36, 0.0  ;;  %v7834_v35 = vadd.f32 %v7833_v20, %v11295_v14  ;;  %v7835_v55 = vpop.f32.mrb[102].mxu0 }
0x117e   :  { %v8032_v43 = vpack.c.bf16 %v7966_v60, %v7960_v16  ;;  %v7836_v48 = vadd.f32 %v7835_v55, %v11297_v32  ;;  %v7837_v6 = vpop.f32.mrb[103].mxu0  ;;  %8100 = vmatpush1.bf16.msra.mxu1 %v14784_v25  ;;  %v7914_v58 = vmax.f32 %v7832_v15, 0.0 }
0x117f   :  { %v8033_v21 = vpack.c.bf16 %v7967_v8, %v7961_v34  ;;  %v7838_v4 = vadd.f32 %v7837_v6, %v11297_v32  ;;  %v7768_v9 = vpop.f32.mrb[88].mxu1  ;;  %8101 = vmatprep.subr.bf16.mxu1 %v8021_v62  ;;  %v7915_v26 = vmax.f32 %v7834_v35, 0.0 }
0x1180   :  { %v7920_v27 = vmax.f32 %v7836_v48, 0.0  ;;  %v7769_v28 = vadd.f32 %v7768_v9, %v11341_v23  ;;  %v7770_v47 = vpop.f32.mrb[89].mxu1 }
0x1181   :  { %v7921_v49 = vmax.f32 %v7838_v4, 0.0  ;;  %v7771_v61 = vadd.f32 %v7770_v47, %v11341_v23  ;;  %v7772_v50 = vpop.f32.mrb[90].mxu1 }
0x1182   :  { %v8010_v52 = vpack.c.bf16 %v7920_v27, %v7914_v58  ;;  %v7773_v36 = vadd.f32 %v7772_v50, %v11339_v17  ;;  %v7774_v29 = vpop.f32.mrb[91].mxu1  ;;  %8102 = vmatpush1.bf16.msra.mxu1 %v14796_v57  ;;  %v7972_v60 = vmax.f32 %v7769_v28, 0.0 }
0x1183   :  { %v8011_v25 = vpack.c.bf16 %v7921_v49, %v7915_v26  ;;  %v7775_v16 = vadd.f32 %v7774_v29, %v11339_v17  ;;  %v7841_v62 = vpop.f32.mrb[104].mxu0  ;;  %8103 = vmatprep.subr.bf16.mxu1 %v8027_v7  ;;  %v7973_v8 = vmax.f32 %v7771_v61, 0.0 }
0x1184   :  { %v7978_v15 = vmax.f32 %v7773_v36, 0.0  ;;  %v7842_v20 = vadd.f32 %v7841_v62, %v11303_v59  ;;  %v7843_v34 = vpop.f32.mrb[105].mxu0 }
0x1185   :  { %v7979_v35 = vmax.f32 %v7775_v16, 0.0  ;;  %v7844_v55 = vadd.f32 %v7843_v34, %v11303_v59  ;;  %v7845_v48 = vpop.f32.mrb[106].mxu0  ;;  %8140 = vmatprep.subr.bf16.mxu0 %v8011_v25 }
0x1186   :  { %v8038_v6 = vpack.c.bf16 %v7978_v15, %v7972_v60  ;;  %v7846_v4 = vadd.f32 %v7845_v48, %v11306_v0  ;;  %v7847_v57 = vpop.f32.mrb[107].mxu0  ;;  %8104 = vmatpush1.bf16.msra.mxu1 %v8026_v41  ;;  %8141 = vmatpush1.bf16.msra.mxu0 %v8010_v52  ;;  %v7926_v27 = vmax.f32 %v7842_v20, 0.0 }
0x1187   :  { %v8039_v9 = vpack.c.bf16 %v7979_v35, %v7973_v8  ;;  %v7848_v7 = vadd.f32 %v7847_v57, %v11306_v0  ;;  %v7778_v58 = vpop.f32.mrb[92].mxu1  ;;  %8105 = vmatprep.subr.bf16.mxu1 %v8033_v21  ;;  %v7927_v49 = vmax.f32 %v7844_v55, 0.0 }
0x1188   :  { %v7932_v28 = vmax.f32 %v7846_v4, 0.0  ;;  %v7779_v47 = vadd.f32 %v7778_v58, %v11357_v56  ;;  %v7780_v26 = vpop.f32.mrb[93].mxu1 }
0x1189   :  { %v7933_v61 = vmax.f32 %v7848_v7, 0.0  ;;  %v7781_v50 = vadd.f32 %v7780_v26, %v11357_v56  ;;  %v7782_v36 = vpop.f32.mrb[94].mxu1 }
0x118a   :  { %v8016_v29 = vpack.c.bf16 %v7932_v28, %v7926_v27  ;;  %v7783_v25 = vadd.f32 %v7782_v36, %v11355_v54  ;;  %v7784_v41 = vpop.f32.mrb[95].mxu1  ;;  %8106 = vmatpush1.bf16.msra.mxu1 %v8032_v43  ;;  %v7984_v21 = vmax.f32 %v7779_v47, 0.0 }
0x118b   :  { %v8017_v52 = vpack.c.bf16 %v7933_v61, %v7927_v49  ;;  %v7785_v16 = vadd.f32 %v7784_v41, %v11355_v54  ;;  %v7851_v62 = vpop.f32.mrb[108].mxu0  ;;  %8107 = vmatprep.subr.bf16.mxu1 %v8039_v9  ;;  %v7985_v34 = vmax.f32 %v7781_v50, 0.0 }
0x118c   :  { %v7990_v60 = vmax.f32 %v7783_v25, 0.0  ;;  %v7852_v15 = vadd.f32 %v7851_v62, %v11311_v13  ;;  %v7853_v20 = vpop.f32.mrb[109].mxu0 }
0x118d   :  { %v7991_v8 = vmax.f32 %v7785_v16, 0.0  ;;  %v7854_v35 = vadd.f32 %v7853_v20, %v11311_v13  ;;  %v7855_v55 = vpop.f32.mrb[110].mxu0  ;;  %8142 = vmatprep.subr.bf16.mxu0 %v8017_v52 }
0x118e   :  { %v8044_v48 = vpack.c.bf16 %v7990_v60, %v7984_v21  ;;  %v7856_v4 = vadd.f32 %v7855_v55, %v11314_v22  ;;  %v7857_v43 = vpop.f32.mrb[111].mxu0  ;;  %8108 = vmatpush1.bf16.msra.mxu1 %v8038_v6  ;;  %8143 = vmatpush1.bf16.msra.mxu0 %v8016_v29  ;;  %v7938_v58 = vmax.f32 %v7852_v15, 0.0 }
0x118f   :  { %v8045_v57 = vpack.c.bf16 %v7991_v8, %v7985_v34  ;;  %v7858_v9 = vadd.f32 %v7857_v43, %v11314_v22  ;;  %v7788_v7 = vpop.f32.mrb[96].mxu1  ;;  %v7939_v26 = vmax.f32 %v7854_v35, 0.0 }
0x1190   :  { %v7944_v27 = vmax.f32 %v7856_v4, 0.0  ;;  %v7789_v28 = vadd.f32 %v7788_v7, %v11373_v18  ;;  %v7790_v47 = vpop.f32.mrb[97].mxu1 }
0x1191   :  { %v7945_v49 = vmax.f32 %v7858_v9, 0.0  ;;  %v7791_v61 = vadd.f32 %v7790_v47, %v11373_v18  ;;  %v7792_v50 = vpop.f32.mrb[98].mxu1  ;;  %8109 = vmatprep.subr.bf16.mxu1 %v8045_v57 }
0x1192   :  { %v8022_v36 = vpack.c.bf16 %v7944_v27, %v7938_v58  ;;  %v7793_v25 = vadd.f32 %v7792_v50, %v11371_v37  ;;  %v7794_v6 = vpop.f32.mrb[99].mxu1  ;;  %8110 = vmatpush1.bf16.msra.mxu1 %v8044_v48  ;;  %v7996_v16 = vmax.f32 %v7789_v28, 0.0 }
0x1193   :  { %v8023_v29 = vpack.c.bf16 %v7945_v49, %v7939_v26  ;;  %v7795_v41 = vadd.f32 %v7794_v6, %v11371_v37  ;;  %v7861_v52 = vpop.f32.mrb[112].mxu0  ;;  %v7997_v15 = vmax.f32 %v7791_v61, 0.0  ;;  %v14855_v6 = vld [vmem:[%s15714_s1 + $0x4] ss:$8 sps:$4 sm:$0xff]  }
0x1194   :  { %v8002_v62 = vmax.f32 %v7793_v25, 0.0  ;;  %v7862_v21 = vadd.f32 %v7861_v52, %v11319_v38  ;;  %v7863_v60 = vpop.f32.mrb[113].mxu0 }
0x1195   :  { %v8003_v20 = vmax.f32 %v7795_v41, 0.0  ;;  %v7864_v34 = vadd.f32 %v7863_v60, %v11319_v38  ;;  %v7865_v8 = vpop.f32.mrb[114].mxu0  ;;  %8144 = vmatprep.subr.bf16.mxu0 %v8023_v29 }
0x1196   :  { %v8050_v35 = vpack.c.bf16 %v8002_v62, %v7996_v16  ;;  %v7866_v55 = vadd.f32 %v7865_v8, %v11321_v40  ;;  %v7867_v4 = vpop.f32.mrb[115].mxu0  ;;  %8145 = vmatpush1.bf16.msra.mxu0 %v8022_v36  ;;  %v7950_v57 = vmax.f32 %v7862_v21, 0.0 }
0x1197   :  { %v8051_v48 = vpack.c.bf16 %v8003_v20, %v7997_v15  ;;  %v7868_v43 = vadd.f32 %v7867_v4, %v11321_v40  ;;  %v7951_v7 = vmax.f32 %v7864_v34, 0.0 }
0x1198   :  { %v7956_v9 = vmax.f32 %v7866_v55, 0.0 }
0x1199   :  { %v7957_v58 = vmax.f32 %v7868_v43, 0.0  ;;  %8111 = vmatprep.subr.bf16.mxu1 %v8051_v48 }
0x119a   :  { %v8028_v27 = vpack.c.bf16 %v7956_v9, %v7950_v57  ;;  %8112 = vmatpush1.bf16.msra.mxu1 %v8050_v35 }
0x119b   :  { %v8029_v28 = vpack.c.bf16 %v7957_v58, %v7951_v7  ;;  %v7871_v47 = vpop.f32.mrb[116].mxu0 }
0x119c   :  { %v7872_v26 = vadd.f32 %v7871_v47, %v11329_v51  ;;  %v7873_v49 = vpop.f32.mrb[117].mxu0 }
0x119d   :  { %v7874_v61 = vadd.f32 %v7873_v49, %v11329_v51  ;;  %v7875_v50 = vpop.f32.mrb[118].mxu0  ;;  %8130 = vmatmul.mubr.bf16.vlgmr.msra.gmra.mrb[104].mxu1 %v14810_v5  ;;  %8146 = vmatprep.subr.bf16.mxu0 %v8029_v28 }
0x119e   :  { %v7876_v36 = vadd.f32 %v7875_v50, %v11327_v33  ;;  %v7877_v25 = vpop.f32.mrb[119].mxu0  ;;  %8147 = vmatpush1.bf16.msra.mxu0 %v8028_v27  ;;  %10371 = vmatprep.mubr.msk.bf16.mxu1 %vm774_vm0, %v14855_v6  ;;  %v7962_v41 = vmax.f32 %v7872_v26, 0.0 }
0x119f   :  { %v7878_v29 = vadd.f32 %v7877_v25, %v11327_v33  ;;  %v7963_v16 = vmax.f32 %v7874_v61, 0.0 }
0x11a0   :  { %v7968_v52 = vmax.f32 %v7876_v36, 0.0 }
0x11a1   :  { %v7969_v62 = vmax.f32 %v7878_v29, 0.0 }
0x11a2   :  { %v8034_v21 = vpack.c.bf16 %v7968_v52, %v7962_v41 }
0x11a3   :  { %v8035_v60 = vpack.c.bf16 %v7969_v62, %v7963_v16  ;;  %v7881_v15 = vpop.f32.mrb[120].mxu0 }
0x11a4   :  { %v7882_v20 = vadd.f32 %v7881_v15, %v11341_v23  ;;  %v7883_v34 = vpop.f32.mrb[121].mxu0 }
0x11a5   :  { %v7884_v8 = vadd.f32 %v7883_v34, %v11341_v23  ;;  %v7885_v35 = vpop.f32.mrb[122].mxu0  ;;  %8148 = vmatprep.subr.bf16.mxu0 %v8035_v60 }
0x11a6   :  { %v7886_v55 = vadd.f32 %v7885_v35, %v11339_v17  ;;  %v7887_v4 = vpop.f32.mrb[123].mxu0  ;;  %8149 = vmatpush1.bf16.msra.mxu0 %v8034_v21  ;;  %v7974_v43 = vmax.f32 %v7882_v20, 0.0 }
0x11a7   :  { %v7888_v48 = vadd.f32 %v7887_v4, %v11339_v17  ;;  %v7975_v9 = vmax.f32 %v7884_v8, 0.0 }
0x11a8   :  { %v7980_v57 = vmax.f32 %v7886_v55, 0.0 }
0x11a9   :  { %v7981_v7 = vmax.f32 %v7888_v48, 0.0 }
0x11aa   :  { %v8040_v58 = vpack.c.bf16 %v7980_v57, %v7974_v43 }
0x11ab   :  { %v8041_v27 = vpack.c.bf16 %v7981_v7, %v7975_v9  ;;  %v7891_v28 = vpop.f32.mrb[124].mxu0 }
0x11ac   :  { %v7892_v47 = vadd.f32 %v7891_v28, %v11357_v56  ;;  %v7893_v26 = vpop.f32.mrb[125].mxu0 }
0x11ad   :  { %v7894_v49 = vadd.f32 %v7893_v26, %v11357_v56  ;;  %v7895_v61 = vpop.f32.mrb[126].mxu0  ;;  %8150 = vmatprep.subr.bf16.mxu0 %v8041_v27 }
0x11ae   :  { %v7896_v50 = vadd.f32 %v7895_v61, %v11355_v54  ;;  %v7897_v36 = vpop.f32.mrb[127].mxu0  ;;  %8151 = vmatpush1.bf16.msra.mxu0 %v8040_v58  ;;  %v7986_v29 = vmax.f32 %v7892_v47, 0.0 }
0x11af   :  { %v7898_v25 = vadd.f32 %v7897_v36, %v11355_v54  ;;  %v7987_v52 = vmax.f32 %v7894_v49, 0.0 }
0x11b0   :  { %v7992_v41 = vmax.f32 %v7896_v50, 0.0 }
0x11b1   :  { %v7993_v16 = vmax.f32 %v7898_v25, 0.0 }
0x11b2   :  { %v8046_v62 = vpack.c.bf16 %v7992_v41, %v7986_v29 }
0x11b3   :  { %v8047_v21 = vpack.c.bf16 %v7993_v16, %v7987_v52  ;;  %v7901_v60 = vpop.f32.mrb[128].mxu0 }
0x11b4   :  { %v7902_v15 = vadd.f32 %v7901_v60, %v11373_v18  ;;  %v7903_v20 = vpop.f32.mrb[129].mxu0 }
0x11b5   :  { %v7904_v34 = vadd.f32 %v7903_v20, %v11373_v18  ;;  %v7905_v8 = vpop.f32.mrb[130].mxu0  ;;  %8152 = vmatprep.subr.bf16.mxu0 %v8047_v21 }
0x11b6   :  { %v7906_v35 = vadd.f32 %v7905_v8, %v11371_v37  ;;  %v7907_v55 = vpop.f32.mrb[131].mxu0  ;;  %8153 = vmatpush1.bf16.msra.mxu0 %v8046_v62  ;;  %v7998_v48 = vmax.f32 %v7902_v15, 0.0 }
0x11b7   :  { %v7908_v4 = vadd.f32 %v7907_v55, %v11371_v37  ;;  %v7999_v57 = vmax.f32 %v7904_v34, 0.0 }
0x11b8   :  { %v8004_v43 = vmax.f32 %v7906_v35, 0.0 }
0x11b9   :  { %v8005_v9 = vmax.f32 %v7908_v4, 0.0 }
0x11ba   :  { %v8052_v7 = vpack.c.bf16 %v8004_v43, %v7998_v48 }
0x11bb   :  { %v8053_v58 = vpack.c.bf16 %v8005_v9, %v7999_v57 }
0x11bd   :  { %8154 = vmatprep.subr.bf16.mxu0 %v8053_v58 }
0x11be   :  { %8155 = vmatpush1.bf16.msra.mxu0 %v8052_v7 }
0x11c1   :  { %8173 = vmatmul.mubr.bf16.vlgmr.msra.gmra.mrb[132].mxu0 %v14810_v5 }
0x11c2   :  { %10379 = vmatprep.mubr.msk.bf16.mxu0 %vm774_vm0, %v14855_v6 }
0x124c   :  { %v8088_v27 = vpop.f32.mrb[100].mxu1 }
0x124d   :  { %v8089_v28 = vadd.f32 %v8088_v27, %v11479_v31  ;;  %v8090_v47 = vpop.f32.mrb[101].mxu1 }
0x124e   :  { %v8092_v26 = vpop.f32.mrb[102].mxu1  ;;  %v8091_v5 = vadd.f32 %v8090_v47, %v11479_v31 }
0x124f   :  { %v8195_v49 = vmul.f32 %v8089_v28, %v11477_v30  ;;  %v8093_v61 = vadd.f32 %v8092_v26, %v11482_v42  ;;  %v8094_v50 = vpop.f32.mrb[103].mxu1 }
0x1250   :  { %v8095_v25 = vadd.f32 %v8094_v50, %v11482_v42  ;;  %v8196_v62 = vmul.f32 %v8091_v5, %v11495_v44 }
0x1251   :  { %v8201_v36 = vmul.f32 %v8093_v61, %v11477_v30  ;;  %v14881_v29 = vadd.f32 %v8195_v49, %v14324_v46 }
0x1252   :  { %v8202_v16 = vmul.f32 %v8095_v25, %v11495_v44 }
0x1253   :  { %v14885_v41 = vadd.f32 %v8201_v36, %v14328_v39  ;;  %v14901_v39 = vadd.f32 %v8196_v62, %v14344_v24  ;;  %v15821_v36 = vld [vmem:[#allocation14_spill] sm:$0xff]  ;;  %v15823_v62 = vld [vmem:[#allocation12_spill] sm:$0xff] }
0x1254   :  { %v14898_v46 = vadd.f32 %v8202_v16, %v14341_v10 }
0x1255   :  { %v14889_v52 = vpack.c.bf16 %v14885_v41, %v14881_v29 }
0x1256   :  { %v14909_v21 = vpack.c.bf16 %v14898_v46, %v14901_v39 }
0x1257   :  { %8325 = vrot.lane.b32.xlu0 %v14889_v52, %s10725_s30  ;;  %8279 = vrot.lane.b32.xlu1 %v14889_v52, %s10724_s29 }
0x125b   :  { %8417 = vrot.lane.b32.xlu0 %v14889_v52, %s10727_s13  ;;  %8371 = vrot.lane.b32.xlu1 %v14889_v52, %s10726_s12 }
0x125f   :  { %8281 = vrot.lane.b32.xlu0 %v14909_v21, %s10724_s29  ;;  %8473 = vrot.lane.b32.xlu1 %v14889_v52, %s10728_s18 }
0x1263   :  { %8519 = vrot.lane.b32.xlu0 %v14889_v52, %s10729_s19  ;;  %8327 = vrot.lane.b32.xlu1 %v14909_v21, %s10725_s30 }
0x1267   :  { %8373 = vrot.lane.b32.xlu0 %v14909_v21, %s10726_s12  ;;  %8565 = vrot.lane.b32.xlu1 %v14889_v52, %s10730_s20 }
0x126b   :  { %8521 = vrot.lane.b32.xlu0 %v14909_v21, %s10729_s19  ;;  %8419 = vrot.lane.b32.xlu1 %v14909_v21, %s10727_s13 }
0x126f   :  { %8613 = vrot.lane.b32.xlu0 %v14909_v21, %s10731_s27  ;;  %8475 = vrot.lane.b32.xlu1 %v14909_v21, %s10728_s18 }
0x1270   :  { %v8131_v10 = vpop.f32.mrb[104].mxu1 }
0x1271   :  { %v8132_v24 = vadd.f32 %v8131_v10, %v11479_v31  ;;  %v8133_v60 = vpop.f32.mrb[105].mxu1 }
0x1272   :  { %v8135_v15 = vpop.f32.mrb[106].mxu1  ;;  %v8134_v48 = vadd.f32 %v8133_v60, %v11479_v31  ;;  %v15824_v60 = vld [vmem:[#allocation11_spill] sm:$0xff] }
0x1273   :  { %v8197_v20 = vmul.f32 %v8132_v24, %v11549_v63  ;;  %v8136_v34 = vadd.f32 %v8135_v15, %v11482_v42  ;;  %8567 = vrot.lane.b32.xlu1 %v14909_v21, %s10730_s20  ;;  %v8137_v8 = vpop.f32.mrb[107].mxu1 }
0x1274   :  { %v8138_v55 = vadd.f32 %v8137_v8, %v11482_v42  ;;  %v8198_v7 = vmul.f32 %v8134_v48, %v11569_v3  ;;  %v15828_v48 = vld [vmem:[#allocation9_spill] sm:$0xff] }
0x1275   :  { %v8203_v35 = vmul.f32 %v8136_v34, %v11549_v63  ;;  %v14939_v4 = vadd.f32 %v8197_v20, %v14382_v2  ;;  %v15826_v20 = vld [vmem:[#allocation13_spill] sm:$0xff] }
0x1276   :  { %v8204_v9 = vmul.f32 %v8138_v55, %v11569_v3  ;;  %v8278_v55 = vpop.permute.xlu1 %8277 }
0x1277   :  { %v14943_v43 = vadd.f32 %v8203_v35, %v14386_v1  ;;  %v14959_v1 = vadd.f32 %v8198_v7, %v14402_v45  ;;  %v8324_v35 = vpop.permute.xlu0 %8323 }
0x1278   :  { %v14956_v2 = vadd.f32 %v8204_v9, %v14399_v12  ;;  %v9377_v9 = vld [vmem:[%s15720_s7] sm:$0xff] }
0x1279   :  { %v14947_v57 = vpack.c.bf16 %v14943_v43, %v14939_v4 }
0x127a   :  { %v14967_v58 = vpack.c.bf16 %v14956_v2, %v14959_v1 }
0x127b   :  { %8523 = vrot.lane.b32.xlu1 %v14947_v57, %s10729_s19  ;;  %8477 = vrot.lane.b32.xlu0 %v14947_v57, %s10728_s18  ;;  %v8416_v7 = vpop.permute.xlu0 %8415 }
0x127f   :  { %8615 = vrot.lane.b32.xlu1 %v14947_v57, %s10731_s27  ;;  %8611 = vrot.lane.b32.xlu0 %v14889_v52, %s10731_s27 }
0x1283   :  { %8285 = vrot.lane.b32.xlu1 %v14967_v58, %s10724_s29  ;;  %8569 = vrot.lane.b32.xlu0 %v14947_v57, %s10730_s20 }
0x1287   :  { %8329 = vrot.lane.b32.xlu1 %v14947_v57, %s10725_s30  ;;  %8283 = vrot.lane.b32.xlu0 %v14947_v57, %s10724_s29 }
0x128b   :  { %8375 = vrot.lane.b32.xlu1 %v14947_v57, %s10726_s12  ;;  %8331 = vrot.lane.b32.xlu0 %v14967_v58, %s10725_s30 }
0x128f   :  { %8421 = vrot.lane.b32.xlu1 %v14947_v57, %s10727_s13  ;;  %8377 = vrot.lane.b32.xlu0 %v14967_v58, %s10726_s12 }
0x1293   :  { %8479 = vrot.lane.b32.xlu1 %v14967_v58, %s10728_s18  ;;  %8423 = vrot.lane.b32.xlu0 %v14967_v58, %s10727_s13 }
0x1294   :  { %v8174_v12 = vpop.f32.mrb[132].mxu0 }
0x1295   :  { %v8175_v45 = vadd.f32 %v8174_v12, %v11479_v31  ;;  %v8176_v27 = vpop.f32.mrb[133].mxu0  ;;  %v8370_v12 = vpop.permute.xlu1 %8369 }
0x1296   :  { %v8178_v28 = vpop.f32.mrb[134].mxu0 }
0x1297   :  { %v8199_v47 = vmul.f32 %v8175_v45, %v11623_v53  ;;  %v8179_v26 = vadd.f32 %v8178_v28, %v11482_v42  ;;  %8525 = vrot.lane.b32.xlu1 %v14967_v58, %s10729_s19  ;;  %v8180_v49 = vpop.f32.mrb[135].mxu0  ;;  %v9379_v45 = vld [vmem:[%s15720_s7 + $0x10] sm:$0xff] }
0x1298   :  { %v8181_v16 = vadd.f32 %v8180_v49, %v11482_v42  ;;  %v9378_v49 = vld [vmem:[%s15720_s7 + $0x8] sm:$0xff] }
0x1299   :  { %v8205_v61 = vmul.f32 %v8179_v26, %v11623_v53  ;;  %v14996_v50 = vadd.f32 %v8199_v47, %v14439_v11  ;;  %v8177_v11 = vadd.f32 %v8176_v27, %v11479_v31  ;;  %v9381_v27 = vld [vmem:[%s15720_s7 + $0x20] sm:$0xff]  ;;  %v9383_v26 = vld [vmem:[%s15720_s7 + $0x30] sm:$0xff] }
0x129a   :  { %v8206_v10 = vmul.f32 %v8181_v16, %v15823_v62  ;;  %v9380_v16 = vld [vmem:[%s15720_s7 + $0x18] sm:$0xff] }
0x129b   :  { %15820 = vst [vmem:[#allocation8_spill] sm:$0xff] %v14996_v50  ;;  %v14999_v25 = vadd.f32 %v8205_v61, %v15821_v36  ;;  %8571 = vrot.lane.b32.xlu1 %v14967_v58, %s10730_s20  ;;  %v8200_v24 = vmul.f32 %v8177_v11, %v15823_v62 }
0x129c   :  { %v15024_v15 = vadd.f32 %v8206_v10, %v15824_v60 }
0x129d   :  { %15822 = vst [vmem:[#allocation14_spill] sm:$0xff] %v14999_v25  ;;  %v15005_v5 = vpack.c.bf16 %v14999_v25, %v14996_v50  ;;  %v15027_v34 = vadd.f32 %v8200_v24, %v15826_v20  ;;  %v9382_v20 = vld [vmem:[%s15720_s7 + $0x28] sm:$0xff] }
0x129e   :  { %15825 = vst [vmem:[#allocation12_spill] sm:$0xff] %v15024_v15  ;;  %v15218_v25 = vld [vmem:[%s15714_s1 + $0x40] ss:$8 sps:$4 sm:$0xff]  }
0x129f   :  { %8617 = vrot.lane.b32.xlu1 %v14967_v58, %s10731_s27  ;;  %8481 = vrot.lane.b32.xlu0 %v15005_v5, %s10728_s18  ;;  %15827 = vst [vmem:[#allocation11_spill] sm:$0xff] %v15027_v34  ;;  %v15035_v8 = vpack.c.bf16 %v15024_v15, %v15027_v34  ;;  %v15193_v34 = vld [vmem:[%s15714_s1 + $0x30] ss:$8 sps:$4 sm:$0xff]  }
0x12a3   :  { %8287 = vrot.lane.b32.xlu1 %v15005_v5, %s10724_s29  ;;  %8527 = vrot.lane.b32.xlu0 %v15005_v5, %s10729_s19 }
0x12a7   :  { %8333 = vrot.lane.b32.xlu1 %v15005_v5, %s10725_s30  ;;  %8573 = vrot.lane.b32.xlu0 %v15005_v5, %s10730_s20 }
0x12ab   :  { %8379 = vrot.lane.b32.xlu1 %v15005_v5, %s10726_s12  ;;  %8619 = vrot.lane.b32.xlu0 %v15005_v5, %s10731_s27 }
0x12af   :  { %8425 = vrot.lane.b32.xlu1 %v15005_v5, %s10727_s13  ;;  %8289 = vrot.lane.b32.xlu0 %v15035_v8, %s10724_s29 }
0x12b3   :  { %8483 = vrot.lane.b32.xlu1 %v15035_v8, %s10728_s18  ;;  %8335 = vrot.lane.b32.xlu0 %v15035_v8, %s10725_s30 }
0x12b7   :  { %8529 = vrot.lane.b32.xlu1 %v15035_v8, %s10729_s19  ;;  %8381 = vrot.lane.b32.xlu0 %v15035_v8, %s10726_s12 }
0x12bb   :  { %8575 = vrot.lane.b32.xlu1 %v15035_v8, %s10730_s20  ;;  %8427 = vrot.lane.b32.xlu0 %v15035_v8, %s10727_s13 }
0x12bf   :  { %8621 = vrot.lane.b32.xlu1 %v15035_v8, %s10731_s27  ;;  %8485 = vrot.lane.b32.xlu0 %v15828_v48, %s10728_s18 }
0x12c3   :  { %9387 = vperm.xlu1 %10542, %v9377_v9   ;;  %8531 = vrot.lane.b32.xlu0 %v15828_v48, %s10729_s19 }
0x12c7   :  { %9397 = vperm.xlu1 %10542, %v9379_v45   ;;  %8577 = vrot.lane.b32.xlu0 %v15828_v48, %s10730_s20 }
0x12c9   :  { %v8326_v28 = vpop.permute.xlu0 %8325  ;;  %v8280_v47 = vpop.permute.xlu1 %8279 }
0x12ca   :  { %v8291_v60 = vsel %vm208_vm1, %v8278_v55, %v8280_v47  ;;  %v9384_v55 = vld [vmem:[%s15720_s7 + $0x38] sm:$0xff] }
0x12cb   :  { %9407 = vperm.xlu1 %10542, %v9381_v27   ;;  %8623 = vrot.lane.b32.xlu0 %v15828_v48, %s10731_s27  ;;  %v8337_v27 = vsel %vm255_vm2, %v8324_v35, %v8326_v28 }
0x12cd   :  { %v8418_v61 = vpop.permute.xlu0 %8417  ;;  %v8372_v36 = vpop.permute.xlu1 %8371 }
0x12ce   :  { %v8429_v35 = vsel %vm349_vm4, %v8416_v7, %v8418_v61 }
0x12cf   :  { %9417 = vperm.xlu1 %10542, %v9383_v26   ;;  %9392 = vperm.xlu0 %10541, %v9378_v49  }
0x12d1   :  { %v8282_v11 = vpop.permute.xlu0 %8281  ;;  %v8474_v10 = vpop.permute.xlu1 %8473 }
0x12d2   :  { %v8292_v24 = vsel %vm208_vm1, %v8280_v47, %v8282_v11 }
0x12d3   :  { %9402 = vperm.xlu0 %10541, %v9380_v16   ;;  %8697 = vmatprep.subr.bf16.mxu1 %v8292_v24  ;;  %v8383_v16 = vsel %vm302_vm3, %v8370_v12, %v8372_v36 }
0x12d4   :  { %8698 = vmatpush1.bf16.msra.mxu1 %v8291_v60 }
0x12d5   :  { %v8520_v48 = vpop.permute.xlu0 %8519  ;;  %v8328_v9 = vpop.permute.xlu1 %8327 }
0x12d6   :  { %v8338_v45 = vsel %vm255_vm2, %v8326_v28, %v8328_v9 }
0x12d7   :  { %9412 = vperm.xlu0 %10541, %v9382_v20   ;;  %8699 = vmatprep.subr.bf16.mxu1 %v8338_v45 }
0x12d8   :  { %8700 = vmatpush1.bf16.msra.mxu1 %v8337_v27 }
0x12d9   :  { %v8374_v47 = vpop.permute.xlu0 %8373  ;;  %v8566_v26 = vpop.permute.xlu1 %8565 }
0x12da   :  { %v8384_v49 = vsel %vm302_vm3, %v8372_v36, %v8374_v47 }
0x12db   :  { %9422 = vperm.xlu0 %10541, %v9384_v55   ;;  %8701 = vmatprep.subr.bf16.mxu1 %v8384_v49 }
0x12dc   :  { %8702 = vmatpush1.bf16.msra.mxu1 %v8383_v16 }
0x12dd   :  { %v8420_v24 = vpop.permute.xlu1 %8419  ;;  %v8522_v28 = vpop.permute.xlu0 %8521 }
0x12de   :  { %v8430_v60 = vsel %vm349_vm4, %v8418_v61, %v8420_v24 }
0x12df   :  { %8703 = vmatprep.subr.bf16.mxu1 %v8430_v60 }
0x12e0   :  { %8704 = vmatpush1.bf16.msra.mxu1 %v8429_v35 }
0x12e1   :  { %8705 = vmatprep.subr.bf16.mxu1 %v14909_v21  ;;  %v8476_v20 = vpop.permute.xlu1 %8475  ;;  %v8614_v45 = vpop.permute.xlu0 %8613 }
0x12e2   :  { %v8487_v55 = vsel %vm408_vm5, %v8474_v10, %v8476_v20 }
0x12e4   :  { %8706 = vmatpush1.bf16.msra.mxu1 %v14889_v52  ;;  %v8533_v52 = vsel %vm455_vm6, %v8520_v48, %v8522_v28 }
0x12e5   :  { %v8568_v27 = vpop.permute.xlu1 %8567 }
0x12e6   :  { %v8579_v10 = vsel %vm502_vm7, %v8566_v26, %v8568_v27 }
0x12ed   :  { %v15097_v15 = vpop.permute.xlu0 %8477  ;;  %v15099_v12 = vpop.permute.xlu1 %8523 }
0x12ee   :  { %v8488_v36 = vsel %vm408_vm5, %v8476_v20, %v15097_v15  ;;  %v8534_v21 = vsel %vm455_vm6, %v8522_v28, %v15099_v12 }
0x12ef   :  { %8707 = vmatprep.subr.bf16.mxu1 %v8488_v36 }
0x12f0   :  { %8708 = vmatpush1.bf16.msra.mxu1 %v8487_v55 }
0x12f1   :  { %v8612_v7 = vpop.permute.xlu0 %8611  ;;  %8709 = vmatprep.subr.bf16.mxu1 %v8534_v21  ;;  %v15106_v61 = vpop.permute.xlu1 %8615 }
0x12f2   :  { %v8626_v35 = vsel %vm549_vm8, %v8614_v45, %v15106_v61  ;;  %v8625_v55 = vsel %vm549_vm8, %v8612_v7, %v8614_v45  ;;  %v15136_v45 = vld [vmem:[%s15714_s1 + $0x14] ss:$8 sps:$4 sm:$0xff]  }
0x12f4   :  { %8710 = vmatpush1.bf16.msra.mxu1 %v8533_v52 }
0x12f5   :  { %v15109_v49 = vpop.permute.xlu0 %8569  ;;  %v15111_v16 = vpop.permute.xlu1 %8285 }
0x12f6   :  { %v8580_v60 = vsel %vm502_vm7, %v8568_v27, %v15109_v49 }
0x12f7   :  { %8711 = vmatprep.subr.bf16.mxu1 %v8580_v60 }
0x12f8   :  { %8712 = vmatpush1.bf16.msra.mxu1 %v8579_v10 }
0x12f9   :  { %v8284_v20 = vpop.permute.xlu0 %8283  ;;  %8713 = vmatprep.subr.bf16.mxu1 %v8626_v35  ;;  %v8330_v36 = vpop.permute.xlu1 %8329 }
0x12fa   :  { %v8293_v48 = vsel %vm208_vm1, %v8282_v11, %v8284_v20  ;;  %v8294_v28 = vsel %vm208_vm1, %v8284_v20, %v15111_v16  ;;  %v8339_v52 = vsel %vm255_vm2, %v8328_v9, %v8330_v36  ;;  %v15130_v11 = vld [vmem:[%s15714_s1] ss:$8 sps:$4 sm:$0xff]  }
0x12fb   :  { %8810 = vmatprep.subr.bf16.mxu0 %v8294_v28  ;;  %v15153_v28 = vld [vmem:[%s15714_s1 + $0x10] ss:$8 sps:$4 sm:$0xff]  }
0x12fc   :  { %8714 = vmatpush1.bf16.msra.mxu1 %v8625_v55  ;;  %8811 = vmatpush1.bf16.msra.mxu0 %v8293_v48 }
0x12fd   :  { %v15122_v21 = vpop.permute.xlu0 %8331  ;;  %v8376_v26 = vpop.permute.xlu1 %8375 }
0x12fe   :  { %v8340_v27 = vsel %vm255_vm2, %v8330_v36, %v15122_v21  ;;  %v8385_v10 = vsel %vm302_vm3, %v8374_v47, %v8376_v26  ;;  %v15159_v47 = vld [vmem:[%s15714_s1 + $0x24] ss:$8 sps:$4 sm:$0xff]  }
0x12ff   :  { %8730 = vmatmul.mubr.bf16.vlgmr.msra.gmra.mrb[108].mxu1 %v15130_v11  ;;  %8812 = vmatprep.subr.bf16.mxu0 %v8340_v27  ;;  %v15174_v27 = vld [vmem:[%s15714_s1 + $0x34] ss:$8 sps:$4 sm:$0xff]  }
0x1300   :  { %8813 = vmatpush1.bf16.msra.mxu0 %v8339_v52  ;;  %10372 = vmatprep.mubr.msk.bf16.mxu1 %vm774_vm0, %v15136_v45 }
0x1301   :  { %v15140_v7 = vpop.permute.xlu0 %8377  ;;  %v8422_v9 = vpop.permute.xlu1 %8421 }
0x1302   :  { %v8386_v60 = vsel %vm302_vm3, %v8376_v26, %v15140_v7  ;;  %v8431_v48 = vsel %vm349_vm4, %v8420_v24, %v8422_v9  ;;  %v15168_v26 = vld [vmem:[%s15714_s1 + $0x20] ss:$8 sps:$4 sm:$0xff]  }
0x1303   :  { %8814 = vmatprep.subr.bf16.mxu0 %v8386_v60 }
0x1304   :  { %8815 = vmatpush1.bf16.msra.mxu0 %v8385_v10 }
0x1305   :  { %v15145_v35 = vpop.permute.xlu0 %8423  ;;  %v8480_v20 = vpop.permute.xlu1 %8479 }
0x1306   :  { %v8432_v36 = vsel %vm349_vm4, %v8422_v9, %v15145_v35  ;;  %v8489_v9 = vsel %vm408_vm5, %v15097_v15, %v8480_v20  ;;  %v15199_v15 = vld [vmem:[%s15714_s1 + $0x44] ss:$8 sps:$4 sm:$0xff]  }
0x1307   :  { %8740 = vmatmul.mubr.bf16.gmra.mrb[112].mxu1 %v15153_v28  ;;  %8816 = vmatprep.subr.bf16.mxu0 %v8432_v36 }
0x1308   :  { %8817 = vmatpush1.bf16.msra.mxu0 %v8431_v48  ;;  %10373 = vmatprep.mubr.msk.bf16.mxu1 %vm774_vm0, %v15159_v47 }
0x1309   :  { %8818 = vmatprep.subr.bf16.mxu0 %v14967_v58  ;;  %v8526_v24 = vpop.permute.xlu1 %8525 }
0x130a   :  { %v8535_v48 = vsel %vm455_vm6, %v15099_v12, %v8526_v24 }
0x130c   :  { %8819 = vmatpush1.bf16.msra.mxu0 %v14947_v57 }
0x130d   :  { %v8572_v55 = vpop.permute.xlu1 %8571 }
0x130f   :  { %8750 = vmatmul.mubr.bf16.gmra.mrb[116].mxu1 %v15168_v26 }
0x1310   :  { %10374 = vmatprep.mubr.msk.bf16.mxu1 %vm774_vm0, %v15174_v27 }
0x1311   :  { %v15178_v58 = vpop.permute.xlu0 %8481  ;;  %v8618_v52 = vpop.permute.xlu1 %8617 }
0x1312   :  { %v8490_v57 = vsel %vm408_vm5, %v8480_v20, %v15178_v58 }
0x1313   :  { %8820 = vmatprep.subr.bf16.mxu0 %v8490_v57 }
0x1314   :  { %8821 = vmatpush1.bf16.msra.mxu0 %v8489_v9 }
0x1315   :  { %v15184_v60 = vpop.permute.xlu0 %8527  ;;  %v8288_v10 = vpop.permute.xlu1 %8287 }
0x1316   :  { %v8536_v36 = vsel %vm455_vm6, %v8526_v24, %v15184_v60  ;;  %v8581_v24 = vsel %vm502_vm7, %v15109_v49, %v8572_v55  ;;  %v15224_v49 = vld [vmem:[%s15714_s1 + $0x54] ss:$8 sps:$4 sm:$0xff]  }
0x1317   :  { %8760 = vmatmul.mubr.bf16.gmra.mrb[120].mxu1 %v15193_v34  ;;  %8822 = vmatprep.subr.bf16.mxu0 %v8536_v36 }
0x1318   :  { %8823 = vmatpush1.bf16.msra.mxu0 %v8535_v48  ;;  %10375 = vmatprep.mubr.msk.bf16.mxu1 %vm774_vm0, %v15199_v15  ;;  %v8627_v48 = vsel %vm549_vm8, %v15106_v61, %v8618_v52 }
0x1319   :  { %v15203_v20 = vpop.permute.xlu0 %8573  ;;  %v8334_v57 = vpop.permute.xlu1 %8333 }
0x131a   :  { %v8582_v12 = vsel %vm502_vm7, %v8572_v55, %v15203_v20 }
0x131b   :  { %8824 = vmatprep.subr.bf16.mxu0 %v8582_v12 }
0x131c   :  { %8825 = vmatpush1.bf16.msra.mxu0 %v8581_v24 }
0x131d   :  { %v15209_v9 = vpop.permute.xlu0 %8619  ;;  %v8380_v55 = vpop.permute.xlu1 %8379 }
0x131e   :  { %v8628_v36 = vsel %vm549_vm8, %v8618_v52, %v15209_v9  ;;  %v8295_v52 = vsel %vm208_vm1, %v15111_v16, %v8288_v10  ;;  %v15246_v16 = vld [vmem:[%s15714_s1 + $0x64] ss:$8 sps:$4 sm:$0xff]  }
0x131f   :  { %8770 = vmatmul.mubr.bf16.gmra.mrb[124].mxu1 %v15218_v25  ;;  %8826 = vmatprep.subr.bf16.mxu0 %v8628_v36 }
0x1320   :  { %8827 = vmatpush1.bf16.msra.mxu0 %v8627_v48  ;;  %10376 = vmatprep.mubr.msk.bf16.mxu1 %vm774_vm0, %v15224_v49  ;;  %v8341_v48 = vsel %vm255_vm2, %v15122_v21, %v8334_v57 }
0x1321   :  { %v8290_v12 = vpop.permute.xlu0 %8289  ;;  %v8426_v50 = vpop.permute.xlu1 %8425 }
0x1322   :  { %v8296_v61 = vsel %vm208_vm1, %v8288_v10, %v8290_v12  ;;  %v15240_v12 = vld [vmem:[%s15714_s1 + $0x50] ss:$8 sps:$4 sm:$0xff]  }
0x1323   :  { %8843 = vmatmul.mubr.bf16.vlgmr.msra.gmra.mrb[136].mxu0 %v15130_v11  ;;  %8923 = vmatprep.subr.bf16.mxu1 %v8296_v61 }
0x1324   :  { %8924 = vmatpush1.bf16.msra.mxu1 %v8295_v52  ;;  %10380 = vmatprep.mubr.msk.bf16.mxu0 %vm774_vm0, %v15136_v45 }
0x1325   :  { %v8336_v24 = vpop.permute.xlu0 %8335  ;;  %v8484_v61 = vpop.permute.xlu1 %8483 }
0x1326   :  { %v8342_v36 = vsel %vm255_vm2, %v8334_v57, %v8336_v24  ;;  %v8387_v57 = vsel %vm302_vm3, %v15140_v7, %v8380_v55  ;;  %v10697_v7 = vld [vmem:[%s15714_s1 + $0x74] ss:$8 sps:$4 sm:$0xff]  }
0x1327   :  { %8780 = vmatmul.mubr.bf16.gmra.mrb[128].mxu1 %v15240_v12  ;;  %8925 = vmatprep.subr.bf16.mxu1 %v8342_v36  ;;  %v8433_v36 = vsel %vm349_vm4, %v15145_v35, %v8426_v50 }
0x1328   :  { %8926 = vmatpush1.bf16.msra.mxu1 %v8341_v48  ;;  %10377 = vmatprep.mubr.msk.bf16.mxu1 %vm774_vm0, %v15246_v16  ;;  %v10696_v48 = vld [vmem:[%s15714_s1 + $0x60] ss:$8 sps:$4 sm:$0xff]  }
0x1329   :  { %v8382_v10 = vpop.permute.xlu0 %8381 }
0x132a   :  { %v8388_v21 = vsel %vm302_vm3, %v8380_v55, %v8382_v10  ;;  %v8530_v10 = vpop.permute.xlu1 %8529 }
0x132b   :  { %8853 = vmatmul.mubr.bf16.gmra.mrb[140].mxu0 %v15153_v28  ;;  %8927 = vmatprep.subr.bf16.mxu1 %v8388_v21  ;;  %v8491_v21 = vsel %vm408_vm5, %v15178_v58, %v8484_v61 }
0x132c   :  { %8928 = vmatpush1.bf16.msra.mxu1 %v8387_v57  ;;  %10381 = vmatprep.mubr.msk.bf16.mxu0 %vm774_vm0, %v15159_v47  ;;  %v10698_v57 = vld [vmem:[%s15714_s1 + $0x70] ss:$8 sps:$4 sm:$0xff]  }
0x132d   :  { %v8428_v52 = vpop.permute.xlu0 %8427 }
0x132e   :  { %v8434_v24 = vsel %vm349_vm4, %v8426_v50, %v8428_v52 }
0x132f   :  { %8790 = vmatmul.mubr.bf16.gmra.mrb[132].mxu1 %v10696_v48  ;;  %8929 = vmatprep.subr.bf16.mxu1 %v8434_v24  ;;  %v8537_v24 = vsel %vm455_vm6, %v15184_v60, %v8530_v10 }
0x1330   :  { %8930 = vmatpush1.bf16.msra.mxu1 %v8433_v36  ;;  %10378 = vmatprep.mubr.msk.bf16.mxu1 %vm774_vm0, %v10697_v7 }
0x1331   :  { %v8486_v55 = vpop.permute.xlu0 %8485  ;;  %8931 = vmatprep.subr.bf16.mxu1 %v15035_v8 }
0x1332   :  { %v8492_v50 = vsel %vm408_vm5, %v8484_v61, %v8486_v55 }
0x1333   :  { %8863 = vmatmul.mubr.bf16.gmra.mrb[144].mxu0 %v15168_v26 }
0x1334   :  { %8932 = vmatpush1.bf16.msra.mxu1 %v15005_v5  ;;  %10382 = vmatprep.mubr.msk.bf16.mxu0 %vm774_vm0, %v15174_v27  ;;  %v8576_v5 = vpop.permute.xlu1 %8575 }
0x1335   :  { %v8532_v35 = vpop.permute.xlu0 %8531  ;;  %8933 = vmatprep.subr.bf16.mxu1 %v8492_v50  ;;  %v8583_v36 = vsel %vm502_vm7, %v15203_v20, %v8576_v5 }
0x1336   :  { %v8538_v8 = vsel %vm455_vm6, %v8530_v10, %v8532_v35 }
0x1337   :  { %8800 = vmatmul.mubr.bf16.gmra.mrb[136].mxu1 %v10698_v57 }
0x1338   :  { %8934 = vmatpush1.bf16.msra.mxu1 %v8491_v21  ;;  %10387 = vmatprep.mubr.msk.bf16.mxu1 %vm774_vm0, %v14855_v6  ;;  %v8622_v6 = vpop.permute.xlu1 %8621 }
0x1339   :  { %v8578_v52 = vpop.permute.xlu0 %8577  ;;  %8935 = vmatprep.subr.bf16.mxu1 %v8538_v8  ;;  %v8629_v60 = vsel %vm549_vm8, %v15209_v9, %v8622_v6 }
0x133a   :  { %v8584_v58 = vsel %vm502_vm7, %v8576_v5, %v8578_v52 }
0x133b   :  { %8873 = vmatmul.mubr.bf16.gmra.mrb[148].mxu0 %v15193_v34 }
0x133c   :  { %8936 = vmatpush1.bf16.msra.mxu1 %v8537_v24  ;;  %10383 = vmatprep.mubr.msk.bf16.mxu0 %vm774_vm0, %v15199_v15 }
0x133d   :  { %v8624_v61 = vpop.permute.xlu0 %8623  ;;  %8937 = vmatprep.subr.bf16.mxu1 %v8584_v58 }
0x133e   :  { %v8630_v55 = vsel %vm549_vm8, %v8622_v6, %v8624_v61 }
0x1340   :  { %8938 = vmatpush1.bf16.msra.mxu1 %v8583_v36 }
0x1341   :  { %8939 = vmatprep.subr.bf16.mxu1 %v8630_v55 }
0x1343   :  { %8883 = vmatmul.mubr.bf16.gmra.mrb[152].mxu0 %v15218_v25 }
0x1344   :  { %8940 = vmatpush1.bf16.msra.mxu1 %v8629_v60  ;;  %10384 = vmatprep.mubr.msk.bf16.mxu0 %vm774_vm0, %v15224_v49 }
0x1347   :  { %8956 = vmatmul.mubr.bf16.vlgmr.msra.gmra.mrb[140].mxu1 %v15130_v11 }
0x1348   :  { %10388 = vmatprep.mubr.msk.bf16.mxu1 %vm774_vm0, %v15136_v45 }
0x134b   :  { %8893 = vmatmul.mubr.bf16.gmra.mrb[156].mxu0 %v15240_v12 }
0x134c   :  { %10385 = vmatprep.mubr.msk.bf16.mxu0 %vm774_vm0, %v15246_v16 }
0x134f   :  { %8966 = vmatmul.mubr.bf16.gmra.mrb[144].mxu1 %v15153_v28 }
0x1350   :  { %10389 = vmatprep.mubr.msk.bf16.mxu1 %vm774_vm0, %v15159_v47 }
0x1353   :  { %8903 = vmatmul.mubr.bf16.gmra.mrb[160].mxu0 %v10696_v48 }
0x1354   :  { %10386 = vmatprep.mubr.msk.bf16.mxu0 %vm774_vm0, %v10697_v7 }
0x1357   :  { %8976 = vmatmul.mubr.bf16.gmra.mrb[148].mxu1 %v15168_v26 }
0x1358   :  { %10390 = vmatprep.mubr.msk.bf16.mxu1 %vm774_vm0, %v15174_v27 }
0x135b   :  { %8913 = vmatmul.mubr.bf16.gmra.mrb[164].mxu0 %v10698_v57 }
0x135c   :  { %9212 = vmatprep.mubr.bf16.mxu0 %v15776_v19 }
0x135f   :  { %8986 = vmatmul.mubr.bf16.gmra.mrb[152].mxu1 %v15193_v34 }
0x1360   :  { %10391 = vmatprep.mubr.msk.bf16.mxu1 %vm774_vm0, %v15199_v15 }
0x1367   :  { %8996 = vmatmul.mubr.bf16.gmra.mrb[156].mxu1 %v15218_v25 }
0x1368   :  { %10392 = vmatprep.mubr.msk.bf16.mxu1 %vm774_vm0, %v15224_v49 }
0x136f   :  { %9006 = vmatmul.mubr.bf16.gmra.mrb[160].mxu1 %v15240_v12 }
0x1370   :  { %10393 = vmatprep.mubr.msk.bf16.mxu1 %vm774_vm0, %v15246_v16 }
0x1377   :  { %9016 = vmatmul.mubr.bf16.gmra.mrb[164].mxu1 %v10696_v48 }
0x1378   :  { %10394 = vmatprep.mubr.msk.bf16.mxu1 %vm774_vm0, %v10697_v7 }
0x137f   :  { %9026 = vmatmul.mubr.bf16.gmra.mrb[168].mxu1 %v10698_v57 }
0x1380   :  { %9298 = vmatprep.mubr.bf16.mxu1 %v15776_v19 }
0x13d2   :  { %v8731_v34 = vpop.f32.mrb[108].mxu1 }
0x13d3   :  { %v8732_v11 = vadd.f32 %v8731_v34, %v11295_v14  ;;  %v8733_v45 = vpop.f32.mrb[109].mxu1 }
0x13d4   :  { %v8734_v25 = vadd.f32 %v8733_v45, %v11295_v14  ;;  %v8735_v28 = vpop.f32.mrb[110].mxu1 }
0x13d5   :  { %v8736_v47 = vadd.f32 %v8735_v28, %v11297_v32  ;;  %v8737_v26 = vpop.f32.mrb[111].mxu1  ;;  %v9036_v15 = vmax.f32 %v8732_v11, 0.0 }
0x13d6   :  { %v8738_v27 = vadd.f32 %v8737_v26, %v11297_v32  ;;  %v9037_v9 = vmax.f32 %v8734_v25, 0.0 }
0x13d7   :  { %v9042_v20 = vmax.f32 %v8736_v47, 0.0 }
0x13d8   :  { %v9043_v49 = vmax.f32 %v8738_v27, 0.0 }
0x13d9   :  { %v9132_v12 = vpack.c.bf16 %v9042_v20, %v9036_v15 }
0x13da   :  { %v9133_v16 = vpack.c.bf16 %v9043_v49, %v9037_v9  ;;  %v8741_v48 = vpop.f32.mrb[112].mxu1 }
0x13db   :  { %v8742_v7 = vadd.f32 %v8741_v48, %v11303_v59  ;;  %v8743_v10 = vpop.f32.mrb[113].mxu1 }
0x13dc   :  { %v8744_v50 = vadd.f32 %v8743_v10, %v11303_v59  ;;  %v8745_v35 = vpop.f32.mrb[114].mxu1  ;;  %9180 = vmatprep.subr.bf16.mxu0 %v9133_v16 }
0x13dd   :  { %v8746_v21 = vadd.f32 %v8745_v35, %v11306_v0  ;;  %v8747_v57 = vpop.f32.mrb[115].mxu1  ;;  %9181 = vmatpush1.bf16.msra.mxu0 %v9132_v12  ;;  %v9048_v5 = vmax.f32 %v8742_v7, 0.0 }
0x13de   :  { %v8748_v8 = vadd.f32 %v8747_v57, %v11306_v0  ;;  %v9049_v24 = vmax.f32 %v8744_v50, 0.0 }
0x13df   :  { %v9054_v52 = vmax.f32 %v8746_v21, 0.0 }
0x13e0   :  { %v9055_v58 = vmax.f32 %v8748_v8, 0.0 }
0x13e1   :  { %v9138_v61 = vpack.c.bf16 %v9054_v52, %v9048_v5 }
0x13e2   :  { %v9139_v36 = vpack.c.bf16 %v9055_v58, %v9049_v24  ;;  %v8751_v6 = vpop.f32.mrb[116].mxu1 }
0x13e3   :  { %v8752_v55 = vadd.f32 %v8751_v6, %v11311_v13  ;;  %v8753_v60 = vpop.f32.mrb[117].mxu1 }
0x13e4   :  { %v8754_v34 = vadd.f32 %v8753_v60, %v11311_v13  ;;  %v8755_v11 = vpop.f32.mrb[118].mxu1  ;;  %9182 = vmatprep.subr.bf16.mxu0 %v9139_v36 }
0x13e5   :  { %v8756_v45 = vadd.f32 %v8755_v11, %v11314_v22  ;;  %v8757_v25 = vpop.f32.mrb[119].mxu1  ;;  %9183 = vmatpush1.bf16.msra.mxu0 %v9138_v61  ;;  %v9060_v47 = vmax.f32 %v8752_v55, 0.0 }
0x13e6   :  { %v8758_v28 = vadd.f32 %v8757_v25, %v11314_v22  ;;  %v9061_v27 = vmax.f32 %v8754_v34, 0.0 }
0x13e7   :  { %v9066_v26 = vmax.f32 %v8756_v45, 0.0 }
0x13e8   :  { %v9067_v15 = vmax.f32 %v8758_v28, 0.0 }
0x13e9   :  { %v9144_v20 = vpack.c.bf16 %v9066_v26, %v9060_v47 }
0x13ea   :  { %v9145_v9 = vpack.c.bf16 %v9067_v15, %v9061_v27  ;;  %v8761_v49 = vpop.f32.mrb[120].mxu1 }
0x13eb   :  { %v8762_v12 = vadd.f32 %v8761_v49, %v11319_v38  ;;  %v8763_v16 = vpop.f32.mrb[121].mxu1 }
0x13ec   :  { %v8764_v48 = vadd.f32 %v8763_v16, %v11319_v38  ;;  %v8765_v7 = vpop.f32.mrb[122].mxu1  ;;  %9184 = vmatprep.subr.bf16.mxu0 %v9145_v9 }
0x13ed   :  { %v8766_v10 = vadd.f32 %v8765_v7, %v11321_v40  ;;  %v8767_v50 = vpop.f32.mrb[123].mxu1  ;;  %9185 = vmatpush1.bf16.msra.mxu0 %v9144_v20  ;;  %v9072_v21 = vmax.f32 %v8762_v12, 0.0 }
0x13ee   :  { %v8768_v35 = vadd.f32 %v8767_v50, %v11321_v40  ;;  %v9073_v8 = vmax.f32 %v8764_v48, 0.0 }
0x13ef   :  { %v9078_v57 = vmax.f32 %v8766_v10, 0.0 }
0x13f0   :  { %v9079_v5 = vmax.f32 %v8768_v35, 0.0 }
0x13f1   :  { %v9150_v52 = vpack.c.bf16 %v9078_v57, %v9072_v21 }
0x13f2   :  { %v9151_v24 = vpack.c.bf16 %v9079_v5, %v9073_v8  ;;  %v8771_v58 = vpop.f32.mrb[124].mxu1 }
0x13f3   :  { %v8772_v61 = vadd.f32 %v8771_v58, %v11329_v51  ;;  %v8773_v36 = vpop.f32.mrb[125].mxu1 }
0x13f4   :  { %v8774_v6 = vadd.f32 %v8773_v36, %v11329_v51  ;;  %v8775_v55 = vpop.f32.mrb[126].mxu1  ;;  %9186 = vmatprep.subr.bf16.mxu0 %v9151_v24 }
0x13f5   :  { %v8776_v60 = vadd.f32 %v8775_v55, %v11327_v33  ;;  %v8777_v34 = vpop.f32.mrb[127].mxu1  ;;  %9187 = vmatpush1.bf16.msra.mxu0 %v9150_v52  ;;  %v9084_v25 = vmax.f32 %v8772_v61, 0.0 }
0x13f6   :  { %v8778_v11 = vadd.f32 %v8777_v34, %v11327_v33  ;;  %v8844_v45 = vpop.f32.mrb[136].mxu0  ;;  %v9085_v27 = vmax.f32 %v8774_v6, 0.0 }
0x13f7   :  { %v9090_v28 = vmax.f32 %v8776_v60, 0.0  ;;  %v8845_v47 = vadd.f32 %v8844_v45, %v11295_v14  ;;  %v8846_v26 = vpop.f32.mrb[137].mxu0 }
0x13f8   :  { %v9091_v15 = vmax.f32 %v8778_v11, 0.0  ;;  %v8847_v20 = vadd.f32 %v8846_v26, %v11295_v14  ;;  %v8848_v9 = vpop.f32.mrb[138].mxu0 }
0x13f9   :  { %v9156_v49 = vpack.c.bf16 %v9090_v28, %v9084_v25  ;;  %v8849_v12 = vadd.f32 %v8848_v9, %v11297_v32  ;;  %v8850_v16 = vpop.f32.mrb[139].mxu0  ;;  %v9038_v50 = vmax.f32 %v8845_v47, 0.0 }
0x13fa   :  { %v9157_v48 = vpack.c.bf16 %v9091_v15, %v9085_v27  ;;  %v8851_v7 = vadd.f32 %v8850_v16, %v11297_v32  ;;  %v8781_v10 = vpop.f32.mrb[128].mxu1  ;;  %v9039_v8 = vmax.f32 %v8847_v20, 0.0 }
0x13fb   :  { %v9044_v35 = vmax.f32 %v8849_v12, 0.0  ;;  %v8782_v21 = vadd.f32 %v8781_v10, %v11341_v23  ;;  %v8783_v57 = vpop.f32.mrb[129].mxu1 }
0x13fc   :  { %v9045_v5 = vmax.f32 %v8851_v7, 0.0  ;;  %v8784_v52 = vadd.f32 %v8783_v57, %v11341_v23  ;;  %v8785_v24 = vpop.f32.mrb[130].mxu1  ;;  %9188 = vmatprep.subr.bf16.mxu0 %v9157_v48 }
0x13fd   :  { %v15345_v58 = vpack.c.bf16 %v9044_v35, %v9038_v50  ;;  %v8786_v61 = vadd.f32 %v8785_v24, %v11339_v17  ;;  %v8787_v36 = vpop.f32.mrb[131].mxu1  ;;  %9189 = vmatpush1.bf16.msra.mxu0 %v9156_v49  ;;  %v9096_v34 = vmax.f32 %v8782_v21, 0.0 }
0x13fe   :  { %v15348_v6 = vpack.c.bf16 %v9045_v5, %v9039_v8  ;;  %v8788_v55 = vadd.f32 %v8787_v36, %v11339_v17  ;;  %v8854_v60 = vpop.f32.mrb[140].mxu0  ;;  %v9097_v28 = vmax.f32 %v8784_v52, 0.0 }
0x13ff   :  { %v9102_v11 = vmax.f32 %v8786_v61, 0.0  ;;  %v8855_v45 = vadd.f32 %v8854_v60, %v11303_v59  ;;  %v8856_v25 = vpop.f32.mrb[141].mxu0 }
0x1400   :  { %v9103_v47 = vmax.f32 %v8788_v55, 0.0  ;;  %v8857_v26 = vadd.f32 %v8856_v25, %v11303_v59  ;;  %v8858_v27 = vpop.f32.mrb[142].mxu0 }
0x1401   :  { %v9162_v15 = vpack.c.bf16 %v9102_v11, %v9096_v34  ;;  %v8859_v20 = vadd.f32 %v8858_v27, %v11306_v0  ;;  %v8860_v9 = vpop.f32.mrb[143].mxu0  ;;  %v9050_v48 = vmax.f32 %v8855_v45, 0.0 }
0x1402   :  { %v9163_v49 = vpack.c.bf16 %v9103_v47, %v9097_v28  ;;  %v8861_v12 = vadd.f32 %v8860_v9, %v11306_v0  ;;  %v8791_v16 = vpop.f32.mrb[132].mxu1  ;;  %v9051_v35 = vmax.f32 %v8857_v26, 0.0 }
0x1403   :  { %v9056_v7 = vmax.f32 %v8859_v20, 0.0  ;;  %v8792_v10 = vadd.f32 %v8791_v16, %v11357_v56  ;;  %v8793_v50 = vpop.f32.mrb[133].mxu1 }
0x1404   :  { %v9057_v21 = vmax.f32 %v8861_v12, 0.0  ;;  %v8794_v57 = vadd.f32 %v8793_v50, %v11357_v56  ;;  %v8795_v8 = vpop.f32.mrb[134].mxu1  ;;  %9190 = vmatprep.subr.bf16.mxu0 %v9163_v49 }
0x1405   :  { %v15357_v5 = vpack.c.bf16 %v9056_v7, %v9050_v48  ;;  %v8796_v52 = vadd.f32 %v8795_v8, %v11355_v54  ;;  %v8797_v24 = vpop.f32.mrb[135].mxu1  ;;  %9191 = vmatpush1.bf16.msra.mxu0 %v9162_v15  ;;  %v9108_v60 = vmax.f32 %v8792_v10, 0.0 }
0x1406   :  { %v15360_v61 = vpack.c.bf16 %v9057_v21, %v9051_v35  ;;  %v8798_v36 = vadd.f32 %v8797_v24, %v11355_v54  ;;  %v8864_v55 = vpop.f32.mrb[144].mxu0  ;;  %v9109_v25 = vmax.f32 %v8794_v57, 0.0 }
0x1407   :  { %v9114_v34 = vmax.f32 %v8796_v52, 0.0  ;;  %v8865_v11 = vadd.f32 %v8864_v55, %v11311_v13  ;;  %v8866_v45 = vpop.f32.mrb[145].mxu0 }
0x1408   :  { %v9115_v28 = vmax.f32 %v8798_v36, 0.0  ;;  %v8867_v47 = vadd.f32 %v8866_v45, %v11311_v13  ;;  %v8868_v26 = vpop.f32.mrb[146].mxu0 }
0x1409   :  { %v9168_v27 = vpack.c.bf16 %v9114_v34, %v9108_v60  ;;  %v8869_v20 = vadd.f32 %v8868_v26, %v11314_v22  ;;  %v8870_v9 = vpop.f32.mrb[147].mxu0  ;;  %v9062_v16 = vmax.f32 %v8865_v11, 0.0 }
0x140a   :  { %v9169_v15 = vpack.c.bf16 %v9115_v28, %v9109_v25  ;;  %v8871_v49 = vadd.f32 %v8870_v9, %v11314_v22  ;;  %v8801_v12 = vpop.f32.mrb[136].mxu1  ;;  %v9063_v50 = vmax.f32 %v8867_v47, 0.0 }
0x140b   :  { %v9068_v48 = vmax.f32 %v8869_v20, 0.0  ;;  %v8802_v7 = vadd.f32 %v8801_v12, %v11373_v18  ;;  %v8803_v10 = vpop.f32.mrb[137].mxu1 }
0x140c   :  { %v9069_v35 = vmax.f32 %v8871_v49, 0.0  ;;  %v8804_v21 = vadd.f32 %v8803_v10, %v11373_v18  ;;  %v8805_v57 = vpop.f32.mrb[138].mxu1  ;;  %9192 = vmatprep.subr.bf16.mxu0 %v9169_v15 }
0x140d   :  { %v15369_v8 = vpack.c.bf16 %v9068_v48, %v9062_v16  ;;  %v8806_v52 = vadd.f32 %v8805_v57, %v11371_v37  ;;  %v8807_v24 = vpop.f32.mrb[139].mxu1  ;;  %9193 = vmatpush1.bf16.msra.mxu0 %v9168_v27  ;;  %v9120_v34 = vmax.f32 %v8802_v7, 0.0 }
0x140e   :  { %v9147_v36 = vpack.c.bf16 %v9069_v35, %v9063_v50  ;;  %v8808_v55 = vadd.f32 %v8807_v24, %v11371_v37  ;;  %v8874_v60 = vpop.f32.mrb[148].mxu0  ;;  %v9121_v28 = vmax.f32 %v8804_v21, 0.0 }
0x140f   :  { %v9126_v11 = vmax.f32 %v8806_v52, 0.0  ;;  %v8875_v45 = vadd.f32 %v8874_v60, %v11319_v38  ;;  %v8876_v25 = vpop.f32.mrb[149].mxu0  ;;  %v15383_v60 = vld [vmem:[%s15716_s3] sm:$0xff]  }
0x1410   :  { %v9127_v47 = vmax.f32 %v8808_v55, 0.0  ;;  %v8877_v26 = vadd.f32 %v8876_v25, %v11319_v38  ;;  %v8878_v20 = vpop.f32.mrb[150].mxu0 }
0x1411   :  { %v9174_v9 = vpack.c.bf16 %v9126_v11, %v9120_v34  ;;  %v8879_v15 = vadd.f32 %v8878_v20, %v11321_v40  ;;  %v8880_v49 = vpop.f32.mrb[151].mxu0  ;;  %v9074_v16 = vmax.f32 %v8875_v45, 0.0 }
0x1412   :  { %v9175_v12 = vpack.c.bf16 %v9127_v47, %v9121_v28  ;;  %v8881_v27 = vadd.f32 %v8880_v49, %v11321_v40  ;;  %v9075_v10 = vmax.f32 %v8877_v26, 0.0 }
0x1413   :  { %v9080_v48 = vmax.f32 %v8879_v15, 0.0 }
0x1414   :  { %v9081_v7 = vmax.f32 %v8881_v27, 0.0  ;;  %9194 = vmatprep.subr.bf16.mxu0 %v9175_v12 }
0x1415   :  { %v9152_v50 = vpack.c.bf16 %v9080_v48, %v9074_v16  ;;  %9195 = vmatpush1.bf16.msra.mxu0 %v9174_v9 }
0x1416   :  { %v9153_v35 = vpack.c.bf16 %v9081_v7, %v9075_v10  ;;  %v8884_v21 = vpop.f32.mrb[152].mxu0  ;;  %9223 = vmatprep.subr.bf16.mxu0 %v15348_v6 }
0x1417   :  { %v8885_v57 = vadd.f32 %v8884_v21, %v11329_v51  ;;  %v8886_v52 = vpop.f32.mrb[153].mxu0 }
0x1418   :  { %v8887_v24 = vadd.f32 %v8886_v52, %v11329_v51  ;;  %v8888_v55 = vpop.f32.mrb[154].mxu0  ;;  %9213 = vmatmul.mubr.bf16.vlgmr.msra.gmra.mrb[168].mxu0 %v15383_v60 }
0x1419   :  { %v8889_v34 = vadd.f32 %v8888_v55, %v11327_v33  ;;  %v8890_v11 = vpop.f32.mrb[155].mxu0  ;;  %9224 = vmatpush1.bf16.msra.mxu0 %v15345_v58  ;;  %9255 = vmatprep.mubr.bf16.mxu0 %v15776_v19  ;;  %v9086_v25 = vmax.f32 %v8885_v57, 0.0 }
0x141a   :  { %v8891_v6 = vadd.f32 %v8890_v11, %v11327_v33  ;;  %v8957_v45 = vpop.f32.mrb[140].mxu1  ;;  %9225 = vmatprep.subr.bf16.mxu0 %v15360_v61  ;;  %v9087_v20 = vmax.f32 %v8887_v24, 0.0 }
0x141b   :  { %v9092_v28 = vmax.f32 %v8889_v34, 0.0  ;;  %v8958_v47 = vadd.f32 %v8957_v45, %v11295_v14  ;;  %v8959_v26 = vpop.f32.mrb[141].mxu1 }
0x141c   :  { %v9093_v9 = vmax.f32 %v8891_v6, 0.0  ;;  %v8960_v15 = vadd.f32 %v8959_v26, %v11295_v14  ;;  %v8961_v49 = vpop.f32.mrb[142].mxu1 }
0x141d   :  { %v9158_v12 = vpack.c.bf16 %v9092_v28, %v9086_v25  ;;  %v8962_v58 = vadd.f32 %v8961_v49, %v11297_v32  ;;  %v8963_v27 = vpop.f32.mrb[143].mxu1  ;;  %9226 = vmatpush1.bf16.msra.mxu0 %v15357_v5  ;;  %v9040_v48 = vmax.f32 %v8958_v47, 0.0 }
0x141e   :  { %v9159_v19 = vpack.c.bf16 %v9093_v9, %v9087_v20  ;;  %v8964_v16 = vadd.f32 %v8963_v27, %v11297_v32  ;;  %v8894_v61 = vpop.f32.mrb[156].mxu0  ;;  %9227 = vmatprep.subr.bf16.mxu0 %v9147_v36  ;;  %v9041_v57 = vmax.f32 %v8960_v15, 0.0 }
0x141f   :  { %v9046_v10 = vmax.f32 %v8962_v58, 0.0  ;;  %v8895_v7 = vadd.f32 %v8894_v61, %v11341_v23  ;;  %v8896_v21 = vpop.f32.mrb[157].mxu0 }
0x1420   :  { %v9047_v52 = vmax.f32 %v8964_v16, 0.0  ;;  %v8897_v14 = vadd.f32 %v8896_v21, %v11341_v23  ;;  %v8898_v24 = vpop.f32.mrb[158].mxu0 }
0x1421   :  { %v9136_v55 = vpack.c.bf16 %v9046_v10, %v9040_v48  ;;  %v8899_v34 = vadd.f32 %v8898_v24, %v11339_v17  ;;  %v8900_v11 = vpop.f32.mrb[159].mxu0  ;;  %9228 = vmatpush1.bf16.msra.mxu0 %v15369_v8  ;;  %v9098_v6 = vmax.f32 %v8895_v7, 0.0 }
0x1422   :  { %v9137_v5 = vpack.c.bf16 %v9047_v52, %v9041_v57  ;;  %v8901_v32 = vadd.f32 %v8900_v11, %v11339_v17  ;;  %v8967_v36 = vpop.f32.mrb[144].mxu1  ;;  %9229 = vmatprep.subr.bf16.mxu0 %v9153_v35  ;;  %v9099_v47 = vmax.f32 %v8897_v14, 0.0 }
0x1423   :  { %v9104_v45 = vmax.f32 %v8899_v34, 0.0  ;;  %v8968_v25 = vadd.f32 %v8967_v36, %v11303_v59  ;;  %v8969_v28 = vpop.f32.mrb[145].mxu1 }
0x1424   :  { %v9105_v26 = vmax.f32 %v8901_v32, 0.0  ;;  %v8970_v20 = vadd.f32 %v8969_v28, %v11303_v59  ;;  %v8971_v9 = vpop.f32.mrb[146].mxu1  ;;  %9266 = vmatprep.subr.bf16.mxu1 %v9137_v5 }
0x1425   :  { %v9164_v15 = vpack.c.bf16 %v9104_v45, %v9098_v6  ;;  %v8972_v49 = vadd.f32 %v8971_v9, %v11306_v0  ;;  %v8973_v8 = vpop.f32.mrb[147].mxu1  ;;  %9230 = vmatpush1.bf16.msra.mxu0 %v9152_v50  ;;  %9267 = vmatpush1.bf16.msra.mxu1 %v9136_v55  ;;  %v9052_v16 = vmax.f32 %v8968_v25, 0.0 }
0x1426   :  { %v9165_v58 = vpack.c.bf16 %v9105_v26, %v9099_v47  ;;  %v8974_v35 = vadd.f32 %v8973_v8, %v11306_v0  ;;  %v8904_v27 = vpop.f32.mrb[160].mxu0  ;;  %9231 = vmatprep.subr.bf16.mxu0 %v9159_v19  ;;  %v9053_v7 = vmax.f32 %v8970_v20, 0.0 }
0x1427   :  { %v9058_v61 = vmax.f32 %v8972_v49, 0.0  ;;  %v8905_v48 = vadd.f32 %v8904_v27, %v11357_v56  ;;  %v8906_v10 = vpop.f32.mrb[161].mxu0 }
0x1428   :  { %v9059_v59 = vmax.f32 %v8974_v35, 0.0  ;;  %v8907_v21 = vadd.f32 %v8906_v10, %v11357_v56  ;;  %v8908_v57 = vpop.f32.mrb[162].mxu0 }
0x1429   :  { %v9142_v52 = vpack.c.bf16 %v9058_v61, %v9052_v16  ;;  %v8909_v14 = vadd.f32 %v8908_v57, %v11355_v54  ;;  %v8910_v50 = vpop.f32.mrb[163].mxu0  ;;  %9232 = vmatpush1.bf16.msra.mxu0 %v9158_v12  ;;  %v9110_v19 = vmax.f32 %v8905_v48, 0.0 }
0x142a   :  { %v9143_v24 = vpack.c.bf16 %v9059_v59, %v9053_v7  ;;  %v8911_v0 = vadd.f32 %v8910_v50, %v11355_v54  ;;  %v8977_v55 = vpop.f32.mrb[148].mxu1  ;;  %9233 = vmatprep.subr.bf16.mxu0 %v9165_v58  ;;  %v9111_v32 = vmax.f32 %v8907_v21, 0.0 }
0x142b   :  { %v9116_v34 = vmax.f32 %v8909_v14, 0.0  ;;  %v8978_v11 = vadd.f32 %v8977_v55, %v11311_v13  ;;  %v8979_v5 = vpop.f32.mrb[149].mxu1 }
0x142c   :  { %v9117_v36 = vmax.f32 %v8911_v0, 0.0  ;;  %v8980_v6 = vadd.f32 %v8979_v5, %v11311_v13  ;;  %v8981_v45 = vpop.f32.mrb[150].mxu1  ;;  %9268 = vmatprep.subr.bf16.mxu1 %v9143_v24 }
0x142d   :  { %v9170_v25 = vpack.c.bf16 %v9116_v34, %v9110_v19  ;;  %v8982_v28 = vadd.f32 %v8981_v45, %v11314_v22  ;;  %v8983_v12 = vpop.f32.mrb[151].mxu1  ;;  %9234 = vmatpush1.bf16.msra.mxu0 %v9164_v15  ;;  %9269 = vmatpush1.bf16.msra.mxu1 %v9142_v52  ;;  %v9064_v9 = vmax.f32 %v8978_v11, 0.0 }
0x142e   :  { %v9171_v47 = vpack.c.bf16 %v9117_v36, %v9111_v32  ;;  %v8984_v26 = vadd.f32 %v8983_v12, %v11314_v22  ;;  %v8914_v20 = vpop.f32.mrb[164].mxu0  ;;  %v9065_v35 = vmax.f32 %v8980_v6, 0.0 }
0x142f   :  { %v9070_v49 = vmax.f32 %v8982_v28, 0.0  ;;  %v8915_v8 = vadd.f32 %v8914_v20, %v11373_v18  ;;  %v8916_v58 = vpop.f32.mrb[165].mxu0 }
0x1430   :  { %v9071_v27 = vmax.f32 %v8984_v26, 0.0  ;;  %v8917_v13 = vadd.f32 %v8916_v58, %v11373_v18  ;;  %v8918_v16 = vpop.f32.mrb[166].mxu0  ;;  %9235 = vmatprep.subr.bf16.mxu0 %v9171_v47 }
0x1431   :  { %v9148_v61 = vpack.c.bf16 %v9070_v49, %v9064_v9  ;;  %v8919_v48 = vadd.f32 %v8918_v16, %v11371_v37  ;;  %v8920_v15 = vpop.f32.mrb[167].mxu0  ;;  %9236 = vmatpush1.bf16.msra.mxu0 %v9170_v25  ;;  %v9122_v59 = vmax.f32 %v8915_v8, 0.0 }
0x1432   :  { %v9149_v10 = vpack.c.bf16 %v9071_v27, %v9065_v35  ;;  %v8921_v22 = vadd.f32 %v8920_v15, %v11371_v37  ;;  %v8987_v7 = vpop.f32.mrb[152].mxu1  ;;  %v9123_v14 = vmax.f32 %v8917_v13, 0.0 }
0x1433   :  { %v9128_v21 = vmax.f32 %v8919_v48, 0.0  ;;  %v8988_v57 = vadd.f32 %v8987_v7, %v11319_v38  ;;  %v8989_v52 = vpop.f32.mrb[153].mxu1 }
0x1434   :  { %v9129_v50 = vmax.f32 %v8921_v22, 0.0  ;;  %v8990_v24 = vadd.f32 %v8989_v52, %v11319_v38  ;;  %v8991_v0 = vpop.f32.mrb[154].mxu1  ;;  %9270 = vmatprep.subr.bf16.mxu1 %v9149_v10 }
0x1435   :  { %v9176_v55 = vpack.c.bf16 %v9128_v21, %v9122_v59  ;;  %v8992_v19 = vadd.f32 %v8991_v0, %v11321_v40  ;;  %v8993_v34 = vpop.f32.mrb[155].mxu1  ;;  %9271 = vmatpush1.bf16.msra.mxu1 %v9148_v61  ;;  %v9076_v32 = vmax.f32 %v8988_v57, 0.0 }
0x1436   :  { %v9177_v11 = vpack.c.bf16 %v9129_v50, %v9123_v14  ;;  %v8994_v5 = vadd.f32 %v8993_v34, %v11321_v40  ;;  %v9077_v6 = vmax.f32 %v8990_v24, 0.0 }
0x1437   :  { %v9082_v36 = vmax.f32 %v8992_v19, 0.0 }
0x1438   :  { %v9083_v45 = vmax.f32 %v8994_v5, 0.0  ;;  %9237 = vmatprep.subr.bf16.mxu0 %v9177_v11 }
0x1439   :  { %v9154_v25 = vpack.c.bf16 %v9082_v36, %v9076_v32  ;;  %9238 = vmatpush1.bf16.msra.mxu0 %v9176_v55 }
0x143a   :  { %v9155_v28 = vpack.c.bf16 %v9083_v45, %v9077_v6  ;;  %v8997_v12 = vpop.f32.mrb[156].mxu1 }
0x143b   :  { %v8998_v38 = vadd.f32 %v8997_v12, %v11329_v51  ;;  %v8999_v47 = vpop.f32.mrb[157].mxu1 }
0x143c   :  { %v9000_v26 = vadd.f32 %v8999_v47, %v11329_v51  ;;  %v9001_v20 = vpop.f32.mrb[158].mxu1  ;;  %9256 = vmatmul.mubr.bf16.vlgmr.msra.gmra.mrb[172].mxu0 %v15383_v60  ;;  %9272 = vmatprep.subr.bf16.mxu1 %v9155_v28 }
0x143d   :  { %v9002_v40 = vadd.f32 %v9001_v20, %v11327_v33  ;;  %v9003_v9 = vpop.f32.mrb[159].mxu1  ;;  %9273 = vmatpush1.bf16.msra.mxu1 %v9154_v25  ;;  %v9088_v8 = vmax.f32 %v8998_v38, 0.0 }
0x143e   :  { %v9004_v49 = vadd.f32 %v9003_v9, %v11327_v33  ;;  %v9089_v35 = vmax.f32 %v9000_v26, 0.0 }
0x143f   :  { %v9094_v58 = vmax.f32 %v9002_v40, 0.0 }
0x1440   :  { %v9095_v27 = vmax.f32 %v9004_v49, 0.0 }
0x1441   :  { %v9160_v13 = vpack.c.bf16 %v9094_v58, %v9088_v8 }
0x1442   :  { %v9161_v16 = vpack.c.bf16 %v9095_v27, %v9089_v35  ;;  %v9007_v61 = vpop.f32.mrb[160].mxu1  ;;  %v10733_v27 = vmov 0.0  }
0x1443   :  { %v9008_v48 = vadd.f32 %v9007_v61, %v11341_v23  ;;  %v9009_v51 = vpop.f32.mrb[161].mxu1  ;;  %9513 = vmatprep.mubr.f32.mxu0 %v10733_v27 }
0x1444   :  { %v9010_v15 = vadd.f32 %v9009_v51, %v11341_v23  ;;  %v9011_v10 = vpop.f32.mrb[162].mxu1  ;;  %9274 = vmatprep.subr.bf16.mxu1 %v9161_v16 }
0x1445   :  { %v9012_v22 = vadd.f32 %v9011_v10, %v11339_v17  ;;  %v9013_v7 = vpop.f32.mrb[163].mxu1  ;;  %9275 = vmatpush1.bf16.msra.mxu1 %v9160_v13  ;;  %v9100_v59 = vmax.f32 %v9008_v48, 0.0 }
0x1446   :  { %v9014_v33 = vadd.f32 %v9013_v7, %v11339_v17  ;;  %v9101_v57 = vmax.f32 %v9010_v15, 0.0 }
0x1447   :  { %v9106_v21 = vmax.f32 %v9012_v22, 0.0 }
0x1448   :  { %v9107_v52 = vmax.f32 %v9014_v33, 0.0 }
0x1449   :  { %v9166_v14 = vpack.c.bf16 %v9106_v21, %v9100_v59 }
0x144a   :  { %v9167_v50 = vpack.c.bf16 %v9107_v52, %v9101_v57  ;;  %v9017_v24 = vpop.f32.mrb[164].mxu1 }
0x144b   :  { %v9018_v0 = vadd.f32 %v9017_v24, %v11357_v56  ;;  %v9019_v55 = vpop.f32.mrb[165].mxu1  ;;  %v15512_v24 = vld [vmem:[%s15719_s6 + $0x28] sm:$0xff] }
0x144c   :  { %v9020_v23 = vadd.f32 %v9019_v55, %v11357_v56  ;;  %v9021_v19 = vpop.f32.mrb[166].mxu1  ;;  %9276 = vmatprep.subr.bf16.mxu1 %v9167_v50  ;;  %v15504_v50 = vld [vmem:[%s15719_s6 + $0x20] sm:$0xff] }
0x144d   :  { %v9022_v34 = vadd.f32 %v9021_v19, %v11355_v54  ;;  %v9023_v11 = vpop.f32.mrb[167].mxu1  ;;  %9277 = vmatpush1.bf16.msra.mxu1 %v9166_v14  ;;  %v9112_v5 = vmax.f32 %v9018_v0, 0.0 }
0x144e   :  { %v9024_v17 = vadd.f32 %v9023_v11, %v11355_v54  ;;  %v9113_v36 = vmax.f32 %v9020_v23, 0.0 }
0x144f   :  { %v9118_v32 = vmax.f32 %v9022_v34, 0.0 }
0x1450   :  { %v9119_v6 = vmax.f32 %v9024_v17, 0.0 }
0x1451   :  { %v9172_v45 = vpack.c.bf16 %v9118_v32, %v9112_v5 }
0x1452   :  { %v9173_v25 = vpack.c.bf16 %v9119_v6, %v9113_v36  ;;  %v9027_v28 = vpop.f32.mrb[168].mxu1 }
0x1453   :  { %v9028_v12 = vadd.f32 %v9027_v28, %v11373_v18  ;;  %v9029_v38 = vpop.f32.mrb[169].mxu1 }
0x1454   :  { %v9030_v56 = vadd.f32 %v9029_v38, %v11373_v18  ;;  %v9031_v47 = vpop.f32.mrb[170].mxu1  ;;  %9278 = vmatprep.subr.bf16.mxu1 %v9173_v25 }
0x1455   :  { %v9032_v26 = vadd.f32 %v9031_v47, %v11371_v37  ;;  %v9033_v20 = vpop.f32.mrb[171].mxu1  ;;  %9279 = vmatpush1.bf16.msra.mxu1 %v9172_v45  ;;  %v9124_v40 = vmax.f32 %v9028_v12, 0.0 }
0x1456   :  { %v9034_v54 = vadd.f32 %v9033_v20, %v11371_v37  ;;  %v9125_v49 = vmax.f32 %v9030_v56, 0.0 }
0x1457   :  { %v9130_v9 = vmax.f32 %v9032_v26, 0.0 }
0x1458   :  { %v9131_v8 = vmax.f32 %v9034_v54, 0.0 }
0x1459   :  { %v9178_v58 = vpack.c.bf16 %v9130_v9, %v9124_v40 }
0x145a   :  { %v9179_v35 = vpack.c.bf16 %v9131_v8, %v9125_v49 }
0x145c   :  { %9280 = vmatprep.subr.bf16.mxu1 %v9179_v35 }
0x145d   :  { %9281 = vmatpush1.bf16.msra.mxu1 %v9178_v58  ;;  %v15830_v58 = vld [vmem:[#allocation14_spill] sm:$0xff] }
0x1460   :  { %9299 = vmatmul.mubr.bf16.vlgmr.msra.gmra.mrb[172].mxu1 %v15383_v60 }
0x1461   :  { %9549 = vmatprep.mubr.f32.mxu1 %v10733_v27 }
0x14eb   :  { %v9214_v18 = vpop.f32.mrb[168].mxu0 }
0x14ec   :  { %v9215_v13 = vadd.f32 %v9214_v18, %v11479_v31  ;;  %v9216_v16 = vpop.f32.mrb[169].mxu0  ;;  %v15831_v18 = vld [vmem:[#allocation11_spill] sm:$0xff] }
0x14ed   :  { %v9217_v37 = vadd.f32 %v9216_v16, %v11479_v31  ;;  %v9218_v61 = vpop.f32.mrb[170].mxu0  ;;  %v15832_v16 = vld [vmem:[#allocation12_spill] sm:$0xff] }
0x14ee   :  { %v9321_v48 = vmul.f32 %v9215_v13, %v11477_v30  ;;  %v9219_v51 = vadd.f32 %v9218_v61, %v11482_v42  ;;  %v9220_v15 = vpop.f32.mrb[171].mxu0 }
0x14ef   :  { %v9322_v10 = vmul.f32 %v9217_v37, %v11495_v44  ;;  %v9221_v60 = vadd.f32 %v9220_v15, %v11482_v42 }
0x14f0   :  { %v9327_v22 = vmul.f32 %v9219_v51, %v11477_v30  ;;  %v9333_v33 = vadd.f32 %v9321_v48, %v14881_v29  ;;  %v15456_v30 = vld [vmem:[%s15719_s6] sm:$0xff]  ;;  %v15472_v29 = vld [vmem:[%s15719_s6 + $0x8] sm:$0xff] }
0x14f1   :  { %v9328_v7 = vmul.f32 %v9221_v60, %v11495_v44  ;;  %v9334_v21 = vadd.f32 %v9322_v10, %v14901_v39  ;;  %v15461_v44 = vld [vmem:[%s15719_s6 + $0x30] sm:$0xff]  ;;  %v15496_v39 = vld [vmem:[%s15719_s6 + $0x18] sm:$0xff]  ;;  %v9836_v51 = vld [vmem:[%s15721_s8] sm:$0xff] }
0x14f2   :  { %v9339_v59 = vadd.f32 %v9327_v22, %v14885_v41  ;;  %v15477_v41 = vld [vmem:[%s15719_s6 + $0x38] sm:$0xff]  ;;  %v9840_v15 = vcombine.high %v9836_v51, %v9836_v51 }
0x14f3   :  { %v9340_v57 = vadd.f32 %v9328_v7, %v14898_v46  ;;  %v15487_v46 = vld [vmem:[%s15719_s6 + $0x10] sm:$0xff] }
0x14f4   :  { %v10452_v52 = vpack.c.bf16 %v9339_v59, %v9333_v33  ;;  %v15833_v10 = vld [vmem:[#allocation10_spill] sm:$0xff] }
0x14f5   :  { %v10450_v14 = vpack.c.bf16 %v9340_v57, %v9334_v21  ;;  %v15599_v21 = vpop.permute.xlu1 %9387  ;;  %v15601_v57 = vpop.permute.xlu0 %9392 }
0x14f7   :  { %10451 = vmatprep.subr.bf16.mxu0 %v10450_v14  ;;  %10522 = vmatprep.subr.bf16.mxu1 %v10450_v14 }
0x14f8   :  { %10453 = vmatpush1.bf16.msra.mxu0 %v10452_v52  ;;  %10523 = vmatpush1.bf16.msra.mxu1 %v10452_v52 }
0x14f9   :  { %v15603_v52 = vpop.permute.xlu1 %9397  ;;  %v15605_v14 = vpop.permute.xlu0 %9402 }
0x14fb   :  { %10395 = vmatmul.mubr.msk.f32.vlgmr.msra.gmra.mrb[176].mxu0 %vm774_vm0, %v15456_v30  ;;  %10401 = vmatmul.mubr.msk.f32.vlgmr.msra.gmra.mrb[176].mxu1 %vm774_vm0, %v15461_v44 }
0x14fc   :  { %9519 = vmatprep.mubr.f32.mxu0 %v10733_v27  ;;  %9555 = vmatprep.mubr.f32.mxu1 %v10733_v27 }
0x14ff   :  { %10396 = vmatmul.mubr.msk.f32.gmra.mrb[178].mxu0 %vm774_vm0, %v15472_v29  ;;  %10402 = vmatmul.mubr.msk.f32.gmra.mrb[178].mxu1 %vm774_vm0, %v15477_v41 }
0x1500   :  { %9525 = vmatprep.mubr.f32.mxu0 %v10733_v27  ;;  %9626 = vmatprep.mubr.f32.mxu1 %v10733_v27 }
0x1503   :  { %10397 = vmatmul.mubr.msk.f32.gmra.mrb[180].mxu0 %vm774_vm0, %v15487_v46 }
0x1504   :  { %9531 = vmatprep.mubr.f32.mxu0 %v10733_v27 }
0x1507   :  { %10398 = vmatmul.mubr.msk.f32.gmra.mrb[182].mxu0 %vm774_vm0, %v15496_v39 }
0x1508   :  { %9537 = vmatprep.mubr.f32.mxu0 %v10733_v27 }
0x150b   :  { %10399 = vmatmul.mubr.msk.f32.gmra.mrb[184].mxu0 %vm774_vm0, %v15504_v50 }
0x150c   :  { %9543 = vmatprep.mubr.f32.mxu0 %v10733_v27 }
0x150f   :  { %v9257_v0 = vpop.f32.mrb[172].mxu0  ;;  %10400 = vmatmul.mubr.msk.f32.gmra.mrb[186].mxu0 %vm774_vm0, %v15512_v24 }
0x1510   :  { %v9258_v55 = vadd.f32 %v9257_v0, %v11479_v31  ;;  %v9259_v23 = vpop.f32.mrb[173].mxu0  ;;  %9739 = vmatprep.mubr.f32.mxu0 %v10733_v27 }
0x1511   :  { %v9260_v19 = vadd.f32 %v9259_v23, %v11479_v31  ;;  %v9261_v34 = vpop.f32.mrb[174].mxu0 }
0x1512   :  { %v9323_v11 = vmul.f32 %v9258_v55, %v11549_v63  ;;  %v9262_v17 = vadd.f32 %v9261_v34, %v11482_v42  ;;  %v9263_v5 = vpop.f32.mrb[175].mxu0 }
0x1513   :  { %v9324_v32 = vmul.f32 %v9260_v19, %v11569_v3  ;;  %v9264_v36 = vadd.f32 %v9263_v5, %v11482_v42 }
0x1514   :  { %v9329_v6 = vmul.f32 %v9262_v17, %v11549_v63  ;;  %v9335_v25 = vadd.f32 %v9323_v11, %v14939_v4 }
0x1515   :  { %v9330_v45 = vmul.f32 %v9264_v36, %v11569_v3  ;;  %v9336_v12 = vadd.f32 %v9324_v32, %v14959_v1 }
0x1516   :  { %v9341_v28 = vadd.f32 %v9329_v6, %v14943_v43 }
0x1517   :  { %v9342_v38 = vadd.f32 %v9330_v45, %v14956_v2 }
0x1518   :  { %v10456_v56 = vpack.c.bf16 %v9341_v28, %v9335_v25 }
0x1519   :  { %v10454_v47 = vpack.c.bf16 %v9342_v38, %v9336_v12 }
0x151b   :  { %10455 = vmatprep.subr.bf16.mxu1 %v10454_v47 }
0x151c   :  { %10457 = vmatpush1.bf16.msra.mxu1 %v10456_v56 }
0x151f   :  { %10403 = vmatmul.mubr.msk.f32.vlgmr.msra.gmra.mrb[180].mxu1 %vm774_vm0, %v15456_v30 }
0x1520   :  { %9632 = vmatprep.mubr.f32.mxu1 %v10733_v27 }
0x1523   :  { %10404 = vmatmul.mubr.msk.f32.gmra.mrb[182].mxu1 %vm774_vm0, %v15472_v29 }
0x1524   :  { %9638 = vmatprep.mubr.f32.mxu1 %v10733_v27 }
0x1527   :  { %10405 = vmatmul.mubr.msk.f32.gmra.mrb[184].mxu1 %vm774_vm0, %v15487_v46 }
0x1528   :  { %9644 = vmatprep.mubr.f32.mxu1 %v10733_v27 }
0x152b   :  { %10406 = vmatmul.mubr.msk.f32.gmra.mrb[186].mxu1 %vm774_vm0, %v15496_v39 }
0x152c   :  { %9650 = vmatprep.mubr.f32.mxu1 %v10733_v27 }
0x152f   :  { %10407 = vmatmul.mubr.msk.f32.gmra.mrb[188].mxu1 %vm774_vm0, %v15504_v50 }
0x1530   :  { %9656 = vmatprep.mubr.f32.mxu1 %v10733_v27 }
0x1533   :  { %v9300_v63 = vpop.f32.mrb[172].mxu1  ;;  %10408 = vmatmul.mubr.msk.f32.gmra.mrb[190].mxu1 %vm774_vm0, %v15512_v24 }
0x1534   :  { %v9301_v3 = vadd.f32 %v9300_v63, %v11479_v31  ;;  %v9302_v4 = vpop.f32.mrb[173].mxu1  ;;  %9662 = vmatprep.mubr.f32.mxu1 %v10733_v27 }
0x1535   :  { %v9303_v43 = vadd.f32 %v9302_v4, %v11479_v31  ;;  %v9304_v2 = vpop.f32.mrb[174].mxu1  ;;  %v15829_v31 = vld [vmem:[#allocation8_spill] sm:$0xff] }
0x1536   :  { %v9325_v1 = vmul.f32 %v9301_v3, %v11623_v53  ;;  %v9305_v26 = vadd.f32 %v9304_v2, %v11482_v42  ;;  %v9306_v20 = vpop.f32.mrb[175].mxu1 }
0x1537   :  { %v9326_v54 = vmul.f32 %v9303_v43, %v15823_v62  ;;  %v9307_v40 = vadd.f32 %v9306_v20, %v11482_v42  ;;  %10409 = vmatmul.mubr.msk.f32.gmra.mrb[192].mxu1 %vm774_vm0, %v15461_v44 }
0x1538   :  { %v9331_v9 = vmul.f32 %v9305_v26, %v11623_v53  ;;  %9668 = vmatprep.mubr.f32.mxu1 %v10733_v27  ;;  %v9337_v8 = vadd.f32 %v9325_v1, %v15829_v31  ;;  %v10734_v53 = vmov 1983009808  }
0x1539   :  { %v9332_v49 = vmul.f32 %v9307_v40, %v15823_v62  ;;  %v9338_v13 = vadd.f32 %v9326_v54, %v15831_v18  ;;  %v9842_v62 = vunpack.c.l.s4 %v10734_v53 }
0x153a   :  { %v9343_v35 = vadd.f32 %v9331_v9, %v15830_v58 }
0x153b   :  { %v9344_v37 = vadd.f32 %v9332_v49, %v15832_v16  ;;  %10410 = vmatmul.mubr.msk.f32.gmra.mrb[194].mxu1 %vm774_vm0, %v15477_v41  ;;  %v9843_v48 = vunpack.c.0.s8 %v9842_v62 }
0x153c   :  { %v10460_v42 = vpack.c.bf16 %v9343_v35, %v9337_v8 }
0x153d   :  { %v10458_v61 = vpack.c.bf16 %v9344_v37, %v9338_v13  ;;  %v9846_v60 = vsub.s32 %v9843_v48, %v15833_v10 }
0x153f   :  { %10459 = vmatprep.subr.bf16.mxu0 %v10458_v61  ;;  %v15591_v22 = vrot.slane %v9840_v15, %v9846_v60  ;;  %v15595_v33 = vrot.slane %v9836_v51, %v9846_v60 }
0x1540   :  { %10461 = vmatpush1.bf16.msra.mxu0 %v10460_v42 }
0x1541   :  { %v9856_v7 = vcombine.high %v15591_v22, %v15591_v22  ;;  %v9855_v59 = vcombine.high %v15595_v33, %v15595_v33 }
0x1543   :  { %10411 = vmatmul.mubr.msk.f32.vlgmr.msra.gmra.mrb[188].mxu0 %vm774_vm0, %v15456_v30  ;;  %10005 = vmatprep.mubr.f32.mxu1 %v9856_v7  ;;  %v15607_v30 = vpop.permute.xlu1 %9407 }
0x1544   :  { %9745 = vmatprep.mubr.f32.mxu0 %v10733_v27 }
0x1547   :  { %10412 = vmatmul.mubr.msk.f32.gmra.mrb[190].mxu0 %vm774_vm0, %v15472_v29 }
0x1548   :  { %9751 = vmatprep.mubr.f32.mxu0 %v10733_v27 }
0x154b   :  { %10413 = vmatmul.mubr.msk.f32.gmra.mrb[192].mxu0 %vm774_vm0, %v15487_v46 }
0x154c   :  { %9757 = vmatprep.mubr.f32.mxu0 %v10733_v27 }
0x154f   :  { %10414 = vmatmul.mubr.msk.f32.gmra.mrb[194].mxu0 %vm774_vm0, %v15496_v39 }
0x1550   :  { %9763 = vmatprep.mubr.f32.mxu0 %v10733_v27 }
0x1553   :  { %10415 = vmatmul.mubr.msk.f32.gmra.mrb[196].mxu0 %vm774_vm0, %v15504_v50  ;;  %v15611_v50 = vpop.permute.xlu1 %9417 }
0x1554   :  { %9769 = vmatprep.mubr.f32.mxu0 %v10733_v27 }
0x1557   :  { %10416 = vmatmul.mubr.msk.f32.gmra.mrb[198].mxu0 %vm774_vm0, %v15512_v24 }
0x1558   :  { %9775 = vmatprep.mubr.f32.mxu0 %v10733_v27 }
0x155b   :  { %10417 = vmatmul.mubr.msk.f32.gmra.mrb[200].mxu0 %vm774_vm0, %v15461_v44  ;;  %v15609_v44 = vpop.permute.xlu0 %9412 }
0x155c   :  { %9781 = vmatprep.mubr.f32.mxu0 %v10733_v27 }
0x155f   :  { %10418 = vmatmul.mubr.msk.f32.gmra.mrb[202].mxu0 %vm774_vm0, %v15477_v41  ;;  %v15613_v24 = vpop.permute.xlu0 %9422 }
0x1560   :  { %9935 = vmatprep.mubr.f32.mxu0 %v9855_v59 }
0x15ce   :  { %v9515_v29 = vpop.f32.mrb[176].mxu0  ;;  %v9551_v41 = vpop.f32.mrb[176].mxu1 }
0x15cf   :  { %v9517_v46 = vpop.f32.mrb[177].mxu0  ;;  %v9553_v39 = vpop.f32.mrb[177].mxu1  ;;  %v9516_v0 = vadd.f32 %v9515_v29, %v15599_v21  ;;  %v9552_v55 = vadd.f32 %v9551_v41, %v15611_v50 }
0x15d0   :  { %v9518_v23 = vadd.f32 %v9517_v46, %v15599_v21  ;;  %v9554_v19 = vadd.f32 %v9553_v39, %v15611_v50 }
0x15d1   :  { %v9788_v25 = vmax.f32 %v9516_v0, 0.0  ;;  %v9824_v28 = vmax.f32 %v9552_v55, 0.0  ;;  %v10735_v55 = vmov 0.0|0.0  }
0x15d2   :  { %v9521_v34 = vpop.f32.mrb[178].mxu0  ;;  %v9557_v11 = vpop.f32.mrb[178].mxu1  ;;  %v9789_v56 = vmax.f32 %v9518_v23, 0.0  ;;  %v9825_v47 = vmax.f32 %v9554_v19, 0.0  ;;  %v10081_v23 = vld [vmem:[%s15722_s9] sm:$0xff]  ;;  %v10082_v19 = vld [vmem:[%s15722_s9 + $0x8] sm:$0xff] }
0x15d3   :  { %v9522_v17 = vadd.f32 %v9521_v34, %v15601_v57  ;;  %v9558_v5 = vadd.f32 %v9557_v11, %v15613_v24  ;;  %v9523_v32 = vpop.f32.mrb[179].mxu0  ;;  %v9559_v36 = vpop.f32.mrb[179].mxu1 }
0x15d4   :  { %v9524_v6 = vadd.f32 %v9523_v32, %v15601_v57  ;;  %v9560_v45 = vadd.f32 %v9559_v36, %v15613_v24  ;;  %v10511_v36 = vpack.c.bf16 %v10082_v19, %v10081_v23 }
0x15d5   :  { %v9794_v12 = vmax.f32 %v9522_v17, 0.0  ;;  %v9830_v38 = vmax.f32 %v9558_v5, 0.0 }
0x15d6   :  { %v9795_v63 = vmax.f32 %v9524_v6, 0.0  ;;  %v9831_v3 = vmax.f32 %v9560_v45, 0.0  ;;  %v9527_v4 = vpop.f32.mrb[180].mxu0  ;;  %v10083_v45 = vld [vmem:[%s15722_s9 + $0x10] sm:$0xff] }
0x15d7   :  { %v10464_v43 = vpack.c.bf16 %v9794_v12, %v9788_v25  ;;  %v10476_v2 = vpack.c.bf16 %v9830_v38, %v9824_v28  ;;  %v9529_v1 = vpop.f32.mrb[181].mxu0  ;;  %v9528_v54 = vadd.f32 %v9527_v4, %v15603_v52  ;;  %v10084_v25 = vld [vmem:[%s15722_s9 + $0x18] sm:$0xff] }
0x15d8   :  { %v10462_v26 = vpack.c.bf16 %v9795_v63, %v9789_v56  ;;  %v10474_v20 = vpack.c.bf16 %v9831_v3, %v9825_v47  ;;  %v9530_v40 = vadd.f32 %v9529_v1, %v15603_v52  ;;  %v10514_v4 = vpack.c.bf16 %v10084_v25, %v10083_v45  ;;  %v10086_v1 = vld [vmem:[%s15722_s9 + $0x28] sm:$0xff] }
0x15d9   :  { %v9800_v58 = vmax.f32 %v9528_v54, 0.0 }
0x15da   :  { %v9533_v9 = vpop.f32.mrb[182].mxu0  ;;  %10463 = vmatprep.subr.bf16.mxu0 %v10462_v26  ;;  %v9801_v18 = vmax.f32 %v9530_v40, 0.0 }
0x15db   :  { %v9534_v49 = vadd.f32 %v9533_v9, %v15605_v14  ;;  %v9535_v31 = vpop.f32.mrb[183].mxu0  ;;  %10465 = vmatpush1.bf16.xpose.msra.mxu0 %v10464_v43 }
0x15dc   :  { %v9536_v8 = vadd.f32 %v9535_v31, %v15605_v14 }
0x15dd   :  { %v9806_v35 = vmax.f32 %v9534_v49, 0.0 }
0x15de   :  { %v9807_v13 = vmax.f32 %v9536_v8, 0.0  ;;  %v9539_v16 = vpop.f32.mrb[184].mxu0 }
0x15df   :  { %v10468_v37 = vpack.c.bf16 %v9806_v35, %v9800_v58  ;;  %v9541_v42 = vpop.f32.mrb[185].mxu0  ;;  %v9540_v53 = vadd.f32 %v9539_v16, %v15607_v30 }
0x15e0   :  { %v10466_v61 = vpack.c.bf16 %v9807_v13, %v9801_v18  ;;  %v9542_v62 = vadd.f32 %v9541_v42, %v15607_v30 }
0x15e1   :  { %v9812_v60 = vmax.f32 %v9540_v53, 0.0 }
0x15e2   :  { %v9545_v48 = vpop.f32.mrb[186].mxu0  ;;  %10467 = vmatprep.subr.bf16.mxu0 %v10466_v61  ;;  %v9813_v59 = vmax.f32 %v9542_v62, 0.0 }
0x15e3   :  { %v9546_v51 = vadd.f32 %v9545_v48, %v15609_v44  ;;  %v9547_v15 = vpop.f32.mrb[187].mxu0  ;;  %10469 = vmatpush1.bf16.xpose.msra.mxu0 %v10468_v37 }
0x15e4   :  { %v9548_v10 = vadd.f32 %v9547_v15, %v15609_v44 }
0x15e5   :  { %v9818_v7 = vmax.f32 %v9546_v51, 0.0 }
0x15e6   :  { %v9819_v29 = vmax.f32 %v9548_v10, 0.0 }
0x15e7   :  { %v10472_v41 = vpack.c.bf16 %v9818_v7, %v9812_v60 }
0x15e8   :  { %v10470_v46 = vpack.c.bf16 %v9819_v29, %v9813_v59 }
0x15ea   :  { %10471 = vmatprep.subr.bf16.mxu0 %v10470_v46 }
0x15eb   :  { %10473 = vmatpush1.bf16.xpose.msra.mxu0 %v10472_v41 }
0x15ec   :  { %10475 = vmatprep.subr.bf16.mxu0 %v10474_v20 }
0x15f2   :  { %v9628_v39 = vpop.f32.mrb[180].mxu1 }
0x15f3   :  { %v9630_v0 = vpop.f32.mrb[181].mxu1  ;;  %10477 = vmatpush1.bf16.xpose.msra.mxu0 %v10476_v2  ;;  %v9629_v34 = vadd.f32 %v9628_v39, %v15599_v21  ;;  %v10085_v2 = vld [vmem:[%s15722_s9 + $0x20] sm:$0xff] }
0x15f4   :  { %10510 = vmatprep.subr.bf16.mxu0 %v10735_v55  ;;  %v9631_v11 = vadd.f32 %v9630_v0, %v15599_v21  ;;  %v10517_v9 = vpack.c.bf16 %v10086_v1, %v10085_v2 }
0x15f5   :  { %v9790_v28 = vmax.f32 %v9629_v34, 0.0 }
0x15f6   :  { %v9634_v17 = vpop.f32.mrb[182].mxu1  ;;  %v9791_v38 = vmax.f32 %v9631_v11, 0.0 }
0x15f7   :  { %v9635_v5 = vadd.f32 %v9634_v17, %v15601_v57  ;;  %v9636_v32 = vpop.f32.mrb[183].mxu1 }
0x15f8   :  { %v9637_v6 = vadd.f32 %v9636_v32, %v15601_v57 }
0x15f9   :  { %v9796_v12 = vmax.f32 %v9635_v5, 0.0 }
0x15fa   :  { %v9797_v56 = vmax.f32 %v9637_v6, 0.0  ;;  %v9640_v47 = vpop.f32.mrb[184].mxu1  ;;  %9936 = vmatmul.mubr.f32.vlgmr.msra.gmra.mrb[204].mxu0 %v15595_v33 }
0x15fb   :  { %v10480_v63 = vpack.c.bf16 %v9796_v12, %v9790_v28  ;;  %v9642_v3 = vpop.f32.mrb[185].mxu1  ;;  %10512 = vmatpush3.bf16.msra.mxu0 %v10511_v36  ;;  %v9641_v26 = vadd.f32 %v9640_v47, %v15603_v52  ;;  %v15669_v28 = vld.sshfl [vmem:[%s15721_s8 + $0x8] sm:$0x33 pattern:$0x76325410]  ;;  %10447 = vmatprep.mubr.msk.f32.mxu0 %vm10736_vm9, %v10733_v27 }
0x15fc   :  { %v10478_v43 = vpack.c.bf16 %v9797_v56, %v9791_v38  ;;  %10513 = vmatprep.subr.bf16.mxu0 %v10735_v55  ;;  %v9643_v20 = vadd.f32 %v9642_v3, %v15603_v52  ;;  %v9864_v3 = vcombine.high %v15669_v28, %v15669_v28 }
0x15fd   :  { %v9802_v31 = vmax.f32 %v9641_v26, 0.0 }
0x15fe   :  { %v9646_v54 = vpop.f32.mrb[186].mxu1  ;;  %10479 = vmatprep.subr.bf16.mxu1 %v10478_v43  ;;  %v9803_v58 = vmax.f32 %v9643_v20, 0.0 }
0x15ff   :  { %v9647_v33 = vadd.f32 %v9646_v54, %v15605_v14  ;;  %v9648_v40 = vpop.f32.mrb[187].mxu1  ;;  %10481 = vmatpush1.bf16.xpose.msra.mxu1 %v10480_v63  ;;  %10515 = vmatpush3.bf16.msra.mxu0 %v10514_v4 }
0x1600   :  { %v9649_v49 = vadd.f32 %v9648_v40, %v15605_v14  ;;  %10516 = vmatprep.subr.bf16.mxu0 %v10735_v55 }
0x1601   :  { %v9808_v8 = vmax.f32 %v9647_v33, 0.0 }
0x1602   :  { %v9809_v35 = vmax.f32 %v9649_v49, 0.0  ;;  %v9652_v18 = vpop.f32.mrb[188].mxu1 }
0x1603   :  { %v10484_v13 = vpack.c.bf16 %v9808_v8, %v9802_v31  ;;  %v9654_v16 = vpop.f32.mrb[189].mxu1  ;;  %10518 = vmatpush3.bf16.msra.mxu0 %v10517_v9  ;;  %v9653_v42 = vadd.f32 %v9652_v18, %v15607_v30 }
0x1604   :  { %v10482_v37 = vpack.c.bf16 %v9809_v35, %v9803_v58  ;;  %10519 = vmatprep.subr.bf16.mxu0 %v10735_v55  ;;  %v9655_v61 = vadd.f32 %v9654_v16, %v15607_v30 }
0x1605   :  { %v9814_v15 = vmax.f32 %v9653_v42, 0.0 }
0x1606   :  { %v9658_v53 = vpop.f32.mrb[190].mxu1  ;;  %10483 = vmatprep.subr.bf16.mxu1 %v10482_v37  ;;  %v9815_v60 = vmax.f32 %v9655_v61, 0.0 }
0x1607   :  { %v9659_v62 = vadd.f32 %v9658_v53, %v15609_v44  ;;  %v9660_v48 = vpop.f32.mrb[191].mxu1  ;;  %10485 = vmatpush1.bf16.xpose.msra.mxu1 %v10484_v13 }
0x1608   :  { %v9661_v51 = vadd.f32 %v9660_v48, %v15609_v44 }
0x1609   :  { %v9820_v10 = vmax.f32 %v9659_v62, 0.0 }
0x160a   :  { %v9821_v7 = vmax.f32 %v9661_v51, 0.0  ;;  %v9664_v59 = vpop.f32.mrb[192].mxu1 }
0x160b   :  { %v10488_v29 = vpack.c.bf16 %v9820_v10, %v9814_v15  ;;  %v9666_v41 = vpop.f32.mrb[193].mxu1  ;;  %v9665_v39 = vadd.f32 %v9664_v59, %v15611_v50 }
0x160c   :  { %v10486_v46 = vpack.c.bf16 %v9821_v7, %v9815_v60  ;;  %v9667_v0 = vadd.f32 %v9666_v41, %v15611_v50 }
0x160d   :  { %v9826_v11 = vmax.f32 %v9665_v39, 0.0 }
0x160e   :  { %v9670_v55 = vpop.f32.mrb[194].mxu1  ;;  %10487 = vmatprep.subr.bf16.mxu1 %v10486_v46  ;;  %v9827_v5 = vmax.f32 %v9667_v0, 0.0 }
0x160f   :  { %v9671_v23 = vadd.f32 %v9670_v55, %v15613_v24  ;;  %v9672_v19 = vpop.f32.mrb[195].mxu1  ;;  %10489 = vmatpush1.bf16.xpose.msra.mxu1 %v10488_v29 }
0x1610   :  { %v9673_v34 = vadd.f32 %v9672_v19, %v15613_v24 }
0x1611   :  { %v9832_v17 = vmax.f32 %v9671_v23, 0.0 }
0x1612   :  { %v9833_v32 = vmax.f32 %v9673_v34, 0.0 }
0x1613   :  { %v10492_v36 = vpack.c.bf16 %v9832_v17, %v9826_v11 }
0x1614   :  { %v10490_v6 = vpack.c.bf16 %v9833_v32, %v9827_v5  ;;  %v10088_v32 = vld [vmem:[%s15722_s9 + $0x38] sm:$0xff] }
0x1616   :  { %v9741_v45 = vpop.f32.mrb[188].mxu0  ;;  %10491 = vmatprep.subr.bf16.mxu1 %v10490_v6 }
0x1617   :  { %v9743_v25 = vpop.f32.mrb[189].mxu0  ;;  %10493 = vmatpush1.bf16.xpose.msra.mxu1 %v10492_v36  ;;  %v9742_v12 = vadd.f32 %v9741_v45, %v15599_v21 }
0x1618   :  { %v9744_v38 = vadd.f32 %v9743_v25, %v15599_v21 }
0x1619   :  { %v9792_v43 = vmax.f32 %v9742_v12, 0.0 }
0x161a   :  { %v9747_v56 = vpop.f32.mrb[190].mxu0  ;;  %v9793_v1 = vmax.f32 %v9744_v38, 0.0 }
0x161b   :  { %v9748_v47 = vadd.f32 %v9747_v56, %v15601_v57  ;;  %v9749_v63 = vpop.f32.mrb[191].mxu0 }
0x161c   :  { %v9750_v4 = vadd.f32 %v9749_v63, %v15601_v57 }
0x161d   :  { %v9798_v2 = vmax.f32 %v9748_v47, 0.0 }
0x161e   :  { %v9799_v26 = vmax.f32 %v9750_v4, 0.0  ;;  %v9753_v20 = vpop.f32.mrb[192].mxu0  ;;  %10006 = vmatmul.mubr.f32.vlgmr.msra.gmra.mrb[196].mxu1 %v15591_v22 }
0x161f   :  { %v10496_v54 = vpack.c.bf16 %v9798_v2, %v9792_v43  ;;  %v9755_v33 = vpop.f32.mrb[193].mxu0  ;;  %10075 = vmatprep.mubr.f32.mxu1 %v9864_v3  ;;  %v9754_v40 = vadd.f32 %v9753_v20, %v15603_v52 }
0x1620   :  { %v10494_v21 = vpack.c.bf16 %v9799_v26, %v9793_v1  ;;  %v9756_v9 = vadd.f32 %v9755_v33, %v15603_v52 }
0x1621   :  { %v9804_v58 = vmax.f32 %v9754_v40, 0.0 }
0x1622   :  { %v9759_v49 = vpop.f32.mrb[194].mxu0  ;;  %10495 = vmatprep.subr.bf16.mxu1 %v10494_v21  ;;  %v9805_v18 = vmax.f32 %v9756_v9, 0.0 }
0x1623   :  { %v9760_v31 = vadd.f32 %v9759_v49, %v15605_v14  ;;  %v9761_v57 = vpop.f32.mrb[195].mxu0  ;;  %10497 = vmatpush1.bf16.xpose.msra.mxu1 %v10496_v54 }
0x1624   :  { %v9762_v8 = vadd.f32 %v9761_v57, %v15605_v14 }
0x1625   :  { %v9810_v35 = vmax.f32 %v9760_v31, 0.0 }
0x1626   :  { %v9811_v22 = vmax.f32 %v9762_v8, 0.0  ;;  %v9765_v13 = vpop.f32.mrb[196].mxu0 }
0x1627   :  { %v10500_v16 = vpack.c.bf16 %v9810_v35, %v9804_v58  ;;  %v9767_v37 = vpop.f32.mrb[197].mxu0  ;;  %v9766_v61 = vadd.f32 %v9765_v13, %v15607_v30 }
0x1628   :  { %v10498_v42 = vpack.c.bf16 %v9811_v22, %v9805_v18  ;;  %v9768_v52 = vadd.f32 %v9767_v37, %v15607_v30 }
0x1629   :  { %v9816_v51 = vmax.f32 %v9766_v61, 0.0 }
0x162a   :  { %v9771_v53 = vpop.f32.mrb[198].mxu0  ;;  %10499 = vmatprep.subr.bf16.mxu1 %v10498_v42  ;;  %v9817_v10 = vmax.f32 %v9768_v52, 0.0 }
0x162b   :  { %v9772_v62 = vadd.f32 %v9771_v53, %v15609_v44  ;;  %v9773_v48 = vpop.f32.mrb[199].mxu0  ;;  %10501 = vmatpush1.bf16.xpose.msra.mxu1 %v10500_v16 }
0x162c   :  { %v9774_v14 = vadd.f32 %v9773_v48, %v15609_v44 }
0x162d   :  { %v9822_v15 = vmax.f32 %v9772_v62, 0.0 }
0x162e   :  { %v9823_v60 = vmax.f32 %v9774_v14, 0.0  ;;  %v9777_v7 = vpop.f32.mrb[200].mxu0 }
0x162f   :  { %v10504_v59 = vpack.c.bf16 %v9822_v15, %v9816_v51  ;;  %v9779_v29 = vpop.f32.mrb[201].mxu0  ;;  %v9778_v46 = vadd.f32 %v9777_v7, %v15611_v50 }
0x1630   :  { %v10502_v41 = vpack.c.bf16 %v9823_v60, %v9817_v10  ;;  %v9780_v30 = vadd.f32 %v9779_v29, %v15611_v50  ;;  %v10087_v50 = vld [vmem:[%s15722_s9 + $0x30] sm:$0xff]  ;;  %s10700_s9 = scalar_lea.vmem %s10179_s21, 32 }
0x1631   :  { %v9828_v23 = vmax.f32 %v9778_v46, 0.0  ;;  %v10520_v36 = vpack.c.bf16 %v10088_v32, %v10087_v50  ;;  %p10701_p0 = scmp.ne.s32.totalorder %s10179_s21, %s10700_s9  ;;  %p10706_p2 = scmp.lt.s32.totalorder %s10700_s9, %s10700_s9 }
0x1632   :  { %v9783_v39 = vpop.f32.mrb[202].mxu0  ;;  %10503 = vmatprep.subr.bf16.mxu1 %v10502_v41  ;;  %v9829_v34 = vmax.f32 %v9780_v30, 0.0 }
0x1633   :  { %v9784_v0 = vadd.f32 %v9783_v39, %v15613_v24  ;;  %v9785_v55 = vpop.f32.mrb[203].mxu0  ;;  %10505 = vmatpush1.bf16.xpose.msra.mxu1 %v10504_v59  ;;  %10521 = vmatpush3.bf16.msra.mxu0 %v10520_v36  ;;  %p10707_p3 = por %p10706_p2, %p10705_p1 }
0x1634   :  { %v9786_v44 = vadd.f32 %v9785_v55, %v15613_v24 }
0x1635   :  { %v9834_v19 = vmax.f32 %v9784_v0, 0.0  ;;  %p10708_p4 = pnand %p10707_p3, %p10701_p0 }
0x1636   :  { %v9835_v11 = vmax.f32 %v9786_v44, 0.0 }
0x1637   :  { %v10508_v17 = vpack.c.bf16 %v9834_v19, %v9828_v23 }
0x1638   :  { %v10506_v5 = vpack.c.bf16 %v9835_v11, %v9829_v34 }
0x163a   :  { %10507 = vmatprep.subr.bf16.mxu1 %v10506_v5 }
0x163b   :  { %10509 = vmatpush1.bf16.xpose.msra.mxu1 %v10508_v17 }
0x1642   :  { %10076 = vmatmul.mubr.f32.vlgmr.msra.gmra.mrb[196].mxu1 %v15669_v28  ;;  %v10420_v28 = vld [vmem:[%s15723_s10] ss:$0 sm:$0xff] }
0x16cd   :  { %v9937_v24 = vpop.f32.mrb[204].mxu0 }
0x16ce   :  { %v9939_v6 = vpop.f32.mrb[205].mxu0 }
0x1715   :  { %v10077_v45 = vpop.f32.mrb[196].mxu1 }
0x1716   :  { %v10524_v25 = vadd.f32 %v10077_v45, %v9937_v24  ;;  %v10079_v12 = vpop.f32.mrb[197].mxu1 }
0x1718   :  { %10448 = vmatmul.mubr.msk.f32.vlgmr.msra.gmra.mrb[206].mxu0 %vm10096_vm10, %v10524_v25 }
0x17eb   :  { %v10166_v38 = vpop.f32.mrb[206].mxu0 }
0x17ec   :  { %v10167_v56 = vadd.f32 %v10420_v28, %v10166_v38  ;;  %v10449_v47 = vpop.f32.mrb[207].mxu0 }
0x17ee   :  { %10171 = vst.msk [vmem:[#allocation5] sm:$0x3] %vm10170_vm11, %v10167_v56 }
0x17ef   :  { %10711 = shalt.err (!%p10708_p4)
}
0x17f0   :  { %s10712_s27 = scalar_lea.hbm %s15724_s11, 32 }
0x17f1   :  { %p10713_p5 = scmp.ne.s32.totalorder %s15724_s11, %s10712_s27  ;;  %p10716_p6 = scmp.lt.u32.totalorder %s10712_s27, %s15724_s11 }
0x17f3   :  { %p10718_p7 = pnand %p10716_p6, %p10713_p5 }
0x17f5   :  { %10721 = shalt.err (!%p10718_p7)
}
0x17f6   :  { %10181 = dma.vmem_to_hbm [thread:$0]  %s10179_s21, 32, %s15724_s11, [#allocation6]  }
0x17f7   :  { %10722 = dma.done.wait [#allocation6], 32  }
0x17f8   :  { %10723 = vsyncadd [#allocation6], 4294967264 }
0x17f9   :  { %10185 = vsyncpa [#allocation6], 1 }

</bundles_post_ra>
